<compile_context>
chip_gen: v5e
topology: v5e:2x2
jax: 0.10.0
libtpu: 0.0.40
codegen_flags: <defaults>
</compile_context>

<pallas_src>
import functools

import jax
import jax.numpy as jnp
from jax.experimental import pallas as pl
from jax.experimental.pallas import tpu as pltpu


_BN_EPS = 1e-5


def _round_up(x, m):
    return ((x + m - 1) // m) * m


@functools.lru_cache(maxsize=None)
def _vmem_limit():
    # Per-generation scoped-VMEM budget: ~85% of physical VMEM per TensorCore
    # (~109 MiB on v5e/v6e, ~54 MiB on v7x), conservative fallback otherwise.
    try:
        cap = int(pltpu.get_tpu_info().vmem_capacity_bytes)
    except Exception:
        cap = 64 * 1024 * 1024
    return max(32 * 1024 * 1024, min(int(cap * 0.85), 112 * 1024 * 1024))


# ---------------------------------------------------------------------------
# Kernel 1: 1x1 conv (full-K matmul) + folded-BN bias + ReLU, M-tiled.
# ---------------------------------------------------------------------------

def _mm_bias_relu_kernel(x_ref, w_ref, b_ref, o_ref):
    acc = jnp.dot(x_ref[...], w_ref[...], preferred_element_type=jnp.float32)
    o_ref[...] = jnp.maximum(acc + b_ref[...], 0.0).astype(o_ref.dtype)


def matmul_bias_relu(x, w, bias, *, tm=512, out_dtype=jnp.bfloat16):
    """relu(x @ w + bias). x:(M,K) bf16, w:(K,Cout) bf16 (BN folded), bias:(1,Cout) f32."""
    M, K = x.shape
    K2, Cout = w.shape
    assert K == K2
    tm = min(tm, _round_up(M, 8))
    n_m = pl.cdiv(M, tm)
    Mp = n_m * tm
    if Mp != M:
        x = jnp.pad(x, ((0, Mp - M), (0, 0)))
    out = pl.pallas_call(
        _mm_bias_relu_kernel,
        out_shape=jax.ShapeDtypeStruct((Mp, Cout), out_dtype),
        grid=(n_m,),
        in_specs=[
            pl.BlockSpec((tm, K), lambda i: (i, 0)),
            pl.BlockSpec((K, Cout), lambda i: (0, 0)),   # weight resident (constant index)
            pl.BlockSpec((1, Cout), lambda i: (0, 0)),
        ],
        out_specs=pl.BlockSpec((tm, Cout), lambda i: (i, 0)),
        compiler_params=pltpu.CompilerParams(
            dimension_semantics=("parallel",),
            vmem_limit_bytes=_vmem_limit()),
    )(x, w, bias)
    return out[:M] if Mp != M else out


# ---------------------------------------------------------------------------
# Kernel 2: fused 3x(3x3 atrous conv) + folded-BN bias + ReLU.
# Image padded once with d_max, DMA'd once per batch element, taps streamed as
# shifted (rows,Cin)x(Cin,planes) matmuls accumulated in a VMEM f32 scratch.
# ---------------------------------------------------------------------------

def _make_atrous_kernel(dils, d_max, th, W, Cin, planes):
    tr = th * W

    def kernel(x_ref, w_ref, b_ref, *rest):
        # x_ref : (1, Hp, Wp, Cin)      shared padded image (resident across row tiles), bf16
        # w_ref : (nb, 9, Cin, planes)  per-branch per-tap weights (BN scale folded), bf16
        # b_ref : (nb, 1, planes)       per-branch BN shift, f32
        # o_refs: nb x (1, tr, planes)  flattened output row tiles, bf16
        # acc   : (tr, planes)          VMEM f32 accumulator
        o_refs, acc_ref = rest[:-1], rest[-1]
        row0 = pl.multiple_of(pl.program_id(1) * th, th)
        for bi, d in enumerate(dils):
            base = d_max - d              # shared d_max padding -> per-branch tap offset
            for t in range(9):            # static, fully unrolled tap loop
                ky, kx = divmod(t, 3)
                # H axis is untiled -> dynamic row offsets are free.  The static
                # column offset base+kx*d is sublane-unaligned; absorbed under MXU.
                win = x_ref[0,
                            pl.ds(row0 + base + ky * d, th),
                            pl.ds(base + kx * d, W),
                            :]                                    # (th, W, Cin) bf16
                contrib = jnp.dot(win.reshape(tr, Cin), w_ref[bi, t],
                                  preferred_element_type=jnp.float32)
                if t == 0:
                    acc_ref[...] = contrib
                else:
                    acc_ref[...] += contrib
            o_refs[bi][0] = jnp.maximum(acc_ref[...] + b_ref[bi], 0.0
                                        ).astype(o_refs[bi].dtype)
    return kernel


def atrous_branches(x_nhwc, w_atrous, b_atrous, dils, *, out_dtype=jnp.bfloat16):
    """Fused 3x3 dilated convs (stride 1, padding=dilation) + folded BN + ReLU.

    Returns len(dils) arrays of shape (N, H*W, planes).
    """
    N, H, W, Cin = x_nhwc.shape
    nb, nine, Cin2, planes = w_atrous.shape
    assert nine == 9 and Cin2 == Cin and nb == len(dils)
    d_max = max(dils)
    Hp = H + 2 * d_max
    Wp = _round_up(W + 2 * d_max, 8)                  # sublane-aligned padded width
    xpad = jnp.pad(x_nhwc, ((0, 0), (d_max, d_max), (d_max, Wp - W - d_max), (0, 0)))
    th = 8 if H % 8 == 0 else H                       # TODO(synk): pad H at production sizes
    tr = th * W
    n_row = H // th
    kernel = _make_atrous_kernel(tuple(dils), d_max, th, W, Cin, planes)
    return pl.pallas_call(
        kernel,
        out_shape=tuple(jax.ShapeDtypeStruct((N, H * W, planes), out_dtype) for _ in dils),
        grid=(N, n_row),
        in_specs=[
            # constant block index across row tiles -> image DMA'd once per n
            pl.BlockSpec((1, Hp, Wp, Cin), lambda n, r: (n, 0, 0, 0)),
            pl.BlockSpec((nb, 9, Cin, planes), lambda n, r: (0, 0, 0, 0)),
            pl.BlockSpec((nb, 1, planes), lambda n, r: (0, 0, 0)),
        ],
        out_specs=tuple(pl.BlockSpec((1, tr, planes), lambda n, r: (n, r, 0))
                        for _ in dils),
        scratch_shapes=[pltpu.VMEM((tr, planes), jnp.float32)],
        compiler_params=pltpu.CompilerParams(
            dimension_semantics=("parallel", "parallel"),
            vmem_limit_bytes=_vmem_limit()),
    )(xpad, w_atrous, b_atrous)


# ---------------------------------------------------------------------------
# Kernel 3: fused concat(x1..x5) + conv1 (1x1) + BN + ReLU.
# The concat never hits HBM: the 4 spatial branches are separate operands and
# the (spatially constant) global-avg-pool branch arrives as a per-batch bias.
# ---------------------------------------------------------------------------

def _fused_final_kernel(x1_ref, x2_ref, x3_ref, x4_ref, w_ref, b_ref, o_ref):
    acc = jnp.dot(x1_ref[0], w_ref[0], preferred_element_type=jnp.float32)
    acc = acc + jnp.dot(x2_ref[0], w_ref[1], preferred_element_type=jnp.float32)
    acc = acc + jnp.dot(x3_ref[0], w_ref[2], preferred_element_type=jnp.float32)
    acc = acc + jnp.dot(x4_ref[0], w_ref[3], preferred_element_type=jnp.float32)
    o_ref[0] = jnp.maximum(acc + b_ref[0], 0.0).astype(o_ref.dtype)


def fused_concat_conv1(branches, w4, nbias, *, tr=512, out_dtype=jnp.bfloat16):
    """relu(concat(b1..b4, gap) @ wf + shift) without materializing the concat."""
    x1, x2, x3, x4 = branches
    N, HW, planes = x1.shape
    _, _, Cout = w4.shape
    tr = min(tr, _round_up(HW, 8))
    n_r = pl.cdiv(HW, tr)
    HWp = n_r * tr
    if HWp != HW:
        pad = ((0, 0), (0, HWp - HW), (0, 0))
        x1, x2, x3, x4 = (jnp.pad(a, pad) for a in (x1, x2, x3, x4))
    out = pl.pallas_call(
        _fused_final_kernel,
        out_shape=jax.ShapeDtypeStruct((N, HWp, Cout), out_dtype),
        grid=(N, n_r),
        in_specs=[pl.BlockSpec((1, tr, planes), lambda n, r: (n, r, 0))] * 4 + [
            pl.BlockSpec((4, planes, Cout), lambda n, r: (0, 0, 0)),
            pl.BlockSpec((1, 1, Cout), lambda n, r: (n, 0, 0)),
        ],
        out_specs=pl.BlockSpec((1, tr, Cout), lambda n, r: (n, r, 0)),
        compiler_params=pltpu.CompilerParams(
            dimension_semantics=("parallel", "parallel"),
            vmem_limit_bytes=_vmem_limit()),
    )(x1, x2, x3, x4, w4, nbias)
    return out[:, :HW] if HWp != HW else out


# ---------------------------------------------------------------------------
# Parameter construction (kaiming-normal like the module, fresh eval-mode BN folded).
# ---------------------------------------------------------------------------

def _bn_scale_shift(cout):
    gamma = jnp.ones((cout,), jnp.float32)
    beta = jnp.zeros((cout,), jnp.float32)
    mean = jnp.zeros((cout,), jnp.float32)
    var = jnp.ones((cout,), jnp.float32)
    scale = gamma / jnp.sqrt(var + _BN_EPS)
    shift = beta - mean * scale
    return scale, shift


def _kaiming(key, shape, fan_in):
    return (2.0 / fan_in) ** 0.5 * jax.random.normal(key, shape, jnp.float32)


def make_aspp_params(key, inplanes, planes):
    keys = jax.random.split(key, 6)
    p = {}
    s, sh = _bn_scale_shift(planes)
    p["w1"] = (_kaiming(keys[0], (inplanes, planes), inplanes) * s).astype(jnp.bfloat16)
    p["b1"] = sh.reshape(1, planes)
    watr, batr = [], []
    for kk in keys[1:4]:
        s, sh = _bn_scale_shift(planes)
        watr.append(_kaiming(kk, (9, inplanes, planes), 9 * inplanes) * s)
        batr.append(sh.reshape(1, planes))
    p["w_atrous"] = jnp.stack(watr).astype(jnp.bfloat16)    # (3, 9, Cin, planes), tap-major
    p["b_atrous"] = jnp.stack(batr)                         # (3, 1, planes)
    s, sh = _bn_scale_shift(planes)
    p["w5"] = _kaiming(keys[4], (inplanes, planes), inplanes) * s   # GAP branch (f32 path)
    p["b5"] = sh
    s, sh = _bn_scale_shift(2 * planes)
    wf = _kaiming(keys[5], (5, planes, 2 * planes), 5 * planes) * s
    p["wf4"] = wf[:4].astype(jnp.bfloat16)                  # chunks for branches 1..4
    p["wf5"] = wf[4]                                        # chunk for GAP branch (f32)
    p["bf"] = sh
    return p


# ---------------------------------------------------------------------------
# ASPP forward (eval mode)
# ---------------------------------------------------------------------------

@functools.partial(jax.jit, static_argnames=("dilations",))
def aspp_forward(x_nchw, params, dilations=(1, 6, 12, 18)):
    assert dilations[0] == 1
    N, Cin, H, W = x_nchw.shape
    HW = H * W
    # Single NCHW->NHWC transpose fused with the f32->bf16 cast; no f32 NHWC copy kept.
    x_bf16 = jnp.transpose(x_nchw, (0, 2, 3, 1)).astype(jnp.bfloat16)

    # aspp1: 1x1 conv + folded-BN + ReLU
    x1 = matmul_bias_relu(x_bf16.reshape(N * HW, Cin), params["w1"], params["b1"])
    x1 = x1.reshape(N, HW, -1)

    # aspp2..4: fused 3x3 atrous branches (image padded once, DMA'd once per n)
    x2, x3, x4 = atrous_branches(x_bf16, params["w_atrous"], params["b_atrous"],
                                 tuple(dilations[1:]))

    # Global-avg-pool branch: bilinear upsample from 1x1 with align_corners=True is a
    # spatial broadcast, so its conv1 contribution folds into a per-batch bias.
    # O(N*C) work -> plain JAX, reduced straight from the NCHW input in f32.
    pooled = jnp.mean(x_nchw, axis=(2, 3))                              # (N, Cin)
    x5 = jax.nn.relu(pooled @ params["w5"] + params["b5"])              # (N, planes)
    nbias = (x5 @ params["wf5"] + params["bf"])[:, None, :]             # (N, 1, 2*planes)

    out = fused_concat_conv1((x1, x2, x3, x4), params["wf4"], nbias)    # (N, HW, 2P) bf16
    # dropout(0.5) -> identity in eval mode.
    out = out.reshape(N, H, W, -1)
    return jnp.transpose(out, (0, 3, 1, 2)).astype(jnp.float32)         # NCHW f32


# ---------------------------------------------------------------------------
# Pure-JAX f32 reference (same folded parameters) for a tolerance check.
# ---------------------------------------------------------------------------

def aspp_reference(x_nchw, params, dilations):
    x = jnp.transpose(x_nchw, (0, 2, 3, 1)).astype(jnp.float32)   # NHWC f32
    N, H, W, Cin = x.shape
    planes = params["b1"].shape[-1]
    ys = [jax.nn.relu(x @ params["w1"].astype(jnp.float32) + params["b1"][0])]
    for bi, d in enumerate(dilations[1:]):
        w = params["w_atrous"][bi].astype(jnp.float32).reshape(3, 3, Cin, planes)
        y = jax.lax.conv_general_dilated(
            x, w, window_strides=(1, 1), padding=((d, d), (d, d)),
            rhs_dilation=(d, d), dimension_numbers=("NHWC", "HWIO", "NHWC"))
        ys.append(jax.nn.relu(y + params["b_atrous"][bi, 0]))
    pooled = jnp.mean(x, axis=(1, 2))
    x5 = jax.nn.relu(pooled @ params["w5"] + params["b5"])
    ys.append(jnp.broadcast_to(x5[:, None, None, :], (N, H, W, planes)))
    cat = jnp.concatenate(ys, axis=-1)                             # (N,H,W,5*planes)
    wf = jnp.concatenate(
        [params["wf4"].astype(jnp.float32).reshape(4 * planes, -1), params["wf5"]], axis=0)
    out = jax.nn.relu(cat @ wf + params["bf"])
    return jnp.transpose(out, (0, 3, 1, 2))


# ---------------------------------------------------------------------------
# Main
# ---------------------------------------------------------------------------

if __name__ == "__main__":
    # Small shapes consistent with the module (scaled down from inplanes=2048,
    # planes=256): batch=2, inplanes=8, planes=16, spatial 16x16, output_stride=16.
    N, INPLANES, PLANES, H, W = 2, 8, 16, 16, 16
    DILATIONS = (1, 6, 12, 18)

    key = jax.random.PRNGKey(0)
    kx, kp = jax.random.split(key)
    x = jax.random.normal(kx, (N, INPLANES, H, W), jnp.float32)   # NCHW like PyTorch
    params = make_aspp_params(kp, INPLANES, PLANES)

    y = jax.block_until_ready(aspp_forward(x, params, dilations=DILATIONS))

    assert y.shape == (N, 2 * PLANES, H, W), y.shape
    assert bool(jnp.all(jnp.isfinite(y)))
    assert bool(jnp.all(y >= 0.0))          # ReLU output

    # Tolerance check against an f32 reference (bf16 activations => ~1e-2 level error).
    y_ref = aspp_reference(x, params, DILATIONS)
    err = float(jnp.max(jnp.abs(y - y_ref)))
    assert err < 2.5e-1, f"max abs err vs f32 reference: {err}"

    print("KERNEL_OK")
</pallas_src>

<mosaic_0001>
module attributes {stable_mosaic.version = 11 : i64} {
  func.func @_mm_bias_relu_kernel(%arg0: i32, %arg1: memref<512x8xbf16, #tpu.memory_space<vmem>>, %arg2: memref<8x16xbf16, #tpu.memory_space<vmem>>, %arg3: memref<1x16xf32, #tpu.memory_space<vmem>>, %arg4: memref<512x16xbf16, #tpu.memory_space<vmem>>) attributes {dimension_semantics = [#tpu.dimension_semantics<parallel>], iteration_bounds = array<i64: 1>, scalar_prefetch = 0 : i64, scratch_operands = 0 : i64, tpu.core_type = #tpu.core_type<tc>, window_params = [{transform_indices = @transform_0, window_bounds = array<i64: 512, 8>}, {pipeline_mode = #tpu.pipeline_mode<synchronous>, transform_indices = @transform_1, window_bounds = array<i64: 8, 16>}, {pipeline_mode = #tpu.pipeline_mode<synchronous>, transform_indices = @transform_2, window_bounds = array<i64: 1, 16>}, {transform_indices = @transform_3, window_bounds = array<i64: 512, 16>}]} {
    %c0 = arith.constant 0 : index
    %c0_0 = arith.constant 0 : index
    %0 = vector.load %arg1[%c0, %c0_0] : memref<512x8xbf16, #tpu.memory_space<vmem>>, vector<512x8xbf16>
    %c0_1 = arith.constant 0 : index
    %c0_2 = arith.constant 0 : index
    %1 = vector.load %arg2[%c0_1, %c0_2] : memref<8x16xbf16, #tpu.memory_space<vmem>>, vector<8x16xbf16>
    %cst = arith.constant dense<0.000000e+00> : vector<512x16xf32>
    %2 = tpu.matmul %0, %1, %cst {dimension_numbers = #tpu.dot_dimension_numbers<[1], [0], [0], [1], [0, 0, 1, 1], [], []>} : vector<512x8xbf16>, vector<8x16xbf16>, vector<512x16xf32> -> vector<512x16xf32>
    %c0_3 = arith.constant 0 : index
    %c0_4 = arith.constant 0 : index
    %3 = vector.load %arg3[%c0_3, %c0_4] : memref<1x16xf32, #tpu.memory_space<vmem>>, vector<1x16xf32>
    %4 = vector.broadcast %3 : vector<1x16xf32> to vector<512x16xf32>
    %5 = arith.addf %2, %4 : vector<512x16xf32>
    %cst_5 = arith.constant 0.000000e+00 : f32
    %6 = vector.broadcast %cst_5 : f32 to vector<512x16xf32>
    %7 = arith.maximumf %5, %6 : vector<512x16xf32>
    %8 = arith.truncf %7 : vector<512x16xf32> to vector<512x16xbf16>
    %c0_6 = arith.constant 0 : index
    %c0_7 = arith.constant 0 : index
    %9 = vector.load %arg4[%c0_6, %c0_7] : memref<512x16xbf16, #tpu.memory_space<vmem>>, vector<512x16xbf16>
    tpu.vector_store %arg4[%c0_6, %c0_7], %8 {strides = array<i32>} : memref<512x16xbf16, #tpu.memory_space<vmem>>, vector<512x16xbf16>,
    return
  }
  func.func @transform_0(%arg0: i32) -> (i32, i32) {
    %c0_i32 = arith.constant 0 : i32
    %c0_i32_0 = arith.constant 0 : i32
    return %arg0, %c0_i32 : i32, i32
  }
  func.func @transform_1(%arg0: i32) -> (i32, i32) {
    %c0_i32 = arith.constant 0 : i32
    %c0_i32_0 = arith.constant 0 : i32
    %c0_i32_1 = arith.constant 0 : i32
    return %c0_i32, %c0_i32_0 : i32, i32
  }
  func.func @transform_2(%arg0: i32) -> (i32, i32) {
    %c0_i32 = arith.constant 0 : i32
    %c0_i32_0 = arith.constant 0 : i32
    %c0_i32_1 = arith.constant 0 : i32
    return %c0_i32, %c0_i32_0 : i32, i32
  }
  func.func @transform_3(%arg0: i32) -> (i32, i32) {
    %c0_i32 = arith.constant 0 : i32
    %c0_i32_0 = arith.constant 0 : i32
    return %arg0, %c0_i32 : i32, i32
  }
}

module attributes {stable_mosaic.version = 11 : i64} {
  func.func @kernel(%arg0: i32, %arg1: i32, %arg2: memref<1x52x56x8xbf16, #tpu.memory_space<vmem>>, %arg3: memref<3x9x8x16xbf16, #tpu.memory_space<vmem>>, %arg4: memref<3x1x16xf32, #tpu.memory_space<vmem>>, %arg5: memref<1x128x16xbf16, #tpu.memory_space<vmem>>, %arg6: memref<1x128x16xbf16, #tpu.memory_space<vmem>>, %arg7: memref<1x128x16xbf16, #tpu.memory_space<vmem>>, %arg8: memref<128x16xf32, #tpu.memory_space<vmem>>) attributes {dimension_semantics = [#tpu.dimension_semantics<parallel>, #tpu.dimension_semantics<parallel>], iteration_bounds = array<i64: 2, 2>, scalar_prefetch = 0 : i64, scratch_operands = 1 : i64, tpu.core_type = #tpu.core_type<tc>, window_params = [{transform_indices = @transform_0, window_bounds = array<i64: 1, 52, 56, 8>}, {pipeline_mode = #tpu.pipeline_mode<synchronous>, transform_indices = @transform_1, window_bounds = array<i64: 3, 9, 8, 16>}, {pipeline_mode = #tpu.pipeline_mode<synchronous>, transform_indices = @transform_2, window_bounds = array<i64: 3, 1, 16>}, {transform_indices = @transform_3, window_bounds = array<i64: 1, 128, 16>}, {transform_indices = @transform_4, window_bounds = array<i64: 1, 128, 16>}, {transform_indices = @transform_5, window_bounds = array<i64: 1, 128, 16>}]} {
    %c8_i32 = arith.constant 8 : i32
    %0 = arith.muli %arg1, %c8_i32 : i32
    %1 = tpu.assume_multiple %0, 8 : i32
    %c12_i32 = arith.constant 12 : i32
    %2 = arith.addi %1, %c12_i32 : i32
    %c0_i32 = arith.constant 0 : i32
    %3 = arith.addi %2, %c0_i32 : i32
    %c0 = arith.constant 0 : index
    %4 = arith.index_cast %3 : i32 to index
    %c12 = arith.constant 12 : index
    %c0_0 = arith.constant 0 : index
    %5 = vector.load %arg2[%c0, %4, %c12, %c0_0] : memref<1x52x56x8xbf16, #tpu.memory_space<vmem>>, vector<1x8x16x8xbf16>
    %6 = vector.shape_cast %5 : vector<1x8x16x8xbf16> to vector<8x16x8xbf16>
    %7 = vector.shape_cast %6 : vector<8x16x8xbf16> to vector<128x8xbf16>
    %c0_1 = arith.constant 0 : index
    %c0_2 = arith.constant 0 : index
    %c0_3 = arith.constant 0 : index
    %c0_4 = arith.constant 0 : index
    %8 = vector.load %arg3[%c0_1, %c0_2, %c0_3, %c0_4] : memref<3x9x8x16xbf16, #tpu.memory_space<vmem>>, vector<1x1x8x16xbf16>
    %9 = vector.shape_cast %8 : vector<1x1x8x16xbf16> to vector<8x16xbf16>
    %cst = arith.constant dense<0.000000e+00> : vector<128x16xf32>
    %10 = tpu.matmul %7, %9, %cst {dimension_numbers = #tpu.dot_dimension_numbers<[1], [0], [0], [1], [0, 0, 1, 1], [], []>} : vector<128x8xbf16>, vector<8x16xbf16>, vector<128x16xf32> -> vector<128x16xf32>
    %c0_5 = arith.constant 0 : index
    %c0_6 = arith.constant 0 : index
    %11 = vector.load %arg8[%c0_5, %c0_6] : memref<128x16xf32, #tpu.memory_space<vmem>>, vector<128x16xf32>
    tpu.vector_store %arg8[%c0_5, %c0_6], %10 {strides = array<i32>} : memref<128x16xf32, #tpu.memory_space<vmem>>, vector<128x16xf32>,
    %c12_i32_7 = arith.constant 12 : i32
    %12 = arith.addi %1, %c12_i32_7 : i32
    %c0_i32_8 = arith.constant 0 : i32
    %13 = arith.addi %12, %c0_i32_8 : i32
    %c0_9 = arith.constant 0 : index
    %14 = arith.index_cast %13 : i32 to index
    %c18 = arith.constant 18 : index
    %c0_10 = arith.constant 0 : index
    %15 = vector.load %arg2[%c0_9, %14, %c18, %c0_10] : memref<1x52x56x8xbf16, #tpu.memory_space<vmem>>, vector<1x8x16x8xbf16>
    %16 = vector.shape_cast %15 : vector<1x8x16x8xbf16> to vector<8x16x8xbf16>
    %17 = vector.shape_cast %16 : vector<8x16x8xbf16> to vector<128x8xbf16>
    %c0_11 = arith.constant 0 : index
    %c1 = arith.constant 1 : index
    %c0_12 = arith.constant 0 : index
    %c0_13 = arith.constant 0 : index
    %18 = vector.load %arg3[%c0_11, %c1, %c0_12, %c0_13] : memref<3x9x8x16xbf16, #tpu.memory_space<vmem>>, vector<1x1x8x16xbf16>
    %19 = vector.shape_cast %18 : vector<1x1x8x16xbf16> to vector<8x16xbf16>
    %cst_14 = arith.constant dense<0.000000e+00> : vector<128x16xf32>
    %20 = tpu.matmul %17, %19, %cst_14 {dimension_numbers = #tpu.dot_dimension_numbers<[1], [0], [0], [1], [0, 0, 1, 1], [], []>} : vector<128x8xbf16>, vector<8x16xbf16>, vector<128x16xf32> -> vector<128x16xf32>
    %c0_15 = arith.constant 0 : index
    %c0_16 = arith.constant 0 : index
    %21 = vector.load %arg8[%c0_15, %c0_16] : memref<128x16xf32, #tpu.memory_space<vmem>>, vector<128x16xf32>
    %22 = arith.addf %21, %20 : vector<128x16xf32>
    %c0_17 = arith.constant 0 : index
    %c0_18 = arith.constant 0 : index
    %23 = vector.load %arg8[%c0_17, %c0_18] : memref<128x16xf32, #tpu.memory_space<vmem>>, vector<128x16xf32>
    tpu.vector_store %arg8[%c0_17, %c0_18], %22 {strides = array<i32>} : memref<128x16xf32, #tpu.memory_space<vmem>>, vector<128x16xf32>,
    %c12_i32_19 = arith.constant 12 : i32
    %24 = arith.addi %1, %c12_i32_19 : i32
    %c0_i32_20 = arith.constant 0 : i32
    %25 = arith.addi %24, %c0_i32_20 : i32
    %c0_21 = arith.constant 0 : index
    %26 = arith.index_cast %25 : i32 to index
    %c24 = arith.constant 24 : index
    %c0_22 = arith.constant 0 : index
    %27 = vector.load %arg2[%c0_21, %26, %c24, %c0_22] : memref<1x52x56x8xbf16, #tpu.memory_space<vmem>>, vector<1x8x16x8xbf16>
    %28 = vector.shape_cast %27 : vector<1x8x16x8xbf16> to vector<8x16x8xbf16>
    %29 = vector.shape_cast %28 : vector<8x16x8xbf16> to vector<128x8xbf16>
    %c0_23 = arith.constant 0 : index
    %c2 = arith.constant 2 : index
    %c0_24 = arith.constant 0 : index
    %c0_25 = arith.constant 0 : index
    %30 = vector.load %arg3[%c0_23, %c2, %c0_24, %c0_25] : memref<3x9x8x16xbf16, #tpu.memory_space<vmem>>, vector<1x1x8x16xbf16>
    %31 = vector.shape_cast %30 : vector<1x1x8x16xbf16> to vector<8x16xbf16>
    %cst_26 = arith.constant dense<0.000000e+00> : vector<128x16xf32>
    %32 = tpu.matmul %29, %31, %cst_26 {dimension_numbers = #tpu.dot_dimension_numbers<[1], [0], [0], [1], [0, 0, 1, 1], [], []>} : vector<128x8xbf16>, vector<8x16xbf16>, vector<128x16xf32> -> vector<128x16xf32>
    %c0_27 = arith.constant 0 : index
    %c0_28 = arith.constant 0 : index
    %33 = vector.load %arg8[%c0_27, %c0_28] : memref<128x16xf32, #tpu.memory_space<vmem>>, vector<128x16xf32>
    %34 = arith.addf %33, %32 : vector<128x16xf32>
    %c0_29 = arith.constant 0 : index
    %c0_30 = arith.constant 0 : index
    %35 = vector.load %arg8[%c0_29, %c0_30] : memref<128x16xf32, #tpu.memory_space<vmem>>, vector<128x16xf32>
    tpu.vector_store %arg8[%c0_29, %c0_30], %34 {strides = array<i32>} : memref<128x16xf32, #tpu.memory_space<vmem>>, vector<128x16xf32>,
    %c12_i32_31 = arith.constant 12 : i32
    %36 = arith.addi %1, %c12_i32_31 : i32
    %c6_i32 = arith.constant 6 : i32
    %37 = arith.addi %36, %c6_i32 : i32
    %c0_32 = arith.constant 0 : index
    %38 = arith.index_cast %37 : i32 to index
    %c12_33 = arith.constant 12 : index
    %c0_34 = arith.constant 0 : index
    %39 = vector.load %arg2[%c0_32, %38, %c12_33, %c0_34] : memref<1x52x56x8xbf16, #tpu.memory_space<vmem>>, vector<1x8x16x8xbf16>
    %40 = vector.shape_cast %39 : vector<1x8x16x8xbf16> to vector<8x16x8xbf16>
    %41 = vector.shape_cast %40 : vector<8x16x8xbf16> to vector<128x8xbf16>
    %c0_35 = arith.constant 0 : index
    %c3 = arith.constant 3 : index
    %c0_36 = arith.constant 0 : index
    %c0_37 = arith.constant 0 : index
    %42 = vector.load %arg3[%c0_35, %c3, %c0_36, %c0_37] : memref<3x9x8x16xbf16, #tpu.memory_space<vmem>>, vector<1x1x8x16xbf16>
    %43 = vector.shape_cast %42 : vector<1x1x8x16xbf16> to vector<8x16xbf16>
    %cst_38 = arith.constant dense<0.000000e+00> : vector<128x16xf32>
    %44 = tpu.matmul %41, %43, %cst_38 {dimension_numbers = #tpu.dot_dimension_numbers<[1], [0], [0], [1], [0, 0, 1, 1], [], []>} : vector<128x8xbf16>, vector<8x16xbf16>, vector<128x16xf32> -> vector<128x16xf32>
    %c0_39 = arith.constant 0 : index
    %c0_40 = arith.constant 0 : index
    %45 = vector.load %arg8[%c0_39, %c0_40] : memref<128x16xf32, #tpu.memory_space<vmem>>, vector<128x16xf32>
    %46 = arith.addf %45, %44 : vector<128x16xf32>
    %c0_41 = arith.constant 0 : index
    %c0_42 = arith.constant 0 : index
    %47 = vector.load %arg8[%c0_41, %c0_42] : memref<128x16xf32, #tpu.memory_space<vmem>>, vector<128x16xf32>
    tpu.vector_store %arg8[%c0_41, %c0_42], %46 {strides = array<i32>} : memref<128x16xf32, #tpu.memory_space<vmem>>, vector<128x16xf32>,
    %c12_i32_43 = arith.constant 12 : i32
    %48 = arith.addi %1, %c12_i32_43 : i32
    %c6_i32_44 = arith.constant 6 : i32
    %49 = arith.addi %48, %c6_i32_44 : i32
    %c0_45 = arith.constant 0 : index
    %50 = arith.index_cast %49 : i32 to index
    %c18_46 = arith.constant 18 : index
    %c0_47 = arith.constant 0 : index
    %51 = vector.load %arg2[%c0_45, %50, %c18_46, %c0_47] : memref<1x52x56x8xbf16, #tpu.memory_space<vmem>>, vector<1x8x16x8xbf16>
    %52 = vector.shape_cast %51 : vector<1x8x16x8xbf16> to vector<8x16x8xbf16>
    %53 = vector.shape_cast %52 : vector<8x16x8xbf16> to vector<128x8xbf16>
    %c0_48 = arith.constant 0 : index
    %c4 = arith.constant 4 : index
    %c0_49 = arith.constant 0 : index
    %c0_50 = arith.constant 0 : index
    %54 = vector.load %arg3[%c0_48, %c4, %c0_49, %c0_50] : memref<3x9x8x16xbf16, #tpu.memory_space<vmem>>, vector<1x1x8x16xbf16>
    %55 = vector.shape_cast %54 : vector<1x1x8x16xbf16> to vector<8x16xbf16>
    %cst_51 = arith.constant dense<0.000000e+00> : vector<128x16xf32>
    %56 = tpu.matmul %53, %55, %cst_51 {dimension_numbers = #tpu.dot_dimension_numbers<[1], [0], [0], [1], [0, 0, 1, 1], [], []>} : vector<128x8xbf16>, vector<8x16xbf16>, vector<128x16xf32> -> vector<128x16xf32>
    %c0_52 = arith.constant 0 : index
    %c0_53 = arith.constant 0 : index
    %57 = vector.load %arg8[%c0_52, %c0_53] : memref<128x16xf32, #tpu.memory_space<vmem>>, vector<128x16xf32>
    %58 = arith.addf %57, %56 : vector<128x16xf32>
    %c0_54 = arith.constant 0 : index
    %c0_55 = arith.constant 0 : index
    %59 = vector.load %arg8[%c0_54, %c0_55] : memref<128x16xf32, #tpu.memory_space<vmem>>, vector<128x16xf32>
    tpu.vector_store %arg8[%c0_54, %c0_55], %58 {strides = array<i32>} : memref<128x16xf32, #tpu.memory_space<vmem>>, vector<128x16xf32>,
    %c12_i32_56 = arith.constant 12 : i32
    %60 = arith.addi %1, %c12_i32_56 : i32
    %c6_i32_57 = arith.constant 6 : i32
    %61 = arith.addi %60, %c6_i32_57 : i32
    %c0_58 = arith.constant 0 : index
    %62 = arith.index_cast %61 : i32 to index
    %c24_59 = arith.constant 24 : index
    %c0_60 = arith.constant 0 : index
    %63 = vector.load %arg2[%c0_58, %62, %c24_59, %c0_60] : memref<1x52x56x8xbf16, #tpu.memory_space<vmem>>, vector<1x8x16x8xbf16>
    %64 = vector.shape_cast %63 : vector<1x8x16x8xbf16> to vector<8x16x8xbf16>
    %65 = vector.shape_cast %64 : vector<8x16x8xbf16> to vector<128x8xbf16>
    %c0_61 = arith.constant 0 : index
    %c5 = arith.constant 5 : index
    %c0_62 = arith.constant 0 : index
    %c0_63 = arith.constant 0 : index
    %66 = vector.load %arg3[%c0_61, %c5, %c0_62, %c0_63] : memref<3x9x8x16xbf16, #tpu.memory_space<vmem>>, vector<1x1x8x16xbf16>
    %67 = vector.shape_cast %66 : vector<1x1x8x16xbf16> to vector<8x16xbf16>
    %cst_64 = arith.constant dense<0.000000e+00> : vector<128x16xf32>
    %68 = tpu.matmul %65, %67, %cst_64 {dimension_numbers = #tpu.dot_dimension_numbers<[1], [0], [0], [1], [0, 0, 1, 1], [], []>} : vector<128x8xbf16>, vector<8x16xbf16>, vector<128x16xf32> -> vector<128x16xf32>
    %c0_65 = arith.constant 0 : index
    %c0_66 = arith.constant 0 : index
    %69 = vector.load %arg8[%c0_65, %c0_66] : memref<128x16xf32, #tpu.memory_space<vmem>>, vector<128x16xf32>
    %70 = arith.addf %69, %68 : vector<128x16xf32>
    %c0_67 = arith.constant 0 : index
    %c0_68 = arith.constant 0 : index
    %71 = vector.load %arg8[%c0_67, %c0_68] : memref<128x16xf32, #tpu.memory_space<vmem>>, vector<128x16xf32>
    tpu.vector_store %arg8[%c0_67, %c0_68], %70 {strides = array<i32>} : memref<128x16xf32, #tpu.memory_space<vmem>>, vector<128x16xf32>,
    %c12_i32_69 = arith.constant 12 : i32
    %72 = arith.addi %1, %c12_i32_69 : i32
    %c12_i32_70 = arith.constant 12 : i32
    %73 = arith.addi %72, %c12_i32_70 : i32
    %c0_71 = arith.constant 0 : index
    %74 = arith.index_cast %73 : i32 to index
    %c12_72 = arith.constant 12 : index
    %c0_73 = arith.constant 0 : index
    %75 = vector.load %arg2[%c0_71, %74, %c12_72, %c0_73] : memref<1x52x56x8xbf16, #tpu.memory_space<vmem>>, vector<1x8x16x8xbf16>
    %76 = vector.shape_cast %75 : vector<1x8x16x8xbf16> to vector<8x16x8xbf16>
    %77 = vector.shape_cast %76 : vector<8x16x8xbf16> to vector<128x8xbf16>
    %c0_74 = arith.constant 0 : index
    %c6 = arith.constant 6 : index
    %c0_75 = arith.constant 0 : index
    %c0_76 = arith.constant 0 : index
    %78 = vector.load %arg3[%c0_74, %c6, %c0_75, %c0_76] : memref<3x9x8x16xbf16, #tpu.memory_space<vmem>>, vector<1x1x8x16xbf16>
    %79 = vector.shape_cast %78 : vector<1x1x8x16xbf16> to vector<8x16xbf16>
    %cst_77 = arith.constant dense<0.000000e+00> : vector<128x16xf32>
    %80 = tpu.matmul %77, %79, %cst_77 {dimension_numbers = #tpu.dot_dimension_numbers<[1], [0], [0], [1], [0, 0, 1, 1], [], []>} : vector<128x8xbf16>, vector<8x16xbf16>, vector<128x16xf32> -> vector<128x16xf32>
    %c0_78 = arith.constant 0 : index
    %c0_79 = arith.constant 0 : index
    %81 = vector.load %arg8[%c0_78, %c0_79] : memref<128x16xf32, #tpu.memory_space<vmem>>, vector<128x16xf32>
    %82 = arith.addf %81, %80 : vector<128x16xf32>
    %c0_80 = arith.constant 0 : index
    %c0_81 = arith.constant 0 : index
    %83 = vector.load %arg8[%c0_80, %c0_81] : memref<128x16xf32, #tpu.memory_space<vmem>>, vector<128x16xf32>
    tpu.vector_store %arg8[%c0_80, %c0_81], %82 {strides = array<i32>} : memref<128x16xf32, #tpu.memory_space<vmem>>, vector<128x16xf32>,
    %c12_i32_82 = arith.constant 12 : i32
    %84 = arith.addi %1, %c12_i32_82 : i32
    %c12_i32_83 = arith.constant 12 : i32
    %85 = arith.addi %84, %c12_i32_83 : i32
    %c0_84 = arith.constant 0 : index
    %86 = arith.index_cast %85 : i32 to index
    %c18_85 = arith.constant 18 : index
    %c0_86 = arith.constant 0 : index
    %87 = vector.load %arg2[%c0_84, %86, %c18_85, %c0_86] : memref<1x52x56x8xbf16, #tpu.memory_space<vmem>>, vector<1x8x16x8xbf16>
    %88 = vector.shape_cast %87 : vector<1x8x16x8xbf16> to vector<8x16x8xbf16>
    %89 = vector.shape_cast %88 : vector<8x16x8xbf16> to vector<128x8xbf16>
    %c0_87 = arith.constant 0 : index
    %c7 = arith.constant 7 : index
    %c0_88 = arith.constant 0 : index
    %c0_89 = arith.constant 0 : index
    %90 = vector.load %arg3[%c0_87, %c7, %c0_88, %c0_89] : memref<3x9x8x16xbf16, #tpu.memory_space<vmem>>, vector<1x1x8x16xbf16>
    %91 = vector.shape_cast %90 : vector<1x1x8x16xbf16> to vector<8x16xbf16>
    %cst_90 = arith.constant dense<0.000000e+00> : vector<128x16xf32>
    %92 = tpu.matmul %89, %91, %cst_90 {dimension_numbers = #tpu.dot_dimension_numbers<[1], [0], [0], [1], [0, 0, 1, 1], [], []>} : vector<128x8xbf16>, vector<8x16xbf16>, vector<128x16xf32> -> vector<128x16xf32>
    %c0_91 = arith.constant 0 : index
    %c0_92 = arith.constant 0 : index
    %93 = vector.load %arg8[%c0_91, %c0_92] : memref<128x16xf32, #tpu.memory_space<vmem>>, vector<128x16xf32>
    %94 = arith.addf %93, %92 : vector<128x16xf32>
    %c0_93 = arith.constant 0 : index
    %c0_94 = arith.constant 0 : index
    %95 = vector.load %arg8[%c0_93, %c0_94] : memref<128x16xf32, #tpu.memory_space<vmem>>, vector<128x16xf32>
    tpu.vector_store %arg8[%c0_93, %c0_94], %94 {strides = array<i32>} : memref<128x16xf32, #tpu.memory_space<vmem>>, vector<128x16xf32>,
    %c12_i32_95 = arith.constant 12 : i32
    %96 = arith.addi %1, %c12_i32_95 : i32
    %c12_i32_96 = arith.constant 12 : i32
    %97 = arith.addi %96, %c12_i32_96 : i32
    %c0_97 = arith.constant 0 : index
    %98 = arith.index_cast %97 : i32 to index
    %c24_98 = arith.constant 24 : index
    %c0_99 = arith.constant 0 : index
    %99 = vector.load %arg2[%c0_97, %98, %c24_98, %c0_99] : memref<1x52x56x8xbf16, #tpu.memory_space<vmem>>, vector<1x8x16x8xbf16>
    %100 = vector.shape_cast %99 : vector<1x8x16x8xbf16> to vector<8x16x8xbf16>
    %101 = vector.shape_cast %100 : vector<8x16x8xbf16> to vector<128x8xbf16>
    %c0_100 = arith.constant 0 : index
    %c8 = arith.constant 8 : index
    %c0_101 = arith.constant 0 : index
    %c0_102 = arith.constant 0 : index
    %102 = vector.load %arg3[%c0_100, %c8, %c0_101, %c0_102] : memref<3x9x8x16xbf16, #tpu.memory_space<vmem>>, vector<1x1x8x16xbf16>
    %103 = vector.shape_cast %102 : vector<1x1x8x16xbf16> to vector<8x16xbf16>
    %cst_103 = arith.constant dense<0.000000e+00> : vector<128x16xf32>
    %104 = tpu.matmul %101, %103, %cst_103 {dimension_numbers = #tpu.dot_dimension_numbers<[1], [0], [0], [1], [0, 0, 1, 1], [], []>} : vector<128x8xbf16>, vector<8x16xbf16>, vector<128x16xf32> -> vector<128x16xf32>
    %c0_104 = arith.constant 0 : index
    %c0_105 = arith.constant 0 : index
    %105 = vector.load %arg8[%c0_104, %c0_105] : memref<128x16xf32, #tpu.memory_space<vmem>>, vector<128x16xf32>
    %106 = arith.addf %105, %104 : vector<128x16xf32>
    %c0_106 = arith.constant 0 : index
    %c0_107 = arith.constant 0 : index
    %107 = vector.load %arg8[%c0_106, %c0_107] : memref<128x16xf32, #tpu.memory_space<vmem>>, vector<128x16xf32>
    tpu.vector_store %arg8[%c0_106, %c0_107], %106 {strides = array<i32>} : memref<128x16xf32, #tpu.memory_space<vmem>>, vector<128x16xf32>,
    %c0_108 = arith.constant 0 : index
    %c0_109 = arith.constant 0 : index
    %108 = vector.load %arg8[%c0_108, %c0_109] : memref<128x16xf32, #tpu.memory_space<vmem>>, vector<128x16xf32>
    %c0_110 = arith.constant 0 : index
    %c0_111 = arith.constant 0 : index
    %c0_112 = arith.constant 0 : index
    %109 = vector.load %arg4[%c0_110, %c0_111, %c0_112] : memref<3x1x16xf32, #tpu.memory_space<vmem>>, vector<1x1x16xf32>
    %110 = vector.shape_cast %109 : vector<1x1x16xf32> to vector<1x16xf32>
    %111 = vector.broadcast %110 : vector<1x16xf32> to vector<128x16xf32>
    %112 = arith.addf %108, %111 : vector<128x16xf32>
    %cst_113 = arith.constant 0.000000e+00 : f32
    %113 = vector.broadcast %cst_113 : f32 to vector<128x16xf32>
    %114 = arith.maximumf %112, %113 : vector<128x16xf32>
    %115 = arith.truncf %114 : vector<128x16xf32> to vector<128x16xbf16>
    %c0_114 = arith.constant 0 : index
    %c0_115 = arith.constant 0 : index
    %c0_116 = arith.constant 0 : index
    %116 = vector.load %arg5[%c0_114, %c0_115, %c0_116] : memref<1x128x16xbf16, #tpu.memory_space<vmem>>, vector<1x128x16xbf16>
    %117 = vector.shape_cast %116 : vector<1x128x16xbf16> to vector<128x16xbf16>
    %118 = vector.shape_cast %115 : vector<128x16xbf16> to vector<1x128x16xbf16>
    tpu.vector_store %arg5[%c0_114, %c0_115, %c0_116], %118 {strides = array<i32>} : memref<1x128x16xbf16, #tpu.memory_space<vmem>>, vector<1x128x16xbf16>,
    %c6_i32_117 = arith.constant 6 : i32
    %119 = arith.addi %1, %c6_i32_117 : i32
    %c0_i32_118 = arith.constant 0 : i32
    %120 = arith.addi %119, %c0_i32_118 : i32
    %c0_119 = arith.constant 0 : index
    %121 = arith.index_cast %120 : i32 to index
    %c6_120 = arith.constant 6 : index
    %c0_121 = arith.constant 0 : index
    %122 = vector.load %arg2[%c0_119, %121, %c6_120, %c0_121] : memref<1x52x56x8xbf16, #tpu.memory_space<vmem>>, vector<1x8x16x8xbf16>
    %123 = vector.shape_cast %122 : vector<1x8x16x8xbf16> to vector<8x16x8xbf16>
    %124 = vector.shape_cast %123 : vector<8x16x8xbf16> to vector<128x8xbf16>
    %c1_122 = arith.constant 1 : index
    %c0_123 = arith.constant 0 : index
    %c0_124 = arith.constant 0 : index
    %c0_125 = arith.constant 0 : index
    %125 = vector.load %arg3[%c1_122, %c0_123, %c0_124, %c0_125] : memref<3x9x8x16xbf16, #tpu.memory_space<vmem>>, vector<1x1x8x16xbf16>
    %126 = vector.shape_cast %125 : vector<1x1x8x16xbf16> to vector<8x16xbf16>
    %cst_126 = arith.constant dense<0.000000e+00> : vector<128x16xf32>
    %127 = tpu.matmul %124, %126, %cst_126 {dimension_numbers = #tpu.dot_dimension_numbers<[1], [0], [0], [1], [0, 0, 1, 1], [], []>} : vector<128x8xbf16>, vector<8x16xbf16>, vector<128x16xf32> -> vector<128x16xf32>
    %c0_127 = arith.constant 0 : index
    %c0_128 = arith.constant 0 : index
    %128 = vector.load %arg8[%c0_127, %c0_128] : memref<128x16xf32, #tpu.memory_space<vmem>>, vector<128x16xf32>
    tpu.vector_store %arg8[%c0_127, %c0_128], %127 {strides = array<i32>} : memref<128x16xf32, #tpu.memory_space<vmem>>, vector<128x16xf32>,
    %c6_i32_129 = arith.constant 6 : i32
    %129 = arith.addi %1, %c6_i32_129 : i32
    %c0_i32_130 = arith.constant 0 : i32
    %130 = arith.addi %129, %c0_i32_130 : i32
    %c0_131 = arith.constant 0 : index
    %131 = arith.index_cast %130 : i32 to index
    %c18_132 = arith.constant 18 : index
    %c0_133 = arith.constant 0 : index
    %132 = vector.load %arg2[%c0_131, %131, %c18_132, %c0_133] : memref<1x52x56x8xbf16, #tpu.memory_space<vmem>>, vector<1x8x16x8xbf16>
    %133 = vector.shape_cast %132 : vector<1x8x16x8xbf16> to vector<8x16x8xbf16>
    %134 = vector.shape_cast %133 : vector<8x16x8xbf16> to vector<128x8xbf16>
    %c1_134 = arith.constant 1 : index
    %c1_135 = arith.constant 1 : index
    %c0_136 = arith.constant 0 : index
    %c0_137 = arith.constant 0 : index
    %135 = vector.load %arg3[%c1_134, %c1_135, %c0_136, %c0_137] : memref<3x9x8x16xbf16, #tpu.memory_space<vmem>>, vector<1x1x8x16xbf16>
    %136 = vector.shape_cast %135 : vector<1x1x8x16xbf16> to vector<8x16xbf16>
    %cst_138 = arith.constant dense<0.000000e+00> : vector<128x16xf32>
    %137 = tpu.matmul %134, %136, %cst_138 {dimension_numbers = #tpu.dot_dimension_numbers<[1], [0], [0], [1], [0, 0, 1, 1], [], []>} : vector<128x8xbf16>, vector<8x16xbf16>, vector<128x16xf32> -> vector<128x16xf32>
    %c0_139 = arith.constant 0 : index
    %c0_140 = arith.constant 0 : index
    %138 = vector.load %arg8[%c0_139, %c0_140] : memref<128x16xf32, #tpu.memory_space<vmem>>, vector<128x16xf32>
    %139 = arith.addf %138, %137 : vector<128x16xf32>
    %c0_141 = arith.constant 0 : index
    %c0_142 = arith.constant 0 : index
    %140 = vector.load %arg8[%c0_141, %c0_142] : memref<128x16xf32, #tpu.memory_space<vmem>>, vector<128x16xf32>
    tpu.vector_store %arg8[%c0_141, %c0_142], %139 {strides = array<i32>} : memref<128x16xf32, #tpu.memory_space<vmem>>, vector<128x16xf32>,
    %c6_i32_143 = arith.constant 6 : i32
    %141 = arith.addi %1, %c6_i32_143 : i32
    %c0_i32_144 = arith.constant 0 : i32
    %142 = arith.addi %141, %c0_i32_144 : i32
    %c0_145 = arith.constant 0 : index
    %143 = arith.index_cast %142 : i32 to index
    %c30 = arith.constant 30 : index
    %c0_146 = arith.constant 0 : index
    %144 = vector.load %arg2[%c0_145, %143, %c30, %c0_146] : memref<1x52x56x8xbf16, #tpu.memory_space<vmem>>, vector<1x8x16x8xbf16>
    %145 = vector.shape_cast %144 : vector<1x8x16x8xbf16> to vector<8x16x8xbf16>
    %146 = vector.shape_cast %145 : vector<8x16x8xbf16> to vector<128x8xbf16>
    %c1_147 = arith.constant 1 : index
    %c2_148 = arith.constant 2 : index
    %c0_149 = arith.constant 0 : index
    %c0_150 = arith.constant 0 : index
    %147 = vector.load %arg3[%c1_147, %c2_148, %c0_149, %c0_150] : memref<3x9x8x16xbf16, #tpu.memory_space<vmem>>, vector<1x1x8x16xbf16>
    %148 = vector.shape_cast %147 : vector<1x1x8x16xbf16> to vector<8x16xbf16>
    %cst_151 = arith.constant dense<0.000000e+00> : vector<128x16xf32>
    %149 = tpu.matmul %146, %148, %cst_151 {dimension_numbers = #tpu.dot_dimension_numbers<[1], [0], [0], [1], [0, 0, 1, 1], [], []>} : vector<128x8xbf16>, vector<8x16xbf16>, vector<128x16xf32> -> vector<128x16xf32>
    %c0_152 = arith.constant 0 : index
    %c0_153 = arith.constant 0 : index
    %150 = vector.load %arg8[%c0_152, %c0_153] : memref<128x16xf32, #tpu.memory_space<vmem>>, vector<128x16xf32>
    %151 = arith.addf %150, %149 : vector<128x16xf32>
    %c0_154 = arith.constant 0 : index
    %c0_155 = arith.constant 0 : index
    %152 = vector.load %arg8[%c0_154, %c0_155] : memref<128x16xf32, #tpu.memory_space<vmem>>, vector<128x16xf32>
    tpu.vector_store %arg8[%c0_154, %c0_155], %151 {strides = array<i32>} : memref<128x16xf32, #tpu.memory_space<vmem>>, vector<128x16xf32>,
    %c6_i32_156 = arith.constant 6 : i32
    %153 = arith.addi %1, %c6_i32_156 : i32
    %c12_i32_157 = arith.constant 12 : i32
    %154 = arith.addi %153, %c12_i32_157 : i32
    %c0_158 = arith.constant 0 : index
    %155 = arith.index_cast %154 : i32 to index
    %c6_159 = arith.constant 6 : index
    %c0_160 = arith.constant 0 : index
    %156 = vector.load %arg2[%c0_158, %155, %c6_159, %c0_160] : memref<1x52x56x8xbf16, #tpu.memory_space<vmem>>, vector<1x8x16x8xbf16>
    %157 = vector.shape_cast %156 : vector<1x8x16x8xbf16> to vector<8x16x8xbf16>
    %158 = vector.shape_cast %157 : vector<8x16x8xbf16> to vector<128x8xbf16>
    %c1_161 = arith.constant 1 : index
    %c3_162 = arith.constant 3 : index
    %c0_163 = arith.constant 0 : index
    %c0_164 = arith.constant 0 : index
    %159 = vector.load %arg3[%c1_161, %c3_162, %c0_163, %c0_164] : memref<3x9x8x16xbf16, #tpu.memory_space<vmem>>, vector<1x1x8x16xbf16>
    %160 = vector.shape_cast %159 : vector<1x1x8x16xbf16> to vector<8x16xbf16>
    %cst_165 = arith.constant dense<0.000000e+00> : vector<128x16xf32>
    %161 = tpu.matmul %158, %160, %cst_165 {dimension_numbers = #tpu.dot_dimension_numbers<[1], [0], [0], [1], [0, 0, 1, 1], [], []>} : vector<128x8xbf16>, vector<8x16xbf16>, vector<128x16xf32> -> vector<128x16xf32>
    %c0_166 = arith.constant 0 : index
    %c0_167 = arith.constant 0 : index
    %162 = vector.load %arg8[%c0_166, %c0_167] : memref<128x16xf32, #tpu.memory_space<vmem>>, vector<128x16xf32>
    %163 = arith.addf %162, %161 : vector<128x16xf32>
    %c0_168 = arith.constant 0 : index
    %c0_169 = arith.constant 0 : index
    %164 = vector.load %arg8[%c0_168, %c0_169] : memref<128x16xf32, #tpu.memory_space<vmem>>, vector<128x16xf32>
    tpu.vector_store %arg8[%c0_168, %c0_169], %163 {strides = array<i32>} : memref<128x16xf32, #tpu.memory_space<vmem>>, vector<128x16xf32>,
    %c6_i32_170 = arith.constant 6 : i32
    %165 = arith.addi %1, %c6_i32_170 : i32
    %c12_i32_171 = arith.constant 12 : i32
    %166 = arith.addi %165, %c12_i32_171 : i32
    %c0_172 = arith.constant 0 : index
    %167 = arith.index_cast %166 : i32 to index
    %c18_173 = arith.constant 18 : index
    %c0_174 = arith.constant 0 : index
    %168 = vector.load %arg2[%c0_172, %167, %c18_173, %c0_174] : memref<1x52x56x8xbf16, #tpu.memory_space<vmem>>, vector<1x8x16x8xbf16>
    %169 = vector.shape_cast %168 : vector<1x8x16x8xbf16> to vector<8x16x8xbf16>
    %170 = vector.shape_cast %169 : vector<8x16x8xbf16> to vector<128x8xbf16>
    %c1_175 = arith.constant 1 : index
    %c4_176 = arith.constant 4 : index
    %c0_177 = arith.constant 0 : index
    %c0_178 = arith.constant 0 : index
    %171 = vector.load %arg3[%c1_175, %c4_176, %c0_177, %c0_178] : memref<3x9x8x16xbf16, #tpu.memory_space<vmem>>, vector<1x1x8x16xbf16>
    %172 = vector.shape_cast %171 : vector<1x1x8x16xbf16> to vector<8x16xbf16>
    %cst_179 = arith.constant dense<0.000000e+00> : vector<128x16xf32>
    %173 = tpu.matmul %170, %172, %cst_179 {dimension_numbers = #tpu.dot_dimension_numbers<[1], [0], [0], [1], [0, 0, 1, 1], [], []>} : vector<128x8xbf16>, vector<8x16xbf16>, vector<128x16xf32> -> vector<128x16xf32>
    %c0_180 = arith.constant 0 : index
    %c0_181 = arith.constant 0 : index
    %174 = vector.load %arg8[%c0_180, %c0_181] : memref<128x16xf32, #tpu.memory_space<vmem>>, vector<128x16xf32>
    %175 = arith.addf %174, %173 : vector<128x16xf32>
    %c0_182 = arith.constant 0 : index
    %c0_183 = arith.constant 0 : index
    %176 = vector.load %arg8[%c0_182, %c0_183] : memref<128x16xf32, #tpu.memory_space<vmem>>, vector<128x16xf32>
    tpu.vector_store %arg8[%c0_182, %c0_183], %175 {strides = array<i32>} : memref<128x16xf32, #tpu.memory_space<vmem>>, vector<128x16xf32>,
    %c6_i32_184 = arith.constant 6 : i32
    %177 = arith.addi %1, %c6_i32_184 : i32
    %c12_i32_185 = arith.constant 12 : i32
    %178 = arith.addi %177, %c12_i32_185 : i32
    %c0_186 = arith.constant 0 : index
    %179 = arith.index_cast %178 : i32 to index
    %c30_187 = arith.constant 30 : index
    %c0_188 = arith.constant 0 : index
    %180 = vector.load %arg2[%c0_186, %179, %c30_187, %c0_188] : memref<1x52x56x8xbf16, #tpu.memory_space<vmem>>, vector<1x8x16x8xbf16>
    %181 = vector.shape_cast %180 : vector<1x8x16x8xbf16> to vector<8x16x8xbf16>
    %182 = vector.shape_cast %181 : vector<8x16x8xbf16> to vector<128x8xbf16>
    %c1_189 = arith.constant 1 : index
    %c5_190 = arith.constant 5 : index
    %c0_191 = arith.constant 0 : index
    %c0_192 = arith.constant 0 : index
    %183 = vector.load %arg3[%c1_189, %c5_190, %c0_191, %c0_192] : memref<3x9x8x16xbf16, #tpu.memory_space<vmem>>, vector<1x1x8x16xbf16>
    %184 = vector.shape_cast %183 : vector<1x1x8x16xbf16> to vector<8x16xbf16>
    %cst_193 = arith.constant dense<0.000000e+00> : vector<128x16xf32>
    %185 = tpu.matmul %182, %184, %cst_193 {dimension_numbers = #tpu.dot_dimension_numbers<[1], [0], [0], [1], [0, 0, 1, 1], [], []>} : vector<128x8xbf16>, vector<8x16xbf16>, vector<128x16xf32> -> vector<128x16xf32>
    %c0_194 = arith.constant 0 : index
    %c0_195 = arith.constant 0 : index
    %186 = vector.load %arg8[%c0_194, %c0_195] : memref<128x16xf32, #tpu.memory_space<vmem>>, vector<128x16xf32>
    %187 = arith.addf %186, %185 : vector<128x16xf32>
    %c0_196 = arith.constant 0 : index
    %c0_197 = arith.constant 0 : index
    %188 = vector.load %arg8[%c0_196, %c0_197] : memref<128x16xf32, #tpu.memory_space<vmem>>, vector<128x16xf32>
    tpu.vector_store %arg8[%c0_196, %c0_197], %187 {strides = array<i32>} : memref<128x16xf32, #tpu.memory_space<vmem>>, vector<128x16xf32>,
    %c6_i32_198 = arith.constant 6 : i32
    %189 = arith.addi %1, %c6_i32_198 : i32
    %c24_i32 = arith.constant 24 : i32
    %190 = arith.addi %189, %c24_i32 : i32
    %c0_199 = arith.constant 0 : index
    %191 = arith.index_cast %190 : i32 to index
    %c6_200 = arith.constant 6 : index
    %c0_201 = arith.constant 0 : index
    %192 = vector.load %arg2[%c0_199, %191, %c6_200, %c0_201] : memref<1x52x56x8xbf16, #tpu.memory_space<vmem>>, vector<1x8x16x8xbf16>
    %193 = vector.shape_cast %192 : vector<1x8x16x8xbf16> to vector<8x16x8xbf16>
    %194 = vector.shape_cast %193 : vector<8x16x8xbf16> to vector<128x8xbf16>
    %c1_202 = arith.constant 1 : index
    %c6_203 = arith.constant 6 : index
    %c0_204 = arith.constant 0 : index
    %c0_205 = arith.constant 0 : index
    %195 = vector.load %arg3[%c1_202, %c6_203, %c0_204, %c0_205] : memref<3x9x8x16xbf16, #tpu.memory_space<vmem>>, vector<1x1x8x16xbf16>
    %196 = vector.shape_cast %195 : vector<1x1x8x16xbf16> to vector<8x16xbf16>
    %cst_206 = arith.constant dense<0.000000e+00> : vector<128x16xf32>
    %197 = tpu.matmul %194, %196, %cst_206 {dimension_numbers = #tpu.dot_dimension_numbers<[1], [0], [0], [1], [0, 0, 1, 1], [], []>} : vector<128x8xbf16>, vector<8x16xbf16>, vector<128x16xf32> -> vector<128x16xf32>
    %c0_207 = arith.constant 0 : index
    %c0_208 = arith.constant 0 : index
    %198 = vector.load %arg8[%c0_207, %c0_208] : memref<128x16xf32, #tpu.memory_space<vmem>>, vector<128x16xf32>
    %199 = arith.addf %198, %197 : vector<128x16xf32>
    %c0_209 = arith.constant 0 : index
    %c0_210 = arith.constant 0 : index
    %200 = vector.load %arg8[%c0_209, %c0_210] : memref<128x16xf32, #tpu.memory_space<vmem>>, vector<128x16xf32>
    tpu.vector_store %arg8[%c0_209, %c0_210], %199 {strides = array<i32>} : memref<128x16xf32, #tpu.memory_space<vmem>>, vector<128x16xf32>,
    %c6_i32_211 = arith.constant 6 : i32
    %201 = arith.addi %1, %c6_i32_211 : i32
    %c24_i32_212 = arith.constant 24 : i32
    %202 = arith.addi %201, %c24_i32_212 : i32
    %c0_213 = arith.constant 0 : index
    %203 = arith.index_cast %202 : i32 to index
    %c18_214 = arith.constant 18 : index
    %c0_215 = arith.constant 0 : index
    %204 = vector.load %arg2[%c0_213, %203, %c18_214, %c0_215] : memref<1x52x56x8xbf16, #tpu.memory_space<vmem>>, vector<1x8x16x8xbf16>
    %205 = vector.shape_cast %204 : vector<1x8x16x8xbf16> to vector<8x16x8xbf16>
    %206 = vector.shape_cast %205 : vector<8x16x8xbf16> to vector<128x8xbf16>
    %c1_216 = arith.constant 1 : index
    %c7_217 = arith.constant 7 : index
    %c0_218 = arith.constant 0 : index
    %c0_219 = arith.constant 0 : index
    %207 = vector.load %arg3[%c1_216, %c7_217, %c0_218, %c0_219] : memref<3x9x8x16xbf16, #tpu.memory_space<vmem>>, vector<1x1x8x16xbf16>
    %208 = vector.shape_cast %207 : vector<1x1x8x16xbf16> to vector<8x16xbf16>
    %cst_220 = arith.constant dense<0.000000e+00> : vector<128x16xf32>
    %209 = tpu.matmul %206, %208, %cst_220 {dimension_numbers = #tpu.dot_dimension_numbers<[1], [0], [0], [1], [0, 0, 1, 1], [], []>} : vector<128x8xbf16>, vector<8x16xbf16>, vector<128x16xf32> -> vector<128x16xf32>
    %c0_221 = arith.constant 0 : index
    %c0_222 = arith.constant 0 : index
    %210 = vector.load %arg8[%c0_221, %c0_222] : memref<128x16xf32, #tpu.memory_space<vmem>>, vector<128x16xf32>
    %211 = arith.addf %210, %209 : vector<128x16xf32>
    %c0_223 = arith.constant 0 : index
    %c0_224 = arith.constant 0 : index
    %212 = vector.load %arg8[%c0_223, %c0_224] : memref<128x16xf32, #tpu.memory_space<vmem>>, vector<128x16xf32>
    tpu.vector_store %arg8[%c0_223, %c0_224], %211 {strides = array<i32>} : memref<128x16xf32, #tpu.memory_space<vmem>>, vector<128x16xf32>,
    %c6_i32_225 = arith.constant 6 : i32
    %213 = arith.addi %1, %c6_i32_225 : i32
    %c24_i32_226 = arith.constant 24 : i32
    %214 = arith.addi %213, %c24_i32_226 : i32
    %c0_227 = arith.constant 0 : index
    %215 = arith.index_cast %214 : i32 to index
    %c30_228 = arith.constant 30 : index
    %c0_229 = arith.constant 0 : index
    %216 = vector.load %arg2[%c0_227, %215, %c30_228, %c0_229] : memref<1x52x56x8xbf16, #tpu.memory_space<vmem>>, vector<1x8x16x8xbf16>
    %217 = vector.shape_cast %216 : vector<1x8x16x8xbf16> to vector<8x16x8xbf16>
    %218 = vector.shape_cast %217 : vector<8x16x8xbf16> to vector<128x8xbf16>
    %c1_230 = arith.constant 1 : index
    %c8_231 = arith.constant 8 : index
    %c0_232 = arith.constant 0 : index
    %c0_233 = arith.constant 0 : index
    %219 = vector.load %arg3[%c1_230, %c8_231, %c0_232, %c0_233] : memref<3x9x8x16xbf16, #tpu.memory_space<vmem>>, vector<1x1x8x16xbf16>
    %220 = vector.shape_cast %219 : vector<1x1x8x16xbf16> to vector<8x16xbf16>
    %cst_234 = arith.constant dense<0.000000e+00> : vector<128x16xf32>
    %221 = tpu.matmul %218, %220, %cst_234 {dimension_numbers = #tpu.dot_dimension_numbers<[1], [0], [0], [1], [0, 0, 1, 1], [], []>} : vector<128x8xbf16>, vector<8x16xbf16>, vector<128x16xf32> -> vector<128x16xf32>
    %c0_235 = arith.constant 0 : index
    %c0_236 = arith.constant 0 : index
    %222 = vector.load %arg8[%c0_235, %c0_236] : memref<128x16xf32, #tpu.memory_space<vmem>>, vector<128x16xf32>
    %223 = arith.addf %222, %221 : vector<128x16xf32>
    %c0_237 = arith.constant 0 : index
    %c0_238 = arith.constant 0 : index
    %224 = vector.load %arg8[%c0_237, %c0_238] : memref<128x16xf32, #tpu.memory_space<vmem>>, vector<128x16xf32>
    tpu.vector_store %arg8[%c0_237, %c0_238], %223 {strides = array<i32>} : memref<128x16xf32, #tpu.memory_space<vmem>>, vector<128x16xf32>,
    %c0_239 = arith.constant 0 : index
    %c0_240 = arith.constant 0 : index
    %225 = vector.load %arg8[%c0_239, %c0_240] : memref<128x16xf32, #tpu.memory_space<vmem>>, vector<128x16xf32>
    %c1_241 = arith.constant 1 : index
    %c0_242 = arith.constant 0 : index
    %c0_243 = arith.constant 0 : index
    %226 = vector.load %arg4[%c1_241, %c0_242, %c0_243] : memref<3x1x16xf32, #tpu.memory_space<vmem>>, vector<1x1x16xf32>
    %227 = vector.shape_cast %226 : vector<1x1x16xf32> to vector<1x16xf32>
    %228 = vector.broadcast %227 : vector<1x16xf32> to vector<128x16xf32>
    %229 = arith.addf %225, %228 : vector<128x16xf32>
    %cst_244 = arith.constant 0.000000e+00 : f32
    %230 = vector.broadcast %cst_244 : f32 to vector<128x16xf32>
    %231 = arith.maximumf %229, %230 : vector<128x16xf32>
    %232 = arith.truncf %231 : vector<128x16xf32> to vector<128x16xbf16>
    %c0_245 = arith.constant 0 : index
    %c0_246 = arith.constant 0 : index
    %c0_247 = arith.constant 0 : index
    %233 = vector.load %arg6[%c0_245, %c0_246, %c0_247] : memref<1x128x16xbf16, #tpu.memory_space<vmem>>, vector<1x128x16xbf16>
    %234 = vector.shape_cast %233 : vector<1x128x16xbf16> to vector<128x16xbf16>
    %235 = vector.shape_cast %232 : vector<128x16xbf16> to vector<1x128x16xbf16>
    tpu.vector_store %arg6[%c0_245, %c0_246, %c0_247], %235 {strides = array<i32>} : memref<1x128x16xbf16, #tpu.memory_space<vmem>>, vector<1x128x16xbf16>,
    %c0_i32_248 = arith.constant 0 : i32
    %236 = arith.addi %1, %c0_i32_248 : i32
    %c0_i32_249 = arith.constant 0 : i32
    %237 = arith.addi %236, %c0_i32_249 : i32
    %c0_250 = arith.constant 0 : index
    %238 = arith.index_cast %237 : i32 to index
    %c0_251 = arith.constant 0 : index
    %c0_252 = arith.constant 0 : index
    %239 = vector.load %arg2[%c0_250, %238, %c0_251, %c0_252] : memref<1x52x56x8xbf16, #tpu.memory_space<vmem>>, vector<1x8x16x8xbf16>
    %240 = vector.shape_cast %239 : vector<1x8x16x8xbf16> to vector<8x16x8xbf16>
    %241 = vector.shape_cast %240 : vector<8x16x8xbf16> to vector<128x8xbf16>
    %c2_253 = arith.constant 2 : index
    %c0_254 = arith.constant 0 : index
    %c0_255 = arith.constant 0 : index
    %c0_256 = arith.constant 0 : index
    %242 = vector.load %arg3[%c2_253, %c0_254, %c0_255, %c0_256] : memref<3x9x8x16xbf16, #tpu.memory_space<vmem>>, vector<1x1x8x16xbf16>
    %243 = vector.shape_cast %242 : vector<1x1x8x16xbf16> to vector<8x16xbf16>
    %cst_257 = arith.constant dense<0.000000e+00> : vector<128x16xf32>
    %244 = tpu.matmul %241, %243, %cst_257 {dimension_numbers = #tpu.dot_dimension_numbers<[1], [0], [0], [1], [0, 0, 1, 1], [], []>} : vector<128x8xbf16>, vector<8x16xbf16>, vector<128x16xf32> -> vector<128x16xf32>
    %c0_258 = arith.constant 0 : index
    %c0_259 = arith.constant 0 : index
    %245 = vector.load %arg8[%c0_258, %c0_259] : memref<128x16xf32, #tpu.memory_space<vmem>>, vector<128x16xf32>
    tpu.vector_store %arg8[%c0_258, %c0_259], %244 {strides = array<i32>} : memref<128x16xf32, #tpu.memory_space<vmem>>, vector<128x16xf32>,
    %c0_i32_260 = arith.constant 0 : i32
    %246 = arith.addi %1, %c0_i32_260 : i32
    %c0_i32_261 = arith.constant 0 : i32
    %247 = arith.addi %246, %c0_i32_261 : i32
    %c0_262 = arith.constant 0 : index
    %248 = arith.index_cast %247 : i32 to index
    %c18_263 = arith.constant 18 : index
    %c0_264 = arith.constant 0 : index
    %249 = vector.load %arg2[%c0_262, %248, %c18_263, %c0_264] : memref<1x52x56x8xbf16, #tpu.memory_space<vmem>>, vector<1x8x16x8xbf16>
    %250 = vector.shape_cast %249 : vector<1x8x16x8xbf16> to vector<8x16x8xbf16>
    %251 = vector.shape_cast %250 : vector<8x16x8xbf16> to vector<128x8xbf16>
    %c2_265 = arith.constant 2 : index
    %c1_266 = arith.constant 1 : index
    %c0_267 = arith.constant 0 : index
    %c0_268 = arith.constant 0 : index
    %252 = vector.load %arg3[%c2_265, %c1_266, %c0_267, %c0_268] : memref<3x9x8x16xbf16, #tpu.memory_space<vmem>>, vector<1x1x8x16xbf16>
    %253 = vector.shape_cast %252 : vector<1x1x8x16xbf16> to vector<8x16xbf16>
    %cst_269 = arith.constant dense<0.000000e+00> : vector<128x16xf32>
    %254 = tpu.matmul %251, %253, %cst_269 {dimension_numbers = #tpu.dot_dimension_numbers<[1], [0], [0], [1], [0, 0, 1, 1], [], []>} : vector<128x8xbf16>, vector<8x16xbf16>, vector<128x16xf32> -> vector<128x16xf32>
    %c0_270 = arith.constant 0 : index
    %c0_271 = arith.constant 0 : index
    %255 = vector.load %arg8[%c0_270, %c0_271] : memref<128x16xf32, #tpu.memory_space<vmem>>, vector<128x16xf32>
    %256 = arith.addf %255, %254 : vector<128x16xf32>
    %c0_272 = arith.constant 0 : index
    %c0_273 = arith.constant 0 : index
    %257 = vector.load %arg8[%c0_272, %c0_273] : memref<128x16xf32, #tpu.memory_space<vmem>>, vector<128x16xf32>
    tpu.vector_store %arg8[%c0_272, %c0_273], %256 {strides = array<i32>} : memref<128x16xf32, #tpu.memory_space<vmem>>, vector<128x16xf32>,
    %c0_i32_274 = arith.constant 0 : i32
    %258 = arith.addi %1, %c0_i32_274 : i32
    %c0_i32_275 = arith.constant 0 : i32
    %259 = arith.addi %258, %c0_i32_275 : i32
    %c0_276 = arith.constant 0 : index
    %260 = arith.index_cast %259 : i32 to index
    %c36 = arith.constant 36 : index
    %c0_277 = arith.constant 0 : index
    %261 = vector.load %arg2[%c0_276, %260, %c36, %c0_277] : memref<1x52x56x8xbf16, #tpu.memory_space<vmem>>, vector<1x8x16x8xbf16>
    %262 = vector.shape_cast %261 : vector<1x8x16x8xbf16> to vector<8x16x8xbf16>
    %263 = vector.shape_cast %262 : vector<8x16x8xbf16> to vector<128x8xbf16>
    %c2_278 = arith.constant 2 : index
    %c2_279 = arith.constant 2 : index
    %c0_280 = arith.constant 0 : index
    %c0_281 = arith.constant 0 : index
    %264 = vector.load %arg3[%c2_278, %c2_279, %c0_280, %c0_281] : memref<3x9x8x16xbf16, #tpu.memory_space<vmem>>, vector<1x1x8x16xbf16>
    %265 = vector.shape_cast %264 : vector<1x1x8x16xbf16> to vector<8x16xbf16>
    %cst_282 = arith.constant dense<0.000000e+00> : vector<128x16xf32>
    %266 = tpu.matmul %263, %265, %cst_282 {dimension_numbers = #tpu.dot_dimension_numbers<[1], [0], [0], [1], [0, 0, 1, 1], [], []>} : vector<128x8xbf16>, vector<8x16xbf16>, vector<128x16xf32> -> vector<128x16xf32>
    %c0_283 = arith.constant 0 : index
    %c0_284 = arith.constant 0 : index
    %267 = vector.load %arg8[%c0_283, %c0_284] : memref<128x16xf32, #tpu.memory_space<vmem>>, vector<128x16xf32>
    %268 = arith.addf %267, %266 : vector<128x16xf32>
    %c0_285 = arith.constant 0 : index
    %c0_286 = arith.constant 0 : index
    %269 = vector.load %arg8[%c0_285, %c0_286] : memref<128x16xf32, #tpu.memory_space<vmem>>, vector<128x16xf32>
    tpu.vector_store %arg8[%c0_285, %c0_286], %268 {strides = array<i32>} : memref<128x16xf32, #tpu.memory_space<vmem>>, vector<128x16xf32>,
    %c0_i32_287 = arith.constant 0 : i32
    %270 = arith.addi %1, %c0_i32_287 : i32
    %c18_i32 = arith.constant 18 : i32
    %271 = arith.addi %270, %c18_i32 : i32
    %c0_288 = arith.constant 0 : index
    %272 = arith.index_cast %271 : i32 to index
    %c0_289 = arith.constant 0 : index
    %c0_290 = arith.constant 0 : index
    %273 = vector.load %arg2[%c0_288, %272, %c0_289, %c0_290] : memref<1x52x56x8xbf16, #tpu.memory_space<vmem>>, vector<1x8x16x8xbf16>
    %274 = vector.shape_cast %273 : vector<1x8x16x8xbf16> to vector<8x16x8xbf16>
    %275 = vector.shape_cast %274 : vector<8x16x8xbf16> to vector<128x8xbf16>
    %c2_291 = arith.constant 2 : index
    %c3_292 = arith.constant 3 : index
    %c0_293 = arith.constant 0 : index
    %c0_294 = arith.constant 0 : index
    %276 = vector.load %arg3[%c2_291, %c3_292, %c0_293, %c0_294] : memref<3x9x8x16xbf16, #tpu.memory_space<vmem>>, vector<1x1x8x16xbf16>
    %277 = vector.shape_cast %276 : vector<1x1x8x16xbf16> to vector<8x16xbf16>
    %cst_295 = arith.constant dense<0.000000e+00> : vector<128x16xf32>
    %278 = tpu.matmul %275, %277, %cst_295 {dimension_numbers = #tpu.dot_dimension_numbers<[1], [0], [0], [1], [0, 0, 1, 1], [], []>} : vector<128x8xbf16>, vector<8x16xbf16>, vector<128x16xf32> -> vector<128x16xf32>
    %c0_296 = arith.constant 0 : index
    %c0_297 = arith.constant 0 : index
    %279 = vector.load %arg8[%c0_296, %c0_297] : memref<128x16xf32, #tpu.memory_space<vmem>>, vector<128x16xf32>
    %280 = arith.addf %279, %278 : vector<128x16xf32>
    %c0_298 = arith.constant 0 : index
    %c0_299 = arith.constant 0 : index
    %281 = vector.load %arg8[%c0_298, %c0_299] : memref<128x16xf32, #tpu.memory_space<vmem>>, vector<128x16xf32>
    tpu.vector_store %arg8[%c0_298, %c0_299], %280 {strides = array<i32>} : memref<128x16xf32, #tpu.memory_space<vmem>>, vector<128x16xf32>,
    %c0_i32_300 = arith.constant 0 : i32
    %282 = arith.addi %1, %c0_i32_300 : i32
    %c18_i32_301 = arith.constant 18 : i32
    %283 = arith.addi %282, %c18_i32_301 : i32
    %c0_302 = arith.constant 0 : index
    %284 = arith.index_cast %283 : i32 to index
    %c18_303 = arith.constant 18 : index
    %c0_304 = arith.constant 0 : index
    %285 = vector.load %arg2[%c0_302, %284, %c18_303, %c0_304] : memref<1x52x56x8xbf16, #tpu.memory_space<vmem>>, vector<1x8x16x8xbf16>
    %286 = vector.shape_cast %285 : vector<1x8x16x8xbf16> to vector<8x16x8xbf16>
    %287 = vector.shape_cast %286 : vector<8x16x8xbf16> to vector<128x8xbf16>
    %c2_305 = arith.constant 2 : index
    %c4_306 = arith.constant 4 : index
    %c0_307 = arith.constant 0 : index
    %c0_308 = arith.constant 0 : index
    %288 = vector.load %arg3[%c2_305, %c4_306, %c0_307, %c0_308] : memref<3x9x8x16xbf16, #tpu.memory_space<vmem>>, vector<1x1x8x16xbf16>
    %289 = vector.shape_cast %288 : vector<1x1x8x16xbf16> to vector<8x16xbf16>
    %cst_309 = arith.constant dense<0.000000e+00> : vector<128x16xf32>
    %290 = tpu.matmul %287, %289, %cst_309 {dimension_numbers = #tpu.dot_dimension_numbers<[1], [0], [0], [1], [0, 0, 1, 1], [], []>} : vector<128x8xbf16>, vector<8x16xbf16>, vector<128x16xf32> -> vector<128x16xf32>
    %c0_310 = arith.constant 0 : index
    %c0_311 = arith.constant 0 : index
    %291 = vector.load %arg8[%c0_310, %c0_311] : memref<128x16xf32, #tpu.memory_space<vmem>>, vector<128x16xf32>
    %292 = arith.addf %291, %290 : vector<128x16xf32>
    %c0_312 = arith.constant 0 : index
    %c0_313 = arith.constant 0 : index
    %293 = vector.load %arg8[%c0_312, %c0_313] : memref<128x16xf32, #tpu.memory_space<vmem>>, vector<128x16xf32>
    tpu.vector_store %arg8[%c0_312, %c0_313], %292 {strides = array<i32>} : memref<128x16xf32, #tpu.memory_space<vmem>>, vector<128x16xf32>,
    %c0_i32_314 = arith.constant 0 : i32
    %294 = arith.addi %1, %c0_i32_314 : i32
    %c18_i32_315 = arith.constant 18 : i32
    %295 = arith.addi %294, %c18_i32_315 : i32
    %c0_316 = arith.constant 0 : index
    %296 = arith.index_cast %295 : i32 to index
    %c36_317 = arith.constant 36 : index
    %c0_318 = arith.constant 0 : index
    %297 = vector.load %arg2[%c0_316, %296, %c36_317, %c0_318] : memref<1x52x56x8xbf16, #tpu.memory_space<vmem>>, vector<1x8x16x8xbf16>
    %298 = vector.shape_cast %297 : vector<1x8x16x8xbf16> to vector<8x16x8xbf16>
    %299 = vector.shape_cast %298 : vector<8x16x8xbf16> to vector<128x8xbf16>
    %c2_319 = arith.constant 2 : index
    %c5_320 = arith.constant 5 : index
    %c0_321 = arith.constant 0 : index
    %c0_322 = arith.constant 0 : index
    %300 = vector.load %arg3[%c2_319, %c5_320, %c0_321, %c0_322] : memref<3x9x8x16xbf16, #tpu.memory_space<vmem>>, vector<1x1x8x16xbf16>
    %301 = vector.shape_cast %300 : vector<1x1x8x16xbf16> to vector<8x16xbf16>
    %cst_323 = arith.constant dense<0.000000e+00> : vector<128x16xf32>
    %302 = tpu.matmul %299, %301, %cst_323 {dimension_numbers = #tpu.dot_dimension_numbers<[1], [0], [0], [1], [0, 0, 1, 1], [], []>} : vector<128x8xbf16>, vector<8x16xbf16>, vector<128x16xf32> -> vector<128x16xf32>
    %c0_324 = arith.constant 0 : index
    %c0_325 = arith.constant 0 : index
    %303 = vector.load %arg8[%c0_324, %c0_325] : memref<128x16xf32, #tpu.memory_space<vmem>>, vector<128x16xf32>
    %304 = arith.addf %303, %302 : vector<128x16xf32>
    %c0_326 = arith.constant 0 : index
    %c0_327 = arith.constant 0 : index
    %305 = vector.load %arg8[%c0_326, %c0_327] : memref<128x16xf32, #tpu.memory_space<vmem>>, vector<128x16xf32>
    tpu.vector_store %arg8[%c0_326, %c0_327], %304 {strides = array<i32>} : memref<128x16xf32, #tpu.memory_space<vmem>>, vector<128x16xf32>,
    %c0_i32_328 = arith.constant 0 : i32
    %306 = arith.addi %1, %c0_i32_328 : i32
    %c36_i32 = arith.constant 36 : i32
    %307 = arith.addi %306, %c36_i32 : i32
    %c0_329 = arith.constant 0 : index
    %308 = arith.index_cast %307 : i32 to index
    %c0_330 = arith.constant 0 : index
    %c0_331 = arith.constant 0 : index
    %309 = vector.load %arg2[%c0_329, %308, %c0_330, %c0_331] : memref<1x52x56x8xbf16, #tpu.memory_space<vmem>>, vector<1x8x16x8xbf16>
    %310 = vector.shape_cast %309 : vector<1x8x16x8xbf16> to vector<8x16x8xbf16>
    %311 = vector.shape_cast %310 : vector<8x16x8xbf16> to vector<128x8xbf16>
    %c2_332 = arith.constant 2 : index
    %c6_333 = arith.constant 6 : index
    %c0_334 = arith.constant 0 : index
    %c0_335 = arith.constant 0 : index
    %312 = vector.load %arg3[%c2_332, %c6_333, %c0_334, %c0_335] : memref<3x9x8x16xbf16, #tpu.memory_space<vmem>>, vector<1x1x8x16xbf16>
    %313 = vector.shape_cast %312 : vector<1x1x8x16xbf16> to vector<8x16xbf16>
    %cst_336 = arith.constant dense<0.000000e+00> : vector<128x16xf32>
    %314 = tpu.matmul %311, %313, %cst_336 {dimension_numbers = #tpu.dot_dimension_numbers<[1], [0], [0], [1], [0, 0, 1, 1], [], []>} : vector<128x8xbf16>, vector<8x16xbf16>, vector<128x16xf32> -> vector<128x16xf32>
    %c0_337 = arith.constant 0 : index
    %c0_338 = arith.constant 0 : index
    %315 = vector.load %arg8[%c0_337, %c0_338] : memref<128x16xf32, #tpu.memory_space<vmem>>, vector<128x16xf32>
    %316 = arith.addf %315, %314 : vector<128x16xf32>
    %c0_339 = arith.constant 0 : index
    %c0_340 = arith.constant 0 : index
    %317 = vector.load %arg8[%c0_339, %c0_340] : memref<128x16xf32, #tpu.memory_space<vmem>>, vector<128x16xf32>
    tpu.vector_store %arg8[%c0_339, %c0_340], %316 {strides = array<i32>} : memref<128x16xf32, #tpu.memory_space<vmem>>, vector<128x16xf32>,
    %c0_i32_341 = arith.constant 0 : i32
    %318 = arith.addi %1, %c0_i32_341 : i32
    %c36_i32_342 = arith.constant 36 : i32
    %319 = arith.addi %318, %c36_i32_342 : i32
    %c0_343 = arith.constant 0 : index
    %320 = arith.index_cast %319 : i32 to index
    %c18_344 = arith.constant 18 : index
    %c0_345 = arith.constant 0 : index
    %321 = vector.load %arg2[%c0_343, %320, %c18_344, %c0_345] : memref<1x52x56x8xbf16, #tpu.memory_space<vmem>>, vector<1x8x16x8xbf16>
    %322 = vector.shape_cast %321 : vector<1x8x16x8xbf16> to vector<8x16x8xbf16>
    %323 = vector.shape_cast %322 : vector<8x16x8xbf16> to vector<128x8xbf16>
    %c2_346 = arith.constant 2 : index
    %c7_347 = arith.constant 7 : index
    %c0_348 = arith.constant 0 : index
    %c0_349 = arith.constant 0 : index
    %324 = vector.load %arg3[%c2_346, %c7_347, %c0_348, %c0_349] : memref<3x9x8x16xbf16, #tpu.memory_space<vmem>>, vector<1x1x8x16xbf16>
    %325 = vector.shape_cast %324 : vector<1x1x8x16xbf16> to vector<8x16xbf16>
    %cst_350 = arith.constant dense<0.000000e+00> : vector<128x16xf32>
    %326 = tpu.matmul %323, %325, %cst_350 {dimension_numbers = #tpu.dot_dimension_numbers<[1], [0], [0], [1], [0, 0, 1, 1], [], []>} : vector<128x8xbf16>, vector<8x16xbf16>, vector<128x16xf32> -> vector<128x16xf32>
    %c0_351 = arith.constant 0 : index
    %c0_352 = arith.constant 0 : index
    %327 = vector.load %arg8[%c0_351, %c0_352] : memref<128x16xf32, #tpu.memory_space<vmem>>, vector<128x16xf32>
    %328 = arith.addf %327, %326 : vector<128x16xf32>
    %c0_353 = arith.constant 0 : index
    %c0_354 = arith.constant 0 : index
    %329 = vector.load %arg8[%c0_353, %c0_354] : memref<128x16xf32, #tpu.memory_space<vmem>>, vector<128x16xf32>
    tpu.vector_store %arg8[%c0_353, %c0_354], %328 {strides = array<i32>} : memref<128x16xf32, #tpu.memory_space<vmem>>, vector<128x16xf32>,
    %c0_i32_355 = arith.constant 0 : i32
    %330 = arith.addi %1, %c0_i32_355 : i32
    %c36_i32_356 = arith.constant 36 : i32
    %331 = arith.addi %330, %c36_i32_356 : i32
    %c0_357 = arith.constant 0 : index
    %332 = arith.index_cast %331 : i32 to index
    %c36_358 = arith.constant 36 : index
    %c0_359 = arith.constant 0 : index
    %333 = vector.load %arg2[%c0_357, %332, %c36_358, %c0_359] : memref<1x52x56x8xbf16, #tpu.memory_space<vmem>>, vector<1x8x16x8xbf16>
    %334 = vector.shape_cast %333 : vector<1x8x16x8xbf16> to vector<8x16x8xbf16>
    %335 = vector.shape_cast %334 : vector<8x16x8xbf16> to vector<128x8xbf16>
    %c2_360 = arith.constant 2 : index
    %c8_361 = arith.constant 8 : index
    %c0_362 = arith.constant 0 : index
    %c0_363 = arith.constant 0 : index
    %336 = vector.load %arg3[%c2_360, %c8_361, %c0_362, %c0_363] : memref<3x9x8x16xbf16, #tpu.memory_space<vmem>>, vector<1x1x8x16xbf16>
    %337 = vector.shape_cast %336 : vector<1x1x8x16xbf16> to vector<8x16xbf16>
    %cst_364 = arith.constant dense<0.000000e+00> : vector<128x16xf32>
    %338 = tpu.matmul %335, %337, %cst_364 {dimension_numbers = #tpu.dot_dimension_numbers<[1], [0], [0], [1], [0, 0, 1, 1], [], []>} : vector<128x8xbf16>, vector<8x16xbf16>, vector<128x16xf32> -> vector<128x16xf32>
    %c0_365 = arith.constant 0 : index
    %c0_366 = arith.constant 0 : index
    %339 = vector.load %arg8[%c0_365, %c0_366] : memref<128x16xf32, #tpu.memory_space<vmem>>, vector<128x16xf32>
    %340 = arith.addf %339, %338 : vector<128x16xf32>
    %c0_367 = arith.constant 0 : index
    %c0_368 = arith.constant 0 : index
    %341 = vector.load %arg8[%c0_367, %c0_368] : memref<128x16xf32, #tpu.memory_space<vmem>>, vector<128x16xf32>
    tpu.vector_store %arg8[%c0_367, %c0_368], %340 {strides = array<i32>} : memref<128x16xf32, #tpu.memory_space<vmem>>, vector<128x16xf32>,
    %c0_369 = arith.constant 0 : index
    %c0_370 = arith.constant 0 : index
    %342 = vector.load %arg8[%c0_369, %c0_370] : memref<128x16xf32, #tpu.memory_space<vmem>>, vector<128x16xf32>
    %c2_371 = arith.constant 2 : index
    %c0_372 = arith.constant 0 : index
    %c0_373 = arith.constant 0 : index
    %343 = vector.load %arg4[%c2_371, %c0_372, %c0_373] : memref<3x1x16xf32, #tpu.memory_space<vmem>>, vector<1x1x16xf32>
    %344 = vector.shape_cast %343 : vector<1x1x16xf32> to vector<1x16xf32>
    %345 = vector.broadcast %344 : vector<1x16xf32> to vector<128x16xf32>
    %346 = arith.addf %342, %345 : vector<128x16xf32>
    %cst_374 = arith.constant 0.000000e+00 : f32
    %347 = vector.broadcast %cst_374 : f32 to vector<128x16xf32>
    %348 = arith.maximumf %346, %347 : vector<128x16xf32>
    %349 = arith.truncf %348 : vector<128x16xf32> to vector<128x16xbf16>
    %c0_375 = arith.constant 0 : index
    %c0_376 = arith.constant 0 : index
    %c0_377 = arith.constant 0 : index
    %350 = vector.load %arg7[%c0_375, %c0_376, %c0_377] : memref<1x128x16xbf16, #tpu.memory_space<vmem>>, vector<1x128x16xbf16>
    %351 = vector.shape_cast %350 : vector<1x128x16xbf16> to vector<128x16xbf16>
    %352 = vector.shape_cast %349 : vector<128x16xbf16> to vector<1x128x16xbf16>
    tpu.vector_store %arg7[%c0_375, %c0_376, %c0_377], %352 {strides = array<i32>} : memref<1x128x16xbf16, #tpu.memory_space<vmem>>, vector<1x128x16xbf16>,
    return
  }
  func.func @transform_0(%arg0: i32, %arg1: i32) -> (i32, i32, i32, i32) {
    %c0_i32 = arith.constant 0 : i32
    %c0_i32_0 = arith.constant 0 : i32
    %c0_i32_1 = arith.constant 0 : i32
    %c0_i32_2 = arith.constant 0 : i32
    return %arg0, %c0_i32, %c0_i32_0, %c0_i32_1 : i32, i32, i32, i32
  }
  func.func @transform_1(%arg0: i32, %arg1: i32) -> (i32, i32, i32, i32) {
    %c0_i32 = arith.constant 0 : i32
    %c0_i32_0 = arith.constant 0 : i32
    %c0_i32_1 = arith.constant 0 : i32
    %c0_i32_2 = arith.constant 0 : i32
    %c0_i32_3 = arith.constant 0 : i32
    return %c0_i32, %c0_i32_0, %c0_i32_1, %c0_i32_2 : i32, i32, i32, i32
  }
  func.func @transform_2(%arg0: i32, %arg1: i32) -> (i32, i32, i32) {
    %c0_i32 = arith.constant 0 : i32
    %c0_i32_0 = arith.constant 0 : i32
    %c0_i32_1 = arith.constant 0 : i32
    %c0_i32_2 = arith.constant 0 : i32
    return %c0_i32, %c0_i32_0, %c0_i32_1 : i32, i32, i32
  }
  func.func @transform_3(%arg0: i32, %arg1: i32) -> (i32, i32, i32) {
    %c0_i32 = arith.constant 0 : i32
    %c0_i32_0 = arith.constant 0 : i32
    return %arg0, %arg1, %c0_i32 : i32, i32, i32
  }
  func.func @transform_4(%arg0: i32, %arg1: i32) -> (i32, i32, i32) {
    %c0_i32 = arith.constant 0 : i32
    %c0_i32_0 = arith.constant 0 : i32
    return %arg0, %arg1, %c0_i32 : i32, i32, i32
  }
  func.func @transform_5(%arg0: i32, %arg1: i32) -> (i32, i32, i32) {
    %c0_i32 = arith.constant 0 : i32
    %c0_i32_0 = arith.constant 0 : i32
    return %arg0, %arg1, %c0_i32 : i32, i32, i32
  }
}

module attributes {stable_mosaic.version = 11 : i64} {
  func.func @_fused_final_kernel(%arg0: i32, %arg1: i32, %arg2: memref<1x256x16xbf16, #tpu.memory_space<vmem>>, %arg3: memref<1x256x16xbf16, #tpu.memory_space<vmem>>, %arg4: memref<1x256x16xbf16, #tpu.memory_space<vmem>>, %arg5: memref<1x256x16xbf16, #tpu.memory_space<vmem>>, %arg6: memref<4x16x32xbf16, #tpu.memory_space<vmem>>, %arg7: memref<1x1x32xf32, #tpu.memory_space<vmem>>, %arg8: memref<1x256x32xbf16, #tpu.memory_space<vmem>>) attributes {dimension_semantics = [#tpu.dimension_semantics<parallel>, #tpu.dimension_semantics<parallel>], iteration_bounds = array<i64: 2, 1>, scalar_prefetch = 0 : i64, scratch_operands = 0 : i64, tpu.core_type = #tpu.core_type<tc>, window_params = [{transform_indices = @transform_0, window_bounds = array<i64: 1, 256, 16>}, {transform_indices = @transform_1, window_bounds = array<i64: 1, 256, 16>}, {transform_indices = @transform_2, window_bounds = array<i64: 1, 256, 16>}, {transform_indices = @transform_3, window_bounds = array<i64: 1, 256, 16>}, {pipeline_mode = #tpu.pipeline_mode<synchronous>, transform_indices = @transform_4, window_bounds = array<i64: 4, 16, 32>}, {transform_indices = @transform_5, window_bounds = array<i64: 1, 1, 32>}, {transform_indices = @transform_6, window_bounds = array<i64: 1, 256, 32>}]} {
    %c0 = arith.constant 0 : index
    %c0_0 = arith.constant 0 : index
    %c0_1 = arith.constant 0 : index
    %0 = vector.load %arg2[%c0, %c0_0, %c0_1] : memref<1x256x16xbf16, #tpu.memory_space<vmem>>, vector<1x256x16xbf16>
    %1 = vector.shape_cast %0 : vector<1x256x16xbf16> to vector<256x16xbf16>
    %c0_2 = arith.constant 0 : index
    %c0_3 = arith.constant 0 : index
    %c0_4 = arith.constant 0 : index
    %2 = vector.load %arg6[%c0_2, %c0_3, %c0_4] : memref<4x16x32xbf16, #tpu.memory_space<vmem>>, vector<1x16x32xbf16>
    %3 = vector.shape_cast %2 : vector<1x16x32xbf16> to vector<16x32xbf16>
    %cst = arith.constant dense<0.000000e+00> : vector<256x32xf32>
    %4 = tpu.matmul %1, %3, %cst {dimension_numbers = #tpu.dot_dimension_numbers<[1], [0], [0], [1], [0, 0, 1, 1], [], []>} : vector<256x16xbf16>, vector<16x32xbf16>, vector<256x32xf32> -> vector<256x32xf32>
    %c0_5 = arith.constant 0 : index
    %c0_6 = arith.constant 0 : index
    %c0_7 = arith.constant 0 : index
    %5 = vector.load %arg3[%c0_5, %c0_6, %c0_7] : memref<1x256x16xbf16, #tpu.memory_space<vmem>>, vector<1x256x16xbf16>
    %6 = vector.shape_cast %5 : vector<1x256x16xbf16> to vector<256x16xbf16>
    %c1 = arith.constant 1 : index
    %c0_8 = arith.constant 0 : index
    %c0_9 = arith.constant 0 : index
    %7 = vector.load %arg6[%c1, %c0_8, %c0_9] : memref<4x16x32xbf16, #tpu.memory_space<vmem>>, vector<1x16x32xbf16>
    %8 = vector.shape_cast %7 : vector<1x16x32xbf16> to vector<16x32xbf16>
    %cst_10 = arith.constant dense<0.000000e+00> : vector<256x32xf32>
    %9 = tpu.matmul %6, %8, %cst_10 {dimension_numbers = #tpu.dot_dimension_numbers<[1], [0], [0], [1], [0, 0, 1, 1], [], []>} : vector<256x16xbf16>, vector<16x32xbf16>, vector<256x32xf32> -> vector<256x32xf32>
    %10 = arith.addf %4, %9 : vector<256x32xf32>
    %c0_11 = arith.constant 0 : index
    %c0_12 = arith.constant 0 : index
    %c0_13 = arith.constant 0 : index
    %11 = vector.load %arg4[%c0_11, %c0_12, %c0_13] : memref<1x256x16xbf16, #tpu.memory_space<vmem>>, vector<1x256x16xbf16>
    %12 = vector.shape_cast %11 : vector<1x256x16xbf16> to vector<256x16xbf16>
    %c2 = arith.constant 2 : index
    %c0_14 = arith.constant 0 : index
    %c0_15 = arith.constant 0 : index
    %13 = vector.load %arg6[%c2, %c0_14, %c0_15] : memref<4x16x32xbf16, #tpu.memory_space<vmem>>, vector<1x16x32xbf16>
    %14 = vector.shape_cast %13 : vector<1x16x32xbf16> to vector<16x32xbf16>
    %cst_16 = arith.constant dense<0.000000e+00> : vector<256x32xf32>
    %15 = tpu.matmul %12, %14, %cst_16 {dimension_numbers = #tpu.dot_dimension_numbers<[1], [0], [0], [1], [0, 0, 1, 1], [], []>} : vector<256x16xbf16>, vector<16x32xbf16>, vector<256x32xf32> -> vector<256x32xf32>
    %16 = arith.addf %10, %15 : vector<256x32xf32>
    %c0_17 = arith.constant 0 : index
    %c0_18 = arith.constant 0 : index
    %c0_19 = arith.constant 0 : index
    %17 = vector.load %arg5[%c0_17, %c0_18, %c0_19] : memref<1x256x16xbf16, #tpu.memory_space<vmem>>, vector<1x256x16xbf16>
    %18 = vector.shape_cast %17 : vector<1x256x16xbf16> to vector<256x16xbf16>
    %c3 = arith.constant 3 : index
    %c0_20 = arith.constant 0 : index
    %c0_21 = arith.constant 0 : index
    %19 = vector.load %arg6[%c3, %c0_20, %c0_21] : memref<4x16x32xbf16, #tpu.memory_space<vmem>>, vector<1x16x32xbf16>
    %20 = vector.shape_cast %19 : vector<1x16x32xbf16> to vector<16x32xbf16>
    %cst_22 = arith.constant dense<0.000000e+00> : vector<256x32xf32>
    %21 = tpu.matmul %18, %20, %cst_22 {dimension_numbers = #tpu.dot_dimension_numbers<[1], [0], [0], [1], [0, 0, 1, 1], [], []>} : vector<256x16xbf16>, vector<16x32xbf16>, vector<256x32xf32> -> vector<256x32xf32>
    %22 = arith.addf %16, %21 : vector<256x32xf32>
    %c0_23 = arith.constant 0 : index
    %c0_24 = arith.constant 0 : index
    %c0_25 = arith.constant 0 : index
    %23 = vector.load %arg7[%c0_23, %c0_24, %c0_25] : memref<1x1x32xf32, #tpu.memory_space<vmem>>, vector<1x1x32xf32>
    %24 = vector.shape_cast %23 : vector<1x1x32xf32> to vector<1x32xf32>
    %25 = vector.broadcast %24 : vector<1x32xf32> to vector<256x32xf32>
    %26 = arith.addf %22, %25 : vector<256x32xf32>
    %cst_26 = arith.constant 0.000000e+00 : f32
    %27 = vector.broadcast %cst_26 : f32 to vector<256x32xf32>
    %28 = arith.maximumf %26, %27 : vector<256x32xf32>
    %29 = arith.truncf %28 : vector<256x32xf32> to vector<256x32xbf16>
    %c0_27 = arith.constant 0 : index
    %c0_28 = arith.constant 0 : index
    %c0_29 = arith.constant 0 : index
    %30 = vector.load %arg8[%c0_27, %c0_28, %c0_29] : memref<1x256x32xbf16, #tpu.memory_space<vmem>>, vector<1x256x32xbf16>
    %31 = vector.shape_cast %30 : vector<1x256x32xbf16> to vector<256x32xbf16>
    %32 = vector.shape_cast %29 : vector<256x32xbf16> to vector<1x256x32xbf16>
    tpu.vector_store %arg8[%c0_27, %c0_28, %c0_29], %32 {strides = array<i32>} : memref<1x256x32xbf16, #tpu.memory_space<vmem>>, vector<1x256x32xbf16>,
    return
  }
  func.func @transform_0(%arg0: i32, %arg1: i32) -> (i32, i32, i32) {
    %c0_i32 = arith.constant 0 : i32
    %c0_i32_0 = arith.constant 0 : i32
    return %arg0, %arg1, %c0_i32 : i32, i32, i32
  }
  func.func @transform_1(%arg0: i32, %arg1: i32) -> (i32, i32, i32) {
    %c0_i32 = arith.constant 0 : i32
    %c0_i32_0 = arith.constant 0 : i32
    return %arg0, %arg1, %c0_i32 : i32, i32, i32
  }
  func.func @transform_2(%arg0: i32, %arg1: i32) -> (i32, i32, i32) {
    %c0_i32 = arith.constant 0 : i32
    %c0_i32_0 = arith.constant 0 : i32
    return %arg0, %arg1, %c0_i32 : i32, i32, i32
  }
  func.func @transform_3(%arg0: i32, %arg1: i32) -> (i32, i32, i32) {
    %c0_i32 = arith.constant 0 : i32
    %c0_i32_0 = arith.constant 0 : i32
    return %arg0, %arg1, %c0_i32 : i32, i32, i32
  }
  func.func @transform_4(%arg0: i32, %arg1: i32) -> (i32, i32, i32) {
    %c0_i32 = arith.constant 0 : i32
    %c0_i32_0 = arith.constant 0 : i32
    %c0_i32_1 = arith.constant 0 : i32
    %c0_i32_2 = arith.constant 0 : i32
    return %c0_i32, %c0_i32_0, %c0_i32_1 : i32, i32, i32
  }
  func.func @transform_5(%arg0: i32, %arg1: i32) -> (i32, i32, i32) {
    %c0_i32 = arith.constant 0 : i32
    %c0_i32_0 = arith.constant 0 : i32
    %c0_i32_1 = arith.constant 0 : i32
    return %arg0, %c0_i32, %c0_i32_0 : i32, i32, i32
  }
  func.func @transform_6(%arg0: i32, %arg1: i32) -> (i32, i32, i32) {
    %c0_i32 = arith.constant 0 : i32
    %c0_i32_0 = arith.constant 0 : i32
    return %arg0, %arg1, %c0_i32 : i32, i32, i32
  }
}

</mosaic_0001>

<bundles_post_ra>
// kernel: aspp_forward.3
= control target key start
LH: loop header
LB: loop body
LE: loop exit
PB: predicated region body
PF: predicated region fallthrough
CT: control target
= control target key end

     0   :  { %8 = vsyncpa [#allocation3], 0  ;;  %s1469_s0 = inlined_call_operand.vmem [shape: bf16[512,8], index: 0, kind: input, shape index: {}]   ;;  %s1470_s1 = inlined_call_operand.hbm [shape: bf16[8,16], index: 1, kind: input, shape index: {}]   ;;  %s1471_s2 = inlined_call_operand.hbm [shape: f32[1,16], index: 2, kind: input, shape index: {}]   ;;  %s1472_s3 = inlined_call_operand.vmem [shape: bf16[512,16], index: 3, kind: output, shape index: {}]  }
   0x1   :  { %s17_s14 = sshll.u32 %s1470_s1, 4  ;;  %s18_s14 = int_to_ptr.hbm [resolvable:$true] %s17_s14 }
   0x2   :  { %9 = vsyncpa [#allocation5], 0  ;;  %s991_s15 = smov [#allocation2]   ;;  %s28_s19 = sshll.u32 %s1471_s2, 4  ;;  %s29_s19 = int_to_ptr.hbm [resolvable:$true] %s28_s19 }
   0x3   :  { %s19_s16 = sshll.u32 %s991_s15, 4  ;;  %s992_s20 = smov [#allocation4]   ;;  %s20_s16 = int_to_ptr.vmem [resolvable:$true] %s19_s16 }
   0x4   :  { %22 = dma.hbm_to_vmem [thread:$0]  %s18_s14, 64, %s20_s16, [#allocation3]  }
   0x5   :  { %s30_s21 = sshll.u32 %s992_s20, 4  ;;  %s31_s21 = int_to_ptr.vmem [resolvable:$true] %s30_s21 }
   0x6   :  { %33 = dma.hbm_to_vmem [thread:$0]  %s29_s19, 16, %s31_s21, [#allocation5]  }
   0x7   :  { %987 = dma.done.wait [#allocation3], 64  }
   0x8   :  { %988 = vsyncadd [#allocation3], 4294967232 }
   0x9   :  { %989 = dma.done.wait [#allocation5], 16  }
   0xa   :  { %990 = vsyncadd [#allocation5], 4294967280  ;;  %vm369_vm0 = vcmask 1043456   ;;  %v107_v0 = vld [vmem:[#allocation2] sm:$0xf]  ;;  %v901_v2 = vld [vmem:[%s1469_s0] sm:$0xff] }
   0xb   :  { %v371_v1 = vsel %vm369_vm0, %v107_v0, 0  ;;  %v909_v3 = vld [vmem:[%s1469_s0 + $0x40] sm:$0xff]  ;;  %vm272_vm1 = vcmask 64512   ;;  %v902_v6 = vld [vmem:[%s1469_s0 + $0x8] sm:$0xff]  ;;  %v903_v10 = vld [vmem:[%s1469_s0 + $0x10] sm:$0xff]  ;;  %vm670_vm2 = vcmask 125952  }
   0xc   :  { %380 = vmatpush.bf16.msra.mxu0 %v371_v1  ;;  %933 = vmatpush.bf16.msra.mxu1 %v371_v1  ;;  %v917_v4 = vld [vmem:[%s1469_s0 + $0x80] sm:$0xff]  ;;  %v910_v7 = vld [vmem:[%s1469_s0 + $0x48] sm:$0xff]  ;;  %v911_v11 = vld [vmem:[%s1469_s0 + $0x50] sm:$0xff] }
   0xd   :  { %v925_v5 = vld [vmem:[%s1469_s0 + $0xc0] sm:$0xff]  ;;  %934 = vmatpush.bf16.msra.mxu2 %v371_v1  ;;  %935 = vmatpush.bf16.msra.mxu3 %v371_v1  ;;  %v918_v8 = vld [vmem:[%s1469_s0 + $0x88] sm:$0xff]  ;;  %v919_v12 = vld [vmem:[%s1469_s0 + $0x90] sm:$0xff] }
   0xe   :  { %v926_v9 = vld [vmem:[%s1469_s0 + $0xc8] sm:$0xff]  ;;  %v927_v13 = vld [vmem:[%s1469_s0 + $0xd0] sm:$0xff]  ;;  %v904_v14 = vld [vmem:[%s1469_s0 + $0x18] sm:$0xff] }
   0xf   :  { %869 = vmatmul.msk.bf16.vlgmr.msra.gmra.mxu0 %vm272_vm1, %v901_v2  ;;  %877 = vmatmul.msk.bf16.vlgmr.msra.gmra.mxu1 %vm272_vm1, %v909_v3  ;;  %v912_v15 = vld [vmem:[%s1469_s0 + $0x58] sm:$0xff]  ;;  %v905_v18 = vld [vmem:[%s1469_s0 + $0x20] sm:$0xff]  ;;  %v906_v22 = vld [vmem:[%s1469_s0 + $0x28] sm:$0xff] }
  0x10   :  { %885 = vmatmul.msk.bf16.vlgmr.msra.gmra.mxu2 %vm272_vm1, %v917_v4  ;;  %893 = vmatmul.msk.bf16.vlgmr.msra.gmra.mxu3 %vm272_vm1, %v925_v5  ;;  %v920_v16 = vld [vmem:[%s1469_s0 + $0x98] sm:$0xff]  ;;  %v913_v19 = vld [vmem:[%s1469_s0 + $0x60] sm:$0xff]  ;;  %v914_v23 = vld [vmem:[%s1469_s0 + $0x68] sm:$0xff] }
  0x11   :  { %v928_v17 = vld [vmem:[%s1469_s0 + $0xd8] sm:$0xff]  ;;  %v921_v20 = vld [vmem:[%s1469_s0 + $0xa0] sm:$0xff]  ;;  %v922_v24 = vld [vmem:[%s1469_s0 + $0xa8] sm:$0xff] }
  0x12   :  { %v929_v21 = vld [vmem:[%s1469_s0 + $0xe0] sm:$0xff]  ;;  %v930_v25 = vld [vmem:[%s1469_s0 + $0xe8] sm:$0xff]  ;;  %v907_v26 = vld [vmem:[%s1469_s0 + $0x30] sm:$0xff] }
  0x13   :  { %v915_v27 = vld [vmem:[%s1469_s0 + $0x70] sm:$0xff]  ;;  %v908_v30 = vld [vmem:[%s1469_s0 + $0x38] sm:$0xff] }
  0x14   :  { %v923_v28 = vld [vmem:[%s1469_s0 + $0xb0] sm:$0xff]  ;;  %v916_v31 = vld [vmem:[%s1469_s0 + $0x78] sm:$0xff] }
  0x15   :  { %v931_v29 = vld [vmem:[%s1469_s0 + $0xf0] sm:$0xff]  ;;  %v924_v32 = vld [vmem:[%s1469_s0 + $0xb8] sm:$0xff] }
  0x16   :  { %v932_v33 = vld [vmem:[%s1469_s0 + $0xf8] sm:$0xff]  ;;  %v1147_v34 = vld [vmem:[#allocation4] ss:$0 sm:$0xff] }
  0x1f   :  { %870 = vmatmul.msk.bf16.gmra.mxu0 %vm272_vm1, %v902_v6  ;;  %878 = vmatmul.msk.bf16.gmra.mxu1 %vm272_vm1, %v910_v7 }
  0x20   :  { %886 = vmatmul.msk.bf16.gmra.mxu2 %vm272_vm1, %v918_v8  ;;  %894 = vmatmul.msk.bf16.gmra.mxu3 %vm272_vm1, %v926_v9 }
  0x2f   :  { %871 = vmatmul.msk.bf16.gmra.mxu0 %vm272_vm1, %v903_v10  ;;  %879 = vmatmul.msk.bf16.gmra.mxu1 %vm272_vm1, %v911_v11 }
  0x30   :  { %887 = vmatmul.msk.bf16.gmra.mxu2 %vm272_vm1, %v919_v12  ;;  %895 = vmatmul.msk.bf16.gmra.mxu3 %vm272_vm1, %v927_v13 }
  0x3f   :  { %872 = vmatmul.msk.bf16.gmra.mxu0 %vm272_vm1, %v904_v14  ;;  %880 = vmatmul.msk.bf16.gmra.mxu1 %vm272_vm1, %v912_v15 }
  0x40   :  { %888 = vmatmul.msk.bf16.gmra.mxu2 %vm272_vm1, %v920_v16  ;;  %896 = vmatmul.msk.bf16.gmra.mxu3 %vm272_vm1, %v928_v17 }
  0x4f   :  { %873 = vmatmul.msk.bf16.gmra.mxu0 %vm272_vm1, %v905_v18  ;;  %881 = vmatmul.msk.bf16.gmra.mxu1 %vm272_vm1, %v913_v19 }
  0x50   :  { %889 = vmatmul.msk.bf16.gmra.mxu2 %vm272_vm1, %v921_v20  ;;  %897 = vmatmul.msk.bf16.gmra.mxu3 %vm272_vm1, %v929_v21 }
  0x5f   :  { %874 = vmatmul.msk.bf16.gmra.mxu0 %vm272_vm1, %v906_v22  ;;  %882 = vmatmul.msk.bf16.gmra.mxu1 %vm272_vm1, %v914_v23 }
  0x60   :  { %890 = vmatmul.msk.bf16.gmra.mxu2 %vm272_vm1, %v922_v24  ;;  %898 = vmatmul.msk.bf16.gmra.mxu3 %vm272_vm1, %v930_v25 }
  0x6f   :  { %875 = vmatmul.msk.bf16.gmra.mxu0 %vm272_vm1, %v907_v26  ;;  %883 = vmatmul.msk.bf16.gmra.mxu1 %vm272_vm1, %v915_v27 }
  0x70   :  { %891 = vmatmul.msk.bf16.gmra.mxu2 %vm272_vm1, %v923_v28  ;;  %899 = vmatmul.msk.bf16.gmra.mxu3 %vm272_vm1, %v931_v29 }
  0x7f   :  { %876 = vmatmul.msk.bf16.gmra.mxu0 %vm272_vm1, %v908_v30  ;;  %884 = vmatmul.msk.bf16.gmra.mxu1 %vm272_vm1, %v916_v31 }
  0x80   :  { %892 = vmatmul.msk.bf16.gmra.mxu2 %vm272_vm1, %v924_v32  ;;  %900 = vmatmul.msk.bf16.gmra.mxu3 %vm272_vm1, %v932_v33 }
  0x8c   :  { %v382_v35 = vpop.f32.mrf.mxu0  ;;  %v422_v36 = vpop.f32.mrf.mxu1 }
  0x8d   :  { %v383_v37 = vadd.f32 %v1147_v34, %v382_v35  ;;  %v423_v38 = vadd.f32 %v1147_v34, %v422_v36 }
  0x8f   :  { %v542_v39 = vmax.f32 %v383_v37, 0.0  ;;  %v558_v40 = vmax.f32 %v423_v38, 0.0 }
  0x91   :  { %v606_v41 = vpack.c.bf16 %v542_v39, %v542_v39  ;;  %v622_v42 = vpack.c.bf16 %v558_v40, %v558_v40 }
  0x93   :  { %671 = vst.msk [vmem:[%s1472_s3] sm:$0xf] %vm670_vm2, %v606_v41  ;;  %v462_v43 = vpop.f32.mrf.mxu2  ;;  %v502_v44 = vpop.f32.mrf.mxu3 }
  0x94   :  { %687 = vst.msk [vmem:[%s1472_s3 + $0x40] sm:$0xf] %vm670_vm2, %v622_v42  ;;  %v463_v45 = vadd.f32 %v1147_v34, %v462_v43  ;;  %v503_v46 = vadd.f32 %v1147_v34, %v502_v44  ;;  %v384_v47 = vpop.f32.mrf.mxu0  ;;  %v424_v48 = vpop.f32.mrf.mxu1 }
  0x95   :  { %v385_v49 = vadd.f32 %v1147_v34, %v384_v47  ;;  %v425_v50 = vadd.f32 %v1147_v34, %v424_v48 }
  0x96   :  { %v574_v51 = vmax.f32 %v463_v45, 0.0  ;;  %v590_v52 = vmax.f32 %v503_v46, 0.0 }
  0x97   :  { %v543_v53 = vmax.f32 %v385_v49, 0.0  ;;  %v559_v54 = vmax.f32 %v425_v50, 0.0 }
  0x98   :  { %v638_v55 = vpack.c.bf16 %v574_v51, %v574_v51  ;;  %v654_v56 = vpack.c.bf16 %v590_v52, %v590_v52 }
  0x99   :  { %v607_v57 = vpack.c.bf16 %v543_v53, %v543_v53  ;;  %v623_v58 = vpack.c.bf16 %v559_v54, %v559_v54 }
  0x9a   :  { %703 = vst.msk [vmem:[%s1472_s3 + $0x80] sm:$0xf] %vm670_vm2, %v638_v55 }
  0x9b   :  { %719 = vst.msk [vmem:[%s1472_s3 + $0xc0] sm:$0xf] %vm670_vm2, %v654_v56  ;;  %v464_v59 = vpop.f32.mrf.mxu2  ;;  %v504_v60 = vpop.f32.mrf.mxu3 }
  0x9c   :  { %672 = vst.msk [vmem:[%s1472_s3 + $0x4] sm:$0xf] %vm670_vm2, %v607_v57  ;;  %v465_v61 = vadd.f32 %v1147_v34, %v464_v59  ;;  %v505_v62 = vadd.f32 %v1147_v34, %v504_v60  ;;  %v387_v63 = vpop.f32.mrf.mxu0  ;;  %v427_v0 = vpop.f32.mrf.mxu1 }
  0x9d   :  { %688 = vst.msk [vmem:[%s1472_s3 + $0x44] sm:$0xf] %vm670_vm2, %v623_v58  ;;  %v388_v1 = vadd.f32 %v1147_v34, %v387_v63  ;;  %v428_v2 = vadd.f32 %v1147_v34, %v427_v0 }
  0x9e   :  { %v575_v3 = vmax.f32 %v465_v61, 0.0  ;;  %v591_v4 = vmax.f32 %v505_v62, 0.0 }
  0x9f   :  { %v544_v5 = vmax.f32 %v388_v1, 0.0  ;;  %v560_v6 = vmax.f32 %v428_v2, 0.0 }
  0xa0   :  { %v639_v7 = vpack.c.bf16 %v575_v3, %v575_v3  ;;  %v655_v8 = vpack.c.bf16 %v591_v4, %v591_v4 }
  0xa1   :  { %v608_v9 = vpack.c.bf16 %v544_v5, %v544_v5  ;;  %v624_v10 = vpack.c.bf16 %v560_v6, %v560_v6 }
  0xa2   :  { %704 = vst.msk [vmem:[%s1472_s3 + $0x84] sm:$0xf] %vm670_vm2, %v639_v7 }
  0xa3   :  { %720 = vst.msk [vmem:[%s1472_s3 + $0xc4] sm:$0xf] %vm670_vm2, %v655_v8  ;;  %v467_v11 = vpop.f32.mrf.mxu2  ;;  %v507_v12 = vpop.f32.mrf.mxu3 }
  0xa4   :  { %673 = vst.msk [vmem:[%s1472_s3 + $0x8] sm:$0xf] %vm670_vm2, %v608_v9  ;;  %v468_v13 = vadd.f32 %v1147_v34, %v467_v11  ;;  %v508_v14 = vadd.f32 %v1147_v34, %v507_v12  ;;  %v389_v15 = vpop.f32.mrf.mxu0  ;;  %v429_v16 = vpop.f32.mrf.mxu1 }
  0xa5   :  { %689 = vst.msk [vmem:[%s1472_s3 + $0x48] sm:$0xf] %vm670_vm2, %v624_v10  ;;  %v390_v17 = vadd.f32 %v1147_v34, %v389_v15  ;;  %v430_v18 = vadd.f32 %v1147_v34, %v429_v16 }
  0xa6   :  { %v576_v19 = vmax.f32 %v468_v13, 0.0  ;;  %v592_v20 = vmax.f32 %v508_v14, 0.0 }
  0xa7   :  { %v545_v21 = vmax.f32 %v390_v17, 0.0  ;;  %v561_v22 = vmax.f32 %v430_v18, 0.0 }
  0xa8   :  { %v640_v23 = vpack.c.bf16 %v576_v19, %v576_v19  ;;  %v656_v24 = vpack.c.bf16 %v592_v20, %v592_v20 }
  0xa9   :  { %v609_v25 = vpack.c.bf16 %v545_v21, %v545_v21  ;;  %v625_v26 = vpack.c.bf16 %v561_v22, %v561_v22 }
  0xaa   :  { %705 = vst.msk [vmem:[%s1472_s3 + $0x88] sm:$0xf] %vm670_vm2, %v640_v23 }
  0xab   :  { %721 = vst.msk [vmem:[%s1472_s3 + $0xc8] sm:$0xf] %vm670_vm2, %v656_v24  ;;  %v469_v27 = vpop.f32.mrf.mxu2  ;;  %v509_v28 = vpop.f32.mrf.mxu3 }
  0xac   :  { %674 = vst.msk [vmem:[%s1472_s3 + $0xc] sm:$0xf] %vm670_vm2, %v609_v25  ;;  %v470_v29 = vadd.f32 %v1147_v34, %v469_v27  ;;  %v510_v30 = vadd.f32 %v1147_v34, %v509_v28  ;;  %v392_v31 = vpop.f32.mrf.mxu0  ;;  %v432_v32 = vpop.f32.mrf.mxu1 }
  0xad   :  { %690 = vst.msk [vmem:[%s1472_s3 + $0x4c] sm:$0xf] %vm670_vm2, %v625_v26  ;;  %v393_v33 = vadd.f32 %v1147_v34, %v392_v31  ;;  %v433_v35 = vadd.f32 %v1147_v34, %v432_v32 }
  0xae   :  { %v577_v36 = vmax.f32 %v470_v29, 0.0  ;;  %v593_v37 = vmax.f32 %v510_v30, 0.0 }
  0xaf   :  { %v546_v38 = vmax.f32 %v393_v33, 0.0  ;;  %v562_v39 = vmax.f32 %v433_v35, 0.0 }
  0xb0   :  { %v641_v40 = vpack.c.bf16 %v577_v36, %v577_v36  ;;  %v657_v41 = vpack.c.bf16 %v593_v37, %v593_v37 }
  0xb1   :  { %v610_v42 = vpack.c.bf16 %v546_v38, %v546_v38  ;;  %v626_v43 = vpack.c.bf16 %v562_v39, %v562_v39 }
  0xb2   :  { %706 = vst.msk [vmem:[%s1472_s3 + $0x8c] sm:$0xf] %vm670_vm2, %v641_v40 }
  0xb3   :  { %722 = vst.msk [vmem:[%s1472_s3 + $0xcc] sm:$0xf] %vm670_vm2, %v657_v41  ;;  %v472_v44 = vpop.f32.mrf.mxu2  ;;  %v512_v45 = vpop.f32.mrf.mxu3 }
  0xb4   :  { %675 = vst.msk [vmem:[%s1472_s3 + $0x10] sm:$0xf] %vm670_vm2, %v610_v42  ;;  %v473_v46 = vadd.f32 %v1147_v34, %v472_v44  ;;  %v513_v47 = vadd.f32 %v1147_v34, %v512_v45  ;;  %v394_v48 = vpop.f32.mrf.mxu0  ;;  %v434_v49 = vpop.f32.mrf.mxu1 }
  0xb5   :  { %691 = vst.msk [vmem:[%s1472_s3 + $0x50] sm:$0xf] %vm670_vm2, %v626_v43  ;;  %v395_v50 = vadd.f32 %v1147_v34, %v394_v48  ;;  %v435_v51 = vadd.f32 %v1147_v34, %v434_v49 }
  0xb6   :  { %v578_v52 = vmax.f32 %v473_v46, 0.0  ;;  %v594_v53 = vmax.f32 %v513_v47, 0.0 }
  0xb7   :  { %v547_v54 = vmax.f32 %v395_v50, 0.0  ;;  %v563_v55 = vmax.f32 %v435_v51, 0.0 }
  0xb8   :  { %v642_v56 = vpack.c.bf16 %v578_v52, %v578_v52  ;;  %v658_v57 = vpack.c.bf16 %v594_v53, %v594_v53 }
  0xb9   :  { %v611_v58 = vpack.c.bf16 %v547_v54, %v547_v54  ;;  %v627_v59 = vpack.c.bf16 %v563_v55, %v563_v55 }
  0xba   :  { %707 = vst.msk [vmem:[%s1472_s3 + $0x90] sm:$0xf] %vm670_vm2, %v642_v56 }
  0xbb   :  { %723 = vst.msk [vmem:[%s1472_s3 + $0xd0] sm:$0xf] %vm670_vm2, %v658_v57  ;;  %v474_v60 = vpop.f32.mrf.mxu2  ;;  %v514_v61 = vpop.f32.mrf.mxu3 }
  0xbc   :  { %676 = vst.msk [vmem:[%s1472_s3 + $0x14] sm:$0xf] %vm670_vm2, %v611_v58  ;;  %v475_v62 = vadd.f32 %v1147_v34, %v474_v60  ;;  %v515_v63 = vadd.f32 %v1147_v34, %v514_v61  ;;  %v397_v0 = vpop.f32.mrf.mxu0  ;;  %v437_v1 = vpop.f32.mrf.mxu1 }
  0xbd   :  { %692 = vst.msk [vmem:[%s1472_s3 + $0x54] sm:$0xf] %vm670_vm2, %v627_v59  ;;  %v398_v2 = vadd.f32 %v1147_v34, %v397_v0  ;;  %v438_v3 = vadd.f32 %v1147_v34, %v437_v1 }
  0xbe   :  { %v579_v4 = vmax.f32 %v475_v62, 0.0  ;;  %v595_v5 = vmax.f32 %v515_v63, 0.0 }
  0xbf   :  { %v548_v6 = vmax.f32 %v398_v2, 0.0  ;;  %v564_v7 = vmax.f32 %v438_v3, 0.0 }
  0xc0   :  { %v643_v8 = vpack.c.bf16 %v579_v4, %v579_v4  ;;  %v659_v9 = vpack.c.bf16 %v595_v5, %v595_v5 }
  0xc1   :  { %v612_v10 = vpack.c.bf16 %v548_v6, %v548_v6  ;;  %v628_v11 = vpack.c.bf16 %v564_v7, %v564_v7 }
  0xc2   :  { %708 = vst.msk [vmem:[%s1472_s3 + $0x94] sm:$0xf] %vm670_vm2, %v643_v8 }
  0xc3   :  { %724 = vst.msk [vmem:[%s1472_s3 + $0xd4] sm:$0xf] %vm670_vm2, %v659_v9  ;;  %v477_v12 = vpop.f32.mrf.mxu2  ;;  %v517_v13 = vpop.f32.mrf.mxu3 }
  0xc4   :  { %677 = vst.msk [vmem:[%s1472_s3 + $0x18] sm:$0xf] %vm670_vm2, %v612_v10  ;;  %v478_v14 = vadd.f32 %v1147_v34, %v477_v12  ;;  %v518_v15 = vadd.f32 %v1147_v34, %v517_v13  ;;  %v399_v16 = vpop.f32.mrf.mxu0  ;;  %v439_v17 = vpop.f32.mrf.mxu1 }
  0xc5   :  { %693 = vst.msk [vmem:[%s1472_s3 + $0x58] sm:$0xf] %vm670_vm2, %v628_v11  ;;  %v400_v18 = vadd.f32 %v1147_v34, %v399_v16  ;;  %v440_v19 = vadd.f32 %v1147_v34, %v439_v17 }
  0xc6   :  { %v580_v20 = vmax.f32 %v478_v14, 0.0  ;;  %v596_v21 = vmax.f32 %v518_v15, 0.0 }
  0xc7   :  { %v549_v22 = vmax.f32 %v400_v18, 0.0  ;;  %v565_v23 = vmax.f32 %v440_v19, 0.0 }
  0xc8   :  { %v644_v24 = vpack.c.bf16 %v580_v20, %v580_v20  ;;  %v660_v25 = vpack.c.bf16 %v596_v21, %v596_v21 }
  0xc9   :  { %v613_v26 = vpack.c.bf16 %v549_v22, %v549_v22  ;;  %v629_v27 = vpack.c.bf16 %v565_v23, %v565_v23 }
  0xca   :  { %709 = vst.msk [vmem:[%s1472_s3 + $0x98] sm:$0xf] %vm670_vm2, %v644_v24 }
  0xcb   :  { %725 = vst.msk [vmem:[%s1472_s3 + $0xd8] sm:$0xf] %vm670_vm2, %v660_v25  ;;  %v479_v28 = vpop.f32.mrf.mxu2  ;;  %v519_v29 = vpop.f32.mrf.mxu3 }
  0xcc   :  { %678 = vst.msk [vmem:[%s1472_s3 + $0x1c] sm:$0xf] %vm670_vm2, %v613_v26  ;;  %v480_v30 = vadd.f32 %v1147_v34, %v479_v28  ;;  %v520_v31 = vadd.f32 %v1147_v34, %v519_v29  ;;  %v402_v32 = vpop.f32.mrf.mxu0  ;;  %v442_v33 = vpop.f32.mrf.mxu1 }
  0xcd   :  { %694 = vst.msk [vmem:[%s1472_s3 + $0x5c] sm:$0xf] %vm670_vm2, %v629_v27  ;;  %v403_v35 = vadd.f32 %v1147_v34, %v402_v32  ;;  %v443_v36 = vadd.f32 %v1147_v34, %v442_v33 }
  0xce   :  { %v581_v37 = vmax.f32 %v480_v30, 0.0  ;;  %v597_v38 = vmax.f32 %v520_v31, 0.0 }
  0xcf   :  { %v550_v39 = vmax.f32 %v403_v35, 0.0  ;;  %v566_v40 = vmax.f32 %v443_v36, 0.0 }
  0xd0   :  { %v645_v41 = vpack.c.bf16 %v581_v37, %v581_v37  ;;  %v661_v42 = vpack.c.bf16 %v597_v38, %v597_v38 }
  0xd1   :  { %v614_v43 = vpack.c.bf16 %v550_v39, %v550_v39  ;;  %v630_v44 = vpack.c.bf16 %v566_v40, %v566_v40 }
  0xd2   :  { %710 = vst.msk [vmem:[%s1472_s3 + $0x9c] sm:$0xf] %vm670_vm2, %v645_v41 }
  0xd3   :  { %726 = vst.msk [vmem:[%s1472_s3 + $0xdc] sm:$0xf] %vm670_vm2, %v661_v42  ;;  %v482_v45 = vpop.f32.mrf.mxu2  ;;  %v522_v46 = vpop.f32.mrf.mxu3 }
  0xd4   :  { %679 = vst.msk [vmem:[%s1472_s3 + $0x20] sm:$0xf] %vm670_vm2, %v614_v43  ;;  %v483_v47 = vadd.f32 %v1147_v34, %v482_v45  ;;  %v523_v48 = vadd.f32 %v1147_v34, %v522_v46  ;;  %v404_v49 = vpop.f32.mrf.mxu0  ;;  %v444_v50 = vpop.f32.mrf.mxu1 }
  0xd5   :  { %695 = vst.msk [vmem:[%s1472_s3 + $0x60] sm:$0xf] %vm670_vm2, %v630_v44  ;;  %v405_v51 = vadd.f32 %v1147_v34, %v404_v49  ;;  %v445_v52 = vadd.f32 %v1147_v34, %v444_v50 }
  0xd6   :  { %v582_v53 = vmax.f32 %v483_v47, 0.0  ;;  %v598_v54 = vmax.f32 %v523_v48, 0.0 }
  0xd7   :  { %v551_v55 = vmax.f32 %v405_v51, 0.0  ;;  %v567_v56 = vmax.f32 %v445_v52, 0.0 }
  0xd8   :  { %v646_v57 = vpack.c.bf16 %v582_v53, %v582_v53  ;;  %v662_v58 = vpack.c.bf16 %v598_v54, %v598_v54 }
  0xd9   :  { %v615_v59 = vpack.c.bf16 %v551_v55, %v551_v55  ;;  %v631_v60 = vpack.c.bf16 %v567_v56, %v567_v56 }
  0xda   :  { %711 = vst.msk [vmem:[%s1472_s3 + $0xa0] sm:$0xf] %vm670_vm2, %v646_v57 }
  0xdb   :  { %727 = vst.msk [vmem:[%s1472_s3 + $0xe0] sm:$0xf] %vm670_vm2, %v662_v58  ;;  %v484_v61 = vpop.f32.mrf.mxu2  ;;  %v524_v62 = vpop.f32.mrf.mxu3 }
  0xdc   :  { %680 = vst.msk [vmem:[%s1472_s3 + $0x24] sm:$0xf] %vm670_vm2, %v615_v59  ;;  %v485_v63 = vadd.f32 %v1147_v34, %v484_v61  ;;  %v525_v0 = vadd.f32 %v1147_v34, %v524_v62  ;;  %v407_v1 = vpop.f32.mrf.mxu0  ;;  %v447_v2 = vpop.f32.mrf.mxu1 }
  0xdd   :  { %696 = vst.msk [vmem:[%s1472_s3 + $0x64] sm:$0xf] %vm670_vm2, %v631_v60  ;;  %v408_v3 = vadd.f32 %v1147_v34, %v407_v1  ;;  %v448_v4 = vadd.f32 %v1147_v34, %v447_v2 }
  0xde   :  { %v583_v5 = vmax.f32 %v485_v63, 0.0  ;;  %v599_v6 = vmax.f32 %v525_v0, 0.0 }
  0xdf   :  { %v552_v7 = vmax.f32 %v408_v3, 0.0  ;;  %v568_v8 = vmax.f32 %v448_v4, 0.0 }
  0xe0   :  { %v647_v9 = vpack.c.bf16 %v583_v5, %v583_v5  ;;  %v663_v10 = vpack.c.bf16 %v599_v6, %v599_v6 }
  0xe1   :  { %v616_v11 = vpack.c.bf16 %v552_v7, %v552_v7  ;;  %v632_v12 = vpack.c.bf16 %v568_v8, %v568_v8 }
  0xe2   :  { %712 = vst.msk [vmem:[%s1472_s3 + $0xa4] sm:$0xf] %vm670_vm2, %v647_v9 }
  0xe3   :  { %728 = vst.msk [vmem:[%s1472_s3 + $0xe4] sm:$0xf] %vm670_vm2, %v663_v10  ;;  %v487_v13 = vpop.f32.mrf.mxu2  ;;  %v527_v14 = vpop.f32.mrf.mxu3 }
  0xe4   :  { %681 = vst.msk [vmem:[%s1472_s3 + $0x28] sm:$0xf] %vm670_vm2, %v616_v11  ;;  %v488_v15 = vadd.f32 %v1147_v34, %v487_v13  ;;  %v528_v16 = vadd.f32 %v1147_v34, %v527_v14  ;;  %v409_v17 = vpop.f32.mrf.mxu0  ;;  %v449_v18 = vpop.f32.mrf.mxu1 }
  0xe5   :  { %697 = vst.msk [vmem:[%s1472_s3 + $0x68] sm:$0xf] %vm670_vm2, %v632_v12  ;;  %v410_v19 = vadd.f32 %v1147_v34, %v409_v17  ;;  %v450_v20 = vadd.f32 %v1147_v34, %v449_v18 }
  0xe6   :  { %v584_v21 = vmax.f32 %v488_v15, 0.0  ;;  %v600_v22 = vmax.f32 %v528_v16, 0.0 }
  0xe7   :  { %v553_v23 = vmax.f32 %v410_v19, 0.0  ;;  %v569_v24 = vmax.f32 %v450_v20, 0.0 }
  0xe8   :  { %v648_v25 = vpack.c.bf16 %v584_v21, %v584_v21  ;;  %v664_v26 = vpack.c.bf16 %v600_v22, %v600_v22 }
  0xe9   :  { %v617_v27 = vpack.c.bf16 %v553_v23, %v553_v23  ;;  %v633_v28 = vpack.c.bf16 %v569_v24, %v569_v24 }
  0xea   :  { %713 = vst.msk [vmem:[%s1472_s3 + $0xa8] sm:$0xf] %vm670_vm2, %v648_v25 }
  0xeb   :  { %729 = vst.msk [vmem:[%s1472_s3 + $0xe8] sm:$0xf] %vm670_vm2, %v664_v26  ;;  %v489_v29 = vpop.f32.mrf.mxu2  ;;  %v529_v30 = vpop.f32.mrf.mxu3 }
  0xec   :  { %682 = vst.msk [vmem:[%s1472_s3 + $0x2c] sm:$0xf] %vm670_vm2, %v617_v27  ;;  %v490_v31 = vadd.f32 %v1147_v34, %v489_v29  ;;  %v530_v32 = vadd.f32 %v1147_v34, %v529_v30  ;;  %v412_v33 = vpop.f32.mrf.mxu0  ;;  %v452_v35 = vpop.f32.mrf.mxu1 }
  0xed   :  { %698 = vst.msk [vmem:[%s1472_s3 + $0x6c] sm:$0xf] %vm670_vm2, %v633_v28  ;;  %v413_v36 = vadd.f32 %v1147_v34, %v412_v33  ;;  %v453_v37 = vadd.f32 %v1147_v34, %v452_v35 }
  0xee   :  { %v585_v38 = vmax.f32 %v490_v31, 0.0  ;;  %v601_v39 = vmax.f32 %v530_v32, 0.0 }
  0xef   :  { %v554_v40 = vmax.f32 %v413_v36, 0.0  ;;  %v570_v41 = vmax.f32 %v453_v37, 0.0 }
  0xf0   :  { %v649_v42 = vpack.c.bf16 %v585_v38, %v585_v38  ;;  %v665_v43 = vpack.c.bf16 %v601_v39, %v601_v39 }
  0xf1   :  { %v618_v44 = vpack.c.bf16 %v554_v40, %v554_v40  ;;  %v634_v45 = vpack.c.bf16 %v570_v41, %v570_v41 }
  0xf2   :  { %714 = vst.msk [vmem:[%s1472_s3 + $0xac] sm:$0xf] %vm670_vm2, %v649_v42 }
  0xf3   :  { %730 = vst.msk [vmem:[%s1472_s3 + $0xec] sm:$0xf] %vm670_vm2, %v665_v43  ;;  %v492_v46 = vpop.f32.mrf.mxu2  ;;  %v532_v47 = vpop.f32.mrf.mxu3 }
  0xf4   :  { %683 = vst.msk [vmem:[%s1472_s3 + $0x30] sm:$0xf] %vm670_vm2, %v618_v44  ;;  %v493_v48 = vadd.f32 %v1147_v34, %v492_v46  ;;  %v533_v49 = vadd.f32 %v1147_v34, %v532_v47  ;;  %v414_v50 = vpop.f32.mrf.mxu0  ;;  %v454_v51 = vpop.f32.mrf.mxu1 }
  0xf5   :  { %699 = vst.msk [vmem:[%s1472_s3 + $0x70] sm:$0xf] %vm670_vm2, %v634_v45  ;;  %v415_v52 = vadd.f32 %v1147_v34, %v414_v50  ;;  %v455_v53 = vadd.f32 %v1147_v34, %v454_v51 }
  0xf6   :  { %v586_v54 = vmax.f32 %v493_v48, 0.0  ;;  %v602_v55 = vmax.f32 %v533_v49, 0.0 }
  0xf7   :  { %v555_v56 = vmax.f32 %v415_v52, 0.0  ;;  %v571_v57 = vmax.f32 %v455_v53, 0.0 }
  0xf8   :  { %v650_v58 = vpack.c.bf16 %v586_v54, %v586_v54  ;;  %v666_v59 = vpack.c.bf16 %v602_v55, %v602_v55 }
  0xf9   :  { %v619_v60 = vpack.c.bf16 %v555_v56, %v555_v56  ;;  %v635_v61 = vpack.c.bf16 %v571_v57, %v571_v57 }
  0xfa   :  { %715 = vst.msk [vmem:[%s1472_s3 + $0xb0] sm:$0xf] %vm670_vm2, %v650_v58 }
  0xfb   :  { %731 = vst.msk [vmem:[%s1472_s3 + $0xf0] sm:$0xf] %vm670_vm2, %v666_v59  ;;  %v494_v62 = vpop.f32.mrf.mxu2  ;;  %v534_v63 = vpop.f32.mrf.mxu3 }
  0xfc   :  { %684 = vst.msk [vmem:[%s1472_s3 + $0x34] sm:$0xf] %vm670_vm2, %v619_v60  ;;  %v495_v0 = vadd.f32 %v1147_v34, %v494_v62  ;;  %v535_v1 = vadd.f32 %v1147_v34, %v534_v63  ;;  %v417_v2 = vpop.f32.mrf.mxu0  ;;  %v457_v3 = vpop.f32.mrf.mxu1 }
  0xfd   :  { %700 = vst.msk [vmem:[%s1472_s3 + $0x74] sm:$0xf] %vm670_vm2, %v635_v61  ;;  %v418_v4 = vadd.f32 %v1147_v34, %v417_v2  ;;  %v458_v5 = vadd.f32 %v1147_v34, %v457_v3 }
  0xfe   :  { %v587_v6 = vmax.f32 %v495_v0, 0.0  ;;  %v603_v7 = vmax.f32 %v535_v1, 0.0 }
  0xff   :  { %v556_v8 = vmax.f32 %v418_v4, 0.0  ;;  %v572_v9 = vmax.f32 %v458_v5, 0.0 }
 0x100   :  { %v651_v10 = vpack.c.bf16 %v587_v6, %v587_v6  ;;  %v667_v11 = vpack.c.bf16 %v603_v7, %v603_v7 }
 0x101   :  { %v620_v12 = vpack.c.bf16 %v556_v8, %v556_v8  ;;  %v636_v13 = vpack.c.bf16 %v572_v9, %v572_v9 }
 0x102   :  { %716 = vst.msk [vmem:[%s1472_s3 + $0xb4] sm:$0xf] %vm670_vm2, %v651_v10 }
 0x103   :  { %732 = vst.msk [vmem:[%s1472_s3 + $0xf4] sm:$0xf] %vm670_vm2, %v667_v11  ;;  %v497_v14 = vpop.f32.mrf.mxu2  ;;  %v537_v15 = vpop.f32.mrf.mxu3 }
 0x104   :  { %685 = vst.msk [vmem:[%s1472_s3 + $0x38] sm:$0xf] %vm670_vm2, %v620_v12  ;;  %v498_v16 = vadd.f32 %v1147_v34, %v497_v14  ;;  %v538_v17 = vadd.f32 %v1147_v34, %v537_v15  ;;  %v419_v18 = vpop.f32.mrf.mxu0  ;;  %v459_v19 = vpop.f32.mrf.mxu1 }
 0x105   :  { %701 = vst.msk [vmem:[%s1472_s3 + $0x78] sm:$0xf] %vm670_vm2, %v636_v13  ;;  %v420_v20 = vadd.f32 %v1147_v34, %v419_v18  ;;  %v460_v21 = vadd.f32 %v1147_v34, %v459_v19 }
 0x106   :  { %v588_v22 = vmax.f32 %v498_v16, 0.0  ;;  %v604_v23 = vmax.f32 %v538_v17, 0.0 }
 0x107   :  { %v557_v24 = vmax.f32 %v420_v20, 0.0  ;;  %v573_v25 = vmax.f32 %v460_v21, 0.0 }
 0x108   :  { %v652_v26 = vpack.c.bf16 %v588_v22, %v588_v22  ;;  %v668_v27 = vpack.c.bf16 %v604_v23, %v604_v23 }
 0x109   :  { %v621_v28 = vpack.c.bf16 %v557_v24, %v557_v24  ;;  %v637_v29 = vpack.c.bf16 %v573_v25, %v573_v25 }
 0x10a   :  { %717 = vst.msk [vmem:[%s1472_s3 + $0xb8] sm:$0xf] %vm670_vm2, %v652_v26 }
 0x10b   :  { %733 = vst.msk [vmem:[%s1472_s3 + $0xf8] sm:$0xf] %vm670_vm2, %v668_v27  ;;  %v499_v30 = vpop.f32.mrf.mxu2  ;;  %v539_v31 = vpop.f32.mrf.mxu3 }
 0x10c   :  { %686 = vst.msk [vmem:[%s1472_s3 + $0x3c] sm:$0xf] %vm670_vm2, %v621_v28  ;;  %v500_v32 = vadd.f32 %v1147_v34, %v499_v30  ;;  %v540_v33 = vadd.f32 %v1147_v34, %v539_v31 }
 0x10d   :  { %702 = vst.msk [vmem:[%s1472_s3 + $0x7c] sm:$0xf] %vm670_vm2, %v637_v29 }
 0x10e   :  { %v589_v35 = vmax.f32 %v500_v32, 0.0  ;;  %v605_v36 = vmax.f32 %v540_v33, 0.0 }
 0x110   :  { %v653_v37 = vpack.c.bf16 %v589_v35, %v589_v35  ;;  %v669_v38 = vpack.c.bf16 %v605_v36, %v605_v36 }
 0x112   :  { %718 = vst.msk [vmem:[%s1472_s3 + $0xbc] sm:$0xf] %vm670_vm2, %v653_v37 }
 0x113   :  { %734 = vst.msk [vmem:[%s1472_s3 + $0xfc] sm:$0xf] %vm670_vm2, %v669_v38 }
 0x114   :  { %739 = vsyncpa [#allocation3], 1 }
 0x115   :  { %740 = vsyncpa [#allocation5], 1 }

// kernel: aspp_forward.5
= control target key start
LH: loop header
LB: loop body
LE: loop exit
PB: predicated region body
PF: predicated region fallthrough
CT: control target
= control target key end

     0   :  { %s2309_s21 = smov 0   ;;  %s2311_s22 = smov 0   ;;  %s2618_s0 = inlined_call_operand.vmem [shape: bf16[2,256,16], index: 0, kind: input, shape index: {}]   ;;  %s2619_s1 = inlined_call_operand.vmem [shape: bf16[2,256,16], index: 1, kind: input, shape index: {}]   ;;  %s2620_s2 = inlined_call_operand.vmem [shape: bf16[2,256,16], index: 2, kind: input, shape index: {}]   ;;  %s2621_s3 = inlined_call_operand.vmem [shape: bf16[2,256,16], index: 3, kind: input, shape index: {}]   ;;  %s2622_s4 = inlined_call_operand.vmem [shape: bf16[4,16,32], index: 4, kind: input, shape index: {}]   ;;  %s2623_s5 = inlined_call_operand.vmem [shape: f32[2,1,32], index: 5, kind: input, shape index: {}]   ;;  %s2624_s6 = inlined_call_operand.vmem [shape: bf16[2,256,32], index: 6, kind: output, shape index: {}]  }
   0x1   :  { %s2313_s23 = smov 0  }
   0x2 LB: > { %s28_s24 = sadd.s32 1, %s2268_s22  ;;  %p1797_p0 = scmp.ge.s32.totalorder %s2272_s23, 1  ;;  %s2272_s23 = sphi %s2313_s23, %s16_s23   ;;  %s2268_s22 = sphi %s2311_s22, %s2626_s22   ;;  %s2264_s21 = sphi %s2309_s21, %s2625_s21  }
   0x3   : > { %p30_p1 = scmp.ge.s32.totalorder %s28_s24, 2  ;;  %p292_p2 = scmp.lt.s32.totalorder %s2272_s23, 3 }
   0x5   : > { %s2628_s24 = smov (%p30_p1, %s28_s24), 0  ;;  %p293_p3 = pnand %p1797_p0, %p292_p2 }
   0x6   : > { %p361_p4 = scmp.lt.s32.totalorder (!%p293_p3), %s2264_s21, 1 }
   0x7   : > { %296 = sbr.rel (%p293_p3) target bundleno = 409 (0x199), region = 44 }
   0xc   : > { %v2190_v0 = vld [vmem:[%s2622_s4 + $0x8] sm:$0xff]  ;;  %v2173_v1 = vld [vmem:[%s2622_s4] sm:$0xff]  ;;  %v2207_v2 = vld [vmem:[%s2622_s4 + $0x10] sm:$0xff]  ;;  %s2630_s21 = smov (!%p361_p4, %s2264_s21), 1  ;;  %vm569_vm0 = vcmask 130048   ;;  %vm1610_vm1 = vcmask 257024  }
   0xd   : > { %v2224_v3 = vld [vmem:[%s2622_s4 + $0x18] sm:$0xff]  ;;  %625 = vmatpush.bf16.msra.mxu0 %v2190_v0  ;;  %848 = vmatpush.bf16.msra.mxu1 %v2173_v1  ;;  %s2342_s9 = sshll.u32 %s2630_s21, 7  ;;  %s402_s12 = scalar_lea.vmem %s2623_s5, %s2630_s21 }
   0xe   : > { %1106 = vmatpush.bf16.msra.mxu2 %v2207_v2  ;;  %1396 = vmatpush.bf16.msra.mxu3 %v2224_v3  ;;  %s2352_s15 = scalar_lea.vmem %s2619_s1, %s2342_s9  ;;  %s2358_s18 = scalar_lea.vmem %s2618_s0, %s2342_s9  ;;  %v2449_v45 = vld [vmem:[%s402_s12] ss:$0 sm:$0xff] }
   0xf   : > { %v2174_v4 = vld [vmem:[%s2352_s15] sm:$0xff]  ;;  %s2366_s25 = scalar_lea.vmem %s2620_s2, %s2342_s9  ;;  %s2372_s28 = scalar_lea.vmem %s2621_s3, %s2342_s9  ;;  %v2175_v8 = vld [vmem:[%s2352_s15 + $0x8] sm:$0xff]  ;;  %v2176_v12 = vld [vmem:[%s2352_s15 + $0x10] sm:$0xff] }
  0x10   : > { %v2157_v5 = vld [vmem:[%s2358_s18] sm:$0xff]  ;;  %1878 = vmatmul.msk.bf16.vlgmr.msra.gmra.mxu0 %vm569_vm0, %v2174_v4  ;;  %v2158_v9 = vld [vmem:[%s2358_s18 + $0x8] sm:$0xff]  ;;  %v2159_v13 = vld [vmem:[%s2358_s18 + $0x10] sm:$0xff]  ;;  %s2456_s10 = scalar_lea.vmem %s2624_s6, %s2342_s9 }
  0x11   : > { %v2191_v6 = vld [vmem:[%s2366_s25] sm:$0xff]  ;;  %1962 = vmatmul.msk.bf16.vlgmr.msra.gmra.mxu1 %vm569_vm0, %v2157_v5  ;;  %v2192_v10 = vld [vmem:[%s2366_s25 + $0x8] sm:$0xff]  ;;  %v2193_v14 = vld [vmem:[%s2366_s25 + $0x10] sm:$0xff] }
  0x12   : > { %v2208_v7 = vld [vmem:[%s2372_s28] sm:$0xff]  ;;  %2048 = vmatmul.msk.bf16.vlgmr.msra.gmra.mxu2 %vm569_vm0, %v2191_v6  ;;  %v2209_v11 = vld [vmem:[%s2372_s28 + $0x8] sm:$0xff]  ;;  %v2210_v15 = vld [vmem:[%s2372_s28 + $0x10] sm:$0xff] }
  0x13   : > { %2134 = vmatmul.msk.bf16.vlgmr.msra.gmra.mxu3 %vm569_vm0, %v2208_v7  ;;  %v2177_v16 = vld [vmem:[%s2352_s15 + $0x18] sm:$0xff]  ;;  %v2178_v20 = vld [vmem:[%s2352_s15 + $0x20] sm:$0xff]  ;;  %v2179_v24 = vld [vmem:[%s2352_s15 + $0x28] sm:$0xff] }
  0x14   : > { %v2160_v17 = vld [vmem:[%s2358_s18 + $0x18] sm:$0xff]  ;;  %v2161_v21 = vld [vmem:[%s2358_s18 + $0x20] sm:$0xff]  ;;  %v2162_v25 = vld [vmem:[%s2358_s18 + $0x28] sm:$0xff] }
  0x15   : > { %v2194_v18 = vld [vmem:[%s2366_s25 + $0x18] sm:$0xff]  ;;  %v2195_v22 = vld [vmem:[%s2366_s25 + $0x20] sm:$0xff]  ;;  %v2196_v26 = vld [vmem:[%s2366_s25 + $0x28] sm:$0xff] }
  0x16   : > { %v2211_v19 = vld [vmem:[%s2372_s28 + $0x18] sm:$0xff]  ;;  %v2212_v23 = vld [vmem:[%s2372_s28 + $0x20] sm:$0xff]  ;;  %v2213_v27 = vld [vmem:[%s2372_s28 + $0x28] sm:$0xff] }
  0x17   : > { %v2180_v28 = vld [vmem:[%s2352_s15 + $0x30] sm:$0xff]  ;;  %v2181_v32 = vld [vmem:[%s2352_s15 + $0x38] sm:$0xff]  ;;  %v2182_v36 = vld [vmem:[%s2352_s15 + $0x40] sm:$0xff] }
  0x18   : > { %v2163_v29 = vld [vmem:[%s2358_s18 + $0x30] sm:$0xff]  ;;  %v2164_v33 = vld [vmem:[%s2358_s18 + $0x38] sm:$0xff]  ;;  %v2165_v37 = vld [vmem:[%s2358_s18 + $0x40] sm:$0xff] }
  0x19   : > { %v2197_v30 = vld [vmem:[%s2366_s25 + $0x30] sm:$0xff]  ;;  %v2198_v34 = vld [vmem:[%s2366_s25 + $0x38] sm:$0xff]  ;;  %v2199_v40 = vld [vmem:[%s2366_s25 + $0x40] sm:$0xff] }
  0x1a   : > { %v2214_v31 = vld [vmem:[%s2372_s28 + $0x30] sm:$0xff]  ;;  %v2215_v35 = vld [vmem:[%s2372_s28 + $0x38] sm:$0xff]  ;;  %v2216_v41 = vld [vmem:[%s2372_s28 + $0x40] sm:$0xff] }
  0x1b   : > { %v2183_v55 = vld [vmem:[%s2352_s15 + $0x48] sm:$0xff] }
  0x1c   : > { %v2166_v56 = vld [vmem:[%s2358_s18 + $0x48] sm:$0xff] }
  0x1d   : > { %v2200_v61 = vld [vmem:[%s2366_s25 + $0x48] sm:$0xff] }
  0x1e   : > { %v2217_v62 = vld [vmem:[%s2372_s28 + $0x48] sm:$0xff] }
  0x20   : > { %1879 = vmatmul.msk.bf16.gmra.mxu0 %vm569_vm0, %v2175_v8 }
  0x21   : > { %1963 = vmatmul.msk.bf16.gmra.mxu1 %vm569_vm0, %v2158_v9 }
  0x22   : > { %2049 = vmatmul.msk.bf16.gmra.mxu2 %vm569_vm0, %v2192_v10 }
  0x23   : > { %2135 = vmatmul.msk.bf16.gmra.mxu3 %vm569_vm0, %v2209_v11 }
  0x30   : > { %1880 = vmatmul.msk.bf16.gmra.mxu0 %vm569_vm0, %v2176_v12 }
  0x31   : > { %1964 = vmatmul.msk.bf16.gmra.mxu1 %vm569_vm0, %v2159_v13 }
  0x32   : > { %2050 = vmatmul.msk.bf16.gmra.mxu2 %vm569_vm0, %v2193_v14 }
  0x33   : > { %2136 = vmatmul.msk.bf16.gmra.mxu3 %vm569_vm0, %v2210_v15  ;;  %v2184_v15 = vld [vmem:[%s2352_s15 + $0x50] sm:$0xff] }
  0x40   : > { %1881 = vmatmul.msk.bf16.gmra.mxu0 %vm569_vm0, %v2177_v16  ;;  %v2167_v16 = vld [vmem:[%s2358_s18 + $0x50] sm:$0xff] }
  0x41   : > { %1965 = vmatmul.msk.bf16.gmra.mxu1 %vm569_vm0, %v2160_v17 }
  0x42   : > { %2051 = vmatmul.msk.bf16.gmra.mxu2 %vm569_vm0, %v2194_v18 }
  0x43   : > { %2137 = vmatmul.msk.bf16.gmra.mxu3 %vm569_vm0, %v2211_v19 }
  0x50   : > { %1882 = vmatmul.msk.bf16.gmra.mxu0 %vm569_vm0, %v2178_v20 }
  0x51   : > { %1966 = vmatmul.msk.bf16.gmra.mxu1 %vm569_vm0, %v2161_v21  ;;  %v2201_v21 = vld [vmem:[%s2366_s25 + $0x50] sm:$0xff] }
  0x52   : > { %2052 = vmatmul.msk.bf16.gmra.mxu2 %vm569_vm0, %v2195_v22  ;;  %v2218_v22 = vld [vmem:[%s2372_s28 + $0x50] sm:$0xff] }
  0x53   : > { %2138 = vmatmul.msk.bf16.gmra.mxu3 %vm569_vm0, %v2212_v23 }
  0x60   : > { %1883 = vmatmul.msk.bf16.gmra.mxu0 %vm569_vm0, %v2179_v24 }
  0x61   : > { %1967 = vmatmul.msk.bf16.gmra.mxu1 %vm569_vm0, %v2162_v25 }
  0x62   : > { %2053 = vmatmul.msk.bf16.gmra.mxu2 %vm569_vm0, %v2196_v26 }
  0x63   : > { %2139 = vmatmul.msk.bf16.gmra.mxu3 %vm569_vm0, %v2213_v27 }
  0x70   : > { %1884 = vmatmul.msk.bf16.gmra.mxu0 %vm569_vm0, %v2180_v28 }
  0x71   : > { %1968 = vmatmul.msk.bf16.gmra.mxu1 %vm569_vm0, %v2163_v29 }
  0x72   : > { %2054 = vmatmul.msk.bf16.gmra.mxu2 %vm569_vm0, %v2197_v30 }
  0x73   : > { %2140 = vmatmul.msk.bf16.gmra.mxu3 %vm569_vm0, %v2214_v31 }
  0x80   : > { %1885 = vmatmul.msk.bf16.gmra.mxu0 %vm569_vm0, %v2181_v32 }
  0x81   : > { %1969 = vmatmul.msk.bf16.gmra.mxu1 %vm569_vm0, %v2164_v33 }
  0x82   : > { %2055 = vmatmul.msk.bf16.gmra.mxu2 %vm569_vm0, %v2198_v34 }
  0x83   : > { %2141 = vmatmul.msk.bf16.gmra.mxu3 %vm569_vm0, %v2215_v35 }
  0x8d   : > { %v627_v38 = vpop.f32.mrf.mxu0 }
  0x8e   : > { %v850_v39 = vpop.f32.mrf.mxu1 }
  0x8f   : > { %v851_v42 = vadd.f32 %v850_v39, %v627_v38  ;;  %v2185_v39 = vld [vmem:[%s2352_s15 + $0x58] sm:$0xff] }
  0x90   : > { %1886 = vmatmul.msk.bf16.gmra.mxu0 %vm569_vm0, %v2182_v36 }
  0x91   : > { %1970 = vmatmul.msk.bf16.gmra.mxu1 %vm569_vm0, %v2165_v37 }
  0x92   : > { %2056 = vmatmul.msk.bf16.gmra.mxu2 %vm569_vm0, %v2199_v40  ;;  %v2168_v40 = vld [vmem:[%s2358_s18 + $0x58] sm:$0xff] }
  0x93   : > { %2142 = vmatmul.msk.bf16.gmra.mxu3 %vm569_vm0, %v2216_v41 }
  0x95   : > { %v1108_v43 = vpop.f32.mrf.mxu2  ;;  %v629_v47 = vpop.f32.mrf.mxu0 }
  0x96   : > { %v1398_v44 = vpop.f32.mrf.mxu3  ;;  %v1188_v46 = vadd.f32 %v1108_v43, %v851_v42  ;;  %v852_v48 = vpop.f32.mrf.mxu1 }
  0x97   : > { %v853_v52 = vadd.f32 %v852_v48, %v629_v47  ;;  %v2219_v47 = vld [vmem:[%s2372_s28 + $0x58] sm:$0xff] }
  0x98   : > { %v1478_v49 = vadd.f32 %v1398_v44, %v1188_v46  ;;  %v2202_v46 = vld [vmem:[%s2366_s25 + $0x58] sm:$0xff] }
  0x9a   : > { %v1514_v50 = vadd.f32 %v2449_v45, %v1478_v49 }
  0x9c   : > { %v1546_v51 = vmax.f32 %v1514_v50, 0.0 }
  0x9d   : > { %v1110_v53 = vpop.f32.mrf.mxu2  ;;  %v632_v59 = vpop.f32.mrf.mxu0 }
  0x9e   : > { %v1400_v54 = vpop.f32.mrf.mxu3  ;;  %v1578_v57 = vpack.c.bf16 %v1546_v51, %v1546_v51  ;;  %v1189_v58 = vadd.f32 %v1110_v53, %v853_v52  ;;  %v855_v60 = vpop.f32.mrf.mxu1 }
  0x9f   : > { %v856_v1 = vadd.f32 %v855_v60, %v632_v59 }
  0xa0   : > { %1611 = vst.msk [vmem:[%s2456_s10] sm:$0xf] %vm1610_vm1, %v1578_v57  ;;  %v1479_v63 = vadd.f32 %v1400_v54, %v1189_v58  ;;  %1887 = vmatmul.msk.bf16.gmra.mxu0 %vm569_vm0, %v2183_v55 }
  0xa1   : > { %1971 = vmatmul.msk.bf16.gmra.mxu1 %vm569_vm0, %v2166_v56 }
  0xa2   : > { %v1515_v0 = vadd.f32 %v2449_v45, %v1479_v63  ;;  %2057 = vmatmul.msk.bf16.gmra.mxu2 %vm569_vm0, %v2200_v61 }
  0xa3   : > { %2143 = vmatmul.msk.bf16.gmra.mxu3 %vm569_vm0, %v2217_v62 }
  0xa4   : > { %v1547_v2 = vmax.f32 %v1515_v0, 0.0  ;;  %v2186_v0 = vld [vmem:[%s2352_s15 + $0x60] sm:$0xff] }
  0xa5   : > { %v1113_v3 = vpop.f32.mrf.mxu2  ;;  %v634_v7 = vpop.f32.mrf.mxu0 }
  0xa6   : > { %v1403_v4 = vpop.f32.mrf.mxu3  ;;  %v1579_v5 = vpack.c.bf16 %v1547_v2, %v1547_v2  ;;  %v1190_v6 = vadd.f32 %v1113_v3, %v856_v1  ;;  %v857_v8 = vpop.f32.mrf.mxu1  ;;  %v2169_v1 = vld [vmem:[%s2358_s18 + $0x60] sm:$0xff] }
  0xa7   : > { %v858_v12 = vadd.f32 %v857_v8, %v634_v7  ;;  %v2220_v7 = vld [vmem:[%s2372_s28 + $0x60] sm:$0xff] }
  0xa8   : > { %1612 = vst.msk [vmem:[%s2456_s10 + $0x4] sm:$0xf] %vm1610_vm1, %v1579_v5  ;;  %v1480_v9 = vadd.f32 %v1403_v4, %v1190_v6  ;;  %v2203_v6 = vld [vmem:[%s2366_s25 + $0x60] sm:$0xff] }
  0xaa   : > { %v1516_v10 = vadd.f32 %v2449_v45, %v1480_v9 }
  0xac   : > { %v1548_v11 = vmax.f32 %v1516_v10, 0.0 }
  0xad   : > { %v1115_v13 = vpop.f32.mrf.mxu2  ;;  %v637_v19 = vpop.f32.mrf.mxu0 }
  0xae   : > { %v1405_v14 = vpop.f32.mrf.mxu3  ;;  %v1580_v17 = vpack.c.bf16 %v1548_v11, %v1548_v11  ;;  %v1191_v18 = vadd.f32 %v1115_v13, %v858_v12  ;;  %v860_v20 = vpop.f32.mrf.mxu1 }
  0xaf   : > { %v861_v25 = vadd.f32 %v860_v20, %v637_v19 }
  0xb0   : > { %1613 = vst.msk [vmem:[%s2456_s10 + $0x8] sm:$0xf] %vm1610_vm1, %v1580_v17  ;;  %v1481_v23 = vadd.f32 %v1405_v14, %v1191_v18  ;;  %1888 = vmatmul.msk.bf16.gmra.mxu0 %vm569_vm0, %v2184_v15 }
  0xb1   : > { %1972 = vmatmul.msk.bf16.gmra.mxu1 %vm569_vm0, %v2167_v16 }
  0xb2   : > { %v1517_v24 = vadd.f32 %v2449_v45, %v1481_v23  ;;  %2058 = vmatmul.msk.bf16.gmra.mxu2 %vm569_vm0, %v2201_v21 }
  0xb3   : > { %2144 = vmatmul.msk.bf16.gmra.mxu3 %vm569_vm0, %v2218_v22 }
  0xb4   : > { %v1549_v26 = vmax.f32 %v1517_v24, 0.0  ;;  %v2187_v24 = vld [vmem:[%s2352_s15 + $0x68] sm:$0xff] }
  0xb5   : > { %v1118_v27 = vpop.f32.mrf.mxu2  ;;  %v639_v31 = vpop.f32.mrf.mxu0 }
  0xb6   : > { %v1408_v28 = vpop.f32.mrf.mxu3  ;;  %v1581_v29 = vpack.c.bf16 %v1549_v26, %v1549_v26  ;;  %v1192_v30 = vadd.f32 %v1118_v27, %v861_v25  ;;  %v862_v32 = vpop.f32.mrf.mxu1  ;;  %v2170_v25 = vld [vmem:[%s2358_s18 + $0x68] sm:$0xff] }
  0xb7   : > { %v863_v36 = vadd.f32 %v862_v32, %v639_v31  ;;  %v2221_v31 = vld [vmem:[%s2372_s28 + $0x68] sm:$0xff] }
  0xb8   : > { %1614 = vst.msk [vmem:[%s2456_s10 + $0xc] sm:$0xf] %vm1610_vm1, %v1581_v29  ;;  %v1482_v33 = vadd.f32 %v1408_v28, %v1192_v30  ;;  %v2204_v30 = vld [vmem:[%s2366_s25 + $0x68] sm:$0xff] }
  0xba   : > { %v1518_v34 = vadd.f32 %v2449_v45, %v1482_v33 }
  0xbc   : > { %v1550_v35 = vmax.f32 %v1518_v34, 0.0 }
  0xbd   : > { %v1120_v37 = vpop.f32.mrf.mxu2  ;;  %v642_v43 = vpop.f32.mrf.mxu0 }
  0xbe   : > { %v1410_v38 = vpop.f32.mrf.mxu3  ;;  %v1582_v41 = vpack.c.bf16 %v1550_v35, %v1550_v35  ;;  %v1193_v42 = vadd.f32 %v1120_v37, %v863_v36  ;;  %v865_v44 = vpop.f32.mrf.mxu1 }
  0xbf   : > { %v866_v50 = vadd.f32 %v865_v44, %v642_v43 }
  0xc0   : > { %1615 = vst.msk [vmem:[%s2456_s10 + $0x10] sm:$0xf] %vm1610_vm1, %v1582_v41  ;;  %v1483_v48 = vadd.f32 %v1410_v38, %v1193_v42  ;;  %1889 = vmatmul.msk.bf16.gmra.mxu0 %vm569_vm0, %v2185_v39 }
  0xc1   : > { %1973 = vmatmul.msk.bf16.gmra.mxu1 %vm569_vm0, %v2168_v40 }
  0xc2   : > { %v1519_v49 = vadd.f32 %v2449_v45, %v1483_v48  ;;  %2059 = vmatmul.msk.bf16.gmra.mxu2 %vm569_vm0, %v2202_v46 }
  0xc3   : > { %2145 = vmatmul.msk.bf16.gmra.mxu3 %vm569_vm0, %v2219_v47 }
  0xc4   : > { %v1551_v51 = vmax.f32 %v1519_v49, 0.0  ;;  %v2188_v49 = vld [vmem:[%s2352_s15 + $0x70] sm:$0xff] }
  0xc5   : > { %v1123_v52 = vpop.f32.mrf.mxu2  ;;  %v644_v56 = vpop.f32.mrf.mxu0 }
  0xc6   : > { %v1413_v53 = vpop.f32.mrf.mxu3  ;;  %v1583_v54 = vpack.c.bf16 %v1551_v51, %v1551_v51  ;;  %v1194_v55 = vadd.f32 %v1123_v52, %v866_v50  ;;  %v867_v57 = vpop.f32.mrf.mxu1  ;;  %v2171_v50 = vld [vmem:[%s2358_s18 + $0x70] sm:$0xff] }
  0xc7   : > { %v868_v61 = vadd.f32 %v867_v57, %v644_v56  ;;  %v2222_v56 = vld [vmem:[%s2372_s28 + $0x70] sm:$0xff] }
  0xc8   : > { %1616 = vst.msk [vmem:[%s2456_s10 + $0x14] sm:$0xf] %vm1610_vm1, %v1583_v54  ;;  %v1484_v58 = vadd.f32 %v1413_v53, %v1194_v55  ;;  %v2205_v55 = vld [vmem:[%s2366_s25 + $0x70] sm:$0xff] }
  0xca   : > { %v1520_v59 = vadd.f32 %v2449_v45, %v1484_v58 }
  0xcc   : > { %v1552_v60 = vmax.f32 %v1520_v59, 0.0 }
  0xcd   : > { %v1125_v62 = vpop.f32.mrf.mxu2  ;;  %v647_v4 = vpop.f32.mrf.mxu0 }
  0xce   : > { %v1415_v63 = vpop.f32.mrf.mxu3  ;;  %v1584_v2 = vpack.c.bf16 %v1552_v60, %v1552_v60  ;;  %v1195_v3 = vadd.f32 %v1125_v62, %v868_v61  ;;  %v870_v5 = vpop.f32.mrf.mxu1 }
  0xcf   : > { %v871_v10 = vadd.f32 %v870_v5, %v647_v4 }
  0xd0   : > { %1617 = vst.msk [vmem:[%s2456_s10 + $0x18] sm:$0xf] %vm1610_vm1, %v1584_v2  ;;  %v1485_v8 = vadd.f32 %v1415_v63, %v1195_v3  ;;  %1890 = vmatmul.msk.bf16.gmra.mxu0 %vm569_vm0, %v2186_v0 }
  0xd1   : > { %1974 = vmatmul.msk.bf16.gmra.mxu1 %vm569_vm0, %v2169_v1 }
  0xd2   : > { %v1521_v9 = vadd.f32 %v2449_v45, %v1485_v8  ;;  %2060 = vmatmul.msk.bf16.gmra.mxu2 %vm569_vm0, %v2203_v6 }
  0xd3   : > { %2146 = vmatmul.msk.bf16.gmra.mxu3 %vm569_vm0, %v2220_v7 }
  0xd4   : > { %v1553_v11 = vmax.f32 %v1521_v9, 0.0  ;;  %v2189_v9 = vld [vmem:[%s2352_s15 + $0x78] sm:$0xff] }
  0xd5   : > { %v1128_v12 = vpop.f32.mrf.mxu2  ;;  %v649_v16 = vpop.f32.mrf.mxu0 }
  0xd6   : > { %v1418_v13 = vpop.f32.mrf.mxu3  ;;  %v1585_v14 = vpack.c.bf16 %v1553_v11, %v1553_v11  ;;  %v1196_v15 = vadd.f32 %v1128_v12, %v871_v10  ;;  %v872_v17 = vpop.f32.mrf.mxu1  ;;  %v2172_v10 = vld [vmem:[%s2358_s18 + $0x78] sm:$0xff] }
  0xd7   : > { %v873_v21 = vadd.f32 %v872_v17, %v649_v16  ;;  %v2223_v16 = vld [vmem:[%s2372_s28 + $0x78] sm:$0xff] }
  0xd8   : > { %1618 = vst.msk [vmem:[%s2456_s10 + $0x1c] sm:$0xf] %vm1610_vm1, %v1585_v14  ;;  %v1486_v18 = vadd.f32 %v1418_v13, %v1196_v15  ;;  %v2206_v15 = vld [vmem:[%s2366_s25 + $0x78] sm:$0xff] }
  0xda   : > { %v1522_v19 = vadd.f32 %v2449_v45, %v1486_v18 }
  0xdc   : > { %v1554_v20 = vmax.f32 %v1522_v19, 0.0 }
  0xdd   : > { %v1130_v22 = vpop.f32.mrf.mxu2  ;;  %v652_v28 = vpop.f32.mrf.mxu0 }
  0xde   : > { %v1420_v23 = vpop.f32.mrf.mxu3  ;;  %v1586_v26 = vpack.c.bf16 %v1554_v20, %v1554_v20  ;;  %v1197_v27 = vadd.f32 %v1130_v22, %v873_v21  ;;  %v875_v29 = vpop.f32.mrf.mxu1 }
  0xdf   : > { %v876_v34 = vadd.f32 %v875_v29, %v652_v28 }
  0xe0   : > { %1619 = vst.msk [vmem:[%s2456_s10 + $0x20] sm:$0xf] %vm1610_vm1, %v1586_v26  ;;  %v1487_v32 = vadd.f32 %v1420_v23, %v1197_v27  ;;  %1891 = vmatmul.msk.bf16.gmra.mxu0 %vm569_vm0, %v2187_v24 }
  0xe1   : > { %1975 = vmatmul.msk.bf16.gmra.mxu1 %vm569_vm0, %v2170_v25 }
  0xe2   : > { %v1523_v33 = vadd.f32 %v2449_v45, %v1487_v32  ;;  %2061 = vmatmul.msk.bf16.gmra.mxu2 %vm569_vm0, %v2204_v30 }
  0xe3   : > { %2147 = vmatmul.msk.bf16.gmra.mxu3 %vm569_vm0, %v2221_v31 }
  0xe4   : > { %v1555_v35 = vmax.f32 %v1523_v33, 0.0 }
  0xe5   : > { %v1133_v36 = vpop.f32.mrf.mxu2  ;;  %v654_v40 = vpop.f32.mrf.mxu0 }
  0xe6   : > { %v1423_v37 = vpop.f32.mrf.mxu3  ;;  %v1587_v38 = vpack.c.bf16 %v1555_v35, %v1555_v35  ;;  %v1198_v39 = vadd.f32 %v1133_v36, %v876_v34  ;;  %v877_v41 = vpop.f32.mrf.mxu1 }
  0xe7   : > { %v878_v46 = vadd.f32 %v877_v41, %v654_v40 }
  0xe8   : > { %1620 = vst.msk [vmem:[%s2456_s10 + $0x24] sm:$0xf] %vm1610_vm1, %v1587_v38  ;;  %v1488_v42 = vadd.f32 %v1423_v37, %v1198_v39 }
  0xea   : > { %v1524_v43 = vadd.f32 %v2449_v45, %v1488_v42 }
  0xec   : > { %v1556_v44 = vmax.f32 %v1524_v43, 0.0 }
  0xed   : > { %v1135_v47 = vpop.f32.mrf.mxu2  ;;  %v657_v53 = vpop.f32.mrf.mxu0 }
  0xee   : > { %v1425_v48 = vpop.f32.mrf.mxu3  ;;  %v1588_v51 = vpack.c.bf16 %v1556_v44, %v1556_v44  ;;  %v1199_v52 = vadd.f32 %v1135_v47, %v878_v46  ;;  %v880_v54 = vpop.f32.mrf.mxu1 }
  0xef   : > { %v881_v59 = vadd.f32 %v880_v54, %v657_v53 }
  0xf0   : > { %1621 = vst.msk [vmem:[%s2456_s10 + $0x28] sm:$0xf] %vm1610_vm1, %v1588_v51  ;;  %v1489_v57 = vadd.f32 %v1425_v48, %v1199_v52  ;;  %1892 = vmatmul.msk.bf16.gmra.mxu0 %vm569_vm0, %v2188_v49 }
  0xf1   : > { %1976 = vmatmul.msk.bf16.gmra.mxu1 %vm569_vm0, %v2171_v50 }
  0xf2   : > { %v1525_v58 = vadd.f32 %v2449_v45, %v1489_v57  ;;  %2062 = vmatmul.msk.bf16.gmra.mxu2 %vm569_vm0, %v2205_v55 }
  0xf3   : > { %2148 = vmatmul.msk.bf16.gmra.mxu3 %vm569_vm0, %v2222_v56 }
  0xf4   : > { %v1557_v60 = vmax.f32 %v1525_v58, 0.0 }
  0xf5   : > { %v1138_v61 = vpop.f32.mrf.mxu2  ;;  %v659_v1 = vpop.f32.mrf.mxu0 }
  0xf6   : > { %v1428_v62 = vpop.f32.mrf.mxu3  ;;  %v1589_v63 = vpack.c.bf16 %v1557_v60, %v1557_v60  ;;  %v1200_v0 = vadd.f32 %v1138_v61, %v881_v59  ;;  %v882_v2 = vpop.f32.mrf.mxu1 }
  0xf7   : > { %v883_v6 = vadd.f32 %v882_v2, %v659_v1 }
  0xf8   : > { %1622 = vst.msk [vmem:[%s2456_s10 + $0x2c] sm:$0xf] %vm1610_vm1, %v1589_v63  ;;  %v1490_v3 = vadd.f32 %v1428_v62, %v1200_v0 }
  0xfa   : > { %v1526_v4 = vadd.f32 %v2449_v45, %v1490_v3 }
  0xfc   : > { %v1558_v5 = vmax.f32 %v1526_v4, 0.0 }
  0xfd   : > { %v1140_v7 = vpop.f32.mrf.mxu2  ;;  %v662_v13 = vpop.f32.mrf.mxu0 }
  0xfe   : > { %v1430_v8 = vpop.f32.mrf.mxu3  ;;  %v1590_v11 = vpack.c.bf16 %v1558_v5, %v1558_v5  ;;  %v1201_v12 = vadd.f32 %v1140_v7, %v883_v6  ;;  %v885_v14 = vpop.f32.mrf.mxu1 }
  0xff   : > { %v886_v19 = vadd.f32 %v885_v14, %v662_v13 }
 0x100   : > { %1623 = vst.msk [vmem:[%s2456_s10 + $0x30] sm:$0xf] %vm1610_vm1, %v1590_v11  ;;  %v1491_v17 = vadd.f32 %v1430_v8, %v1201_v12  ;;  %1893 = vmatmul.msk.bf16.gmra.mxu0 %vm569_vm0, %v2189_v9 }
 0x101   : > { %1977 = vmatmul.msk.bf16.gmra.mxu1 %vm569_vm0, %v2172_v10 }
 0x102   : > { %v1527_v18 = vadd.f32 %v2449_v45, %v1491_v17  ;;  %2063 = vmatmul.msk.bf16.gmra.mxu2 %vm569_vm0, %v2206_v15 }
 0x103   : > { %2149 = vmatmul.msk.bf16.gmra.mxu3 %vm569_vm0, %v2223_v16 }
 0x104   : > { %v1559_v20 = vmax.f32 %v1527_v18, 0.0 }
 0x105   : > { %v1143_v21 = vpop.f32.mrf.mxu2  ;;  %v664_v25 = vpop.f32.mrf.mxu0 }
 0x106   : > { %v1433_v22 = vpop.f32.mrf.mxu3  ;;  %v1591_v23 = vpack.c.bf16 %v1559_v20, %v1559_v20  ;;  %v1202_v24 = vadd.f32 %v1143_v21, %v886_v19  ;;  %v887_v26 = vpop.f32.mrf.mxu1 }
 0x107   : > { %v888_v30 = vadd.f32 %v887_v26, %v664_v25 }
 0x108   : > { %1624 = vst.msk [vmem:[%s2456_s10 + $0x34] sm:$0xf] %vm1610_vm1, %v1591_v23  ;;  %v1492_v27 = vadd.f32 %v1433_v22, %v1202_v24 }
 0x10a   : > { %v1528_v28 = vadd.f32 %v2449_v45, %v1492_v27 }
 0x10c   : > { %v1560_v29 = vmax.f32 %v1528_v28, 0.0 }
 0x10d   : > { %v1145_v31 = vpop.f32.mrf.mxu2  ;;  %v667_v35 = vpop.f32.mrf.mxu0 }
 0x10e   : > { %v1435_v32 = vpop.f32.mrf.mxu3  ;;  %v1592_v33 = vpack.c.bf16 %v1560_v29, %v1560_v29  ;;  %v1203_v34 = vadd.f32 %v1145_v31, %v888_v30  ;;  %v890_v36 = vpop.f32.mrf.mxu1 }
 0x10f   : > { %v891_v39 = vadd.f32 %v890_v36, %v667_v35 }
 0x110   : > { %1625 = vst.msk [vmem:[%s2456_s10 + $0x38] sm:$0xf] %vm1610_vm1, %v1592_v33  ;;  %v1493_v37 = vadd.f32 %v1435_v32, %v1203_v34 }
 0x112   : > { %v1529_v38 = vadd.f32 %v2449_v45, %v1493_v37 }
 0x114   : > { %v1561_v40 = vmax.f32 %v1529_v38, 0.0 }
 0x115   : > { %v1148_v41 = vpop.f32.mrf.mxu2  ;;  %v669_v46 = vpop.f32.mrf.mxu0 }
 0x116   : > { %v1438_v42 = vpop.f32.mrf.mxu3  ;;  %v1593_v43 = vpack.c.bf16 %v1561_v40, %v1561_v40  ;;  %v1204_v44 = vadd.f32 %v1148_v41, %v891_v39  ;;  %v892_v47 = vpop.f32.mrf.mxu1 }
 0x117   : > { %v893_v51 = vadd.f32 %v892_v47, %v669_v46 }
 0x118   : > { %1626 = vst.msk [vmem:[%s2456_s10 + $0x3c] sm:$0xf] %vm1610_vm1, %v1593_v43  ;;  %v1494_v48 = vadd.f32 %v1438_v42, %v1204_v44 }
 0x11a   : > { %v1530_v49 = vadd.f32 %v2449_v45, %v1494_v48 }
 0x11c   : > { %v1562_v50 = vmax.f32 %v1530_v49, 0.0 }
 0x11d   : > { %v1150_v52 = vpop.f32.mrf.mxu2  ;;  %v672_v56 = vpop.f32.mrf.mxu0 }
 0x11e   : > { %v1440_v53 = vpop.f32.mrf.mxu3  ;;  %v1594_v54 = vpack.c.bf16 %v1562_v50, %v1562_v50  ;;  %v1205_v55 = vadd.f32 %v1150_v52, %v893_v51  ;;  %v895_v57 = vpop.f32.mrf.mxu1 }
 0x11f   : > { %v896_v60 = vadd.f32 %v895_v57, %v672_v56 }
 0x120   : > { %1627 = vst.msk [vmem:[%s2456_s10 + $0x40] sm:$0xf] %vm1610_vm1, %v1594_v54  ;;  %v1495_v58 = vadd.f32 %v1440_v53, %v1205_v55 }
 0x122   : > { %v1531_v59 = vadd.f32 %v2449_v45, %v1495_v58 }
 0x124   : > { %v1563_v61 = vmax.f32 %v1531_v59, 0.0 }
 0x125   : > { %v1153_v62 = vpop.f32.mrf.mxu2  ;;  %v674_v2 = vpop.f32.mrf.mxu0 }
 0x126   : > { %v1443_v63 = vpop.f32.mrf.mxu3  ;;  %v1595_v0 = vpack.c.bf16 %v1563_v61, %v1563_v61  ;;  %v1206_v1 = vadd.f32 %v1153_v62, %v896_v60  ;;  %v897_v3 = vpop.f32.mrf.mxu1 }
 0x127   : > { %v898_v7 = vadd.f32 %v897_v3, %v674_v2 }
 0x128   : > { %1628 = vst.msk [vmem:[%s2456_s10 + $0x44] sm:$0xf] %vm1610_vm1, %v1595_v0  ;;  %v1496_v4 = vadd.f32 %v1443_v63, %v1206_v1 }
 0x12a   : > { %v1532_v5 = vadd.f32 %v2449_v45, %v1496_v4 }
 0x12c   : > { %v1564_v6 = vmax.f32 %v1532_v5, 0.0 }
 0x12d   : > { %v1155_v8 = vpop.f32.mrf.mxu2  ;;  %v677_v12 = vpop.f32.mrf.mxu0 }
 0x12e   : > { %v1445_v9 = vpop.f32.mrf.mxu3  ;;  %v1596_v10 = vpack.c.bf16 %v1564_v6, %v1564_v6  ;;  %v1207_v11 = vadd.f32 %v1155_v8, %v898_v7  ;;  %v900_v13 = vpop.f32.mrf.mxu1 }
 0x12f   : > { %v901_v16 = vadd.f32 %v900_v13, %v677_v12 }
 0x130   : > { %1629 = vst.msk [vmem:[%s2456_s10 + $0x48] sm:$0xf] %vm1610_vm1, %v1596_v10  ;;  %v1497_v14 = vadd.f32 %v1445_v9, %v1207_v11 }
 0x132   : > { %v1533_v15 = vadd.f32 %v2449_v45, %v1497_v14 }
 0x134   : > { %v1565_v17 = vmax.f32 %v1533_v15, 0.0 }
 0x135   : > { %v1158_v18 = vpop.f32.mrf.mxu2  ;;  %v679_v22 = vpop.f32.mrf.mxu0 }
 0x136   : > { %v1448_v19 = vpop.f32.mrf.mxu3  ;;  %v1597_v20 = vpack.c.bf16 %v1565_v17, %v1565_v17  ;;  %v1208_v21 = vadd.f32 %v1158_v18, %v901_v16  ;;  %v902_v23 = vpop.f32.mrf.mxu1 }
 0x137   : > { %v903_v27 = vadd.f32 %v902_v23, %v679_v22 }
 0x138   : > { %1630 = vst.msk [vmem:[%s2456_s10 + $0x4c] sm:$0xf] %vm1610_vm1, %v1597_v20  ;;  %v1498_v24 = vadd.f32 %v1448_v19, %v1208_v21 }
 0x13a   : > { %v1534_v25 = vadd.f32 %v2449_v45, %v1498_v24 }
 0x13c   : > { %v1566_v26 = vmax.f32 %v1534_v25, 0.0 }
 0x13d   : > { %v1160_v28 = vpop.f32.mrf.mxu2  ;;  %v682_v32 = vpop.f32.mrf.mxu0 }
 0x13e   : > { %v1450_v29 = vpop.f32.mrf.mxu3  ;;  %v1598_v30 = vpack.c.bf16 %v1566_v26, %v1566_v26  ;;  %v1209_v31 = vadd.f32 %v1160_v28, %v903_v27  ;;  %v905_v33 = vpop.f32.mrf.mxu1 }
 0x13f   : > { %v906_v36 = vadd.f32 %v905_v33, %v682_v32 }
 0x140   : > { %1631 = vst.msk [vmem:[%s2456_s10 + $0x50] sm:$0xf] %vm1610_vm1, %v1598_v30  ;;  %v1499_v34 = vadd.f32 %v1450_v29, %v1209_v31 }
 0x142   : > { %v1535_v35 = vadd.f32 %v2449_v45, %v1499_v34 }
 0x144   : > { %v1567_v37 = vmax.f32 %v1535_v35, 0.0 }
 0x145   : > { %v1163_v38 = vpop.f32.mrf.mxu2  ;;  %v684_v42 = vpop.f32.mrf.mxu0 }
 0x146   : > { %v1453_v39 = vpop.f32.mrf.mxu3  ;;  %v1599_v40 = vpack.c.bf16 %v1567_v37, %v1567_v37  ;;  %v1210_v41 = vadd.f32 %v1163_v38, %v906_v36  ;;  %v907_v43 = vpop.f32.mrf.mxu1 }
 0x147   : > { %v908_v48 = vadd.f32 %v907_v43, %v684_v42 }
 0x148   : > { %1632 = vst.msk [vmem:[%s2456_s10 + $0x54] sm:$0xf] %vm1610_vm1, %v1599_v40  ;;  %v1500_v44 = vadd.f32 %v1453_v39, %v1210_v41 }
 0x14a   : > { %v1536_v46 = vadd.f32 %v2449_v45, %v1500_v44 }
 0x14c   : > { %v1568_v47 = vmax.f32 %v1536_v46, 0.0 }
 0x14d   : > { %v1165_v49 = vpop.f32.mrf.mxu2  ;;  %v687_v53 = vpop.f32.mrf.mxu0 }
 0x14e   : > { %v1455_v50 = vpop.f32.mrf.mxu3  ;;  %v1600_v51 = vpack.c.bf16 %v1568_v47, %v1568_v47  ;;  %v1211_v52 = vadd.f32 %v1165_v49, %v908_v48  ;;  %v910_v54 = vpop.f32.mrf.mxu1 }
 0x14f   : > { %v911_v57 = vadd.f32 %v910_v54, %v687_v53 }
 0x150   : > { %1633 = vst.msk [vmem:[%s2456_s10 + $0x58] sm:$0xf] %vm1610_vm1, %v1600_v51  ;;  %v1501_v55 = vadd.f32 %v1455_v50, %v1211_v52 }
 0x152   : > { %v1537_v56 = vadd.f32 %v2449_v45, %v1501_v55 }
 0x154   : > { %v1569_v58 = vmax.f32 %v1537_v56, 0.0 }
 0x155   : > { %v1168_v59 = vpop.f32.mrf.mxu2  ;;  %v689_v63 = vpop.f32.mrf.mxu0 }
 0x156   : > { %v1458_v60 = vpop.f32.mrf.mxu3  ;;  %v1601_v61 = vpack.c.bf16 %v1569_v58, %v1569_v58  ;;  %v1212_v62 = vadd.f32 %v1168_v59, %v911_v57  ;;  %v912_v0 = vpop.f32.mrf.mxu1 }
 0x157   : > { %v913_v4 = vadd.f32 %v912_v0, %v689_v63 }
 0x158   : > { %1634 = vst.msk [vmem:[%s2456_s10 + $0x5c] sm:$0xf] %vm1610_vm1, %v1601_v61  ;;  %v1502_v1 = vadd.f32 %v1458_v60, %v1212_v62 }
 0x15a   : > { %v1538_v2 = vadd.f32 %v2449_v45, %v1502_v1 }
 0x15c   : > { %v1570_v3 = vmax.f32 %v1538_v2, 0.0 }
 0x15d   : > { %v1170_v5 = vpop.f32.mrf.mxu2  ;;  %v692_v9 = vpop.f32.mrf.mxu0 }
 0x15e   : > { %v1460_v6 = vpop.f32.mrf.mxu3  ;;  %v1602_v7 = vpack.c.bf16 %v1570_v3, %v1570_v3  ;;  %v1213_v8 = vadd.f32 %v1170_v5, %v913_v4  ;;  %v915_v10 = vpop.f32.mrf.mxu1 }
 0x15f   : > { %v916_v13 = vadd.f32 %v915_v10, %v692_v9 }
 0x160   : > { %1635 = vst.msk [vmem:[%s2456_s10 + $0x60] sm:$0xf] %vm1610_vm1, %v1602_v7  ;;  %v1503_v11 = vadd.f32 %v1460_v6, %v1213_v8 }
 0x162   : > { %v1539_v12 = vadd.f32 %v2449_v45, %v1503_v11 }
 0x164   : > { %v1571_v14 = vmax.f32 %v1539_v12, 0.0 }
 0x165   : > { %v1173_v15 = vpop.f32.mrf.mxu2  ;;  %v694_v19 = vpop.f32.mrf.mxu0 }
 0x166   : > { %v1463_v16 = vpop.f32.mrf.mxu3  ;;  %v1603_v17 = vpack.c.bf16 %v1571_v14, %v1571_v14  ;;  %v1214_v18 = vadd.f32 %v1173_v15, %v916_v13  ;;  %v917_v20 = vpop.f32.mrf.mxu1 }
 0x167   : > { %v918_v24 = vadd.f32 %v917_v20, %v694_v19 }
 0x168   : > { %1636 = vst.msk [vmem:[%s2456_s10 + $0x64] sm:$0xf] %vm1610_vm1, %v1603_v17  ;;  %v1504_v21 = vadd.f32 %v1463_v16, %v1214_v18 }
 0x16a   : > { %v1540_v22 = vadd.f32 %v2449_v45, %v1504_v21 }
 0x16c   : > { %v1572_v23 = vmax.f32 %v1540_v22, 0.0 }
 0x16d   : > { %v1175_v25 = vpop.f32.mrf.mxu2  ;;  %v697_v29 = vpop.f32.mrf.mxu0 }
 0x16e   : > { %v1465_v26 = vpop.f32.mrf.mxu3  ;;  %v1604_v27 = vpack.c.bf16 %v1572_v23, %v1572_v23  ;;  %v1215_v28 = vadd.f32 %v1175_v25, %v918_v24  ;;  %v920_v30 = vpop.f32.mrf.mxu1 }
 0x16f   : > { %v921_v33 = vadd.f32 %v920_v30, %v697_v29 }
 0x170   : > { %1637 = vst.msk [vmem:[%s2456_s10 + $0x68] sm:$0xf] %vm1610_vm1, %v1604_v27  ;;  %v1505_v31 = vadd.f32 %v1465_v26, %v1215_v28 }
 0x172   : > { %v1541_v32 = vadd.f32 %v2449_v45, %v1505_v31 }
 0x174   : > { %v1573_v34 = vmax.f32 %v1541_v32, 0.0 }
 0x175   : > { %v1178_v35 = vpop.f32.mrf.mxu2  ;;  %v699_v39 = vpop.f32.mrf.mxu0 }
 0x176   : > { %v1468_v36 = vpop.f32.mrf.mxu3  ;;  %v1605_v37 = vpack.c.bf16 %v1573_v34, %v1573_v34  ;;  %v1216_v38 = vadd.f32 %v1178_v35, %v921_v33  ;;  %v922_v40 = vpop.f32.mrf.mxu1 }
 0x177   : > { %v923_v44 = vadd.f32 %v922_v40, %v699_v39 }
 0x178   : > { %1638 = vst.msk [vmem:[%s2456_s10 + $0x6c] sm:$0xf] %vm1610_vm1, %v1605_v37  ;;  %v1506_v41 = vadd.f32 %v1468_v36, %v1216_v38 }
 0x17a   : > { %v1542_v42 = vadd.f32 %v2449_v45, %v1506_v41 }
 0x17c   : > { %v1574_v43 = vmax.f32 %v1542_v42, 0.0 }
 0x17d   : > { %v1180_v46 = vpop.f32.mrf.mxu2  ;;  %v702_v50 = vpop.f32.mrf.mxu0 }
 0x17e   : > { %v1470_v47 = vpop.f32.mrf.mxu3  ;;  %v1606_v48 = vpack.c.bf16 %v1574_v43, %v1574_v43  ;;  %v1217_v49 = vadd.f32 %v1180_v46, %v923_v44  ;;  %v925_v51 = vpop.f32.mrf.mxu1 }
 0x17f   : > { %v926_v54 = vadd.f32 %v925_v51, %v702_v50 }
 0x180   : > { %1639 = vst.msk [vmem:[%s2456_s10 + $0x70] sm:$0xf] %vm1610_vm1, %v1606_v48  ;;  %v1507_v52 = vadd.f32 %v1470_v47, %v1217_v49 }
 0x182   : > { %v1543_v53 = vadd.f32 %v2449_v45, %v1507_v52 }
 0x184   : > { %v1575_v55 = vmax.f32 %v1543_v53, 0.0 }
 0x185   : > { %v1183_v56 = vpop.f32.mrf.mxu2  ;;  %v704_v61 = vpop.f32.mrf.mxu0 }
 0x186   : > { %v1473_v57 = vpop.f32.mrf.mxu3  ;;  %v1607_v58 = vpack.c.bf16 %v1575_v55, %v1575_v55  ;;  %v1218_v59 = vadd.f32 %v1183_v56, %v926_v54  ;;  %v927_v62 = vpop.f32.mrf.mxu1 }
 0x187   : > { %v928_v1 = vadd.f32 %v927_v62, %v704_v61 }
 0x188   : > { %1640 = vst.msk [vmem:[%s2456_s10 + $0x74] sm:$0xf] %vm1610_vm1, %v1607_v58  ;;  %v1508_v60 = vadd.f32 %v1473_v57, %v1218_v59 }
 0x18a   : > { %v1544_v63 = vadd.f32 %v2449_v45, %v1508_v60 }
 0x18c   : > { %v1576_v0 = vmax.f32 %v1544_v63, 0.0 }
 0x18d   : > { %v1185_v2 = vpop.f32.mrf.mxu2 }
 0x18e   : > { %v1608_v3 = vpack.c.bf16 %v1576_v0, %v1576_v0  ;;  %v1219_v4 = vadd.f32 %v1185_v2, %v928_v1  ;;  %v1475_v5 = vpop.f32.mrf.mxu3 }
 0x190   : > { %1641 = vst.msk [vmem:[%s2456_s10 + $0x78] sm:$0xf] %vm1610_vm1, %v1608_v3  ;;  %v1509_v6 = vadd.f32 %v1475_v5, %v1219_v4 }
 0x192   : > { %v1545_v7 = vadd.f32 %v2449_v45, %v1509_v6 }
 0x194   : > { %v1577_v8 = vmax.f32 %v1545_v7, 0.0 }
 0x196   : > { %v1609_v9 = vpack.c.bf16 %v1577_v8, %v1577_v8 }
 0x198   : > { %1642 = vst.msk [vmem:[%s2456_s10 + $0x7c] sm:$0xf] %vm1610_vm1, %v1609_v9 }
 0x199 PF: > { %s16_s23 = sadd.s32 1, %s2272_s23   ;;  %s2625_s21 = smov %s2268_s22 }
 0x19a   : > { %p13_p5 = scmp.ge.s32.totalorder %s16_s23, 4   ;;  %s2626_s22 = smov %s2628_s24 }
 0x19c   :  { %15 = sbr.rel (!%p13_p5) target bundleno = 2 (0x2), region = 89 }

// kernel: aspp_forward.4
= control target key start
LH: loop header
LB: loop body
LE: loop exit
PB: predicated region body
PF: predicated region fallthrough
CT: control target
= control target key end

     0   :  { %s8470_s18 = smov 0   ;;  %s8472_s19 = smov 0   ;;  %s11542_s0 = inlined_call_operand.vmem [shape: bf16[2,52,56,8], index: 0, kind: input, shape index: {}]   ;;  %s11543_s1 = inlined_call_operand.vmem [shape: bf16[3,9,8,16], index: 1, kind: input, shape index: {}]   ;;  %s11544_s2 = inlined_call_operand.vmem [shape: f32[3,1,16], index: 2, kind: input, shape index: {}]   ;;  %s11545_s3 = inlined_call_operand.vmem [shape: bf16[2,256,16], index: 3, kind: output, shape index: {0}]   ;;  %s11546_s4 = inlined_call_operand.vmem [shape: bf16[2,256,16], index: 4, kind: output, shape index: {1}]   ;;  %s11547_s5 = inlined_call_operand.vmem [shape: bf16[2,256,16], index: 5, kind: output, shape index: {2}]  }
   0x1   :  { %s8474_s20 = smov 0   ;;  %s8476_s21 = smov 0  }
   0x2   :  { %s8478_s22 = smov 0  }
   0x3 LB: > { %s25_s23 = sadd.s32 1, %s8430_s20  ;;  %s28_s24 = sadd.s32 1, %s8434_s21  ;;  %s8438_s22 = sphi %s8478_s22, %s16_s22   ;;  %s8434_s21 = sphi %s8476_s21, %s11558_s21   ;;  %s8430_s20 = sphi %s8474_s20, %s11557_s20   ;;  %s8426_s19 = sphi %s8472_s19, %s11556_s19   ;;  %s8422_s18 = sphi %s8470_s18, %s11555_s18  }
   0x4   : > { %p26_p0 = scmp.ge.s32.totalorder %s25_s23, 2  ;;  %p7134_p1 = scmp.ge.s32.totalorder %s8438_s22, 1 }
   0x5   : > { %p210_p2 = scmp.lt.s32.totalorder %s8438_s22, 5 }
   0x6   : > { %s11560_s23 = smov (%p26_p0, %s25_s23), 0  ;;  %s11562_s24 = smov (!%p26_p0, %s28_s24), %s8434_s21 }
   0x7   : > { %p211_p3 = pnand %p7134_p1, %p210_p2  ;;  %p30_p4 = scmp.ge.s32.totalorder %s11562_s24, 2 }
   0x8   : > { %p260_p5 = scmp.lt.s32.totalorder (!%p211_p3), %s8426_s19, 1  ;;  %s7147_s27 = smul.u32 (!%p211_p3), 224, %s8422_s18 }
   0x9   : > { %s11564_s24 = smov (%p30_p4, %s11562_s24), 0  ;;  %214 = sbr.rel (%p211_p3) target bundleno = 1066 (0x42a), region = 32 }
   0xa   : > { %s7136_s30 = sshll.u32 (!%p211_p3), %s8422_s18, 4 }
   0xb   : > { %p9531_p6 = scmp.lt.s32.totalorder (!%p211_p3), %s7136_s30, 31 }
   0xe   : > { %v408_v0 = vld [vmem:[%s11543_s1] sm:$0xf]  ;;  %vm458_vm0 = vcmask 1043456   ;;  %v7220_v2 = vld [vmem:[%s11543_s1 + $0x4] sm:$0xf]  ;;  %s11566_s19 = smov (!%p260_p5, %s8426_s19), 1 }
   0xf   : > { %v460_v1 = vsel %vm458_vm0, %v408_v0, 0  ;;  %vm349_vm1 = vcmask 1041408   ;;  %v686_v3 = vsel %vm458_vm0, %v7220_v2, 0  ;;  %v7361_v4 = vld [vmem:[%s11543_s1 + $0x10] sm:$0xf]  ;;  %vm350_vm2 = vcmask 1045508  }
  0x10   : > { %8351 = vmatpush.bf16.msra.mxu3 %v460_v1  ;;  %469 = vmatpush.bf16.msra.mxu0 %v460_v1  ;;  %v1380_v5 = vsel %vm458_vm0, %v7361_v4, 0  ;;  %v7245_v6 = vld [vmem:[%s11543_s1 + $0x8] sm:$0xf]  ;;  %s8354_s9 = smul.u32 1456, %s11566_s19  ;;  %v7386_v8 = vld [vmem:[%s11543_s1 + $0x14] sm:$0xf]  ;;  %vm8540_vm3 = vmor %vm349_vm1, %vm350_vm2 }
  0x11   : > { %695 = vmatpush.bf16.msra.mxu1 %v686_v3  ;;  %v8522_v7 = vsel %vm458_vm0, %v7245_v6, 0  ;;  %v7461_v9 = vld [vmem:[%s11543_s1 + $0x18] sm:$0xf]  ;;  %v1562_v10 = vsel %vm458_vm0, %v7386_v8, 0  ;;  %vm433_vm4 = vcmask 64512   ;;  %vm576_vm5 = vcmask 1042432  }
  0x12   : > { %877 = vmatpush.bf16.msra.mxu2 %v8522_v7  ;;  %v1820_v11 = vsel %vm458_vm0, %v7461_v9, 0  ;;  %s264_s16 = scalar_lea.vmem %s11542_s0, %s8354_s9  ;;  %vm577_vm6 = vcmask 1046532   ;;  %vm511_vm8 = vcmask 130048   ;;  %vm2492_vm9 = vcmask 1040384   ;;  %s7137_s6 = sshll.u32 %s11566_s19, 5 }
  0x13   : > { %s8536_s17 = scalar_lea.vmem %s264_s16, %s7147_s27  ;;  %vm8564_vm7 = vmor %vm576_vm5, %vm577_vm6  ;;  %vm2493_vm10 = vcmask 1044484   ;;  %s11568_s30 = smov (!%p9531_p6, %s7136_s30), 31  ;;  %vm2423_vm12 = vcmask 125952  }
  0x14   : > { %8352 = vmatpush.bf16.msrb.mxu3 %v686_v3  ;;  %1389 = vmatpush.bf16.msrb.mxu0 %v1380_v5  ;;  %v7166_v13 = vld [vmem:[%s8536_s17 + $0x1fc] sm:$0xc]  ;;  %v7167_v14 = vld [vmem:[%s8536_s17 + $0x200] sm:$0xf]  ;;  %v7168_v15 = vld [vmem:[%s8536_s17 + $0x204] sm:$0x3]  ;;  %s271_s11 = sadd.s32 %s7137_s6, %s11568_s30 }
  0x15   : > { %1571 = vmatpush.bf16.msrb.mxu1 %v1562_v10  ;;  %v7178_v16 = vrot.slane %v7166_v13, 10  ;;  %v396_v17 = vrot.slane %v7167_v14, 6  ;;  %v399_v18 = vrot.slane %v7168_v15, 6  ;;  %v7148_v19 = vld [vmem:[%s8536_s17 + $0x154] sm:$0xc]  ;;  %v8302_v20 = vld [vmem:[%s8536_s17 + $0x15c] sm:$0xff]  ;;  %vm9019_vm11 = vmor %vm2492_vm9, %vm2493_vm10 }
  0x16   : > { %1829 = vmatpush.bf16.msrb.mxu2 %v1820_v11  ;;  %v7149_v21 = vld [vmem:[%s8536_s17 + $0x158] sm:$0xf]  ;;  %v7150_v22 = vld [vmem:[%s8536_s17 + $0x15c] sm:$0x3]  ;;  %v7172_v23 = vrot.slane %v7148_v19, 10  ;;  %s9606_s13 = sshll.u32 %s271_s11, 2 }
  0x17   : > { %v397_v24 = vsel %vm8540_vm3, %v7178_v16, %v396_v17  ;;  %v398_v25 = vrot.slane %v396_v17, 4  ;;  %v354_v26 = vrot.slane %v7149_v21, 6  ;;  %v357_v27 = vrot.slane %v7150_v22, 6  ;;  %7278 = vmatmul.msk.bf16.vlgmr.msra.gmra.mxu2 %vm433_vm4, %v8302_v20  ;;  %v7170_v29 = vld [vmem:[%s8536_s17 + $0x21c] sm:$0xf]  ;;  %s9627_s16 = scalar_lea.vmem %s11545_s3, %s9606_s13  ;;  %s10668_s29 = scalar_lea.vmem %s11546_s4, %s9606_s13 }
  0x18   : > { %v421_v28 = vunpack.c.l.b16 %v397_v24  ;;  %v7188_v33 = vld [vmem:[%s8536_s17 + $0x158] sm:$0xe]  ;;  %v7189_v34 = vld [vmem:[%s8536_s17 + $0x15c] sm:$0xf]  ;;  %v7190_v37 = vld [vmem:[%s8536_s17 + $0x160] sm:$0x1]  ;;  %s11429_s18 = scalar_lea.vmem %s11547_s5, %s9606_s13 }
  0x19   : > { %v400_v30 = vsel %vm8540_vm3, %v398_v25, %v399_v18  ;;  %v355_v31 = vsel %vm8540_vm3, %v7172_v23, %v354_v26  ;;  %v356_v32 = vrot.slane %v354_v26, 4  ;;  %v7212_v39 = vrot.slane %v7188_v33, 9  ;;  %v7152_v43 = vld [vmem:[%s8536_s17 + $0x174] sm:$0xf]  ;;  %v7169_v46 = vld [vmem:[%s8536_s17 + $0x218] sm:$0xc] }
  0x1a   : > { %v422_v35 = vunpack.c.l.b16 %v400_v30  ;;  %v409_v36 = vunpack.c.l.b16 %v355_v31  ;;  %v403_v41 = vrot.slane %v7170_v29, 6  ;;  %v581_v42 = vrot.slane %v7189_v34, 5  ;;  %v7171_v47 = vld [vmem:[%s8536_s17 + $0x220] sm:$0x3]  ;;  %v7151_v51 = vld [vmem:[%s8536_s17 + $0x170] sm:$0xc] }
  0x1b   : > { %v358_v40 = vsel %vm8540_vm3, %v356_v32, %v357_v27  ;;  %v584_v48 = vrot.slane %v7190_v37, 5  ;;  %v7153_v54 = vld [vmem:[%s8536_s17 + $0x178] sm:$0x3]  ;;  %v361_v55 = vrot.slane %v7152_v43, 6  ;;  %v7179_v57 = vrot.slane %v7169_v46, 10 }
  0x1c   : > { %v431_v44 = vpack.c.b16 %v422_v35, %v421_v28  ;;  %v410_v45 = vunpack.c.l.b16 %v358_v40  ;;  %v582_v49 = vsel %vm8564_vm7, %v7212_v39, %v581_v42  ;;  %v583_v50 = vrot.slane %v581_v42, 4  ;;  %v7192_v56 = vld [vmem:[%s8536_s17 + $0x178] sm:$0xf]  ;;  %v7191_v1 = vld [vmem:[%s8536_s17 + $0x174] sm:$0xe] }
  0x1d   : > { %v637_v53 = vunpack.c.l.b16 %v582_v49  ;;  %v405_v58 = vrot.slane %v403_v41, 4  ;;  %v406_v59 = vrot.slane %v7171_v47, 6  ;;  %v7173_v62 = vrot.slane %v7151_v51, 10  ;;  %v7193_v4 = vld [vmem:[%s8536_s17 + $0x17c] sm:$0x1]  ;;  %v8304_v46 = vld [vmem:[%s8536_s17 + $0x194] sm:$0xff] }
  0x1e   : > { %7186 = vmatmul.msk.bf16.vlgmr.msra.gmra.mxu3 %vm433_vm4, %v431_v44  ;;  %v425_v52 = vpack.c.b16 %v410_v45, %v409_v36  ;;  %v585_v60 = vsel %vm8564_vm7, %v583_v50, %v584_v48  ;;  %v363_v63 = vrot.slane %v361_v55, 4  ;;  %v364_v0 = vrot.slane %v7153_v54, 6  ;;  %v8303_v8 = vld [vmem:[%s8536_s17 + $0x178] sm:$0xff]  ;;  %v7207_v18 = vld [vmem:[%s8536_s17 + $0x204] sm:$0xf] }
  0x1f   : > { %8353 = vmatpush.bf16.msra.mxu3 %v8522_v7  ;;  %v638_v61 = vunpack.c.l.b16 %v585_v60  ;;  %v588_v2 = vrot.slane %v7192_v56, 5  ;;  %v404_v5 = vsel %vm8540_vm3, %v7179_v57, %v403_v41  ;;  %v407_v6 = vsel %vm8540_vm3, %v405_v58, %v406_v59  ;;  %v7155_v22 = vld [vmem:[%s8536_s17 + $0x190] sm:$0xf]  ;;  %v7206_v27 = vld [vmem:[%s8536_s17 + $0x200] sm:$0xe] }
  0x20   : > { %7180 = vmatmul.msk.bf16.vlgmr.msra.gmra.mxu0 %vm433_vm4, %v425_v52  ;;  %v7213_v7 = vrot.slane %v7191_v1, 9  ;;  %v362_v9 = vsel %vm8540_vm3, %v7173_v62, %v361_v55  ;;  %v365_v10 = vsel %vm8540_vm3, %v363_v63, %v364_v0  ;;  %v591_v13 = vrot.slane %v7193_v4, 5  ;;  %v7208_v28 = vld [vmem:[%s8536_s17 + $0x208] sm:$0x1]  ;;  %v7154_v30 = vld [vmem:[%s8536_s17 + $0x18c] sm:$0xc] }
  0x21   : > { %v653_v3 = vpack.c.b16 %v638_v61, %v637_v53  ;;  %v590_v11 = vrot.slane %v588_v2, 4  ;;  %v423_v14 = vunpack.c.l.b16 %v404_v5  ;;  %v424_v15 = vunpack.c.l.b16 %v407_v6  ;;  %v7156_v31 = vld [vmem:[%s8536_s17 + $0x194] sm:$0x3]  ;;  %v7194_v41 = vld [vmem:[%s8536_s17 + $0x190] sm:$0xe] }
  0x22   : > { %v411_v16 = vunpack.c.l.b16 %v362_v9  ;;  %v412_v17 = vunpack.c.l.b16 %v365_v10  ;;  %v589_v19 = vsel %vm8564_vm7, %v7213_v7, %v588_v2  ;;  %v623_v23 = vrot.slane %v7207_v18, 5  ;;  %v7195_v32 = vld [vmem:[%s8536_s17 + $0x194] sm:$0xf]  ;;  %v7196_v43 = vld [vmem:[%s8536_s17 + $0x198] sm:$0x1] }
  0x23   : > { %7221 = vmatmul.msk.bf16.vlgmr.msra.gmra.mxu1 %vm433_vm4, %v653_v3  ;;  %v592_v20 = vsel %vm8564_vm7, %v590_v11, %v591_v13  ;;  %v432_v21 = vpack.c.b16 %v424_v15, %v423_v14  ;;  %v639_v25 = vunpack.c.l.b16 %v589_v19  ;;  %v368_v29 = vrot.slane %v7155_v22, 6  ;;  %v7210_v56 = vld [vmem:[%s8536_s17 + $0x220] sm:$0xf]  ;;  %v7158_v60 = vld [vmem:[%s8536_s17 + $0x1ac] sm:$0xf]  ;;  %v8305_v22 = vld [vmem:[%s8536_s17 + $0x1b0] sm:$0xff] }
  0x24   : > { %v426_v24 = vpack.c.b16 %v412_v17, %v411_v16  ;;  %v640_v26 = vunpack.c.l.b16 %v592_v20  ;;  %v7218_v33 = vrot.slane %v7206_v27, 9  ;;  %v625_v34 = vrot.slane %v623_v23, 4  ;;  %v7209_v1 = vld [vmem:[%s8536_s17 + $0x21c] sm:$0xe]  ;;  %v7211_v2 = vld [vmem:[%s8536_s17 + $0x224] sm:$0x1] }
  0x25   : > { %v626_v35 = vrot.slane %v7208_v28, 5  ;;  %v7174_v37 = vrot.slane %v7154_v30, 10  ;;  %v370_v39 = vrot.slane %v368_v29, 4  ;;  %v371_v40 = vrot.slane %v7156_v31, 6  ;;  %v7157_v3 = vld [vmem:[%s8536_s17 + $0x1a8] sm:$0xc] }
  0x26   : > { %v654_v36 = vpack.c.b16 %v640_v26, %v639_v25  ;;  %v595_v42 = vrot.slane %v7195_v32, 5  ;;  %v624_v44 = vsel %vm8564_vm7, %v7218_v33, %v623_v23  ;;  %v7214_v47 = vrot.slane %v7194_v41, 9  ;;  %v7159_v5 = vld [vmem:[%s8536_s17 + $0x1b0] sm:$0x3]  ;;  %v7197_v18 = vld [vmem:[%s8536_s17 + $0x1ac] sm:$0xe] }
  0x27   : > { %7279 = vmatmul.msk.bf16.gmra.mxu2 %vm433_vm4, %v8303_v8  ;;  %v627_v45 = vsel %vm8564_vm7, %v625_v34, %v626_v35  ;;  %v369_v48 = vsel %vm8540_vm3, %v7174_v37, %v368_v29  ;;  %v372_v49 = vsel %vm8540_vm3, %v370_v39, %v371_v40  ;;  %v598_v51 = vrot.slane %v7196_v43, 5  ;;  %v7198_v6 = vld [vmem:[%s8536_s17 + $0x1b0] sm:$0xf]  ;;  %v7320_v8 = vld [vmem:[%s11543_s1 + $0xc] sm:$0xf] }
  0x28   : > { %v597_v50 = vrot.slane %v595_v42, 4  ;;  %v649_v52 = vunpack.c.l.b16 %v624_v44  ;;  %v650_v53 = vunpack.c.l.b16 %v627_v45  ;;  %v413_v54 = vunpack.c.l.b16 %v369_v48  ;;  %v7199_v19 = vld [vmem:[%s8536_s17 + $0x1b4] sm:$0x1]  ;;  %v7161_v35 = vld [vmem:[%s8536_s17 + $0x1c8] sm:$0xf] }
  0x29   : > { %v414_v55 = vunpack.c.l.b16 %v372_v49  ;;  %v596_v57 = vsel %vm8564_vm7, %v7214_v47, %v595_v42  ;;  %v630_v61 = vrot.slane %v7210_v56, 5  ;;  %v375_v4 = vrot.slane %v7158_v60, 6  ;;  %v7160_v40 = vld [vmem:[%s8536_s17 + $0x1c4] sm:$0xc]  ;;  %v7162_v42 = vld [vmem:[%s8536_s17 + $0x1cc] sm:$0x3] }
  0x2a   : > { %v599_v58 = vsel %vm8564_vm7, %v597_v50, %v598_v51  ;;  %v659_v59 = vpack.c.b16 %v650_v53, %v649_v52  ;;  %v641_v63 = vunpack.c.l.b16 %v596_v57  ;;  %v7219_v7 = vrot.slane %v7209_v1, 9  ;;  %v7201_v43 = vld [vmem:[%s8536_s17 + $0x1cc] sm:$0xf]  ;;  %v7200_v49 = vld [vmem:[%s8536_s17 + $0x1c8] sm:$0xe] }
  0x2b   : > { %v427_v62 = vpack.c.b16 %v414_v55, %v413_v54  ;;  %v642_v0 = vunpack.c.l.b16 %v599_v58  ;;  %v632_v9 = vrot.slane %v630_v61, 4  ;;  %v633_v10 = vrot.slane %v7211_v2, 5  ;;  %v7202_v50 = vld [vmem:[%s8536_s17 + $0x1d0] sm:$0x1]  ;;  %v7163_v2 = vld [vmem:[%s8536_s17 + $0x1e0] sm:$0xc] }
  0x2c   : > { %v1126_v11 = vsel %vm458_vm0, %v7320_v8, 0  ;;  %v7175_v14 = vrot.slane %v7157_v3, 10  ;;  %v377_v15 = vrot.slane %v375_v4, 4  ;;  %v378_v16 = vrot.slane %v7159_v5, 6  ;;  %v8306_v51 = vld [vmem:[%s8536_s17 + $0x1cc] sm:$0xff] }
  0x2d   : > { %v655_v13 = vpack.c.b16 %v642_v0, %v641_v63  ;;  %v602_v17 = vrot.slane %v7198_v6, 5  ;;  %v631_v20 = vsel %vm8564_vm7, %v7219_v7, %v630_v61  ;;  %v7215_v25 = vrot.slane %v7197_v18, 9  ;;  %v8308_v61 = vld [vmem:[%s8536_s17 + $0x204] sm:$0xff]  ;;  %v7502_v6 = vld [vmem:[%s11543_s1 + $0x1c] sm:$0xf] }
  0x2e   : > { %7187 = vmatmul.msk.bf16.gmra.mxu3 %vm433_vm4, %v432_v21  ;;  %v634_v21 = vsel %vm8564_vm7, %v632_v9, %v633_v10  ;;  %v376_v23 = vsel %vm8540_vm3, %v7175_v14, %v375_v4  ;;  %v605_v27 = vrot.slane %v7199_v19, 5  ;;  %v651_v28 = vunpack.c.l.b16 %v631_v20  ;;  %v7165_v4 = vld [vmem:[%s8536_s17 + $0x1e8] sm:$0x3]  ;;  %v7203_v14 = vld [vmem:[%s8536_s17 + $0x1e4] sm:$0xe] }
  0x2f   : > { %v604_v26 = vrot.slane %v602_v17, 4  ;;  %v652_v29 = vunpack.c.l.b16 %v634_v21  ;;  %v415_v30 = vunpack.c.l.b16 %v376_v23  ;;  %v603_v32 = vsel %vm8564_vm7, %v7215_v25, %v602_v17  ;;  %v7204_v5 = vld [vmem:[%s8536_s17 + $0x1e8] sm:$0xf] }
  0x30   : > { %7181 = vmatmul.msk.bf16.gmra.mxu0 %vm433_vm4, %v426_v24  ;;  %v379_v24 = vsel %vm8540_vm3, %v377_v15, %v378_v16  ;;  %v643_v37 = vunpack.c.l.b16 %v603_v32  ;;  %v382_v41 = vrot.slane %v7161_v35, 6  ;;  %v7176_v45 = vrot.slane %v7160_v40, 10  ;;  %v7205_v15 = vld [vmem:[%s8536_s17 + $0x1ec] sm:$0x1]  ;;  %v7329_v40 = vld [vmem:[%s8536_s17 + $0x200] sm:$0xe] }
  0x31   : > { %v416_v31 = vunpack.c.l.b16 %v379_v24  ;;  %v606_v33 = vsel %vm8564_vm7, %v604_v26, %v605_v27  ;;  %v660_v34 = vpack.c.b16 %v652_v29, %v651_v28  ;;  %v385_v47 = vrot.slane %v7162_v42, 6  ;;  %v8307_v16 = vld [vmem:[%s8536_s17 + $0x1e8] sm:$0xff]  ;;  %v7289_v24 = vld [vmem:[%s8536_s17 + $0x200] sm:$0xf]  ;;  %v7330_v28 = vld [vmem:[%s8536_s17 + $0x204] sm:$0xf] }
  0x32   : > { %v644_v39 = vunpack.c.l.b16 %v606_v33  ;;  %v609_v48 = vrot.slane %v7201_v43, 5  ;;  %v383_v52 = vsel %vm8540_vm3, %v7176_v45, %v382_v41  ;;  %v7216_v54 = vrot.slane %v7200_v49, 9  ;;  %v8309_v27 = vld [vmem:[%s8536_s17 + $0x220] sm:$0xff]  ;;  %v7430_v29 = vld [vmem:[%s8536_s17 + $0x2a8] sm:$0xf] }
  0x33   : > { %7222 = vmatmul.msk.bf16.gmra.mxu1 %vm433_vm4, %v654_v36  ;;  %v428_v36 = vpack.c.b16 %v416_v31, %v415_v30  ;;  %v612_v56 = vrot.slane %v7202_v50, 5  ;;  %v417_v57 = vunpack.c.l.b16 %v383_v52  ;;  %v2074_v8 = vsel %vm458_vm0, %v7502_v6, 0  ;;  %v7288_v30 = vld [vmem:[%s8536_s17 + $0x1fc] sm:$0xc]  ;;  %v7290_v31 = vld [vmem:[%s8536_s17 + $0x204] sm:$0x3] }
  0x34   : > { %v656_v44 = vpack.c.b16 %v644_v39, %v643_v37  ;;  %v611_v55 = vrot.slane %v609_v48, 4  ;;  %v7177_v9 = vrot.slane %v7163_v2, 10  ;;  %v7217_v19 = vrot.slane %v7203_v14, 9  ;;  %v7429_v37 = vld [vmem:[%s8536_s17 + $0x2a4] sm:$0xc] }
  0x35   : > { %v619_v21 = vrot.slane %v7205_v15, 5  ;;  %v1021_v32 = vrot.slane %v7289_v24, 6  ;;  %v1715_v33 = vrot.slane %v7430_v29, 6  ;;  %v7431_v39 = vld [vmem:[%s8536_s17 + $0x2ac] sm:$0x3]  ;;  %v7453_v42 = vrot.slane %v7429_v37, 10 }
  0x36   : > { %v613_v60 = vsel %vm8564_vm7, %v611_v55, %v612_v56  ;;  %v7312_v45 = vrot.slane %v7288_v30, 10 }
  0x37   : > { %7280 = vmatmul.msk.bf16.gmra.mxu2 %vm433_vm4, %v8304_v46  ;;  %v384_v46 = vrot.slane %v382_v41, 4  ;;  %v646_v1 = vunpack.c.l.b16 %v613_v60  ;;  %v1275_v41 = vrot.slane %v7330_v28, 5  ;;  %v1717_v43 = vrot.slane %v1715_v33, 4 }
  0x38   : > { %v1023_v49 = vrot.slane %v1021_v32, 4 }
  0x39   : > { %v386_v53 = vsel %vm8540_vm3, %v384_v46, %v385_v47  ;;  %v1024_v46 = vrot.slane %v7290_v31, 6  ;;  %v7331_v47 = vld [vmem:[%s8536_s17 + $0x208] sm:$0x1] }
  0x3a   : > { %v418_v58 = vunpack.c.l.b16 %v386_v53  ;;  %v1278_v60 = vrot.slane %v7331_v47, 5  ;;  %v8310_v31 = vld [vmem:[%s8536_s17 + $0x204] sm:$0xff]  ;;  %v7295_v47 = vld [vmem:[%s8536_s17 + $0x238] sm:$0xf] }
  0x3c   : > { %v429_v63 = vpack.c.b16 %v418_v58, %v417_v57  ;;  %v7602_v57 = vld [vmem:[%s11543_s1 + $0x24] sm:$0xf]  ;;  %v7643_v58 = vld [vmem:[%s11543_s1 + $0x28] sm:$0xf] }
  0x3e   : > { %7227 = vmatmul.msk.bf16.vlgmr.msrb.gmra.mxu3 %vm433_vm4, %v659_v59  ;;  %v610_v59 = vsel %vm8564_vm7, %v7216_v54, %v609_v48  ;;  %v7527_v48 = vld [vmem:[%s11543_s1 + $0x20] sm:$0xf]  ;;  %v7353_v54 = vrot.slane %v7329_v40, 9 }
  0x3f   : > { %1135 = vmatpush.bf16.msrb.mxu3 %v1126_v11  ;;  %v645_v0 = vunpack.c.l.b16 %v610_v59  ;;  %v392_v11 = vrot.slane %v7165_v4, 6  ;;  %v2256_v50 = vsel %vm458_vm0, %v7527_v48, 0  ;;  %v1277_v59 = vrot.slane %v1275_v41, 4 }
  0x40   : > { %7182 = vmatmul.msk.bf16.gmra.mxu0 %vm433_vm4, %v427_v62  ;;  %v7164_v62 = vld [vmem:[%s8536_s17 + $0x1e4] sm:$0xf]  ;;  %v1276_v2 = vsel %vm8564_vm7, %v7353_v54, %v1275_v41 }
  0x41   : > { %v389_v3 = vrot.slane %v7164_v62, 6  ;;  %v657_v7 = vpack.c.b16 %v646_v1, %v645_v0  ;;  %2265 = vmatpush.bf16.msra.mxu0 %v2256_v50  ;;  %v2824_v62 = vsel %vm458_vm0, %v7643_v58, 0  ;;  %v1025_v0 = vsel %vm8540_vm3, %v1023_v49, %v1024_v46  ;;  %v7336_v49 = vld [vmem:[%s8536_s17 + $0x23c] sm:$0xf]  ;;  %v7436_v50 = vld [vmem:[%s8536_s17 + $0x2e0] sm:$0xf] }
  0x42   : > { %2833 = vmatpush.bf16.msra.mxu2 %v2824_v62  ;;  %v1331_v6 = vunpack.c.l.b16 %v1276_v2  ;;  %v1289_v58 = vrot.slane %v7336_v49, 5 }
  0x43   : > { %7223 = vmatmul.msk.bf16.gmra.mxu1 %vm433_vm4, %v655_v13  ;;  %v391_v10 = vrot.slane %v389_v3, 4  ;;  %v616_v13 = vrot.slane %v7204_v5, 5  ;;  %v390_v17 = vsel %vm8540_vm3, %v7177_v9, %v389_v3  ;;  %v1279_v3 = vsel %vm8564_vm7, %v1277_v59, %v1278_v60 }
  0x44   : > { %v1078_v5 = vunpack.c.l.b16 %v1025_v0  ;;  %v7337_v0 = vld [vmem:[%s8536_s17 + $0x240] sm:$0x1] }
  0x45   : > { %v393_v18 = vsel %vm8540_vm3, %v391_v10, %v392_v11  ;;  %v618_v20 = vrot.slane %v616_v13, 4  ;;  %v617_v25 = vsel %vm8564_vm7, %v7217_v19, %v616_v13  ;;  %v7333_v10 = vld [vmem:[%s8536_s17 + $0x220] sm:$0xf]  ;;  %v7433_v11 = vld [vmem:[%s8536_s17 + $0x2c4] sm:$0xf] }
  0x46   : > { %v420_v23 = vunpack.c.l.b16 %v393_v18  ;;  %v647_v35 = vunpack.c.l.b16 %v617_v25  ;;  %v7291_v13 = vld [vmem:[%s8536_s17 + $0x218] sm:$0xc]  ;;  %v1722_v15 = vrot.slane %v7433_v11, 6  ;;  %v7432_v18 = vld [vmem:[%s8536_s17 + $0x2c0] sm:$0xc] }
  0x47   : > { %7281 = vmatmul.msk.bf16.gmra.mxu2 %vm433_vm4, %v8305_v22  ;;  %v419_v22 = vunpack.c.l.b16 %v390_v17  ;;  %v620_v26 = vsel %vm8564_vm7, %v618_v20, %v619_v21  ;;  %v7293_v17 = vld [vmem:[%s8536_s17 + $0x220] sm:$0x3]  ;;  %v7434_v19 = vld [vmem:[%s8536_s17 + $0x2c8] sm:$0x3]  ;;  %v1282_v20 = vrot.slane %v7333_v10, 5  ;;  %v7454_v21 = vrot.slane %v7432_v18, 10 }
  0x48   : > { %v7313_v24 = vrot.slane %v7291_v13, 10  ;;  %v7332_v25 = vld [vmem:[%s8536_s17 + $0x21c] sm:$0xe]  ;;  %v1031_v28 = vrot.slane %v7293_v17, 6  ;;  %v1292_v10 = vrot.slane %v7337_v0, 5 }
  0x49   : > { %v1723_v29 = vsel %vm8540_vm3, %v7454_v21, %v1722_v15  ;;  %v7298_v21 = vld [vmem:[%s8536_s17 + $0x254] sm:$0xf] }
  0x4e   : > { %7228 = vmatmul.msk.bf16.gmra.mxu3 %vm433_vm4, %v660_v34  ;;  %v430_v34 = vpack.c.b16 %v420_v23, %v419_v22  ;;  %v1724_v22 = vrot.slane %v1722_v15, 4  ;;  %v1725_v23 = vrot.slane %v7434_v19, 6 }
  0x50   : > { %7183 = vmatmul.msk.bf16.gmra.mxu0 %vm433_vm4, %v428_v36  ;;  %v648_v36 = vunpack.c.l.b16 %v620_v26  ;;  %v7334_v26 = vld [vmem:[%s8536_s17 + $0x224] sm:$0x1]  ;;  %v1726_v30 = vsel %vm8540_vm3, %v1724_v22, %v1725_v23 }
  0x52   : > { %v658_v53 = vpack.c.b16 %v648_v36, %v647_v35  ;;  %v1284_v35 = vrot.slane %v1282_v20, 4  ;;  %v1285_v36 = vrot.slane %v7334_v26, 5  ;;  %v7297_v26 = vld [vmem:[%s8536_s17 + $0x250] sm:$0xc] }
  0x53   : > { %7224 = vmatmul.msk.bf16.gmra.mxu1 %vm433_vm4, %v656_v44  ;;  %v1718_v44 = vrot.slane %v7431_v39, 6 }
  0x55   : > { %v1719_v52 = vsel %vm8540_vm3, %v1717_v43, %v1718_v44 }
  0x56   : > { %v1772_v56 = vunpack.c.l.b16 %v1719_v52  ;;  %v1035_v52 = vrot.slane %v7295_v47, 6 }
  0x57   : > { %7282 = vmatmul.msk.bf16.gmra.mxu2 %vm433_vm4, %v8306_v51  ;;  %v1716_v51 = vsel %vm8540_vm3, %v7453_v42, %v1715_v33  ;;  %v1774_v33 = vunpack.c.l.b16 %v1726_v30  ;;  %v1286_v42 = vsel %vm8564_vm7, %v1284_v35, %v1285_v36  ;;  %v7299_v30 = vld [vmem:[%s8536_s17 + $0x258] sm:$0x3] }
  0x58   : > { %v1771_v55 = vunpack.c.l.b16 %v1716_v51  ;;  %v1334_v46 = vunpack.c.l.b16 %v1286_v42  ;;  %v7294_v51 = vld [vmem:[%s8536_s17 + $0x234] sm:$0xc] }
  0x59   : > { %v7314_v62 = vrot.slane %v7294_v51, 10 }
  0x5a   : > { %v1787_v1 = vpack.c.b16 %v1772_v56, %v1771_v55  ;;  %v7296_v55 = vld [vmem:[%s8536_s17 + $0x23c] sm:$0x3]  ;;  %v7435_v56 = vld [vmem:[%s8536_s17 + $0x2dc] sm:$0xc] }
  0x5b   : > { %v7455_v59 = vrot.slane %v7435_v56, 10  ;;  %v1038_v2 = vrot.slane %v7296_v55, 6  ;;  %v1036_v11 = vsel %vm8540_vm3, %v7314_v62, %v1035_v52 }
  0x5c   : > { %v1081_v17 = vunpack.c.l.b16 %v1036_v11 }
  0x5e   : > { %7284 = vmatmul.msk.bf16.vlgmr.msra.gmra.mxu3 %vm433_vm4, %v8308_v61  ;;  %v2602_v61 = vsel %vm458_vm0, %v7602_v57, 0  ;;  %v7437_v57 = vld [vmem:[%s8536_s17 + $0x2e4] sm:$0x3] }
  0x5f   : > { %2083 = vmatpush.bf16.msra.mxu3 %v2074_v8  ;;  %2611 = vmatpush.bf16.msra.mxu1 %v2602_v61  ;;  %v1332_v8 = vunpack.c.l.b16 %v1279_v3  ;;  %v1732_v61 = vrot.slane %v7437_v57, 6 }
  0x60   : > { %7184 = vmatmul.msk.bf16.gmra.mxu0 %vm433_vm4, %v429_v63  ;;  %v1022_v63 = vsel %vm8540_vm3, %v7312_v45, %v1021_v32  ;;  %v1773_v32 = vunpack.c.l.b16 %v1723_v29 }
  0x61   : > { %v1077_v4 = vunpack.c.l.b16 %v1022_v63  ;;  %v7335_v63 = vld [vmem:[%s8536_s17 + $0x238] sm:$0xe] }
  0x62   : > { %v1788_v40 = vpack.c.b16 %v1774_v33, %v1773_v32  ;;  %v7440_v32 = vld [vmem:[%s8536_s17 + $0x300] sm:$0x3] }
  0x63   : > { %7225 = vmatmul.msk.bf16.gmra.mxu1 %vm433_vm4, %v657_v7  ;;  %v7292_v7 = vld [vmem:[%s8536_s17 + $0x21c] sm:$0xf]  ;;  %v1093_v9 = vpack.c.b16 %v1078_v5, %v1077_v4  ;;  %v8311_v5 = vld [vmem:[%s8536_s17 + $0x220] sm:$0xff] }
  0x64   : > { %v1028_v14 = vrot.slane %v7292_v7, 6  ;;  %v7355_v7 = vrot.slane %v7335_v63, 9 }
  0x66   : > { %v1029_v37 = vsel %vm8540_vm3, %v7313_v24, %v1028_v14  ;;  %v1290_v15 = vsel %vm8564_vm7, %v7355_v7, %v1289_v58  ;;  %v7339_v24 = vld [vmem:[%s8536_s17 + $0x258] sm:$0xf]  ;;  %v7342_v7 = vld [vmem:[%s8536_s17 + $0x274] sm:$0xf] }
  0x67   : > { %7283 = vmatmul.msk.bf16.gmra.mxu2 %vm433_vm4, %v8307_v16  ;;  %v1347_v16 = vpack.c.b16 %v1332_v8, %v1331_v6  ;;  %v1079_v43 = vunpack.c.l.b16 %v1029_v37  ;;  %v1335_v19 = vunpack.c.l.b16 %v1290_v15  ;;  %v1739_v37 = vrot.slane %v7440_v32, 6  ;;  %v7302_v15 = vld [vmem:[%s8536_s17 + $0x274] sm:$0x3] }
  0x6e   : > { %7285 = vmatmul.msk.bf16.gmra.mxu3 %vm433_vm4, %v8309_v27  ;;  %v1030_v27 = vrot.slane %v1028_v14, 4 }
  0x70   : > { %7185 = vmatmul.msk.bf16.gmra.mxu0 %vm433_vm4, %v430_v34  ;;  %v7354_v34 = vrot.slane %v7332_v25, 9  ;;  %v1032_v39 = vsel %vm8540_vm3, %v1030_v27, %v1031_v28  ;;  %v7439_v25 = vld [vmem:[%s8536_s17 + $0x2fc] sm:$0xf]  ;;  %v1042_v27 = vrot.slane %v7298_v21, 6 }
  0x71   : > { %v1080_v44 = vunpack.c.l.b16 %v1032_v39  ;;  %v1736_v28 = vrot.slane %v7439_v25, 6  ;;  %v7315_v39 = vrot.slane %v7297_v26, 10 }
  0x72   : > { %v1283_v41 = vsel %vm8564_vm7, %v7354_v34, %v1282_v20  ;;  %v1296_v34 = vrot.slane %v7339_v24, 5  ;;  %v1044_v42 = vrot.slane %v1042_v27, 4 }
  0x73   : > { %7226 = vmatmul.msk.bf16.gmra.mxu1 %vm433_vm4, %v658_v53  ;;  %v1333_v45 = vunpack.c.l.b16 %v1283_v41  ;;  %v1094_v48 = vpack.c.b16 %v1080_v44, %v1079_v43  ;;  %v1729_v53 = vrot.slane %v7436_v50, 6  ;;  %v1738_v36 = vrot.slane %v1736_v28, 4  ;;  %v7340_v41 = vld [vmem:[%s8536_s17 + $0x25c] sm:$0x1] }
  0x74   : > { %v1045_v43 = vrot.slane %v7299_v30, 6  ;;  %v1043_v55 = vsel %vm8540_vm3, %v7315_v39, %v1042_v27  ;;  %v7341_v27 = vld [vmem:[%s8536_s17 + $0x270] sm:$0xe] }
  0x75   : > { %v1348_v54 = vpack.c.b16 %v1334_v46, %v1333_v45  ;;  %v1731_v60 = vrot.slane %v1729_v53, 4  ;;  %v1730_v3 = vsel %vm8540_vm3, %v7455_v59, %v1729_v53  ;;  %v1740_v45 = vsel %vm8540_vm3, %v1738_v36, %v1739_v37  ;;  %v8312_v46 = vld [vmem:[%s8536_s17 + $0x23c] sm:$0xff] }
  0x76   : > { %v1775_v6 = vunpack.c.l.b16 %v1730_v3  ;;  %v1299_v53 = vrot.slane %v7340_v41, 5  ;;  %v1046_v56 = vsel %vm8540_vm3, %v1044_v42, %v1045_v43  ;;  %v1083_v63 = vunpack.c.l.b16 %v1043_v55  ;;  %v7301_v3 = vld [vmem:[%s8536_s17 + $0x270] sm:$0xf] }
  0x77   : > { %7462 = vmatmul.msk.bf16.vlgmr.msrb.gmra.mxu2 %vm433_vm4, %v1787_v1  ;;  %v1037_v1 = vrot.slane %v1035_v52, 4  ;;  %v1733_v4 = vsel %vm8540_vm3, %v1731_v60, %v1732_v61  ;;  %v1298_v52 = vrot.slane %v1296_v34, 4  ;;  %v1084_v0 = vunpack.c.l.b16 %v1046_v56 }
  0x78   : > { %v1776_v8 = vunpack.c.l.b16 %v1733_v4  ;;  %v1049_v11 = vrot.slane %v7301_v3, 6  ;;  %v7357_v41 = vrot.slane %v7341_v27, 9  ;;  %v8314_v27 = vld [vmem:[%s8536_s17 + $0x274] sm:$0xff] }
  0x79   : > { %v1039_v13 = vsel %vm8540_vm3, %v1037_v1, %v1038_v2  ;;  %v1300_v61 = vsel %vm8564_vm7, %v1298_v52, %v1299_v53 }
  0x7a   : > { %v1789_v14 = vpack.c.b16 %v1776_v8, %v1775_v6  ;;  %v1082_v18 = vunpack.c.l.b16 %v1039_v13  ;;  %v1338_v2 = vunpack.c.l.b16 %v1300_v61  ;;  %v1096_v6 = vpack.c.b16 %v1084_v0, %v1083_v63  ;;  %v7345_v0 = vld [vmem:[%s8536_s17 + $0x290] sm:$0xf] }
  0x7b   : > { %v1051_v30 = vrot.slane %v1049_v11, 4 }
  0x7c   : > { %v1095_v22 = vpack.c.b16 %v1082_v18, %v1081_v17  ;;  %v7443_v17 = vld [vmem:[%s8536_s17 + $0x31c] sm:$0x3] }
  0x7d   : > { %v1746_v24 = vrot.slane %v7443_v17, 6 }
  0x7e   : > { %7321 = vmatmul.msk.bf16.vlgmr.msrb.gmra.mxu3 %vm433_vm4, %v1093_v9  ;;  %v1291_v9 = vrot.slane %v1289_v58, 4 }
  0x80   : > { %7362 = vmatmul.msk.bf16.vlgmr.msrb.gmra.mxu0 %vm433_vm4, %v1347_v16  ;;  %v1293_v16 = vsel %vm8564_vm7, %v1291_v9, %v1292_v10  ;;  %v7442_v9 = vld [vmem:[%s8536_s17 + $0x318] sm:$0xf]  ;;  %v7300_v10 = vld [vmem:[%s8536_s17 + $0x26c] sm:$0xc] }
  0x81   : > { %v1336_v20 = vunpack.c.l.b16 %v1293_v16  ;;  %v1743_v13 = vrot.slane %v7442_v9, 6  ;;  %v7441_v16 = vld [vmem:[%s8536_s17 + $0x314] sm:$0xc]  ;;  %v7316_v26 = vrot.slane %v7300_v10, 10 }
  0x82   : > { %v7457_v21 = vrot.slane %v7441_v16, 10 }
  0x83   : > { %7419 = vmatmul.msk.bf16.vlgmr.msrb.gmra.mxu1 %vm433_vm4, %v8310_v31  ;;  %v1349_v29 = vpack.c.b16 %v1336_v20, %v1335_v19  ;;  %v7438_v31 = vld [vmem:[%s8536_s17 + $0x2f8] sm:$0xc]  ;;  %v1303_v20 = vrot.slane %v7342_v7, 5  ;;  %v7446_v7 = vld [vmem:[%s8536_s17 + $0x338] sm:$0x3] }
  0x84   : > { %v7456_v35 = vrot.slane %v7438_v31, 10  ;;  %v1052_v31 = vrot.slane %v7302_v15, 6  ;;  %v1744_v32 = vsel %vm8540_vm3, %v7457_v21, %v1743_v13  ;;  %v1753_v15 = vrot.slane %v7446_v7, 6 }
  0x85   : > { %v1779_v36 = vunpack.c.l.b16 %v1744_v32  ;;  %v1305_v42 = vrot.slane %v1303_v20, 4 }
  0x86   : > { %v1737_v44 = vsel %vm8540_vm3, %v7456_v35, %v1736_v28  ;;  %v7343_v28 = vld [vmem:[%s8536_s17 + $0x278] sm:$0x1] }
  0x87   : > { %7463 = vmatmul.msk.bf16.gmra.mxu2 %vm433_vm4, %v1788_v40  ;;  %v7338_v40 = vld [vmem:[%s8536_s17 + $0x254] sm:$0xe]  ;;  %v1777_v47 = vunpack.c.l.b16 %v1737_v44  ;;  %v8313_v35 = vld [vmem:[%s8536_s17 + $0x258] sm:$0xff]  ;;  %v1306_v43 = vrot.slane %v7343_v28, 5 }
  0x88   : > { %v7356_v51 = vrot.slane %v7338_v40, 9 }
  0x8a   : > { %v1297_v60 = vsel %vm8564_vm7, %v7356_v51, %v1296_v34 }
  0x8b   : > { %v1337_v1 = vunpack.c.l.b16 %v1297_v60 }
  0x8e   : > { %7322 = vmatmul.msk.bf16.gmra.mxu3 %vm433_vm4, %v1094_v48  ;;  %v1778_v48 = vunpack.c.l.b16 %v1740_v45  ;;  %v1050_v45 = vsel %vm8540_vm3, %v7316_v26, %v1049_v11  ;;  %v1310_v11 = vrot.slane %v7345_v0, 5  ;;  %v7308_v0 = vld [vmem:[%s8536_s17 + $0x2ac] sm:$0x3] }
  0x8f   : > { %v1085_v52 = vunpack.c.l.b16 %v1050_v45 }
  0x90   : > { %7363 = vmatmul.msk.bf16.gmra.mxu0 %vm433_vm4, %v1348_v54  ;;  %v1790_v57 = vpack.c.b16 %v1778_v48, %v1777_v47 }
  0x93   : > { %7420 = vmatmul.msk.bf16.gmra.mxu1 %vm433_vm4, %v8311_v5 }
  0x97   : > { %7464 = vmatmul.msk.bf16.gmra.mxu2 %vm433_vm4, %v1789_v14  ;;  %v1350_v14 = vpack.c.b16 %v1338_v2, %v1337_v1  ;;  %v7445_v1 = vld [vmem:[%s8536_s17 + $0x334] sm:$0xf]  ;;  %v7303_v2 = vld [vmem:[%s8536_s17 + $0x288] sm:$0xc] }
  0x98   : > { %v7317_v17 = vrot.slane %v7303_v2, 10 }
  0x9a   : > { %v8790_v23 = vpop.f32.mrf.mxu2 }
  0x9d   : > { %v471_v33 = vpop.f32.mrf.mxu0 }
  0x9e   : > { %7323 = vmatmul.msk.bf16.gmra.mxu3 %vm433_vm4, %v1095_v22  ;;  %512 = vst.msk [vmem:[#allocation2] sm:$0xff] %vm511_vm8, %v471_v33  ;;  %v1745_v22 = vrot.slane %v1743_v13, 4 }
  0xa0   : > { %7364 = vmatmul.msk.bf16.gmra.mxu0 %vm433_vm4, %v1349_v29  ;;  %v697_v50 = vpop.f32.mrf.mxu1  ;;  %v1747_v33 = vsel %vm8540_vm3, %v1745_v22, %v1746_v24 }
  0xa1   : > { %v501_v49 = vpop.f32.mrf.mxu3  ;;  %v1780_v37 = vunpack.c.l.b16 %v1747_v33 }
  0xa2   : > { %524 = vst.msk [vmem:[#allocation2 + $0x60] sm:$0xff] %vm511_vm8, %v501_v49  ;;  %v8809_v54 = vpop.f32.mrf.mxu2  ;;  %v1304_v49 = vsel %vm8564_vm7, %v7357_v41, %v1303_v20 }
  0xa3   : > { %7421 = vmatmul.msk.bf16.gmra.mxu1 %vm433_vm4, %v8312_v46  ;;  %v1791_v46 = vpack.c.b16 %v1780_v37, %v1779_v36 }
  0xa5   : > { %v473_v58 = vpop.f32.mrf.mxu0  ;;  %v737_v59 = vld [vmem:[#allocation2] sm:$0xff] }
  0xa6   : > { %513 = vst.msk [vmem:[#allocation2 + $0x8] sm:$0xff] %vm511_vm8, %v473_v58  ;;  %v753_v62 = vadd.f32 %v737_v59, %v697_v50  ;;  %v1307_v50 = vsel %vm8564_vm7, %v1305_v42, %v1306_v43  ;;  %v7304_v59 = vld [vmem:[%s8536_s17 + $0x28c] sm:$0xf] }
  0xa7   : > { %7465 = vmatmul.msk.bf16.gmra.mxu2 %vm433_vm4, %v1790_v57  ;;  %v1339_v57 = vunpack.c.l.b16 %v1304_v49  ;;  %v1340_v58 = vunpack.c.l.b16 %v1307_v50  ;;  %v1056_v3 = vrot.slane %v7304_v59, 6 }
  0xa8   : > { %769 = vst.msk [vmem:[#allocation2] sm:$0xff] %vm511_vm8, %v753_v62  ;;  %v699_v5 = vpop.f32.mrf.mxu1 }
  0xa9   : > { %v503_v4 = vpop.f32.mrf.mxu3  ;;  %v1058_v21 = vrot.slane %v1056_v3, 4 }
  0xaa   : > { %525 = vst.msk [vmem:[#allocation2 + $0x68] sm:$0xff] %vm511_vm8, %v503_v4  ;;  %v8825_v8 = vpop.f32.mrf.mxu2  ;;  %v1351_v4 = vpack.c.b16 %v1340_v58, %v1339_v57 }
  0xad   : > { %v476_v18 = vpop.f32.mrf.mxu0  ;;  %v738_v19 = vld [vmem:[#allocation2 + $0x8] sm:$0xff] }
  0xae   : > { %7324 = vmatmul.msk.bf16.gmra.mxu3 %vm433_vm4, %v1096_v6  ;;  %514 = vst.msk [vmem:[#allocation2 + $0x10] sm:$0xff] %vm511_vm8, %v476_v18  ;;  %v754_v25 = vadd.f32 %v738_v19, %v699_v5  ;;  %v7305_v5 = vld [vmem:[%s8536_s17 + $0x290] sm:$0x3]  ;;  %v7444_v6 = vld [vmem:[%s8536_s17 + $0x330] sm:$0xc] }
  0xaf   : > { %v919_v29 = vld [vmem:[#allocation2] sm:$0xff]  ;;  %v7458_v13 = vrot.slane %v7444_v6, 10  ;;  %v7344_v18 = vld [vmem:[%s8536_s17 + $0x28c] sm:$0xe]  ;;  %v1059_v22 = vrot.slane %v7305_v5, 6 }
  0xb0   : > { %770 = vst.msk [vmem:[#allocation2 + $0x8] sm:$0xff] %vm511_vm8, %v754_v25  ;;  %v935_v34 = vadd.f32 %v919_v29, %v8790_v23  ;;  %7365 = vmatmul.msk.bf16.gmra.mxu0 %vm433_vm4, %v1350_v14  ;;  %v702_v40 = vpop.f32.mrf.mxu1  ;;  %v1053_v23 = vsel %vm8540_vm3, %v1051_v30, %v1052_v31  ;;  %v7346_v19 = vld [vmem:[%s8536_s17 + $0x294] sm:$0x1]  ;;  %v7358_v33 = vrot.slane %v7344_v18, 9  ;;  %v1066_v18 = vrot.slane %v7308_v0, 6 }
  0xb1   : > { %v506_v39 = vpop.f32.mrf.mxu3  ;;  %v1086_v53 = vunpack.c.l.b16 %v1053_v23  ;;  %v749_v31 = vld [vmem:[#allocation2 + $0x60] sm:$0xff] }
  0xb2   : > { %526 = vst.msk [vmem:[#allocation2 + $0x70] sm:$0xff] %vm511_vm8, %v506_v39  ;;  %v8846_v44 = vpop.f32.mrf.mxu2  ;;  %v1057_v39 = vsel %vm8540_vm3, %v7317_v17, %v1056_v3  ;;  %v1311_v43 = vsel %vm8564_vm7, %v7358_v33, %v1310_v11  ;;  %v7447_v3 = vld [vmem:[%s8536_s17 + $0x34c] sm:$0xc] }
  0xb3   : > { %951 = vst.msk [vmem:[#allocation2] sm:$0xff] %vm511_vm8, %v935_v34  ;;  %7422 = vmatmul.msk.bf16.gmra.mxu1 %vm433_vm4, %v8313_v35  ;;  %v1097_v62 = vpack.c.b16 %v1086_v53, %v1085_v52  ;;  %v1312_v34 = vrot.slane %v1310_v11, 4  ;;  %v1313_v35 = vrot.slane %v7346_v19, 5  ;;  %v1341_v50 = vunpack.c.l.b16 %v1311_v43  ;;  %v7307_v52 = vld [vmem:[%s8536_s17 + $0x2a8] sm:$0xf] }
  0xb4   : > { %v7459_v7 = vrot.slane %v7447_v3, 10 }
  0xb5   : > { %v478_v47 = vpop.f32.mrf.mxu0  ;;  %v739_v48 = vld [vmem:[#allocation2 + $0x10] sm:$0xff]  ;;  %v1314_v45 = vsel %vm8564_vm7, %v1312_v34, %v1313_v35 }
  0xb6   : > { %515 = vst.msk [vmem:[#allocation2 + $0x18] sm:$0xff] %vm511_vm8, %v478_v47  ;;  %v755_v51 = vadd.f32 %v739_v48, %v702_v40 }
  0xb7   : > { %v920_v55 = vld [vmem:[#allocation2 + $0x8] sm:$0xff]  ;;  %7466 = vmatmul.msk.bf16.gmra.mxu2 %vm433_vm4, %v1791_v46  ;;  %v1087_v46 = vunpack.c.l.b16 %v1057_v39 }
  0xb8   : > { %771 = vst.msk [vmem:[#allocation2 + $0x10] sm:$0xff] %vm511_vm8, %v755_v51  ;;  %v936_v56 = vadd.f32 %v920_v55, %v8809_v54  ;;  %v704_v61 = vpop.f32.mrf.mxu1  ;;  %v1750_v54 = vrot.slane %v7445_v1, 6  ;;  %v1342_v51 = vunpack.c.l.b16 %v1314_v45  ;;  %v750_v55 = vld [vmem:[#allocation2 + $0x68] sm:$0xff]  ;;  %v1063_v1 = vrot.slane %v7307_v52, 6  ;;  %v7309_v52 = vld [vmem:[%s8536_s17 + $0x2c0] sm:$0xc] }
  0xb9   : > { %v508_v60 = vpop.f32.mrf.mxu3  ;;  %v7319_v0 = vrot.slane %v7309_v52, 10 }
  0xba   : > { %527 = vst.msk [vmem:[#allocation2 + $0x78] sm:$0xff] %vm511_vm8, %v508_v60  ;;  %v8864_v63 = vpop.f32.mrf.mxu2  ;;  %v1752_v14 = vrot.slane %v1750_v54, 4  ;;  %v1751_v24 = vsel %vm8540_vm3, %v7458_v13, %v1750_v54  ;;  %v7348_v60 = vld [vmem:[%s8536_s17 + $0x2ac] sm:$0xf]  ;;  %v1352_v2 = vpack.c.b16 %v1342_v51, %v1341_v50  ;;  %v7449_v54 = vld [vmem:[%s8536_s17 + $0x354] sm:$0x3] }
  0xbb   : > { %952 = vst.msk [vmem:[#allocation2 + $0x8] sm:$0xff] %vm511_vm8, %v936_v56  ;;  %v1781_v28 = vunpack.c.l.b16 %v1751_v24  ;;  %v1317_v6 = vrot.slane %v7348_v60, 5  ;;  %v1065_v17 = vrot.slane %v1063_v1, 4  ;;  %v7451_v60 = vld [vmem:[%s8536_s17 + $0x36c] sm:$0xf] }
  0xbc   : > { %v1754_v25 = vsel %vm8540_vm3, %v1752_v14, %v1753_v15  ;;  %v7347_v14 = vld [vmem:[%s8536_s17 + $0x2a8] sm:$0xe]  ;;  %v7349_v15 = vld [vmem:[%s8536_s17 + $0x2b0] sm:$0x1] }
  0xbd   : > { %v481_v9 = vpop.f32.mrf.mxu0  ;;  %v740_v10 = vld [vmem:[#allocation2 + $0x18] sm:$0xff]  ;;  %v1782_v29 = vunpack.c.l.b16 %v1754_v25  ;;  %v1067_v34 = vsel %vm8540_vm3, %v1065_v17, %v1066_v18 }
  0xbe   : > { %7325 = vmatmul.msk.bf16.gmra.mxu3 %vm433_vm4, %v1097_v62  ;;  %516 = vst.msk [vmem:[#allocation2 + $0x20] sm:$0xff] %vm511_vm8, %v481_v9  ;;  %v756_v16 = vadd.f32 %v740_v10, %v704_v61  ;;  %v7448_v61 = vld [vmem:[%s8536_s17 + $0x350] sm:$0xf]  ;;  %v7306_v62 = vld [vmem:[%s8536_s17 + $0x2a4] sm:$0xc]  ;;  %v1760_v10 = vrot.slane %v7449_v54, 6  ;;  %v1090_v43 = vunpack.c.l.b16 %v1067_v34 }
  0xbf   : > { %v921_v20 = vld [vmem:[#allocation2 + $0x10] sm:$0xff]  ;;  %v1792_v40 = vpack.c.b16 %v1782_v29, %v1781_v28  ;;  %v7318_v13 = vrot.slane %v7306_v62, 10  ;;  %v7359_v29 = vrot.slane %v7347_v14, 9 }
  0xc0   : > { %772 = vst.msk [vmem:[#allocation2 + $0x18] sm:$0xff] %vm511_vm8, %v756_v16  ;;  %v937_v26 = vadd.f32 %v921_v20, %v8825_v8  ;;  %7366 = vmatmul.msk.bf16.gmra.mxu0 %vm433_vm4, %v1351_v4  ;;  %v707_v32 = vpop.f32.mrf.mxu1  ;;  %v1060_v8 = vsel %vm8540_vm3, %v1058_v21, %v1059_v22  ;;  %v8315_v22 = vld [vmem:[%s8536_s17 + $0x290] sm:$0xff] }
  0xc1   : > { %v727_v30 = vpop.f32.mrf.mxu3  ;;  %v1088_v47 = vunpack.c.l.b16 %v1060_v8  ;;  %v1318_v8 = vsel %vm8564_vm7, %v7359_v29, %v1317_v6  ;;  %v752_v50 = vld [vmem:[#allocation2 + $0x78] sm:$0xff] }
  0xc2   : > { %v765_v36 = vadd.f32 %v749_v31, %v727_v30  ;;  %953 = vst.msk [vmem:[#allocation2 + $0x10] sm:$0xff] %vm511_vm8, %v937_v26  ;;  %v8886_v37 = vpop.f32.mrf.mxu2  ;;  %v1319_v30 = vrot.slane %v1317_v6, 4  ;;  %v1320_v31 = vrot.slane %v7349_v15, 5 }
  0xc3   : > { %7423 = vmatmul.msk.bf16.gmra.mxu1 %vm433_vm4, %v8314_v27  ;;  %v1098_v58 = vpack.c.b16 %v1088_v47, %v1087_v46  ;;  %v751_v27 = vld [vmem:[#allocation2 + $0x70] sm:$0xff]  ;;  %v1343_v47 = vunpack.c.l.b16 %v1318_v8 }
  0xc4   : > { %781 = vst.msk [vmem:[#allocation2 + $0x60] sm:$0xff] %vm511_vm8, %v765_v36 }
  0xc5   : > { %v483_v41 = vpop.f32.mrf.mxu0  ;;  %v741_v42 = vld [vmem:[#allocation2 + $0x20] sm:$0xff] }
  0xc6   : > { %517 = vst.msk [vmem:[#allocation2 + $0x28] sm:$0xff] %vm511_vm8, %v483_v41  ;;  %v757_v23 = vadd.f32 %v741_v42, %v707_v32 }
  0xc7   : > { %v922_v48 = vld [vmem:[#allocation2 + $0x18] sm:$0xff]  ;;  %7467 = vmatmul.msk.bf16.gmra.mxu2 %vm433_vm4, %v1792_v40  ;;  %v1321_v40 = vsel %vm8564_vm7, %v1319_v30, %v1320_v31 }
  0xc8   : > { %773 = vst.msk [vmem:[#allocation2 + $0x20] sm:$0xff] %vm511_vm8, %v757_v23  ;;  %v938_v49 = vadd.f32 %v922_v48, %v8846_v44  ;;  %v709_v56 = vpop.f32.mrf.mxu1  ;;  %v1757_v44 = vrot.slane %v7448_v61, 6  ;;  %v7310_v23 = vld [vmem:[%s8536_s17 + $0x2c4] sm:$0xf]  ;;  %v1344_v48 = vunpack.c.l.b16 %v1321_v40  ;;  %v7311_v61 = vld [vmem:[%s8536_s17 + $0x2c8] sm:$0x3] }
  0xc9   : > { %v729_v53 = vpop.f32.mrf.mxu3  ;;  %v1073_v15 = vrot.slane %v7311_v61, 6  ;;  %v7611_v61 = vld [vmem:[%s8536_s17 + $0xb0] sm:$0xe] }
  0xca   : > { %v766_v57 = vadd.f32 %v750_v55, %v729_v53  ;;  %954 = vst.msk [vmem:[#allocation2 + $0x18] sm:$0xff] %vm511_vm8, %v938_v49  ;;  %v8904_v59 = vpop.f32.mrf.mxu2  ;;  %v1759_v9 = vrot.slane %v1757_v44, 4  ;;  %v1758_v19 = vsel %vm8540_vm3, %v7459_v7, %v1757_v44  ;;  %v1353_v62 = vpack.c.b16 %v1344_v48, %v1343_v47  ;;  %v7450_v44 = vld [vmem:[%s8536_s17 + $0x368] sm:$0xc] }
  0xcb   : > { %v1783_v24 = vunpack.c.l.b16 %v1758_v19 }
  0xcc   : > { %782 = vst.msk [vmem:[#allocation2 + $0x68] sm:$0xff] %vm511_vm8, %v766_v57  ;;  %v1761_v20 = vsel %vm8540_vm3, %v1759_v9, %v1760_v10 }
  0xcd   : > { %v486_v4 = vpop.f32.mrf.mxu0  ;;  %v742_v5 = vld [vmem:[#allocation2 + $0x28] sm:$0xff]  ;;  %v1784_v25 = vunpack.c.l.b16 %v1761_v20  ;;  %v8316_v20 = vld [vmem:[%s8536_s17 + $0x2ac] sm:$0xff] }
  0xce   : > { %7326 = vmatmul.msk.bf16.gmra.mxu3 %vm433_vm4, %v1098_v58  ;;  %518 = vst.msk [vmem:[#allocation2 + $0x30] sm:$0xff] %vm511_vm8, %v486_v4  ;;  %v758_v11 = vadd.f32 %v742_v5, %v709_v56  ;;  %v1070_v56 = vrot.slane %v7310_v23, 6  ;;  %v7351_v58 = vld [vmem:[%s8536_s17 + $0x2c8] sm:$0xf]  ;;  %v7460_v5 = vrot.slane %v7450_v44, 10 }
  0xcf   : > { %v923_v16 = vld [vmem:[#allocation2 + $0x20] sm:$0xff]  ;;  %v1793_v35 = vpack.c.b16 %v1784_v25, %v1783_v24  ;;  %v1324_v4 = vrot.slane %v7351_v58, 5 }
  0xd0   : > { %774 = vst.msk [vmem:[#allocation2 + $0x28] sm:$0xff] %vm511_vm8, %v758_v11  ;;  %v939_v21 = vadd.f32 %v923_v16, %v8864_v63  ;;  %7367 = vmatmul.msk.bf16.gmra.mxu0 %vm433_vm4, %v1352_v2  ;;  %v712_v28 = vpop.f32.mrf.mxu1  ;;  %v1064_v63 = vsel %vm8540_vm3, %v7318_v13, %v1063_v1  ;;  %v7350_v1 = vld [vmem:[%s8536_s17 + $0x2c4] sm:$0xe]  ;;  %v7452_v2 = vld [vmem:[%s8536_s17 + $0x370] sm:$0x3]  ;;  %v1072_v10 = vrot.slane %v1070_v56, 4 }
  0xd1   : > { %v732_v26 = vpop.f32.mrf.mxu3  ;;  %v1089_v42 = vunpack.c.l.b16 %v1064_v63  ;;  %v1767_v7 = vrot.slane %v7452_v2, 6  ;;  %v7352_v11 = vld [vmem:[%s8536_s17 + $0x2cc] sm:$0x1]  ;;  %v931_v25 = vld [vmem:[#allocation2 + $0x60] sm:$0xff] }
  0xd2   : > { %v767_v32 = vadd.f32 %v751_v27, %v732_v26  ;;  %955 = vst.msk [vmem:[#allocation2 + $0x20] sm:$0xff] %vm511_vm8, %v939_v21  ;;  %v8926_v33 = vpop.f32.mrf.mxu2  ;;  %v7684_v13 = vld [vmem:[%s11543_s1 + $0x2c] sm:$0xf]  ;;  %v7360_v27 = vrot.slane %v7350_v1, 9  ;;  %v1327_v29 = vrot.slane %v7352_v11, 5  ;;  %v7635_v1 = vrot.slane %v7611_v61, 9 }
  0xd3   : > { %7424 = vmatmul.msk.bf16.gmra.mxu1 %vm433_vm4, %v8315_v22  ;;  %v1099_v55 = vpack.c.b16 %v1090_v43, %v1089_v42  ;;  %v3078_v16 = vsel %vm458_vm0, %v7684_v13, 0  ;;  %v932_v48 = vld [vmem:[#allocation2 + $0x68] sm:$0xff]  ;;  %v8317_v11 = vld [vmem:[%s8536_s17 + $0x2c8] sm:$0xff]  ;;  %v7616_v61 = vld [vmem:[%s8536_s17 + $0xd4] sm:$0x1] }
  0xd4   : > { %783 = vst.msk [vmem:[#allocation2 + $0x70] sm:$0xff] %vm511_vm8, %v767_v32  ;;  %3087 = vmatpush.bf16.msrb.mxu3 %v3078_v16  ;;  %v1074_v32 = vsel %vm8540_vm3, %v1072_v10, %v1073_v15 }
  0xd5   : > { %v488_v36 = vpop.f32.mrf.mxu0  ;;  %v743_v39 = vld [vmem:[#allocation2 + $0x30] sm:$0xff] }
  0xd6   : > { %519 = vst.msk [vmem:[#allocation2 + $0x38] sm:$0xff] %vm511_vm8, %v488_v36  ;;  %v759_v41 = vadd.f32 %v743_v39, %v712_v28  ;;  %v1326_v28 = vrot.slane %v1324_v4, 4  ;;  %v1325_v36 = vsel %vm8564_vm7, %v7360_v27, %v1324_v4 }
  0xd7   : > { %v924_v45 = vld [vmem:[#allocation2 + $0x28] sm:$0xff]  ;;  %7468 = vmatmul.msk.bf16.gmra.mxu2 %vm433_vm4, %v1793_v35 }
  0xd8   : > { %775 = vst.msk [vmem:[#allocation2 + $0x30] sm:$0xff] %vm511_vm8, %v759_v41  ;;  %v940_v46 = vadd.f32 %v924_v45, %v8886_v37  ;;  %v714_v51 = vpop.f32.mrf.mxu1  ;;  %v1764_v37 = vrot.slane %v7451_v60, 6  ;;  %v1328_v39 = vsel %vm8564_vm7, %v1326_v28, %v1327_v29  ;;  %v1092_v41 = vunpack.c.l.b16 %v1074_v32 }
  0xd9   : > { %v734_v49 = vpop.f32.mrf.mxu3  ;;  %v1345_v45 = vunpack.c.l.b16 %v1325_v36  ;;  %v1346_v23 = vunpack.c.l.b16 %v1328_v39 }
  0xda   : > { %v768_v53 = vadd.f32 %v752_v50, %v734_v49  ;;  %956 = vst.msk [vmem:[#allocation2 + $0x28] sm:$0xff] %vm511_vm8, %v940_v46  ;;  %v8945_v57 = vpop.f32.mrf.mxu2  ;;  %v1766_v6 = vrot.slane %v1764_v37, 4  ;;  %v1765_v17 = vsel %vm8540_vm3, %v7460_v5, %v1764_v37  ;;  %v7471_v46 = vld [vmem:[%s8536_s17 + $0x2ac] sm:$0xf]  ;;  %v7613_v37 = vld [vmem:[%s8536_s17 + $0xb8] sm:$0x1] }
  0xdb   : > { %v1785_v21 = vunpack.c.l.b16 %v1765_v17  ;;  %v1969_v58 = vrot.slane %v7471_v46, 5  ;;  %v1354_v60 = vpack.c.b16 %v1346_v23, %v1345_v45  ;;  %v2722_v4 = vrot.slane %v7613_v37, 5  ;;  %v933_v16 = vld [vmem:[#allocation2 + $0x70] sm:$0xff] }
  0xdc   : > { %784 = vst.msk [vmem:[#allocation2 + $0x78] sm:$0xff] %vm511_vm8, %v768_v53  ;;  %v1768_v18 = vsel %vm8540_vm3, %v1766_v6, %v1767_v7  ;;  %v7612_v53 = vld [vmem:[%s8536_s17 + $0xb4] sm:$0xf] }
  0xdd   : > { %v491_v3 = vpop.f32.mrf.mxu0  ;;  %v744_v54 = vld [vmem:[#allocation2 + $0x38] sm:$0xff]  ;;  %v1786_v22 = vunpack.c.l.b16 %v1768_v18  ;;  %v1971_v6 = vrot.slane %v1969_v58, 4 }
  0xde   : > { %7327 = vmatmul.msk.bf16.gmra.mxu3 %vm433_vm4, %v1099_v55  ;;  %520 = vst.msk [vmem:[#allocation2 + $0x40] sm:$0xff] %vm511_vm8, %v491_v3  ;;  %v760_v9 = vadd.f32 %v744_v54, %v714_v51  ;;  %v7470_v55 = vld [vmem:[%s8536_s17 + $0x2a8] sm:$0xe]  ;;  %v7571_v54 = vld [vmem:[%s8536_s17 + $0xac] sm:$0xf] }
  0xdf   : > { %v925_v14 = vld [vmem:[#allocation2 + $0x30] sm:$0xff]  ;;  %v1794_v63 = vpack.c.b16 %v1786_v22, %v1785_v21  ;;  %v7494_v3 = vrot.slane %v7470_v55, 9  ;;  %v2497_v18 = vrot.slane %v7571_v54, 7  ;;  %v7574_v54 = vld [vmem:[%s8536_s17 + $0xc8] sm:$0xf] }
  0xe0   : > { %776 = vst.msk [vmem:[#allocation2 + $0x38] sm:$0xff] %vm511_vm8, %v760_v9  ;;  %v941_v19 = vadd.f32 %v925_v14, %v8904_v59  ;;  %7368 = vmatmul.msk.bf16.gmra.mxu0 %vm433_vm4, %v1353_v62  ;;  %v717_v26 = vpop.f32.mrf.mxu1  ;;  %v1071_v59 = vsel %vm8540_vm3, %v7319_v0, %v1070_v56  ;;  %v7472_v56 = vld [vmem:[%s8536_s17 + $0x2b0] sm:$0x1] }
  0xe1   : > { %v909_v24 = vpop.f32.mrf.mxu3  ;;  %v1091_v40 = vunpack.c.l.b16 %v1071_v59  ;;  %v1972_v7 = vrot.slane %v7472_v56, 5  ;;  %v1970_v21 = vsel %vm8564_vm7, %v7494_v3, %v1969_v58  ;;  %v8318_v56 = vld [vmem:[%s8536_s17 + $0x2ac] sm:$0xff] }
  0xe2   : > { %v947_v30 = vadd.f32 %v931_v25, %v909_v24  ;;  %957 = vst.msk [vmem:[#allocation2 + $0x30] sm:$0xff] %vm511_vm8, %v941_v19  ;;  %v8970_v31 = vpop.f32.mrf.mxu2  ;;  %v7572_v24 = vld [vmem:[%s8536_s17 + $0xb0] sm:$0x7] }
  0xe3   : > { %7425 = vmatmul.msk.bf16.gmra.mxu1 %vm433_vm4, %v8316_v20  ;;  %v1100_v51 = vpack.c.b16 %v1092_v41, %v1091_v40  ;;  %v1973_v25 = vsel %vm8564_vm7, %v1971_v6, %v1972_v7  ;;  %v2500_v59 = vrot.slane %v7572_v24, 7  ;;  %v7725_v40 = vld [vmem:[%s11543_s1 + $0x30] sm:$0xf] }
  0xe4   : > { %963 = vst.msk [vmem:[#allocation2 + $0x60] sm:$0xff] %vm511_vm8, %v947_v30  ;;  %v2499_v30 = vrot.slane %v2497_v18, 4  ;;  %v3332_v45 = vsel %vm458_vm0, %v7725_v40, 0 }
  0xe5   : > { %v493_v34 = vpop.f32.mrf.mxu0  ;;  %v745_v35 = vld [vmem:[#allocation2 + $0x40] sm:$0xff]  ;;  %3341 = vmatpush.bf16.msrb.mxu0 %v3332_v45 }
  0xe6   : > { %521 = vst.msk [vmem:[#allocation2 + $0x48] sm:$0xff] %vm511_vm8, %v493_v34  ;;  %v761_v8 = vadd.f32 %v745_v35, %v717_v26  ;;  %v2026_v34 = vunpack.c.l.b16 %v1973_v25  ;;  %v2501_v46 = vsel %vm9019_vm11, %v2499_v30, %v2500_v59  ;;  %v5198_v35 = vld [vmem:[%s8536_s17 + $0x14] sm:$0xf] }
  0xe7   : > { %v926_v42 = vld [vmem:[#allocation2 + $0x38] sm:$0xff]  ;;  %7469 = vmatmul.msk.bf16.gmra.mxu2 %vm433_vm4, %v1794_v63  ;;  %v2025_v63 = vunpack.c.l.b16 %v1970_v21  ;;  %v7766_v21 = vld [vmem:[%s11543_s1 + $0x34] sm:$0xf] }
  0xe8   : > { %777 = vst.msk [vmem:[#allocation2 + $0x40] sm:$0xff] %vm511_vm8, %v761_v8  ;;  %v942_v43 = vadd.f32 %v926_v42, %v8926_v33  ;;  %v719_v49 = vpop.f32.mrf.mxu1  ;;  %v2719_v33 = vrot.slane %v7612_v53, 5  ;;  %v7474_v8 = vld [vmem:[%s8536_s17 + $0x2c8] sm:$0xf] }
  0xe9   : > { %v911_v47 = vpop.f32.mrf.mxu3  ;;  %v934_v42 = vld [vmem:[#allocation2 + $0x78] sm:$0xff]  ;;  %v1976_v53 = vrot.slane %v7474_v8, 5  ;;  %v7477_v8 = vld [vmem:[%s8536_s17 + $0x2e4] sm:$0xf] }
  0xea   : > { %v948_v50 = vadd.f32 %v932_v48, %v911_v47  ;;  %958 = vst.msk [vmem:[#allocation2 + $0x38] sm:$0xff] %vm511_vm8, %v942_v43  ;;  %v8988_v52 = vpop.f32.mrf.mxu2  ;;  %v2721_v44 = vrot.slane %v2719_v33, 4  ;;  %v2720_v9 = vsel %vm8564_vm7, %v7635_v1, %v2719_v33  ;;  %v2041_v47 = vpack.c.b16 %v2026_v34, %v2025_v63  ;;  %v7807_v34 = vld [vmem:[%s11543_s1 + $0x38] sm:$0xf] }
  0xeb   : > { %v2775_v14 = vunpack.c.l.b16 %v2720_v9  ;;  %v2554_v33 = vunpack.c.l.b16 %v2501_v46 }
  0xec   : > { %964 = vst.msk [vmem:[#allocation2 + $0x68] sm:$0xff] %vm511_vm8, %v948_v50  ;;  %v2723_v13 = vsel %vm8564_vm7, %v2721_v44, %v2722_v4  ;;  %v7473_v50 = vld [vmem:[%s8536_s17 + $0x2c4] sm:$0xe]  ;;  %v2729_v44 = vrot.slane %v7616_v61, 5  ;;  %v7617_v61 = vld [vmem:[%s8536_s17 + $0xe8] sm:$0xe] }
  0xed   : > { %v496_v62 = vpop.f32.mrf.mxu0  ;;  %v746_v0 = vld [vmem:[#allocation2 + $0x48] sm:$0xff]  ;;  %v2776_v19 = vunpack.c.l.b16 %v2723_v13  ;;  %v7495_v3 = vrot.slane %v7473_v50, 9 }
  0xee   : > { %7328 = vmatmul.msk.bf16.gmra.mxu3 %vm433_vm4, %v1100_v51  ;;  %522 = vst.msk [vmem:[#allocation2 + $0x50] sm:$0xff] %vm511_vm8, %v496_v62  ;;  %v762_v2 = vadd.f32 %v746_v0, %v719_v49  ;;  %v7615_v49 = vld [vmem:[%s8536_s17 + $0xd0] sm:$0xf]  ;;  %v7475_v51 = vld [vmem:[%s8536_s17 + $0x2cc] sm:$0x1] }
  0xef   : > { %v927_v5 = vld [vmem:[#allocation2 + $0x40] sm:$0xff]  ;;  %v2791_v26 = vpack.c.b16 %v2776_v19, %v2775_v14  ;;  %v2726_v55 = vrot.slane %v7615_v49, 5  ;;  %v1979_v6 = vrot.slane %v7475_v51, 5  ;;  %v2504_v19 = vrot.slane %v7574_v54, 7  ;;  %v7618_v49 = vld [vmem:[%s8536_s17 + $0xec] sm:$0xf] }
  0xf0   : > { %778 = vst.msk [vmem:[#allocation2 + $0x48] sm:$0xff] %vm511_vm8, %v762_v2  ;;  %v943_v10 = vadd.f32 %v927_v5, %v8945_v57  ;;  %7369 = vmatmul.msk.bf16.gmra.mxu0 %vm433_vm4, %v1354_v60  ;;  %v722_v17 = vpop.f32.mrf.mxu1  ;;  %v7570_v57 = vld [vmem:[%s8536_s17 + $0xa8] sm:$0x8]  ;;  %v7614_v60 = vld [vmem:[%s8536_s17 + $0xcc] sm:$0xe]  ;;  %v1978_v5 = vrot.slane %v1976_v53, 4  ;;  %v1977_v24 = vsel %vm8564_vm7, %v7495_v3, %v1976_v53 }
  0xf1   : > { %v914_v15 = vpop.f32.mrf.mxu3  ;;  %v7594_v29 = vrot.slane %v7570_v57, 11  ;;  %v7636_v0 = vrot.slane %v7614_v60, 9  ;;  %v2728_v1 = vrot.slane %v2726_v55, 4  ;;  %v2506_v30 = vrot.slane %v2504_v19, 4  ;;  %v7476_v51 = vld [vmem:[%s8536_s17 + $0x2e0] sm:$0xe] }
  0xf2   : > { %v949_v20 = vadd.f32 %v933_v16, %v914_v15  ;;  %959 = vst.msk [vmem:[#allocation2 + $0x40] sm:$0xff] %vm511_vm8, %v943_v10  ;;  %v9010_v22 = vpop.f32.mrf.mxu2  ;;  %v1177_v16 = vld [vmem:[#allocation2] sm:$0xff]  ;;  %v1980_v25 = vsel %vm8564_vm7, %v1978_v5, %v1979_v6  ;;  %v7478_v53 = vld [vmem:[%s8536_s17 + $0x2e8] sm:$0x1]  ;;  %v7496_v54 = vrot.slane %v7476_v51, 9 }
  0xf3   : > { %7426 = vmatmul.msk.bf16.gmra.mxu1 %vm433_vm4, %v8317_v11  ;;  %v2498_v23 = vsel %vm9019_vm11, %v7594_v29, %v2497_v18  ;;  %v2727_v7 = vsel %vm8564_vm7, %v7636_v0, %v2726_v55  ;;  %v2730_v9 = vsel %vm8564_vm7, %v2728_v1, %v2729_v44  ;;  %v7573_v18 = vld [vmem:[%s8536_s17 + $0xc4] sm:$0x8]  ;;  %v2028_v63 = vunpack.c.l.b16 %v1980_v25 }
  0xf4   : > { %965 = vst.msk [vmem:[#allocation2 + $0x70] sm:$0xff] %vm511_vm8, %v949_v20  ;;  %v2553_v58 = vunpack.c.l.b16 %v2498_v23  ;;  %v2777_v13 = vunpack.c.l.b16 %v2727_v7  ;;  %v2778_v14 = vunpack.c.l.b16 %v2730_v9  ;;  %v7595_v29 = vrot.slane %v7573_v18, 11  ;;  %v7577_v1 = vld [vmem:[%s8536_s17 + $0xe4] sm:$0xf]  ;;  %v7578_v18 = vld [vmem:[%s8536_s17 + $0xe8] sm:$0x7] }
  0xf5   : > { %v498_v27 = vpop.f32.mrf.mxu0  ;;  %v747_v28 = vld [vmem:[#allocation2 + $0x50] sm:$0xff]  ;;  %v2733_v55 = vrot.slane %v7618_v49, 5  ;;  %v7637_v44 = vrot.slane %v7617_v61, 9  ;;  %v2511_v9 = vrot.slane %v7577_v1, 7  ;;  %v7479_v49 = vld [vmem:[%s8536_s17 + $0x2fc] sm:$0xe] }
  0xf6   : > { %523 = vst.msk [vmem:[#allocation2 + $0x58] sm:$0xff] %vm511_vm8, %v498_v27  ;;  %v763_v32 = vadd.f32 %v747_v28, %v722_v17  ;;  %v2569_v11 = vpack.c.b16 %v2554_v33, %v2553_v58  ;;  %v2792_v27 = vpack.c.b16 %v2778_v14, %v2777_v13  ;;  %v2505_v45 = vsel %vm9019_vm11, %v7595_v29, %v2504_v19  ;;  %v8319_v58 = vld [vmem:[%s8536_s17 + $0x2c8] sm:$0xff]  ;;  %v1179_v14 = vld [vmem:[#allocation2 + $0x10] sm:$0xff] }
  0xf7   : > { %v928_v36 = vld [vmem:[#allocation2 + $0x48] sm:$0xff]  ;;  %7644 = vmatmul.msk.bf16.vlgmr.msra.gmra.mxu2 %vm433_vm4, %v2791_v26  ;;  %v3586_v26 = vsel %vm458_vm0, %v7766_v21, 0  ;;  %v2555_v33 = vunpack.c.l.b16 %v2505_v45  ;;  %v2734_v5 = vsel %vm8564_vm7, %v7637_v44, %v2733_v55  ;;  %v2513_v29 = vrot.slane %v2511_v9, 4  ;;  %v7580_v1 = vld [vmem:[%s8536_s17 + $0x100] sm:$0xf] }
  0xf8   : > { %779 = vst.msk [vmem:[#allocation2 + $0x50] sm:$0xff] %vm511_vm8, %v763_v32  ;;  %v944_v39 = vadd.f32 %v928_v36, %v8970_v31  ;;  %v724_v43 = vpop.f32.mrf.mxu1  ;;  %3595 = vmatpush.bf16.msrb.mxu1 %v3586_v26  ;;  %v2027_v32 = vunpack.c.l.b16 %v1977_v24 }
  0xf9   : > { %v916_v41 = vpop.f32.mrf.mxu3 }
  0xfa   : > { %v950_v31 = vadd.f32 %v934_v42, %v916_v41  ;;  %960 = vst.msk [vmem:[#allocation2 + $0x48] sm:$0xff] %vm511_vm8, %v944_v39  ;;  %v9036_v48 = vpop.f32.mrf.mxu2  ;;  %v3840_v39 = vsel %vm458_vm0, %v7807_v34, 0  ;;  %v1178_v42 = vld [vmem:[#allocation2 + $0x8] sm:$0xff] }
  0xfb   : > { %3849 = vmatpush.bf16.msrb.mxu2 %v3840_v39 }
  0xfc   : > { %966 = vst.msk [vmem:[#allocation2 + $0x78] sm:$0xff] %vm511_vm8, %v950_v31  ;;  %v2042_v31 = vpack.c.b16 %v2028_v63, %v2027_v32 }
  0xfd   : > { %v748_v37 = vld [vmem:[#allocation2 + $0x58] sm:$0xff]  ;;  %v9045_v62 = vpop.f32.mrf.mxu0 }
  0xfe   : > { %7503 = vmatmul.msk.bf16.vlgmr.msra.gmra.mxu3 %vm433_vm4, %v2041_v47  ;;  %v764_v2 = vadd.f32 %v748_v37, %v724_v43  ;;  %v7619_v37 = vld [vmem:[%s8536_s17 + $0xf0] sm:$0x1] }
  0xff   : > { %v929_v4 = vld [vmem:[#allocation2 + $0x50] sm:$0xff]  ;;  %v2736_v3 = vrot.slane %v7619_v37, 5 }
 0x100   : > { %780 = vst.msk [vmem:[#allocation2 + $0x58] sm:$0xff] %vm511_vm8, %v764_v2  ;;  %v945_v10 = vadd.f32 %v929_v4, %v8988_v52  ;;  %7560 = vmatmul.msk.bf16.vlgmr.msra.gmra.mxu0 %vm433_vm4, %v8318_v56  ;;  %v9056_v17 = vpop.f32.mrf.mxu1  ;;  %v7575_v52 = vld [vmem:[%s8536_s17 + $0xcc] sm:$0x7]  ;;  %v2735_v2 = vrot.slane %v2733_v55, 4  ;;  %v1986_v4 = vrot.slane %v7478_v53, 5 }
 0x101   : > { %v1137_v15 = vpop.f32.mrf.mxu3  ;;  %v2507_v59 = vrot.slane %v7575_v52, 7 }
 0x102   : > { %v1193_v20 = vadd.f32 %v1177_v16, %v1137_v15  ;;  %961 = vst.msk [vmem:[#allocation2 + $0x50] sm:$0xff] %vm511_vm8, %v945_v10  ;;  %v9063_v57 = vpop.f32.mrf.mxu2  ;;  %v2737_v6 = vsel %vm8564_vm7, %v2735_v2, %v2736_v3  ;;  %v2779_v10 = vunpack.c.l.b16 %v2734_v5  ;;  %v7576_v16 = vld [vmem:[%s8536_s17 + $0xe0] sm:$0x8] }
 0x103   : > { %7603 = vmatmul.msk.bf16.vlgmr.msra.gmra.mxu1 %vm433_vm4, %v2569_v11  ;;  %v2508_v23 = vsel %vm9019_vm11, %v2506_v30, %v2507_v59  ;;  %v2780_v11 = vunpack.c.l.b16 %v2737_v6  ;;  %v2514_v30 = vrot.slane %v7578_v18, 7 }
 0x104   : > { %1209 = vst.msk [vmem:[#allocation2] sm:$0xff] %vm511_vm8, %v1193_v20  ;;  %v2556_v60 = vunpack.c.l.b16 %v2508_v23 }
 0x105   : > { %v9073_v28 = vpop.f32.mrf.mxu0  ;;  %v2793_v25 = vpack.c.b16 %v2780_v11, %v2779_v10 }
 0x106   : > { %v2570_v7 = vpack.c.b16 %v2556_v60, %v2555_v33  ;;  %v7620_v33 = vld [vmem:[%s8536_s17 + $0x104] sm:$0xe]  ;;  %v7622_v60 = vld [vmem:[%s8536_s17 + $0x10c] sm:$0x1] }
 0x107   : > { %v930_v36 = vld [vmem:[#allocation2 + $0x58] sm:$0xff]  ;;  %7645 = vmatmul.msk.bf16.gmra.mxu2 %vm433_vm4, %v2792_v27  ;;  %v7596_v27 = vrot.slane %v7576_v16, 11  ;;  %v7638_v44 = vrot.slane %v7620_v33, 9  ;;  %v2743_v3 = vrot.slane %v7622_v60, 5  ;;  %v1181_v16 = vld [vmem:[#allocation2 + $0x20] sm:$0xff] }
 0x108   : > { %v946_v40 = vadd.f32 %v930_v36, %v9010_v22  ;;  %v9082_v43 = vpop.f32.mrf.mxu1  ;;  %v1983_v22 = vrot.slane %v7477_v8, 5  ;;  %v2515_v8 = vsel %vm9019_vm11, %v2513_v29, %v2514_v30 }
 0x109   : > { %v1139_v41 = vpop.f32.mrf.mxu3  ;;  %v2512_v39 = vsel %vm9019_vm11, %v7596_v27, %v2511_v9  ;;  %v2558_v53 = vunpack.c.l.b16 %v2515_v8 }
 0x10a   : > { %v1194_v46 = vadd.f32 %v1178_v42, %v1139_v41  ;;  %962 = vst.msk [vmem:[#allocation2 + $0x58] sm:$0xff] %vm511_vm8, %v946_v40  ;;  %v9089_v47 = vpop.f32.mrf.mxu2  ;;  %v1984_v52 = vsel %vm8564_vm7, %v7496_v54, %v1983_v22  ;;  %v1180_v41 = vld [vmem:[#allocation2 + $0x18] sm:$0xff]  ;;  %v2557_v51 = vunpack.c.l.b16 %v2512_v39 }
 0x10b   : > { %v1431_v50 = vld [vmem:[#allocation2] sm:$0xff]  ;;  %v2029_v34 = vunpack.c.l.b16 %v1984_v52 }
 0x10c   : > { %v1447_v56 = vadd.f32 %v1431_v50, %v9045_v62  ;;  %1210 = vst.msk [vmem:[#allocation2 + $0x8] sm:$0xff] %vm511_vm8, %v1194_v46  ;;  %v1985_v62 = vrot.slane %v1983_v22, 4  ;;  %v7481_v50 = vld [vmem:[%s8536_s17 + $0x304] sm:$0x1]  ;;  %v2571_v6 = vpack.c.b16 %v2558_v53, %v2557_v51 }
 0x10d   : > { %v1396_v0 = vpop.f32.mrf.mxu0  ;;  %v1993_v5 = vrot.slane %v7481_v50, 5  ;;  %v7624_v51 = vld [vmem:[%s8536_s17 + $0x124] sm:$0xf] }
 0x10e   : > { %1463 = vst.msk [vmem:[#allocation2] sm:$0xff] %vm511_vm8, %v1447_v56  ;;  %7504 = vmatmul.msk.bf16.gmra.mxu3 %vm433_vm4, %v2042_v31  ;;  %v1987_v24 = vsel %vm8564_vm7, %v1985_v62, %v1986_v4  ;;  %v7621_v31 = vld [vmem:[%s8536_s17 + $0x108] sm:$0xf]  ;;  %v7497_v62 = vrot.slane %v7479_v49, 9  ;;  %v2747_v60 = vrot.slane %v7624_v51, 5 }
 0x10f   : > { %v2030_v36 = vunpack.c.l.b16 %v1987_v24  ;;  %v2740_v55 = vrot.slane %v7621_v31, 5 }
 0x110   : > { %7561 = vmatmul.msk.bf16.gmra.mxu0 %vm433_vm4, %v8319_v58  ;;  %v9107_v15 = vpop.f32.mrf.mxu1  ;;  %v8320_v58 = vld [vmem:[%s8536_s17 + $0x2e4] sm:$0xff] }
 0x111   : > { %v1142_v13 = vpop.f32.mrf.mxu3  ;;  %v2043_v45 = vpack.c.b16 %v2030_v36, %v2029_v34  ;;  %v2742_v2 = vrot.slane %v2740_v55, 4 }
 0x112   : > { %v1195_v19 = vadd.f32 %v1179_v14, %v1142_v13  ;;  %v9111_v20 = vpop.f32.mrf.mxu2 }
 0x113   : > { %v1432_v21 = vld [vmem:[#allocation2 + $0x8] sm:$0xff]  ;;  %7604 = vmatmul.msk.bf16.gmra.mxu1 %vm433_vm4, %v2570_v7  ;;  %v2741_v7 = vsel %vm8564_vm7, %v7638_v44, %v2740_v55  ;;  %v2744_v9 = vsel %vm8564_vm7, %v2742_v2, %v2743_v3  ;;  %v7623_v44 = vld [vmem:[%s8536_s17 + $0x120] sm:$0xe]  ;;  %v7625_v2 = vld [vmem:[%s8536_s17 + $0x128] sm:$0x1] }
 0x114   : > { %v1448_v26 = vadd.f32 %v1432_v21, %v9073_v28  ;;  %1211 = vst.msk [vmem:[#allocation2 + $0x10] sm:$0xff] %vm511_vm8, %v1195_v19  ;;  %v7480_v28 = vld [vmem:[%s8536_s17 + $0x300] sm:$0xf]  ;;  %v2781_v11 = vunpack.c.l.b16 %v2741_v7  ;;  %v2782_v13 = vunpack.c.l.b16 %v2744_v9  ;;  %v7579_v19 = vld [vmem:[%s8536_s17 + $0xfc] sm:$0x8] }
 0x115   : > { %v1613_v59 = vld [vmem:[#allocation2] sm:$0xff]  ;;  %v9120_v32 = vpop.f32.mrf.mxu0  ;;  %v1990_v23 = vrot.slane %v7480_v28, 5  ;;  %v7581_v21 = vld [vmem:[%s8536_s17 + $0x104] sm:$0x7]  ;;  %v7597_v30 = vrot.slane %v7579_v19, 11 }
 0x116   : > { %1464 = vst.msk [vmem:[#allocation2 + $0x8] sm:$0xff] %vm511_vm8, %v1448_v26  ;;  %v1629_v63 = vadd.f32 %v1613_v59, %v9056_v17  ;;  %v2794_v27 = vpack.c.b16 %v2782_v13, %v2781_v11  ;;  %v7482_v55 = vld [vmem:[%s8536_s17 + $0x318] sm:$0xe] }
 0x117   : > { %7646 = vmatmul.msk.bf16.gmra.mxu2 %vm433_vm4, %v2793_v25  ;;  %v7498_v7 = vrot.slane %v7482_v55, 9 }
 0x118   : > { %1645 = vst.msk [vmem:[#allocation2] sm:$0xff] %vm511_vm8, %v1629_v63  ;;  %v9131_v17 = vpop.f32.mrf.mxu1  ;;  %v2521_v63 = vrot.slane %v7581_v21, 7 }
 0x119   : > { %v1144_v40 = vpop.f32.mrf.mxu3 }
 0x11a   : > { %v1196_v42 = vadd.f32 %v1180_v41, %v1144_v40  ;;  %v9133_v46 = vpop.f32.mrf.mxu2  ;;  %v7483_v41 = vld [vmem:[%s8536_s17 + $0x31c] sm:$0xf] }
 0x11b   : > { %v1433_v22 = vld [vmem:[#allocation2 + $0x10] sm:$0xff]  ;;  %v1997_v50 = vrot.slane %v7483_v41, 5 }
 0x11c   : > { %v1449_v56 = vadd.f32 %v1433_v22, %v1396_v0  ;;  %1212 = vst.msk [vmem:[#allocation2 + $0x18] sm:$0xff] %vm511_vm8, %v1196_v42  ;;  %v1992_v0 = vrot.slane %v1990_v23, 4 }
 0x11d   : > { %v1614_v61 = vld [vmem:[#allocation2 + $0x8] sm:$0xff]  ;;  %v9142_v37 = vpop.f32.mrf.mxu0 }
 0x11e   : > { %1465 = vst.msk [vmem:[#allocation2 + $0x10] sm:$0xff] %vm511_vm8, %v1449_v56  ;;  %v1630_v54 = vadd.f32 %v1614_v61, %v9082_v43  ;;  %7505 = vmatmul.msk.bf16.gmra.mxu3 %vm433_vm4, %v2043_v45  ;;  %v2518_v43 = vrot.slane %v7580_v1, 7  ;;  %v1994_v26 = vsel %vm8564_vm7, %v1992_v0, %v1993_v5  ;;  %v7484_v56 = vld [vmem:[%s8536_s17 + $0x320] sm:$0x1]  ;;  %v7639_v0 = vrot.slane %v7623_v44, 9 }
 0x11f   : > { %v1871_v4 = vld [vmem:[#allocation2] sm:$0xff]  ;;  %v2032_v8 = vunpack.c.l.b16 %v1994_v26  ;;  %v8321_v1 = vld [vmem:[%s8536_s17 + $0x300] sm:$0xff]  ;;  %v2750_v5 = vrot.slane %v7625_v2, 5 }
 0x120   : > { %1646 = vst.msk [vmem:[#allocation2 + $0x8] sm:$0xff] %vm511_vm8, %v1630_v54  ;;  %v1887_v10 = vadd.f32 %v1871_v4, %v9036_v48  ;;  %7562 = vmatmul.msk.bf16.gmra.mxu0 %vm433_vm4, %v8320_v58  ;;  %v9155_v18 = vpop.f32.mrf.mxu1  ;;  %v1991_v48 = vsel %vm8564_vm7, %v7497_v62, %v1990_v23  ;;  %v2520_v59 = vrot.slane %v2518_v43, 4  ;;  %v2519_v42 = vsel %vm9019_vm11, %v7597_v30, %v2518_v43  ;;  %v1182_v23 = vld [vmem:[#allocation2 + $0x28] sm:$0xff]  ;;  %v7584_v26 = vld [vmem:[%s8536_s17 + $0x120] sm:$0x7] }
 0x121   : > { %v1147_v14 = vpop.f32.mrf.mxu3  ;;  %v2031_v39 = vunpack.c.l.b16 %v1991_v48  ;;  %v2559_v58 = vunpack.c.l.b16 %v2519_v42  ;;  %v7583_v62 = vld [vmem:[%s8536_s17 + $0x11c] sm:$0xf]  ;;  %v2749_v4 = vrot.slane %v2747_v60, 4  ;;  %v2748_v11 = vsel %vm8564_vm7, %v7639_v0, %v2747_v60  ;;  %v7582_v48 = vld [vmem:[%s8536_s17 + $0x118] sm:$0x8] }
 0x122   : > { %1903 = vst.msk [vmem:[#allocation2] sm:$0xff] %vm511_vm8, %v1887_v10  ;;  %v1197_v52 = vadd.f32 %v1181_v16, %v1147_v14  ;;  %v9160_v24 = vpop.f32.mrf.mxu2  ;;  %v2522_v45 = vsel %vm9019_vm11, %v2520_v59, %v2521_v63  ;;  %v2000_v10 = vrot.slane %v7484_v56, 5  ;;  %v2783_v16 = vunpack.c.l.b16 %v2748_v11  ;;  %v7485_v60 = vld [vmem:[%s8536_s17 + $0x334] sm:$0xe]  ;;  %v7626_v0 = vld [vmem:[%s8536_s17 + $0x13c] sm:$0xe] }
 0x123   : > { %v1434_v25 = vld [vmem:[#allocation2 + $0x18] sm:$0xff]  ;;  %7605 = vmatmul.msk.bf16.gmra.mxu1 %vm433_vm4, %v2571_v6  ;;  %v2044_v49 = vpack.c.b16 %v2032_v8, %v2031_v39  ;;  %v2560_v33 = vunpack.c.l.b16 %v2522_v45  ;;  %v2751_v13 = vsel %vm8564_vm7, %v2749_v4, %v2750_v5  ;;  %v2528_v8 = vrot.slane %v7584_v26, 7  ;;  %v7628_v4 = vld [vmem:[%s8536_s17 + $0x144] sm:$0x1] }
 0x124   : > { %v1450_v29 = vadd.f32 %v1434_v25, %v9120_v32  ;;  %1213 = vst.msk [vmem:[#allocation2 + $0x20] sm:$0xff] %vm511_vm8, %v1197_v52  ;;  %v2784_v19 = vunpack.c.l.b16 %v2751_v13  ;;  %v1183_v52 = vld [vmem:[#allocation2 + $0x30] sm:$0xff]  ;;  %v7499_v11 = vrot.slane %v7485_v60, 9 }
 0x125   : > { %v1615_v34 = vld [vmem:[#allocation2 + $0x10] sm:$0xff]  ;;  %v9169_v36 = vpop.f32.mrf.mxu0  ;;  %v2572_v43 = vpack.c.b16 %v2560_v33, %v2559_v58 }
 0x126   : > { %1466 = vst.msk [vmem:[#allocation2 + $0x18] sm:$0xff] %vm511_vm8, %v1450_v29  ;;  %v1631_v28 = vadd.f32 %v1615_v34, %v9107_v15  ;;  %v2795_v63 = vpack.c.b16 %v2784_v19, %v2783_v16  ;;  %v7627_v58 = vld [vmem:[%s8536_s17 + $0x140] sm:$0xf] }
 0x127   : > { %v1872_v40 = vld [vmem:[#allocation2 + $0x8] sm:$0xff]  ;;  %7647 = vmatmul.msk.bf16.gmra.mxu2 %vm433_vm4, %v2794_v27  ;;  %v2754_v2 = vrot.slane %v7627_v58, 5 }
 0x128   : > { %1647 = vst.msk [vmem:[#allocation2 + $0x10] sm:$0xff] %vm511_vm8, %v1631_v28  ;;  %v1888_v32 = vadd.f32 %v1872_v40, %v9063_v57  ;;  %v9181_v31 = vpop.f32.mrf.mxu1  ;;  %v7598_v28 = vrot.slane %v7582_v48, 11 }
 0x129   : > { %v1149_v15 = vpop.f32.mrf.mxu3 }
 0x12a   : > { %1904 = vst.msk [vmem:[#allocation2 + $0x8] sm:$0xff] %vm511_vm8, %v1888_v32  ;;  %v1198_v22 = vadd.f32 %v1182_v23, %v1149_v15  ;;  %v9184_v57 = vpop.f32.mrf.mxu2  ;;  %v7486_v23 = vld [vmem:[%s8536_s17 + $0x338] sm:$0xf] }
 0x12b   : > { %v1435_v53 = vld [vmem:[#allocation2 + $0x20] sm:$0xff]  ;;  %v2004_v56 = vrot.slane %v7486_v23, 5 }
 0x12c   : > { %v1451_v61 = vadd.f32 %v1435_v53, %v9142_v37  ;;  %1214 = vst.msk [vmem:[#allocation2 + $0x28] sm:$0xff] %vm511_vm8, %v1198_v22  ;;  %v1999_v37 = vrot.slane %v1997_v50, 4 }
 0x12d   : > { %v1616_v3 = vld [vmem:[#allocation2 + $0x18] sm:$0xff]  ;;  %v9194_v54 = vpop.f32.mrf.mxu0 }
 0x12e   : > { %1467 = vst.msk [vmem:[#allocation2 + $0x20] sm:$0xff] %vm511_vm8, %v1451_v61  ;;  %v1632_v6 = vadd.f32 %v1616_v3, %v9131_v17  ;;  %7506 = vmatmul.msk.bf16.gmra.mxu3 %vm433_vm4, %v2044_v49  ;;  %v2525_v17 = vrot.slane %v7583_v62, 7  ;;  %v2001_v59 = vsel %vm8564_vm7, %v1999_v37, %v2000_v10  ;;  %v7487_v61 = vld [vmem:[%s8536_s17 + $0x33c] sm:$0x1]  ;;  %v7640_v37 = vrot.slane %v7626_v0, 9 }
 0x12f   : > { %v1873_v9 = vld [vmem:[#allocation2 + $0x10] sm:$0xff]  ;;  %v2034_v45 = vunpack.c.l.b16 %v2001_v59  ;;  %v2757_v10 = vrot.slane %v7628_v4, 5  ;;  %v7587_v59 = vld [vmem:[%s8536_s17 + $0x13c] sm:$0x7] }
 0x130   : > { %1648 = vst.msk [vmem:[#allocation2 + $0x18] sm:$0xff] %vm511_vm8, %v1632_v6  ;;  %v1889_v14 = vadd.f32 %v1873_v9, %v9089_v47  ;;  %7563 = vmatmul.msk.bf16.gmra.mxu0 %vm433_vm4, %v8321_v1  ;;  %v9207_v25 = vpop.f32.mrf.mxu1  ;;  %v1998_v47 = vsel %vm8564_vm7, %v7498_v7, %v1997_v50  ;;  %v2527_v39 = vrot.slane %v2525_v17, 4  ;;  %v2526_v22 = vsel %vm9019_vm11, %v7598_v28, %v2525_v17  ;;  %v1184_v50 = vld [vmem:[#allocation2 + $0x38] sm:$0xff]  ;;  %v8322_v62 = vld [vmem:[%s8536_s17 + $0x31c] sm:$0xff]  ;;  %v7586_v7 = vld [vmem:[%s8536_s17 + $0x138] sm:$0xf] }
 0x131   : > { %v1152_v21 = vpop.f32.mrf.mxu3  ;;  %v2033_v42 = vunpack.c.l.b16 %v1998_v47  ;;  %v2561_v1 = vunpack.c.l.b16 %v2526_v22  ;;  %v2756_v9 = vrot.slane %v2754_v2, 4  ;;  %v2755_v16 = vsel %vm8564_vm7, %v7640_v37, %v2754_v2  ;;  %v7585_v47 = vld [vmem:[%s8536_s17 + $0x134] sm:$0x8]  ;;  %v7488_v2 = vld [vmem:[%s8536_s17 + $0x350] sm:$0xe] }
 0x132   : > { %1905 = vst.msk [vmem:[#allocation2 + $0x10] sm:$0xff] %vm511_vm8, %v1889_v14  ;;  %v1199_v27 = vadd.f32 %v1183_v52, %v1152_v21  ;;  %v9212_v29 = vpop.f32.mrf.mxu2  ;;  %v2529_v49 = vsel %vm9019_vm11, %v2527_v39, %v2528_v8  ;;  %v2007_v14 = vrot.slane %v7487_v61, 5  ;;  %v2785_v52 = vunpack.c.l.b16 %v2755_v16  ;;  %v7629_v37 = vld [vmem:[%s8536_s17 + $0x158] sm:$0xe] }
 0x133   : > { %v1436_v30 = vld [vmem:[#allocation2 + $0x28] sm:$0xff]  ;;  %7606 = vmatmul.msk.bf16.gmra.mxu1 %vm433_vm4, %v2572_v43  ;;  %v2045_v55 = vpack.c.b16 %v2034_v45, %v2033_v42  ;;  %v2562_v44 = vunpack.c.l.b16 %v2529_v49  ;;  %v2758_v19 = vsel %vm8564_vm7, %v2756_v9, %v2757_v10  ;;  %v2535_v45 = vrot.slane %v7587_v59, 7  ;;  %v7631_v9 = vld [vmem:[%s8536_s17 + $0x160] sm:$0x1] }
 0x134   : > { %v1452_v34 = vadd.f32 %v1436_v30, %v9169_v36  ;;  %1215 = vst.msk [vmem:[#allocation2 + $0x30] sm:$0xff] %vm511_vm8, %v1199_v27  ;;  %v2786_v48 = vunpack.c.l.b16 %v2758_v19  ;;  %v1185_v27 = vld [vmem:[#allocation2 + $0x40] sm:$0xff]  ;;  %v7500_v16 = vrot.slane %v7488_v2, 9 }
 0x135   : > { %v1617_v40 = vld [vmem:[#allocation2 + $0x20] sm:$0xff]  ;;  %v9221_v41 = vpop.f32.mrf.mxu0  ;;  %v2573_v17 = vpack.c.b16 %v2562_v44, %v2561_v1  ;;  %v7630_v1 = vld [vmem:[%s8536_s17 + $0x15c] sm:$0xf] }
 0x136   : > { %1468 = vst.msk [vmem:[#allocation2 + $0x28] sm:$0xff] %vm511_vm8, %v1452_v34  ;;  %v1633_v32 = vadd.f32 %v1617_v40, %v9155_v18  ;;  %v2796_v8 = vpack.c.b16 %v2786_v48, %v2785_v52  ;;  %v2761_v4 = vrot.slane %v7630_v1, 5 }
 0x137   : > { %v1874_v15 = vld [vmem:[#allocation2 + $0x18] sm:$0xff]  ;;  %7648 = vmatmul.msk.bf16.gmra.mxu2 %vm433_vm4, %v2795_v63 }
 0x138   : > { %1649 = vst.msk [vmem:[#allocation2 + $0x20] sm:$0xff] %vm511_vm8, %v1633_v32  ;;  %v1890_v36 = vadd.f32 %v1874_v15, %v9111_v20  ;;  %v9233_v51 = vpop.f32.mrf.mxu1  ;;  %v7599_v32 = vrot.slane %v7585_v47, 11 }
 0x139   : > { %v1154_v18 = vpop.f32.mrf.mxu3 }
 0x13a   : > { %1906 = vst.msk [vmem:[#allocation2 + $0x18] sm:$0xff] %vm511_vm8, %v1890_v36  ;;  %v1200_v53 = vadd.f32 %v1184_v50, %v1154_v18  ;;  %v9236_v20 = vpop.f32.mrf.mxu2  ;;  %v7489_v50 = vld [vmem:[%s8536_s17 + $0x354] sm:$0xf] }
 0x13b   : > { %v1437_v33 = vld [vmem:[#allocation2 + $0x30] sm:$0xff]  ;;  %v2011_v61 = vrot.slane %v7489_v50, 5 }
 0x13c   : > { %v1453_v3 = vadd.f32 %v1437_v33, %v9194_v54  ;;  %1216 = vst.msk [vmem:[#allocation2 + $0x38] sm:$0xff] %vm511_vm8, %v1200_v53  ;;  %v2006_v54 = vrot.slane %v2004_v56, 4 }
 0x13d   : > { %v1618_v5 = vld [vmem:[#allocation2 + $0x28] sm:$0xff]  ;;  %v9246_v6 = vpop.f32.mrf.mxu0 }
 0x13e   : > { %1469 = vst.msk [vmem:[#allocation2 + $0x30] sm:$0xff] %vm511_vm8, %v1453_v3  ;;  %v1634_v43 = vadd.f32 %v1618_v5, %v9181_v31  ;;  %7507 = vmatmul.msk.bf16.gmra.mxu3 %vm433_vm4, %v2045_v55  ;;  %v2532_v31 = vrot.slane %v7586_v7, 7  ;;  %v2008_v39 = vsel %vm8564_vm7, %v2006_v54, %v2007_v14  ;;  %v7490_v3 = vld [vmem:[%s8536_s17 + $0x358] sm:$0x1]  ;;  %v7641_v54 = vrot.slane %v7629_v37, 9 }
 0x13f   : > { %v1875_v13 = vld [vmem:[#allocation2 + $0x20] sm:$0xff]  ;;  %v2036_v49 = vunpack.c.l.b16 %v2008_v39  ;;  %v8323_v7 = vld [vmem:[%s8536_s17 + $0x338] sm:$0xff]  ;;  %v2764_v14 = vrot.slane %v7631_v9, 5 }
 0x140   : > { %1650 = vst.msk [vmem:[#allocation2 + $0x28] sm:$0xff] %vm511_vm8, %v1634_v43  ;;  %v1891_v21 = vadd.f32 %v1875_v13, %v9133_v46  ;;  %7564 = vmatmul.msk.bf16.gmra.mxu0 %vm433_vm4, %v8322_v62  ;;  %v9259_v30 = vpop.f32.mrf.mxu1  ;;  %v2005_v46 = vsel %vm8564_vm7, %v7499_v11, %v2004_v56  ;;  %v2534_v42 = vrot.slane %v2532_v31, 4  ;;  %v2533_v53 = vsel %vm9019_vm11, %v7599_v32, %v2532_v31  ;;  %v1186_v56 = vld [vmem:[#allocation2 + $0x48] sm:$0xff]  ;;  %v7589_v11 = vld [vmem:[%s8536_s17 + $0x154] sm:$0xf] }
 0x141   : > { %v1157_v26 = vpop.f32.mrf.mxu3  ;;  %v2035_v22 = vunpack.c.l.b16 %v2005_v46  ;;  %v2563_v62 = vunpack.c.l.b16 %v2533_v53  ;;  %v2763_v13 = vrot.slane %v2761_v4, 4  ;;  %v2762_v52 = vsel %vm8564_vm7, %v7641_v54, %v2761_v4  ;;  %v7588_v46 = vld [vmem:[%s8536_s17 + $0x150] sm:$0x8]  ;;  %v7590_v39 = vld [vmem:[%s8536_s17 + $0x158] sm:$0x7] }
 0x142   : > { %1907 = vst.msk [vmem:[#allocation2 + $0x20] sm:$0xff] %vm511_vm8, %v1891_v21  ;;  %v1201_v63 = vadd.f32 %v1185_v27, %v1157_v26  ;;  %v9264_v34 = vpop.f32.mrf.mxu2  ;;  %v2536_v55 = vsel %vm9019_vm11, %v2534_v42, %v2535_v45  ;;  %v2014_v21 = vrot.slane %v7490_v3, 5  ;;  %v2787_v27 = vunpack.c.l.b16 %v2762_v52  ;;  %v7491_v4 = vld [vmem:[%s8536_s17 + $0x36c] sm:$0xe]  ;;  %v7632_v54 = vld [vmem:[%s8536_s17 + $0x174] sm:$0xe] }
 0x143   : > { %v1438_v28 = vld [vmem:[#allocation2 + $0x38] sm:$0xff]  ;;  %7607 = vmatmul.msk.bf16.gmra.mxu1 %vm433_vm4, %v2573_v17  ;;  %v2046_v60 = vpack.c.b16 %v2036_v49, %v2035_v22  ;;  %v2564_v0 = vunpack.c.l.b16 %v2536_v55  ;;  %v2765_v48 = vsel %vm8564_vm7, %v2763_v13, %v2764_v14  ;;  %v2542_v49 = vrot.slane %v7590_v39, 7  ;;  %v7634_v13 = vld [vmem:[%s8536_s17 + $0x17c] sm:$0x1] }
 0x144   : > { %v1454_v40 = vadd.f32 %v1438_v28, %v9221_v41  ;;  %1217 = vst.msk [vmem:[#allocation2 + $0x40] sm:$0xff] %vm511_vm8, %v1201_v63  ;;  %v2788_v47 = vunpack.c.l.b16 %v2765_v48  ;;  %v1187_v63 = vld [vmem:[#allocation2 + $0x50] sm:$0xff]  ;;  %v7501_v52 = vrot.slane %v7491_v4, 9 }
 0x145   : > { %v1619_v15 = vld [vmem:[#allocation2 + $0x30] sm:$0xff]  ;;  %v9273_v23 = vpop.f32.mrf.mxu0  ;;  %v2574_v31 = vpack.c.b16 %v2564_v0, %v2563_v62  ;;  %v7633_v62 = vld [vmem:[%s8536_s17 + $0x178] sm:$0xf] }
 0x146   : > { %1470 = vst.msk [vmem:[#allocation2 + $0x38] sm:$0xff] %vm511_vm8, %v1454_v40  ;;  %v1635_v36 = vadd.f32 %v1619_v15, %v9207_v25  ;;  %v2797_v45 = vpack.c.b16 %v2788_v47, %v2787_v27  ;;  %v2768_v9 = vrot.slane %v7633_v62, 5  ;;  %v1190_v62 = vld [vmem:[#allocation2 + $0x68] sm:$0xff] }
 0x147   : > { %v1876_v18 = vld [vmem:[#allocation2 + $0x28] sm:$0xff]  ;;  %7649 = vmatmul.msk.bf16.gmra.mxu2 %vm433_vm4, %v2796_v8 }
 0x148   : > { %1651 = vst.msk [vmem:[#allocation2 + $0x30] sm:$0xff] %vm511_vm8, %v1635_v36  ;;  %v1892_v41 = vadd.f32 %v1876_v18, %v9160_v24  ;;  %v9285_v58 = vpop.f32.mrf.mxu1  ;;  %v7600_v36 = vrot.slane %v7588_v46, 11 }
 0x149   : > { %v1159_v25 = vpop.f32.mrf.mxu3 }
 0x14a   : > { %1908 = vst.msk [vmem:[#allocation2 + $0x28] sm:$0xff] %vm511_vm8, %v1892_v41  ;;  %v1202_v33 = vadd.f32 %v1186_v56, %v1159_v25  ;;  %v9288_v24 = vpop.f32.mrf.mxu2  ;;  %v7492_v56 = vld [vmem:[%s8536_s17 + $0x370] sm:$0xf] }
 0x14b   : > { %v1439_v44 = vld [vmem:[#allocation2 + $0x40] sm:$0xff]  ;;  %v2018_v3 = vrot.slane %v7492_v56, 5 }
 0x14c   : > { %v1455_v5 = vadd.f32 %v1439_v44, %v9246_v6  ;;  %1218 = vst.msk [vmem:[#allocation2 + $0x48] sm:$0xff] %vm511_vm8, %v1202_v33  ;;  %v2013_v6 = vrot.slane %v2011_v61, 4 }
 0x14d   : > { %v1620_v10 = vld [vmem:[#allocation2 + $0x38] sm:$0xff]  ;;  %v9298_v43 = vpop.f32.mrf.mxu0 }
 0x14e   : > { %1471 = vst.msk [vmem:[#allocation2 + $0x40] sm:$0xff] %vm511_vm8, %v1455_v5  ;;  %v1636_v17 = vadd.f32 %v1620_v10, %v9233_v51  ;;  %7508 = vmatmul.msk.bf16.gmra.mxu3 %vm433_vm4, %v2046_v60  ;;  %v2539_v51 = vrot.slane %v7589_v11, 7  ;;  %v2015_v42 = vsel %vm8564_vm7, %v2013_v6, %v2014_v21  ;;  %v7493_v5 = vld [vmem:[%s8536_s17 + $0x374] sm:$0x1]  ;;  %v7642_v6 = vrot.slane %v7632_v54, 9 }
 0x14f   : > { %v1877_v19 = vld [vmem:[#allocation2 + $0x30] sm:$0xff]  ;;  %v2038_v55 = vunpack.c.l.b16 %v2015_v42  ;;  %v8324_v11 = vld [vmem:[%s8536_s17 + $0x354] sm:$0xff]  ;;  %v2771_v21 = vrot.slane %v7634_v13, 5 }
 0x150   : > { %1652 = vst.msk [vmem:[#allocation2 + $0x38] sm:$0xff] %vm511_vm8, %v1636_v17  ;;  %v1893_v26 = vadd.f32 %v1877_v19, %v9184_v57  ;;  %7565 = vmatmul.msk.bf16.gmra.mxu0 %vm433_vm4, %v8323_v7  ;;  %v9311_v28 = vpop.f32.mrf.mxu1  ;;  %v2012_v57 = vsel %vm8564_vm7, %v7500_v16, %v2011_v61  ;;  %v2541_v22 = vrot.slane %v2539_v51, 4  ;;  %v2540_v33 = vsel %vm9019_vm11, %v7600_v36, %v2539_v51  ;;  %v1188_v61 = vld [vmem:[#allocation2 + $0x58] sm:$0xff]  ;;  %v7592_v16 = vld [vmem:[%s8536_s17 + $0x170] sm:$0xf] }
 0x151   : > { %v1162_v59 = vpop.f32.mrf.mxu3  ;;  %v2037_v53 = vunpack.c.l.b16 %v2012_v57  ;;  %v2565_v7 = vunpack.c.l.b16 %v2540_v33  ;;  %v2770_v19 = vrot.slane %v2768_v9, 4  ;;  %v2769_v27 = vsel %vm8564_vm7, %v7642_v6, %v2768_v9  ;;  %v7591_v57 = vld [vmem:[%s8536_s17 + $0x16c] sm:$0x8]  ;;  %v7593_v42 = vld [vmem:[%s8536_s17 + $0x174] sm:$0x7] }
 0x152   : > { %1909 = vst.msk [vmem:[#allocation2 + $0x30] sm:$0xff] %vm511_vm8, %v1893_v26  ;;  %v1203_v8 = vadd.f32 %v1187_v63, %v1162_v59  ;;  %v9316_v40 = vpop.f32.mrf.mxu2  ;;  %v2543_v60 = vsel %vm9019_vm11, %v2541_v22, %v2542_v49  ;;  %v2021_v26 = vrot.slane %v7493_v5, 5  ;;  %v2789_v63 = vunpack.c.l.b16 %v2769_v27  ;;  %v7694_v5 = vld [vmem:[%s8536_s17 + $0x1fc] sm:$0xf]  ;;  %v7776_v6 = vld [vmem:[%s8536_s17 + $0x208] sm:$0xf] }
 0x153   : > { %v1440_v32 = vld [vmem:[#allocation2 + $0x48] sm:$0xff]  ;;  %7608 = vmatmul.msk.bf16.gmra.mxu1 %vm433_vm4, %v2574_v31  ;;  %v2047_v2 = vpack.c.b16 %v2038_v55, %v2037_v53  ;;  %v2566_v37 = vunpack.c.l.b16 %v2543_v60  ;;  %v2772_v47 = vsel %vm8564_vm7, %v2770_v19, %v2771_v21  ;;  %v2549_v55 = vrot.slane %v7593_v42, 7  ;;  %v8325_v21 = vld [vmem:[%s8536_s17 + $0x370] sm:$0xff]  ;;  %v7775_v27 = vld [vmem:[%s8536_s17 + $0x204] sm:$0x8] }
 0x154   : > { %v1456_v15 = vadd.f32 %v1440_v32, %v9273_v23  ;;  %1219 = vst.msk [vmem:[#allocation2 + $0x50] sm:$0xff] %vm511_vm8, %v1203_v8  ;;  %v2790_v46 = vunpack.c.l.b16 %v2772_v47  ;;  %v1189_v8 = vld [vmem:[#allocation2 + $0x60] sm:$0xff]  ;;  %v7654_v9 = vld [vmem:[%s8536_s17 + $0xbc] sm:$0x7]  ;;  %v7777_v47 = vld [vmem:[%s8536_s17 + $0x20c] sm:$0x7] }
 0x155   : > { %v1621_v18 = vld [vmem:[#allocation2 + $0x40] sm:$0xff]  ;;  %v9325_v50 = vpop.f32.mrf.mxu0  ;;  %v2575_v51 = vpack.c.b16 %v2566_v37, %v2565_v7 }
 0x156   : > { %1472 = vst.msk [vmem:[#allocation2 + $0x48] sm:$0xff] %vm511_vm8, %v1456_v15  ;;  %v1637_v41 = vadd.f32 %v1621_v18, %v9259_v30  ;;  %v2798_v49 = vpack.c.b16 %v2790_v46, %v2789_v63  ;;  %v7652_v37 = vld [vmem:[%s8536_s17 + $0xb4] sm:$0x8]  ;;  %v7799_v63 = vrot.slane %v7775_v27, 11  ;;  %v7655_v27 = vld [vmem:[%s8536_s17 + $0xd0] sm:$0x8] }
 0x157   : > { %v1878_v25 = vld [vmem:[#allocation2 + $0x38] sm:$0xff]  ;;  %7650 = vmatmul.msk.bf16.gmra.mxu2 %vm433_vm4, %v2797_v45 }
 0x158   : > { %1653 = vst.msk [vmem:[#allocation2 + $0x40] sm:$0xff] %vm511_vm8, %v1637_v41  ;;  %v1894_v23 = vadd.f32 %v1878_v25, %v9212_v29  ;;  %v9337_v1 = vpop.f32.mrf.mxu1  ;;  %v7601_v41 = vrot.slane %v7591_v57, 11 }
 0x159   : > { %v1164_v30 = vpop.f32.mrf.mxu3 }
 0x15a   : > { %1910 = vst.msk [vmem:[#allocation2 + $0x38] sm:$0xff] %vm511_vm8, %v1894_v23  ;;  %v1204_v44 = vadd.f32 %v1188_v61, %v1164_v30  ;;  %v9340_v29 = vpop.f32.mrf.mxu2 }
 0x15b   : > { %v1441_v0 = vld [vmem:[#allocation2 + $0x50] sm:$0xff] }
 0x15c   : > { %v1457_v10 = vadd.f32 %v1441_v0, %v9298_v43  ;;  %1220 = vst.msk [vmem:[#allocation2 + $0x58] sm:$0xff] %vm511_vm8, %v1204_v44  ;;  %v2020_v43 = vrot.slane %v2018_v3, 4  ;;  %v7850_v44 = vld [vmem:[%s11543_s1 + $0x3c] sm:$0xf] }
 0x15d   : > { %v1622_v14 = vld [vmem:[#allocation2 + $0x48] sm:$0xff]  ;;  %v9350_v17 = vpop.f32.mrf.mxu0  ;;  %v4098_v4 = vsel %vm458_vm0, %v7850_v44, 0 }
 0x15e   : > { %1473 = vst.msk [vmem:[#allocation2 + $0x50] sm:$0xff] %vm511_vm8, %v1457_v10  ;;  %v1638_v31 = vadd.f32 %v1622_v14, %v9285_v58  ;;  %7509 = vmatmul.msk.bf16.gmra.mxu3 %vm433_vm4, %v2047_v2  ;;  %v2546_v58 = vrot.slane %v7592_v16, 7  ;;  %v2022_v22 = vsel %vm8564_vm7, %v2020_v43, %v2021_v26  ;;  %v7693_v16 = vld [vmem:[%s8536_s17 + $0x1f8] sm:$0x8]  ;;  %v3735_v43 = vrot.slane %v7776_v6, 7 }
 0x15f   : > { %v1879_v48 = vld [vmem:[#allocation2 + $0x40] sm:$0xff]  ;;  %v2040_v60 = vunpack.c.l.b16 %v2022_v22  ;;  %4107 = vmatpush.bf16.msra.mxu3 %v4098_v4  ;;  %v7717_v42 = vrot.slane %v7693_v16, 11 }
 0x160   : > { %1654 = vst.msk [vmem:[#allocation2 + $0x48] sm:$0xff] %vm511_vm8, %v1638_v31  ;;  %v1895_v59 = vadd.f32 %v1879_v48, %v9236_v20  ;;  %7566 = vmatmul.msk.bf16.gmra.mxu0 %vm433_vm4, %v8324_v11  ;;  %v9363_v32 = vpop.f32.mrf.mxu1  ;;  %v2019_v20 = vsel %vm8564_vm7, %v7501_v52, %v2018_v3  ;;  %v2548_v53 = vrot.slane %v2546_v58, 4  ;;  %v7695_v31 = vld [vmem:[%s8536_s17 + $0x200] sm:$0x7]  ;;  %v3227_v52 = vrot.slane %v7694_v5, 7 }
 0x161   : > { %v1167_v39 = vpop.f32.mrf.mxu3  ;;  %v2039_v33 = vunpack.c.l.b16 %v2019_v20  ;;  %v3737_v46 = vrot.slane %v3735_v43, 4  ;;  %v3230_v20 = vrot.slane %v7695_v31, 7  ;;  %v3736_v22 = vsel %vm9019_vm11, %v7799_v63, %v3735_v43  ;;  %v9448_v16 = vld [vmem:[%s8536_s17 + $0xd4] sm:$0xf]  ;;  %v7697_v43 = vld [vmem:[%s8536_s17 + $0x218] sm:$0xf] }
 0x162   : > { %1911 = vst.msk [vmem:[#allocation2 + $0x40] sm:$0xff] %vm511_vm8, %v1895_v59  ;;  %v1205_v45 = vadd.f32 %v1189_v8, %v1167_v39  ;;  %v9368_v15 = vpop.f32.mrf.mxu2  ;;  %v2550_v2 = vsel %vm9019_vm11, %v2548_v53, %v2549_v55  ;;  %v2976_v8 = vrot.slane %v7654_v9, 7  ;;  %v7734_v53 = vld [vmem:[%s8536_s17 + $0x200] sm:$0xe] }
 0x163   : > { %v1442_v36 = vld [vmem:[#allocation2 + $0x58] sm:$0xff]  ;;  %7609 = vmatmul.msk.bf16.gmra.mxu1 %vm433_vm4, %v2575_v51  ;;  %v2048_v7 = vpack.c.b16 %v2040_v60, %v2039_v33  ;;  %v2568_v14 = vunpack.c.l.b16 %v2550_v2  ;;  %v7676_v51 = vrot.slane %v7652_v37, 11 }
 0x164   : > { %v1458_v18 = vadd.f32 %v1442_v36, %v9325_v50  ;;  %1221 = vst.msk [vmem:[#allocation2 + $0x60] sm:$0xff] %vm511_vm8, %v1205_v45  ;;  %v9382_v50 = vld [vmem:[%s8536_s17 + $0xb8] sm:$0xf]  ;;  %v3738_v45 = vrot.slane %v7777_v47, 7  ;;  %v7736_v60 = vld [vmem:[%s8536_s17 + $0x208] sm:$0x1] }
 0x165   : > { %v1623_v25 = vld [vmem:[#allocation2 + $0x50] sm:$0xff]  ;;  %v9377_v56 = vpop.f32.mrf.mxu0  ;;  %v2973_v10 = vrot.slane %v9382_v50, 7  ;;  %v3484_v37 = vrot.slane %v7736_v60, 5  ;;  %v2980_v47 = vrot.slane %v9448_v16, 7 }
 0x166   : > { %1474 = vst.msk [vmem:[#allocation2 + $0x58] sm:$0xff] %vm511_vm8, %v1458_v18  ;;  %v1639_v23 = vadd.f32 %v1623_v25, %v9311_v28  ;;  %v2547_v28 = vsel %vm9019_vm11, %v7601_v41, %v2546_v58  ;;  %v1191_v18 = vld [vmem:[#allocation2 + $0x70] sm:$0xff]  ;;  %v3739_v25 = vsel %vm9019_vm11, %v3737_v46, %v3738_v45  ;;  %v7696_v46 = vld [vmem:[%s8536_s17 + $0x214] sm:$0x8]  ;;  %v3234_v45 = vrot.slane %v7697_v43, 7 }
 0x167   : > { %v1880_v30 = vld [vmem:[#allocation2 + $0x48] sm:$0xff]  ;;  %7651 = vmatmul.msk.bf16.gmra.mxu2 %vm433_vm4, %v2798_v49  ;;  %v2567_v13 = vunpack.c.l.b16 %v2547_v28  ;;  %v2975_v58 = vrot.slane %v2973_v10, 4  ;;  %v3228_v28 = vsel %vm9019_vm11, %v7717_v42, %v3227_v52  ;;  %v7718_v60 = vrot.slane %v7696_v46, 11 }
 0x168   : > { %1655 = vst.msk [vmem:[#allocation2 + $0x50] sm:$0xff] %vm511_vm8, %v1639_v23  ;;  %v1896_v61 = vadd.f32 %v1880_v30, %v9264_v34  ;;  %v9394_v0 = vpop.f32.mrf.mxu1  ;;  %v3791_v23 = vunpack.c.l.b16 %v3736_v22  ;;  %v3792_v30 = vunpack.c.l.b16 %v3739_v25  ;;  %v7698_v42 = vld [vmem:[%s8536_s17 + $0x21c] sm:$0x7]  ;;  %v7677_v22 = vrot.slane %v7655_v27, 11  ;;  %v7738_v25 = vld [vmem:[%s8536_s17 + $0x220] sm:$0xf] }
 0x169   : > { %v1169_v3 = vpop.f32.mrf.mxu3  ;;  %v2576_v57 = vpack.c.b16 %v2568_v14, %v2567_v13  ;;  %v2977_v44 = vsel %vm9019_vm11, %v2975_v58, %v2976_v8  ;;  %v3283_v13 = vunpack.c.l.b16 %v3228_v28  ;;  %v3236_v28 = vrot.slane %v3234_v45, 4 }
 0x16a   : > { %1912 = vst.msk [vmem:[#allocation2 + $0x48] sm:$0xff] %vm511_vm8, %v1896_v61  ;;  %v1206_v34 = vadd.f32 %v1190_v62, %v1169_v3  ;;  %v9402_v11 = vpop.f32.mrf.mxu2  ;;  %v2974_v61 = vsel %vm9019_vm11, %v7676_v51, %v2973_v10  ;;  %v7758_v62 = vrot.slane %v7734_v53, 9  ;;  %v3807_v4 = vpack.c.b16 %v3792_v30, %v3791_v23 }
 0x16b   : > { %v1443_v54 = vld [vmem:[#allocation2 + $0x60] sm:$0xff]  ;;  %v3029_v9 = vunpack.c.l.b16 %v2974_v61  ;;  %v3030_v10 = vunpack.c.l.b16 %v2977_v44  ;;  %v3237_v30 = vrot.slane %v7698_v42, 7  ;;  %v7658_v42 = vld [vmem:[%s8536_s17 + $0xec] sm:$0x8] }
 0x16c   : > { %v1459_v19 = vadd.f32 %v1443_v54, %v9350_v17  ;;  %1222 = vst.msk [vmem:[#allocation2 + $0x68] sm:$0xff] %vm511_vm8, %v1206_v34  ;;  %v7735_v17 = vld [vmem:[%s8536_s17 + $0x204] sm:$0xf] }
 0x16d   : > { %v1624_v48 = vld [vmem:[#allocation2 + $0x58] sm:$0xff]  ;;  %v9410_v26 = vpop.f32.mrf.mxu0  ;;  %v3481_v55 = vrot.slane %v7735_v17, 5  ;;  %v3045_v51 = vpack.c.b16 %v3030_v10, %v3029_v9  ;;  %v7737_v9 = vld [vmem:[%s8536_s17 + $0x21c] sm:$0xe]  ;;  %v7739_v10 = vld [vmem:[%s8536_s17 + $0x224] sm:$0x1] }
 0x16e   : > { %1475 = vst.msk [vmem:[#allocation2 + $0x60] sm:$0xff] %vm511_vm8, %v1459_v19  ;;  %v1640_v59 = vadd.f32 %v1624_v48, %v9337_v1  ;;  %7510 = vmatmul.msk.bf16.gmra.mxu3 %vm433_vm4, %v2048_v7  ;;  %v3229_v1 = vrot.slane %v3227_v52, 4  ;;  %v7759_v27 = vrot.slane %v7737_v9, 9 }
 0x16f   : > { %v1881_v39 = vld [vmem:[#allocation2 + $0x50] sm:$0xff]  ;;  %v3483_v7 = vrot.slane %v3481_v55, 4  ;;  %v3482_v19 = vsel %vm8564_vm7, %v7758_v62, %v3481_v55  ;;  %v2125_v62 = vld [vmem:[#allocation2] sm:$0xff] }
 0x170   : > { %1656 = vst.msk [vmem:[#allocation2 + $0x58] sm:$0xff] %vm511_vm8, %v1640_v59  ;;  %v1897_v36 = vadd.f32 %v1881_v39, %v9288_v24  ;;  %7567 = vmatmul.msk.bf16.gmra.mxu0 %vm433_vm4, %v8325_v21  ;;  %v9423_v41 = vpop.f32.mrf.mxu1  ;;  %v3231_v3 = vsel %vm9019_vm11, %v3229_v1, %v3230_v20  ;;  %v1192_v21 = vld [vmem:[#allocation2 + $0x78] sm:$0xff]  ;;  %v3537_v63 = vunpack.c.l.b16 %v3482_v19  ;;  %v7779_v39 = vld [vmem:[%s8536_s17 + $0x224] sm:$0xf] }
 0x171   : > { %v1172_v49 = vpop.f32.mrf.mxu3  ;;  %v3284_v14 = vunpack.c.l.b16 %v3231_v3  ;;  %v3485_v52 = vsel %vm8564_vm7, %v3483_v7, %v3484_v37 }
 0x172   : > { %1913 = vst.msk [vmem:[#allocation2 + $0x50] sm:$0xff] %vm511_vm8, %v1897_v36  ;;  %v1207_v24 = vadd.f32 %v1191_v18, %v1172_v49  ;;  %v9429_v33 = vpop.f32.mrf.mxu2  ;;  %v3742_v36 = vrot.slane %v7779_v39, 7  ;;  %v7778_v49 = vld [vmem:[%s8536_s17 + $0x220] sm:$0x8]  ;;  %v7780_v18 = vld [vmem:[%s8536_s17 + $0x228] sm:$0x7] }
 0x173   : > { %v1444_v50 = vld [vmem:[#allocation2 + $0x68] sm:$0xff]  ;;  %7610 = vmatmul.msk.bf16.gmra.mxu1 %vm433_vm4, %v2576_v57  ;;  %v3299_v17 = vpack.c.b16 %v3284_v14, %v3283_v13  ;;  %v3538_v57 = vunpack.c.l.b16 %v3485_v52  ;;  %v7800_v23 = vrot.slane %v7778_v49, 11  ;;  %v3745_v61 = vrot.slane %v7780_v18, 7  ;;  %v9508_v52 = vld [vmem:[%s8536_s17 + $0xf0] sm:$0xf] }
 0x174   : > { %v1460_v2 = vadd.f32 %v1444_v50, %v9377_v56  ;;  %1223 = vst.msk [vmem:[#allocation2 + $0x70] sm:$0xff] %vm511_vm8, %v1207_v24  ;;  %v3744_v50 = vrot.slane %v3742_v36, 4  ;;  %v2981_v14 = vsel %vm9019_vm11, %v7677_v22, %v2980_v47 }
 0x175   : > { %v1625_v5 = vld [vmem:[#allocation2 + $0x60] sm:$0xff]  ;;  %v9443_v34 = vpop.f32.mrf.mxu0 }
 0x176   : > { %1476 = vst.msk [vmem:[#allocation2 + $0x68] sm:$0xff] %vm511_vm8, %v1460_v2  ;;  %v1641_v56 = vadd.f32 %v1625_v5, %v9363_v32  ;;  %v3743_v2 = vsel %vm9019_vm11, %v7800_v23, %v3742_v36  ;;  %v3488_v5 = vrot.slane %v7738_v25, 5  ;;  %v3746_v7 = vsel %vm9019_vm11, %v3744_v50, %v3745_v61  ;;  %v2126_v36 = vld [vmem:[#allocation2 + $0x8] sm:$0xff]  ;;  %v7932_v61 = vld [vmem:[%s11543_s1 + $0x44] sm:$0xf] }
 0x177   : > { %v1882_v54 = vld [vmem:[#allocation2 + $0x58] sm:$0xff]  ;;  %7808 = vmatmul.msk.bf16.vlgmr.msrb.gmra.mxu2 %vm433_vm4, %v3807_v4  ;;  %v3793_v37 = vunpack.c.l.b16 %v3743_v2  ;;  %v7782_v2 = vld [vmem:[%s8536_s17 + $0x240] sm:$0xf] }
 0x178   : > { %1657 = vst.msk [vmem:[#allocation2 + $0x60] sm:$0xff] %vm511_vm8, %v1641_v56  ;;  %v1898_v6 = vadd.f32 %v1882_v54, %v9316_v40  ;;  %v9455_v31 = vpop.f32.mrf.mxu1  ;;  %v7657_v40 = vld [vmem:[%s8536_s17 + $0xd8] sm:$0x7]  ;;  %v3794_v54 = vunpack.c.l.b16 %v3746_v7  ;;  %v3489_v22 = vsel %vm8564_vm7, %v7759_v27, %v3488_v5 }
 0x179   : > { %v1174_v32 = vpop.f32.mrf.mxu3  ;;  %v2983_v55 = vrot.slane %v7657_v40, 7  ;;  %v3490_v40 = vrot.slane %v3488_v5, 4  ;;  %v4606_v5 = vsel %vm458_vm0, %v7932_v61, 0 }
 0x17a   : > { %1914 = vst.msk [vmem:[#allocation2 + $0x58] sm:$0xff] %vm511_vm8, %v1898_v6  ;;  %v1208_v48 = vadd.f32 %v1192_v21, %v1174_v32  ;;  %v9464_v59 = vpop.f32.mrf.mxu2  ;;  %v3235_v6 = vsel %vm9019_vm11, %v7718_v60, %v3234_v45  ;;  %v7891_v32 = vld [vmem:[%s11543_s1 + $0x40] sm:$0xf]  ;;  %v3238_v21 = vsel %vm9019_vm11, %v3236_v28, %v3237_v30  ;;  %v3808_v43 = vpack.c.b16 %v3794_v54, %v3793_v37  ;;  %v7699_v60 = vld [vmem:[%s8536_s17 + $0x230] sm:$0x8] }
 0x17b   : > { %v1445_v58 = vld [vmem:[#allocation2 + $0x70] sm:$0xff]  ;;  %v3285_v39 = vunpack.c.l.b16 %v3235_v6  ;;  %v2987_v45 = vrot.slane %v9508_v52, 7  ;;  %v9543_v30 = vld [vmem:[%s8536_s17 + $0x23c] sm:$0xf]  ;;  %v3749_v37 = vrot.slane %v7782_v2, 7  ;;  %4615 = vmatpush.bf16.msra.mxu1 %v4606_v5 }
 0x17c   : > { %v1461_v8 = vadd.f32 %v1445_v58, %v9410_v26  ;;  %1224 = vst.msk [vmem:[#allocation2 + $0x78] sm:$0xff] %vm511_vm8, %v1208_v48  ;;  %v2982_v26 = vrot.slane %v2980_v47, 4  ;;  %v3491_v47 = vrot.slane %v7739_v10, 5  ;;  %v7781_v10 = vld [vmem:[%s8536_s17 + $0x23c] sm:$0x8] }
 0x17d   : > { %v1626_v1 = vld [vmem:[#allocation2 + $0x68] sm:$0xff]  ;;  %v9471_v20 = vpop.f32.mrf.mxu0  ;;  %v7783_v54 = vld [vmem:[%s8536_s17 + $0x244] sm:$0x7]  ;;  %v7801_v6 = vrot.slane %v7781_v10, 11  ;;  %v7742_v52 = vld [vmem:[%s8536_s17 + $0x240] sm:$0x1] }
 0x17e   : > { %1477 = vst.msk [vmem:[#allocation2 + $0x70] sm:$0xff] %vm511_vm8, %v1461_v8  ;;  %v1642_v53 = vadd.f32 %v1626_v1, %v9394_v0  ;;  %7685 = vmatmul.msk.bf16.vlgmr.msrb.gmra.mxu3 %vm433_vm4, %v3045_v51  ;;  %v3553_v0 = vpack.c.b16 %v3538_v57, %v3537_v63  ;;  %v2984_v16 = vsel %vm9019_vm11, %v2982_v26, %v2983_v55  ;;  %v3286_v8 = vunpack.c.l.b16 %v3238_v21  ;;  %v9537_v26 = vld [vmem:[%s8536_s17 + $0x234] sm:$0xf]  ;;  %v7740_v21 = vld [vmem:[%s8536_s17 + $0x238] sm:$0xe] }
 0x17f   : > { %v1883_v24 = vld [vmem:[#allocation2 + $0x60] sm:$0xff]  ;;  %v3032_v63 = vunpack.c.l.b16 %v2984_v16  ;;  %v3492_v49 = vsel %vm8564_vm7, %v3490_v40, %v3491_v47  ;;  %v3241_v7 = vrot.slane %v9537_v26, 7  ;;  %v3495_v16 = vrot.slane %v9543_v30, 5  ;;  %v7944_v26 = vld [vmem:[%s11543_s1 + $0x48] sm:$0xf] }
 0x180   : > { %1658 = vst.msk [vmem:[#allocation2 + $0x68] sm:$0xff] %vm511_vm8, %v1642_v53  ;;  %v1899_v44 = vadd.f32 %v1883_v24, %v9340_v29  ;;  %7726 = vmatmul.msk.bf16.vlgmr.msrb.gmra.mxu0 %vm433_vm4, %v3299_v17  ;;  %v9484_v4 = vpop.f32.mrf.mxu1  ;;  %v3031_v17 = vunpack.c.l.b16 %v2981_v14  ;;  %v7660_v53 = vld [vmem:[%s8536_s17 + $0xf4] sm:$0x7]  ;;  %v3300_v23 = vpack.c.b16 %v3286_v8, %v3285_v39  ;;  %v7678_v24 = vrot.slane %v7658_v42, 11 }
 0x181   : > { %v2085_v3 = vpop.f32.mrf.mxu3  ;;  %v3540_v28 = vunpack.c.l.b16 %v3492_v49  ;;  %v2990_v9 = vrot.slane %v7660_v53, 7  ;;  %v7719_v14 = vrot.slane %v7699_v60, 11  ;;  %v3243_v47 = vrot.slane %v3241_v7, 4 }
 0x182   : > { %1915 = vst.msk [vmem:[#allocation2 + $0x60] sm:$0xff] %vm511_vm8, %v1899_v44  ;;  %v2141_v29 = vadd.f32 %v2125_v62, %v2085_v3  ;;  %v9489_v56 = vpop.f32.mrf.mxu2  ;;  %v3046_v18 = vpack.c.b16 %v3032_v63, %v3031_v17  ;;  %v2989_v44 = vrot.slane %v2987_v45, 4  ;;  %v2988_v40 = vsel %vm9019_vm11, %v7678_v24, %v2987_v45 }
 0x183   : > { %v1446_v13 = vld [vmem:[#allocation2 + $0x78] sm:$0xff]  ;;  %7767 = vmatmul.msk.bf16.vlgmr.msrb.gmra.mxu1 %vm433_vm4, %v3553_v0  ;;  %v3539_v0 = vunpack.c.l.b16 %v3489_v22  ;;  %v3750_v17 = vsel %vm9019_vm11, %v7801_v6, %v3749_v37  ;;  %v7760_v45 = vrot.slane %v7740_v21, 9  ;;  %v7704_v21 = vld [vmem:[%s8536_s17 + $0x254] sm:$0x7] }
 0x184   : > { %v1462_v19 = vadd.f32 %v1446_v13, %v9443_v34  ;;  %2157 = vst.msk [vmem:[#allocation2] sm:$0xff] %vm511_vm8, %v2141_v29  ;;  %v4352_v34 = vsel %vm458_vm0, %v7891_v32, 0 }
 0x185   : > { %v1627_v48 = vld [vmem:[#allocation2 + $0x70] sm:$0xff]  ;;  %v9510_v51 = vpop.f32.mrf.mxu0  ;;  %4361 = vmatpush.bf16.msra.mxu0 %v4352_v34  ;;  %v3554_v32 = vpack.c.b16 %v3540_v28, %v3539_v0  ;;  %v3496_v0 = vsel %vm8564_vm7, %v7760_v45, %v3495_v16 }
 0x186   : > { %1478 = vst.msk [vmem:[#allocation2 + $0x78] sm:$0xff] %vm511_vm8, %v1462_v19  ;;  %v1643_v58 = vadd.f32 %v1627_v48, %v9423_v41  ;;  %v3751_v19 = vrot.slane %v3749_v37, 4  ;;  %v2127_v34 = vld [vmem:[#allocation2 + $0x10] sm:$0xff]  ;;  %v2128_v37 = vld [vmem:[#allocation2 + $0x18] sm:$0xff] }
 0x187   : > { %v1884_v46 = vld [vmem:[#allocation2 + $0x68] sm:$0xff]  ;;  %7809 = vmatmul.msk.bf16.gmra.mxu2 %vm433_vm4, %v3808_v43  ;;  %v3752_v43 = vrot.slane %v7783_v54, 7  ;;  %v7786_v45 = vld [vmem:[%s8536_s17 + $0x260] sm:$0x7] }
 0x188   : > { %1659 = vst.msk [vmem:[#allocation2 + $0x70] sm:$0xff] %vm511_vm8, %v1643_v58  ;;  %v1900_v57 = vadd.f32 %v1884_v46, %v9368_v15  ;;  %v9522_v1 = vpop.f32.mrf.mxu1  ;;  %v2991_v46 = vsel %vm9019_vm11, %v2989_v44, %v2990_v9  ;;  %v7703_v9 = vld [vmem:[%s8536_s17 + $0x250] sm:$0xf] }
 0x189   : > { %v2087_v41 = vpop.f32.mrf.mxu3  ;;  %v3753_v8 = vsel %vm9019_vm11, %v3751_v19, %v3752_v43 }
 0x18a   : > { %1916 = vst.msk [vmem:[#allocation2 + $0x68] sm:$0xff] %vm511_vm8, %v1900_v57  ;;  %v2142_v15 = vadd.f32 %v2126_v36, %v2087_v41  ;;  %v9539_v55 = vpop.f32.mrf.mxu2  ;;  %v3795_v57 = vunpack.c.l.b16 %v3750_v17  ;;  %v3497_v41 = vrot.slane %v3495_v16, 4  ;;  %v3498_v36 = vrot.slane %v7742_v52, 5 }
 0x18b   : > { %v2307_v25 = vld [vmem:[#allocation2] sm:$0xff]  ;;  %v3796_v22 = vunpack.c.l.b16 %v3753_v8 }
 0x18c   : > { %v2323_v50 = vadd.f32 %v2307_v25, %v9471_v20  ;;  %2158 = vst.msk [vmem:[#allocation2 + $0x8] sm:$0xff] %vm511_vm8, %v2142_v15  ;;  %v7701_v20 = vld [vmem:[%s8536_s17 + $0x238] sm:$0x7]  ;;  %v3242_v15 = vsel %vm9019_vm11, %v7719_v14, %v3241_v7  ;;  %v3033_v25 = vunpack.c.l.b16 %v2988_v40  ;;  %v3499_v28 = vsel %vm8564_vm7, %v3497_v41, %v3498_v36  ;;  %v7785_v40 = vld [vmem:[%s8536_s17 + $0x25c] sm:$0xf] }
 0x18d   : > { %v1628_v3 = vld [vmem:[#allocation2 + $0x78] sm:$0xff]  ;;  %v9551_v62 = vpop.f32.mrf.mxu0  ;;  %v3244_v58 = vrot.slane %v7701_v20, 7  ;;  %v3809_v60 = vpack.c.b16 %v3796_v22, %v3795_v57  ;;  %v3287_v44 = vunpack.c.l.b16 %v3242_v15  ;;  %v3541_v14 = vunpack.c.l.b16 %v3496_v0  ;;  %v7745_v0 = vld [vmem:[%s8536_s17 + $0x25c] sm:$0x1] }
 0x18e   : > { %2339 = vst.msk [vmem:[#allocation2] sm:$0xff] %vm511_vm8, %v2323_v50  ;;  %v1644_v29 = vadd.f32 %v1628_v3, %v9455_v31  ;;  %7686 = vmatmul.msk.bf16.gmra.mxu3 %vm433_vm4, %v3046_v18  ;;  %v4876_v50 = vsel %vm458_vm0, %v7944_v26, 0  ;;  %v9619_v20 = vld [vmem:[%s8536_s17 + $0x108] sm:$0x8]  ;;  %v3542_v16 = vunpack.c.l.b16 %v3499_v28  ;;  %v3251_v26 = vrot.slane %v7704_v21, 7 }
 0x18f   : > { %v1885_v13 = vld [vmem:[#allocation2 + $0x70] sm:$0xff]  ;;  %v3245_v24 = vsel %vm9019_vm11, %v3243_v47, %v3244_v58  ;;  %4885 = vmatpush.bf16.msra.mxu2 %v4876_v50 }
 0x190   : > { %1660 = vst.msk [vmem:[#allocation2 + $0x78] sm:$0xff] %vm511_vm8, %v1644_v29  ;;  %v1901_v31 = vadd.f32 %v1885_v13, %v9402_v11  ;;  %7727 = vmatmul.msk.bf16.gmra.mxu0 %vm433_vm4, %v3300_v23  ;;  %v9571_v27 = vpop.f32.mrf.mxu1  ;;  %v9580_v11 = vld [vmem:[%s11544_s2] ss:$0 sm:$0xff]  ;;  %v3034_v23 = vunpack.c.l.b16 %v2991_v46  ;;  %v3288_v5 = vunpack.c.l.b16 %v3245_v24  ;;  %v7663_v13 = vld [vmem:[%s8536_s17 + $0x110] sm:$0x7]  ;;  %v3756_v46 = vrot.slane %v7785_v40, 7 }
 0x191   : > { %v2090_v48 = vpop.f32.mrf.mxu3  ;;  %v2997_v17 = vrot.slane %v7663_v13, 7  ;;  %v3555_v57 = vpack.c.b16 %v3542_v16, %v3541_v14  ;;  %v2129_v24 = vld [vmem:[#allocation2 + $0x20] sm:$0xff]  ;;  %v3505_v14 = vrot.slane %v7745_v0, 5 }
 0x192   : > { %1917 = vst.msk [vmem:[#allocation2 + $0x70] sm:$0xff] %vm511_vm8, %v1901_v31  ;;  %v2143_v63 = vadd.f32 %v2127_v34, %v2090_v48  ;;  %v9585_v39 = vpop.f32.mrf.mxu2  ;;  %v3047_v29 = vpack.c.b16 %v3034_v23, %v3033_v25  ;;  %v7679_v31 = vrot.slane %v9619_v20, 11  ;;  %v3301_v43 = vpack.c.b16 %v3288_v5, %v3287_v44 }
 0x193   : > { %v2308_v42 = vld [vmem:[#allocation2 + $0x8] sm:$0xff]  ;;  %7768 = vmatmul.msk.bf16.gmra.mxu1 %vm433_vm4, %v3554_v32  ;;  %v7702_v32 = vld [vmem:[%s8536_s17 + $0x24c] sm:$0x8]  ;;  %v3248_v34 = vrot.slane %v7703_v9, 7  ;;  %v3759_v25 = vrot.slane %v7786_v45, 7 }
 0x194   : > { %v2324_v49 = vadd.f32 %v2308_v42, %v9510_v51  ;;  %2159 = vst.msk [vmem:[#allocation2 + $0x10] sm:$0xff] %vm511_vm8, %v2143_v63  ;;  %v9604_v51 = vld [vmem:[%s8536_s17 + $0x10c] sm:$0xf]  ;;  %v9649_v63 = vld [vmem:[%s8536_s17 + $0x258] sm:$0xf]  ;;  %v7720_v36 = vrot.slane %v7702_v32, 11 }
 0x195   : > { %v2355_v18 = vld [vmem:[#allocation2] sm:$0xff]  ;;  %v9596_v53 = vpop.f32.mrf.mxu0  ;;  %v2994_v7 = vrot.slane %v9604_v51, 7  ;;  %v7784_v42 = vld [vmem:[%s8536_s17 + $0x258] sm:$0x8]  ;;  %v7665_v9 = vld [vmem:[%s8536_s17 + $0x128] sm:$0xf] }
 0x196   : > { %v2375_v30 = vadd.f32 %v9580_v11, %v2355_v18  ;;  %2340 = vst.msk [vmem:[#allocation2 + $0x8] sm:$0xff] %vm511_vm8, %v2324_v49  ;;  %v7802_v22 = vrot.slane %v7784_v42, 11  ;;  %v3758_v49 = vrot.slane %v3756_v46, 4  ;;  %v3250_v18 = vrot.slane %v3248_v34, 4  ;;  %v9706_v45 = vld [vmem:[%s8536_s17 + $0x26c] sm:$0xf] }
 0x197   : > { %2653 = vst.msk [vmem:[#allocation2] sm:$0xff] %vm511_vm8, %v9484_v4  ;;  %v1886_v61 = vld [vmem:[#allocation2 + $0x78] sm:$0xff]  ;;  %7810 = vmatmul.msk.bf16.gmra.mxu2 %vm433_vm4, %v3809_v60  ;;  %v2996_v48 = vrot.slane %v2994_v7, 4 }
 0x198   : > { %v2391_v2 = vmax.f32 %v2375_v30, 0.0  ;;  %v1902_v3 = vadd.f32 %v1886_v61, %v9429_v33  ;;  %v9629_v33 = vpop.f32.mrf.mxu1  ;;  %v3757_v30 = vsel %vm9019_vm11, %v7802_v22, %v3756_v46  ;;  %v3760_v28 = vsel %vm9019_vm11, %v3758_v49, %v3759_v25  ;;  %v7705_v22 = vld [vmem:[%s8536_s17 + $0x268] sm:$0x8]  ;;  %v9712_v49 = vld [vmem:[%s8536_s17 + $0x274] sm:$0xf] }
 0x199   : > { %v2092_v4 = vpop.f32.mrf.mxu3  ;;  %v2998_v5 = vsel %vm9019_vm11, %v2996_v48, %v2997_v17  ;;  %v3798_v20 = vunpack.c.l.b16 %v3760_v28 }
 0x19a   : > { %v2407_v10 = vpack.c.bf16 %v2391_v2, %v2391_v2  ;;  %1918 = vst.msk [vmem:[#allocation2 + $0x78] sm:$0xff] %vm511_vm8, %v1902_v3  ;;  %v2144_v54 = vadd.f32 %v2128_v37, %v2092_v4  ;;  %v9634_v6 = vpop.f32.mrf.mxu2  ;;  %v3797_v2 = vunpack.c.l.b16 %v3757_v30  ;;  %v2995_v3 = vsel %vm9019_vm11, %v7679_v31, %v2994_v7 }
 0x19b   : > { %v2309_v19 = vld [vmem:[#allocation2 + $0x10] sm:$0xff]  ;;  %v3249_v37 = vsel %vm9019_vm11, %v7720_v36, %v3248_v34  ;;  %v3035_v32 = vunpack.c.l.b16 %v2995_v3  ;;  %v3036_v21 = vunpack.c.l.b16 %v2998_v5  ;;  %v7789_v5 = vld [vmem:[%s8536_s17 + $0x27c] sm:$0x7] }
 0x19c   : > { %2424 = vst.msk [vmem:[%s9627_s16] sm:$0xf] %vm2423_vm12, %v2407_v10  ;;  %v2325_v52 = vadd.f32 %v2309_v19, %v9551_v62  ;;  %v3810_v16 = vpack.c.b16 %v3798_v20, %v3797_v2  ;;  %v3289_v34 = vunpack.c.l.b16 %v3249_v37  ;;  %v3509_v37 = vrot.slane %v9712_v49, 5 }
 0x19d   : > { %v2356_v47 = vld [vmem:[#allocation2 + $0x8] sm:$0xff]  ;;  %2160 = vst.msk [vmem:[#allocation2 + $0x18] sm:$0xff] %vm511_vm8, %v2144_v54  ;;  %v9646_v58 = vpop.f32.mrf.mxu0 }
 0x19e   : > { %v2376_v8 = vadd.f32 %v9580_v11, %v2356_v47  ;;  %2341 = vst.msk [vmem:[#allocation2 + $0x10] sm:$0xff] %vm511_vm8, %v2325_v52  ;;  %v2875_v62 = vld [vmem:[#allocation2] sm:$0xff]  ;;  %7687 = vmatmul.msk.bf16.gmra.mxu3 %vm433_vm4, %v3047_v29  ;;  %v3252_v29 = vsel %vm9019_vm11, %v3250_v18, %v3251_v26  ;;  %v7664_v52 = vld [vmem:[%s8536_s17 + $0x124] sm:$0x8]  ;;  %v2130_v47 = vld [vmem:[#allocation2 + $0x28] sm:$0xff] }
 0x19f   : > { %2654 = vst.msk [vmem:[#allocation2 + $0x8] sm:$0xff] %vm511_vm8, %v9522_v1  ;;  %v2891_v41 = vadd.f32 %v2875_v62, %v9464_v59  ;;  %v7743_v1 = vld [vmem:[%s8536_s17 + $0x254] sm:$0xe]  ;;  %v3502_v59 = vrot.slane %v9649_v63, 5  ;;  %v3290_v40 = vunpack.c.l.b16 %v3252_v29  ;;  %v7666_v63 = vld [vmem:[%s8536_s17 + $0x12c] sm:$0x7] }
 0x1a0   : > { %v2392_v15 = vmax.f32 %v2376_v8, 0.0  ;;  %7728 = vmatmul.msk.bf16.gmra.mxu0 %vm433_vm4, %v3301_v43  ;;  %v9661_v60 = vpop.f32.mrf.mxu1  ;;  %v7761_v51 = vrot.slane %v7743_v1, 9  ;;  %v3001_v43 = vrot.slane %v7665_v9, 7  ;;  %v7680_v42 = vrot.slane %v7664_v52, 11 }
 0x1a1   : > { %2907 = vst.msk [vmem:[#allocation2] sm:$0xff] %vm511_vm8, %v2891_v41  ;;  %v2095_v23 = vpop.f32.mrf.mxu3  ;;  %v3504_v13 = vrot.slane %v3502_v59, 4  ;;  %v3302_v18 = vpack.c.b16 %v3290_v40, %v3289_v34  ;;  %v3004_v26 = vrot.slane %v7666_v63, 7 }
 0x1a2   : > { %v2408_v50 = vpack.c.bf16 %v2392_v15, %v2392_v15  ;;  %v2145_v61 = vadd.f32 %v2129_v24, %v2095_v23  ;;  %v9667_v44 = vpop.f32.mrf.mxu2  ;;  %v3003_v36 = vrot.slane %v3001_v43, 4  ;;  %v7788_v24 = vld [vmem:[%s8536_s17 + $0x278] sm:$0xf]  ;;  %v9727_v3 = vsel %vm9019_vm11, %v7680_v42, %v3001_v43 }
 0x1a3   : > { %7769 = vmatmul.msk.bf16.gmra.mxu1 %vm433_vm4, %v3555_v57  ;;  %v3506_v46 = vsel %vm8564_vm7, %v3504_v13, %v3505_v14  ;;  %v3048_v57 = vpack.c.b16 %v3036_v21, %v3035_v32  ;;  %v3763_v0 = vrot.slane %v7788_v24, 7  ;;  %v3766_v13 = vrot.slane %v7789_v5, 7  ;;  %v7709_v5 = vld [vmem:[%s8536_s17 + $0x288] sm:$0xf] }
 0x1a4   : > { %2425 = vst.msk [vmem:[%s9627_s16 + $0x4] sm:$0xf] %vm2423_vm12, %v2408_v50  ;;  %v2310_v4 = vld [vmem:[#allocation2 + $0x18] sm:$0xff]  ;;  %v3544_v23 = vunpack.c.l.b16 %v3506_v46  ;;  %v7707_v50 = vld [vmem:[%s8536_s17 + $0x270] sm:$0x7] }
 0x1a5   : > { %v2357_v10 = vld [vmem:[#allocation2 + $0x10] sm:$0xff]  ;;  %v2326_v7 = vadd.f32 %v2310_v4, %v9596_v53  ;;  %2161 = vst.msk [vmem:[#allocation2 + $0x20] sm:$0xff] %vm511_vm8, %v2145_v61  ;;  %v9688_v54 = vpop.f32.mrf.mxu0  ;;  %v3255_v61 = vrot.slane %v9706_v45, 7  ;;  %v7746_v4 = vld [vmem:[%s8536_s17 + $0x270] sm:$0xe]  ;;  %v3765_v9 = vrot.slane %v3763_v0, 4 }
 0x1a6   : > { %v2377_v19 = vadd.f32 %v9580_v11, %v2357_v10  ;;  %2655 = vst.msk [vmem:[#allocation2 + $0x10] sm:$0xff] %vm511_vm8, %v9571_v27  ;;  %v2876_v31 = vld [vmem:[#allocation2 + $0x8] sm:$0xff]  ;;  %v7721_v10 = vrot.slane %v7705_v22, 11  ;;  %v7762_v43 = vrot.slane %v7746_v4, 9  ;;  %v9753_v46 = vld [vmem:[%s8536_s17 + $0x144] sm:$0xf]  ;;  %v3037_v22 = vunpack.c.l.b16 %v9727_v3 }
 0x1a7   : > { %2342 = vst.msk [vmem:[#allocation2 + $0x18] sm:$0xff] %vm511_vm8, %v2326_v7  ;;  %v2892_v53 = vadd.f32 %v2876_v31, %v9489_v56  ;;  %7811 = vmatmul.msk.bf16.gmra.mxu2 %vm433_vm4, %v3810_v16  ;;  %v3503_v56 = vsel %vm8564_vm7, %v7761_v51, %v3502_v59  ;;  %v7748_v7 = vld [vmem:[%s8536_s17 + $0x278] sm:$0x1]  ;;  %v3257_v32 = vrot.slane %v3255_v61, 4 }
 0x1a8   : > { %v2393_v48 = vmax.f32 %v2377_v19, 0.0  ;;  %v9698_v17 = vpop.f32.mrf.mxu1  ;;  %v3543_v25 = vunpack.c.l.b16 %v3503_v56  ;;  %v2131_v19 = vld [vmem:[#allocation2 + $0x30] sm:$0xff] }
 0x1a9   : > { %2908 = vst.msk [vmem:[#allocation2 + $0x8] sm:$0xff] %vm511_vm8, %v2892_v53  ;;  %v2097_v27 = vpop.f32.mrf.mxu3 }
 0x1aa   : > { %v2409_v8 = vpack.c.bf16 %v2393_v48, %v2393_v48  ;;  %v2146_v62 = vadd.f32 %v2130_v47, %v2097_v27  ;;  %v9708_v41 = vpop.f32.mrf.mxu2  ;;  %v3556_v51 = vpack.c.b16 %v3544_v23, %v3543_v25  ;;  %v3767_v48 = vsel %vm9019_vm11, %v3765_v9, %v3766_v13  ;;  %v7710_v13 = vld [vmem:[%s8536_s17 + $0x28c] sm:$0x7] }
 0x1ab   : > { %v3511_v27 = vrot.slane %v3509_v37, 4  ;;  %v3512_v47 = vrot.slane %v7748_v7, 5  ;;  %v3800_v63 = vunpack.c.l.b16 %v3767_v48 }
 0x1ac   : > { %2426 = vst.msk [vmem:[%s9627_s16 + $0x8] sm:$0xf] %vm2423_vm12, %v2409_v8  ;;  %v2311_v15 = vld [vmem:[#allocation2 + $0x20] sm:$0xff] }
 0x1ad   : > { %v2327_v1 = vadd.f32 %v2311_v15, %v9646_v58  ;;  %v2877_v59 = vld [vmem:[#allocation2 + $0x10] sm:$0xff]  ;;  %2162 = vst.msk [vmem:[#allocation2 + $0x28] sm:$0xff] %vm511_vm8, %v2146_v62  ;;  %v9719_v30 = vpop.f32.mrf.mxu0  ;;  %v7787_v58 = vld [vmem:[%s8536_s17 + $0x274] sm:$0x8]  ;;  %v3513_v25 = vsel %vm8564_vm7, %v3511_v27, %v3512_v47  ;;  %v3265_v27 = vrot.slane %v7710_v13, 7 }
 0x1ae   : > { %v2358_v28 = vld [vmem:[#allocation2 + $0x18] sm:$0xff]  ;;  %v2893_v2 = vadd.f32 %v2877_v59, %v9539_v55  ;;  %7688 = vmatmul.msk.bf16.gmra.mxu3 %vm433_vm4, %v3048_v57  ;;  %v7803_v29 = vrot.slane %v7787_v58, 11  ;;  %v3005_v55 = vsel %vm9019_vm11, %v3003_v36, %v3004_v26  ;;  %v3256_v57 = vsel %vm9019_vm11, %v7721_v10, %v3255_v61  ;;  %v7667_v59 = vld [vmem:[%s8536_s17 + $0x140] sm:$0x8] }
 0x1af   : > { %v2378_v20 = vadd.f32 %v9580_v11, %v2358_v28  ;;  %2343 = vst.msk [vmem:[#allocation2 + $0x20] sm:$0xff] %vm511_vm8, %v2327_v1  ;;  %v3038_v49 = vunpack.c.l.b16 %v3005_v55  ;;  %v3510_v26 = vsel %vm8564_vm7, %v7762_v43, %v3509_v37  ;;  %v3291_v24 = vunpack.c.l.b16 %v3256_v57  ;;  %v7708_v55 = vld [vmem:[%s8536_s17 + $0x284] sm:$0x8]  ;;  %v7792_v43 = vld [vmem:[%s8536_s17 + $0x298] sm:$0x7] }
 0x1b0   : > { %2656 = vst.msk [vmem:[#allocation2 + $0x18] sm:$0xff] %vm511_vm8, %v9629_v33  ;;  %7729 = vmatmul.msk.bf16.gmra.mxu0 %vm433_vm4, %v3302_v18  ;;  %v9742_v31 = vpop.f32.mrf.mxu1  ;;  %v3258_v33 = vrot.slane %v7707_v50, 7  ;;  %v3764_v21 = vsel %vm9019_vm11, %v7803_v29, %v3763_v0  ;;  %v3008_v18 = vrot.slane %v9753_v46, 7  ;;  %v2132_v0 = vld [vmem:[#allocation2 + $0x38] sm:$0xff]  ;;  %v3546_v58 = vunpack.c.l.b16 %v3513_v25 }
 0x1b1   : > { %v2394_v14 = vmax.f32 %v2378_v20, 0.0  ;;  %2909 = vst.msk [vmem:[#allocation2 + $0x10] sm:$0xff] %vm511_vm8, %v2893_v2  ;;  %v2100_v16 = vpop.f32.mrf.mxu3  ;;  %v3799_v34 = vunpack.c.l.b16 %v3764_v21  ;;  %v7669_v2 = vld [vmem:[%s8536_s17 + $0x148] sm:$0x7]  ;;  %v7681_v29 = vrot.slane %v7667_v59, 11 }
 0x1b2   : > { %v2147_v53 = vadd.f32 %v2131_v19, %v2100_v16  ;;  %v9746_v52 = vpop.f32.mrf.mxu2  ;;  %v3259_v42 = vsel %vm9019_vm11, %v3257_v32, %v3258_v33  ;;  %v3010_v9 = vrot.slane %v3008_v18, 4  ;;  %v3011_v7 = vrot.slane %v7669_v2, 7  ;;  %v9796_v32 = vld [vmem:[%s8536_s17 + $0x290] sm:$0xf] }
 0x1b3   : > { %v2410_v40 = vpack.c.bf16 %v2394_v14, %v2394_v14  ;;  %7770 = vmatmul.msk.bf16.gmra.mxu1 %vm433_vm4, %v3556_v51  ;;  %v3811_v45 = vpack.c.b16 %v3800_v63, %v3799_v34  ;;  %v3292_v1 = vunpack.c.l.b16 %v3259_v42  ;;  %v7791_v14 = vld [vmem:[%s8536_s17 + $0x294] sm:$0xf]  ;;  %v3262_v19 = vrot.slane %v7709_v5, 7 }
 0x1b4   : > { %v2312_v56 = vld [vmem:[#allocation2 + $0x28] sm:$0xff]  ;;  %2163 = vst.msk [vmem:[#allocation2 + $0x30] sm:$0xff] %vm511_vm8, %v2147_v53  ;;  %v3770_v33 = vrot.slane %v7791_v14, 7  ;;  %v7790_v53 = vld [vmem:[%s8536_s17 + $0x290] sm:$0x8]  ;;  %v3773_v42 = vrot.slane %v7792_v43, 7 }
 0x1b5   : > { %2427 = vst.msk [vmem:[%s9627_s16 + $0xc] sm:$0xf] %vm2423_vm12, %v2410_v40  ;;  %v2328_v8 = vadd.f32 %v2312_v56, %v9688_v54  ;;  %v9758_v62 = vpop.f32.mrf.mxu0  ;;  %v3303_v10 = vpack.c.b16 %v3292_v1, %v3291_v24  ;;  %v7722_v40 = vrot.slane %v7708_v55, 11  ;;  %v7804_v47 = vrot.slane %v7790_v53, 11  ;;  %v2133_v56 = vld [vmem:[#allocation2 + $0x40] sm:$0xff] }
 0x1b6   : > { %v2359_v36 = vld [vmem:[#allocation2 + $0x20] sm:$0xff]  ;;  %v3772_v57 = vrot.slane %v3770_v33, 4  ;;  %v9846_v14 = vld [vmem:[%s8536_s17 + $0x15c] sm:$0x8] }
 0x1b7   : > { %v2379_v15 = vadd.f32 %v9580_v11, %v2359_v36  ;;  %2344 = vst.msk [vmem:[#allocation2 + $0x28] sm:$0xff] %vm511_vm8, %v2328_v8  ;;  %v2878_v54 = vld [vmem:[#allocation2 + $0x18] sm:$0xff]  ;;  %7812 = vmatmul.msk.bf16.gmra.mxu2 %vm433_vm4, %v3811_v45  ;;  %v3516_v8 = vrot.slane %v9796_v32, 5 }
 0x1b8   : > { %2657 = vst.msk [vmem:[#allocation2 + $0x20] sm:$0xff] %vm511_vm8, %v9661_v60  ;;  %v2894_v23 = vadd.f32 %v2878_v54, %v9585_v39  ;;  %v9777_v28 = vpop.f32.mrf.mxu1  ;;  %v3049_v60 = vpack.c.b16 %v3038_v49, %v3037_v22  ;;  %v3545_v39 = vunpack.c.l.b16 %v3510_v26  ;;  %v3264_v49 = vrot.slane %v3262_v19, 4 }
 0x1b9   : > { %v2395_v50 = vmax.f32 %v2379_v15, 0.0  ;;  %v2102_v61 = vpop.f32.mrf.mxu3  ;;  %v7751_v15 = vld [vmem:[%s8536_s17 + $0x294] sm:$0x1]  ;;  %v3771_v54 = vsel %vm9019_vm11, %v7804_v47, %v3770_v33  ;;  %v3009_v26 = vsel %vm9019_vm11, %v7681_v29, %v3008_v18  ;;  %v9831_v18 = vld [vmem:[%s8536_s17 + $0x160] sm:$0xf]  ;;  %v7682_v47 = vrot.slane %v9846_v14, 11 }
 0x1ba   : > { %2910 = vst.msk [vmem:[#allocation2 + $0x18] sm:$0xff] %vm511_vm8, %v2894_v23  ;;  %v2148_v3 = vadd.f32 %v2132_v0, %v2102_v61  ;;  %v9782_v20 = vpop.f32.mrf.mxu2  ;;  %v3774_v23 = vsel %vm9019_vm11, %v3772_v57, %v3773_v42  ;;  %v3801_v24 = vunpack.c.l.b16 %v3771_v54  ;;  %v3263_v61 = vsel %vm9019_vm11, %v7722_v40, %v3262_v19 }
 0x1bb   : > { %v2411_v4 = vpack.c.bf16 %v2395_v50, %v2395_v50  ;;  %v2313_v37 = vld [vmem:[#allocation2 + $0x30] sm:$0xff]  ;;  %v3012_v50 = vsel %vm9019_vm11, %v3010_v9, %v3011_v7  ;;  %v3802_v0 = vunpack.c.l.b16 %v3774_v23  ;;  %v3266_v5 = vsel %vm9019_vm11, %v3264_v49, %v3265_v27 }
 0x1bc   : > { %v2329_v51 = vadd.f32 %v2313_v37, %v9719_v30  ;;  %2164 = vst.msk [vmem:[#allocation2 + $0x38] sm:$0xff] %vm511_vm8, %v2148_v3  ;;  %v3557_v30 = vpack.c.b16 %v3546_v58, %v3545_v39  ;;  %v3518_v3 = vrot.slane %v3516_v8, 4  ;;  %v3039_v29 = vunpack.c.l.b16 %v3009_v26  ;;  %v7753_v26 = vld [vmem:[%s8536_s17 + $0x2ac] sm:$0xf] }
 0x1bd   : > { %2428 = vst.msk [vmem:[%s9627_s16 + $0x10] sm:$0xf] %vm2423_vm12, %v2411_v4  ;;  %v9793_v16 = vpop.f32.mrf.mxu0  ;;  %v3812_v4 = vpack.c.b16 %v3802_v0, %v3801_v24  ;;  %v3040_v9 = vunpack.c.l.b16 %v3012_v50  ;;  %v3294_v13 = vunpack.c.l.b16 %v3266_v5 }
 0x1be   : > { %v2360_v21 = vld [vmem:[#allocation2 + $0x28] sm:$0xff]  ;;  %2345 = vst.msk [vmem:[#allocation2 + $0x30] sm:$0xff] %vm511_vm8, %v2329_v51  ;;  %7689 = vmatmul.msk.bf16.gmra.mxu3 %vm433_vm4, %v3049_v60  ;;  %v3519_v60 = vrot.slane %v7751_v15, 5  ;;  %v3293_v51 = vunpack.c.l.b16 %v3263_v61 }
 0x1bf   : > { %v2380_v48 = vadd.f32 %v9580_v11, %v2360_v21  ;;  %2658 = vst.msk [vmem:[#allocation2 + $0x28] sm:$0xff] %vm511_vm8, %v9698_v17  ;;  %v2879_v34 = vld [vmem:[#allocation2 + $0x20] sm:$0xff]  ;;  %v7749_v17 = vld [vmem:[%s8536_s17 + $0x28c] sm:$0xe]  ;;  %v7672_v21 = vld [vmem:[%s8536_s17 + $0x164] sm:$0x7] }
 0x1c0   : > { %v2895_v63 = vadd.f32 %v2879_v34, %v9634_v6  ;;  %7730 = vmatmul.msk.bf16.gmra.mxu0 %vm433_vm4, %v3303_v10  ;;  %v9808_v22 = vpop.f32.mrf.mxu1  ;;  %v7763_v2 = vrot.slane %v7749_v17, 9  ;;  %v3015_v10 = vrot.slane %v9831_v18, 7  ;;  %v3520_v32 = vsel %vm8564_vm7, %v3518_v3, %v3519_v60  ;;  %v7711_v34 = vld [vmem:[%s8536_s17 + $0x2a0] sm:$0x8]  ;;  %v7794_v17 = vld [vmem:[%s8536_s17 + $0x2b0] sm:$0xf] }
 0x1c1   : > { %v2396_v45 = vmax.f32 %v2380_v48, 0.0  ;;  %v2105_v36 = vpop.f32.mrf.mxu3  ;;  %v3050_v48 = vpack.c.b16 %v3040_v9, %v3039_v29  ;;  %v3304_v42 = vpack.c.b16 %v3294_v13, %v3293_v51  ;;  %v3777_v23 = vrot.slane %v7794_v17, 7  ;;  %v2135_v3 = vld [vmem:[#allocation2 + $0x50] sm:$0xff]  ;;  %v7754_v29 = vld [vmem:[%s8536_s17 + $0x2b0] sm:$0x1]  ;;  %v2136_v17 = vld [vmem:[#allocation2 + $0x58] sm:$0xff] }
 0x1c2   : > { %2911 = vst.msk [vmem:[#allocation2 + $0x20] sm:$0xff] %vm511_vm8, %v2895_v63  ;;  %v2149_v6 = vadd.f32 %v2133_v56, %v2105_v36  ;;  %v9819_v25 = vpop.f32.mrf.mxu2  ;;  %v3517_v19 = vsel %vm8564_vm7, %v7763_v2, %v3516_v8  ;;  %v3017_v63 = vrot.slane %v3015_v10, 4  ;;  %v3548_v8 = vunpack.c.l.b16 %v3520_v32  ;;  %v7713_v36 = vld [vmem:[%s8536_s17 + $0x2a8] sm:$0x7] }
 0x1c3   : > { %v2412_v1 = vpack.c.bf16 %v2396_v45, %v2396_v45  ;;  %v2314_v59 = vld [vmem:[#allocation2 + $0x38] sm:$0xff]  ;;  %7771 = vmatmul.msk.bf16.gmra.mxu1 %vm433_vm4, %v3557_v30  ;;  %v7712_v30 = vld [vmem:[%s8536_s17 + $0x2a4] sm:$0xf]  ;;  %v3547_v56 = vunpack.c.l.b16 %v3517_v19  ;;  %v3018_v45 = vrot.slane %v7672_v21, 7  ;;  %v3016_v14 = vsel %vm9019_vm11, %v7682_v47, %v3015_v10 }
 0x1c4   : > { %v2330_v46 = vadd.f32 %v2314_v59, %v9758_v62  ;;  %2165 = vst.msk [vmem:[#allocation2 + $0x40] sm:$0xff] %vm511_vm8, %v2149_v6  ;;  %v3269_v49 = vrot.slane %v7712_v30, 7  ;;  %v7723_v6 = vrot.slane %v7711_v34, 11  ;;  %v7795_v59 = vld [vmem:[%s8536_s17 + $0x2b4] sm:$0x7] }
 0x1c5   : > { %2429 = vst.msk [vmem:[%s9627_s16 + $0x14] sm:$0xf] %vm2423_vm12, %v2412_v1  ;;  %v2361_v39 = vld [vmem:[#allocation2 + $0x30] sm:$0xff]  ;;  %v9835_v58 = vpop.f32.mrf.mxu0  ;;  %v7793_v1 = vld [vmem:[%s8536_s17 + $0x2ac] sm:$0x8]  ;;  %v3558_v61 = vpack.c.b16 %v3548_v8, %v3547_v56  ;;  %v3780_v5 = vrot.slane %v7795_v59, 7  ;;  %v3019_v19 = vsel %vm9019_vm11, %v3017_v63, %v3018_v45  ;;  %v3041_v63 = vunpack.c.l.b16 %v3016_v14 }
 0x1c6   : > { %v2381_v62 = vadd.f32 %v9580_v11, %v2361_v39  ;;  %2346 = vst.msk [vmem:[#allocation2 + $0x38] sm:$0xff] %vm511_vm8, %v2330_v46  ;;  %v2880_v37 = vld [vmem:[#allocation2 + $0x28] sm:$0xff]  ;;  %v7805_v0 = vrot.slane %v7793_v1, 11  ;;  %v3779_v46 = vrot.slane %v3777_v23, 4  ;;  %v3271_v60 = vrot.slane %v3269_v49, 4 }
 0x1c7   : > { %2659 = vst.msk [vmem:[#allocation2 + $0x30] sm:$0xff] %vm511_vm8, %v9742_v31  ;;  %v2896_v55 = vadd.f32 %v2880_v37, %v9667_v44  ;;  %7813 = vmatmul.msk.bf16.gmra.mxu2 %vm433_vm4, %v3812_v4  ;;  %v2134_v31 = vld [vmem:[#allocation2 + $0x48] sm:$0xff]  ;;  %v3523_v39 = vrot.slane %v7753_v26, 5  ;;  %v7752_v37 = vld [vmem:[%s8536_s17 + $0x2a8] sm:$0xe]  ;;  %v3042_v56 = vunpack.c.l.b16 %v3019_v19 }
 0x1c8   : > { %v2397_v7 = vmax.f32 %v2381_v62, 0.0  ;;  %v9854_v33 = vpop.f32.mrf.mxu1  ;;  %v7764_v21 = vrot.slane %v7752_v37, 9  ;;  %v9914_v8 = vld [vmem:[%s8536_s17 + $0x17c] sm:$0xf]  ;;  %v7715_v26 = vld [vmem:[%s8536_s17 + $0x2c0] sm:$0xf] }
 0x1c9   : > { %2912 = vst.msk [vmem:[#allocation2 + $0x28] sm:$0xff] %vm511_vm8, %v2896_v55  ;;  %v2107_v44 = vpop.f32.mrf.mxu3  ;;  %v3525_v30 = vrot.slane %v3523_v39, 4  ;;  %v7675_v1 = vld [vmem:[%s8536_s17 + $0x180] sm:$0x7]  ;;  %v7796_v14 = vld [vmem:[%s8536_s17 + $0x2c8] sm:$0x8] }
 0x1ca   : > { %v2413_v53 = vpack.c.bf16 %v2397_v7, %v2397_v7  ;;  %v2150_v43 = vadd.f32 %v2134_v31, %v2107_v44  ;;  %v9859_v40 = vpop.f32.mrf.mxu2  ;;  %v3781_v7 = vsel %vm9019_vm11, %v3779_v46, %v3780_v5  ;;  %v3270_v31 = vsel %vm9019_vm11, %v7723_v6, %v3269_v49  ;;  %v7714_v46 = vld [vmem:[%s8536_s17 + $0x2bc] sm:$0x8]  ;;  %v7797_v5 = vld [vmem:[%s8536_s17 + $0x2cc] sm:$0xf]  ;;  %v7798_v19 = vld [vmem:[%s8536_s17 + $0x2d0] sm:$0x7] }
 0x1cb   : > { %v2315_v27 = vld [vmem:[#allocation2 + $0x40] sm:$0xff]  ;;  %v3804_v32 = vunpack.c.l.b16 %v3781_v7  ;;  %v3524_v49 = vsel %vm8564_vm7, %v7764_v21, %v3523_v39  ;;  %v3022_v6 = vrot.slane %v9914_v8, 7  ;;  %v3276_v39 = vrot.slane %v7715_v26, 7  ;;  %v7757_v8 = vld [vmem:[%s8536_s17 + $0x2cc] sm:$0x1] }
 0x1cc   : > { %2430 = vst.msk [vmem:[%s9627_s16 + $0x18] sm:$0xf] %vm2423_vm12, %v2413_v53  ;;  %v2331_v57 = vadd.f32 %v2315_v27, %v9793_v16  ;;  %v3526_v53 = vrot.slane %v7754_v29, 5 }
 0x1cd   : > { %v2362_v15 = vld [vmem:[#allocation2 + $0x38] sm:$0xff]  ;;  %2166 = vst.msk [vmem:[#allocation2 + $0x48] sm:$0xff] %vm511_vm8, %v2150_v43  ;;  %v9870_v54 = vpop.f32.mrf.mxu0  ;;  %v3024_v29 = vrot.slane %v3022_v6, 4  ;;  %v3278_v21 = vrot.slane %v3276_v39, 4 }
 0x1ce   : > { %v2382_v24 = vadd.f32 %v9580_v11, %v2362_v15  ;;  %2347 = vst.msk [vmem:[#allocation2 + $0x40] sm:$0xff] %vm511_vm8, %v2331_v57  ;;  %v2881_v16 = vld [vmem:[#allocation2 + $0x30] sm:$0xff]  ;;  %7690 = vmatmul.msk.bf16.gmra.mxu3 %vm433_vm4, %v3050_v48  ;;  %v3295_v57 = vunpack.c.l.b16 %v3270_v31 }
 0x1cf   : > { %2660 = vst.msk [vmem:[#allocation2 + $0x38] sm:$0xff] %vm511_vm8, %v9777_v28  ;;  %v2897_v50 = vadd.f32 %v2881_v16, %v9708_v41  ;;  %v3272_v28 = vrot.slane %v7713_v36, 7  ;;  %v3778_v41 = vsel %vm9019_vm11, %v7805_v0, %v3777_v23  ;;  %v9919_v36 = vld [vmem:[%s8536_s17 + $0x178] sm:$0x8]  ;;  %v3051_v16 = vpack.c.b16 %v3042_v56, %v3041_v63 }
 0x1d0   : > { %v2398_v2 = vmax.f32 %v2382_v24, 0.0  ;;  %7731 = vmatmul.msk.bf16.gmra.mxu0 %vm433_vm4, %v3304_v42  ;;  %v9883_v62 = vpop.f32.mrf.mxu1  ;;  %v3803_v13 = vunpack.c.l.b16 %v3778_v41  ;;  %v9945_v41 = vld [vmem:[%s8536_s17 + $0x2c8] sm:$0xf] }
 0x1d1   : > { %2913 = vst.msk [vmem:[#allocation2 + $0x30] sm:$0xff] %vm511_vm8, %v2897_v50  ;;  %v2110_v4 = vpop.f32.mrf.mxu3  ;;  %v3273_v48 = vsel %vm9019_vm11, %v3271_v60, %v3272_v28  ;;  %v7683_v50 = vrot.slane %v9919_v36, 11 }
 0x1d2   : > { %v2414_v9 = vpack.c.bf16 %v2398_v2, %v2398_v2  ;;  %v2151_v55 = vadd.f32 %v2135_v3, %v2110_v4  ;;  %v9889_v51 = vpop.f32.mrf.mxu2  ;;  %v3813_v34 = vpack.c.b16 %v3804_v32, %v3803_v13  ;;  %v3296_v45 = vunpack.c.l.b16 %v3273_v48  ;;  %v7716_v2 = vld [vmem:[%s8536_s17 + $0x2c4] sm:$0x7]  ;;  %v2137_v48 = vld [vmem:[#allocation2 + $0x60] sm:$0xff] }
 0x1d3   : > { %7772 = vmatmul.msk.bf16.gmra.mxu1 %vm433_vm4, %v3558_v61  ;;  %v3549_v61 = vunpack.c.l.b16 %v3524_v49  ;;  %v3025_v13 = vrot.slane %v7675_v1, 7 }
 0x1d4   : > { %2431 = vst.msk [vmem:[%s9627_s16 + $0x1c] sm:$0xf] %vm2423_vm12, %v2414_v9  ;;  %v2316_v44 = vld [vmem:[#allocation2 + $0x48] sm:$0xff]  ;;  %v3305_v60 = vpack.c.b16 %v3296_v45, %v3295_v57  ;;  %v3784_v9 = vrot.slane %v7797_v5, 7  ;;  %v3023_v45 = vsel %vm9019_vm11, %v7683_v50, %v3022_v6 }
 0x1d5   : > { %v2363_v18 = vld [vmem:[#allocation2 + $0x40] sm:$0xff]  ;;  %v2332_v43 = vadd.f32 %v2316_v44, %v9835_v58  ;;  %2167 = vst.msk [vmem:[#allocation2 + $0x50] sm:$0xff] %vm511_vm8, %v2151_v55  ;;  %v9906_v10 = vpop.f32.mrf.mxu0  ;;  %v7806_v44 = vrot.slane %v7796_v14, 11  ;;  %v3026_v36 = vsel %vm9019_vm11, %v3024_v29, %v3025_v13 }
 0x1d6   : > { %v2383_v27 = vadd.f32 %v9580_v11, %v2363_v18  ;;  %2661 = vst.msk [vmem:[#allocation2 + $0x40] sm:$0xff] %vm511_vm8, %v9808_v22  ;;  %v2882_v47 = vld [vmem:[#allocation2 + $0x38] sm:$0xff]  ;;  %v3527_v22 = vsel %vm8564_vm7, %v3525_v30, %v3526_v53  ;;  %v3786_v31 = vrot.slane %v3784_v9, 4  ;;  %v3279_v30 = vrot.slane %v7716_v2, 7 }
 0x1d7   : > { %2348 = vst.msk [vmem:[#allocation2 + $0x48] sm:$0xff] %vm511_vm8, %v2332_v43  ;;  %v2898_v58 = vadd.f32 %v2882_v47, %v9746_v52  ;;  %7814 = vmatmul.msk.bf16.gmra.mxu2 %vm433_vm4, %v3813_v34  ;;  %v3550_v0 = vunpack.c.l.b16 %v3527_v22  ;;  %v3787_v53 = vrot.slane %v7798_v19, 7  ;;  %v3530_v47 = vrot.slane %v9945_v41, 5  ;;  %v7818_v19 = vld [vmem:[%s8536_s17 + $0x348] sm:$0x8] }
 0x1d8   : > { %v2399_v42 = vmax.f32 %v2383_v27, 0.0  ;;  %v9927_v15 = vpop.f32.mrf.mxu1  ;;  %v7755_v27 = vld [vmem:[%s8536_s17 + $0x2c4] sm:$0xe] }
 0x1d9   : > { %2914 = vst.msk [vmem:[#allocation2 + $0x38] sm:$0xff] %vm511_vm8, %v2898_v58  ;;  %v2112_v52 = vpop.f32.mrf.mxu3  ;;  %v3788_v58 = vsel %vm9019_vm11, %v3786_v31, %v3787_v53  ;;  %v7765_v26 = vrot.slane %v7755_v27, 9  ;;  %v7901_v27 = vld [vmem:[%s8536_s17 + $0x358] sm:$0xf] }
 0x1da   : > { %v2415_v23 = vpack.c.bf16 %v2399_v42, %v2399_v42  ;;  %v2152_v24 = vadd.f32 %v2136_v17, %v2112_v52  ;;  %v9932_v59 = vpop.f32.mrf.mxu2  ;;  %v3806_v49 = vunpack.c.l.b16 %v3788_v58  ;;  %v3280_v17 = vsel %vm9019_vm11, %v3278_v21, %v3279_v30  ;;  %v7859_v21 = vld [vmem:[%s8536_s17 + $0x350] sm:$0xe] }
 0x1db   : > { %v7883_v58 = vrot.slane %v7859_v21, 9 }
 0x1dc   : > { %2432 = vst.msk [vmem:[%s9627_s16 + $0x20] sm:$0xf] %vm2423_vm12, %v2415_v23  ;;  %v2317_v3 = vld [vmem:[#allocation2 + $0x50] sm:$0xff] }
 0x1dd   : > { %v2333_v4 = vadd.f32 %v2317_v3, %v9870_v54  ;;  %v2883_v28 = vld [vmem:[#allocation2 + $0x40] sm:$0xff]  ;;  %2168 = vst.msk [vmem:[#allocation2 + $0x58] sm:$0xff] %vm511_vm8, %v2152_v24  ;;  %v9942_v37 = vpop.f32.mrf.mxu0  ;;  %v3559_v54 = vpack.c.b16 %v3550_v0, %v3549_v61  ;;  %v3532_v24 = vrot.slane %v3530_v47, 4  ;;  %v3043_v61 = vunpack.c.l.b16 %v3023_v45 }
 0x1de   : > { %v2364_v55 = vld [vmem:[#allocation2 + $0x48] sm:$0xff]  ;;  %v2899_v7 = vadd.f32 %v2883_v28, %v9782_v20  ;;  %7691 = vmatmul.msk.bf16.gmra.mxu3 %vm433_vm4, %v3051_v16  ;;  %v7724_v20 = vrot.slane %v7714_v46, 11  ;;  %v3533_v16 = vrot.slane %v7757_v8, 5  ;;  %v3044_v0 = vunpack.c.l.b16 %v3026_v36 }
 0x1df   : > { %v2384_v32 = vadd.f32 %v9580_v11, %v2364_v55  ;;  %2349 = vst.msk [vmem:[#allocation2 + $0x50] sm:$0xff] %vm511_vm8, %v2333_v4  ;;  %v2138_v28 = vld [vmem:[#allocation2 + $0x68] sm:$0xff] }
 0x1e0   : > { %2662 = vst.msk [vmem:[#allocation2 + $0x48] sm:$0xff] %vm511_vm8, %v9854_v33  ;;  %7732 = vmatmul.msk.bf16.gmra.mxu0 %vm433_vm4, %v3305_v60  ;;  %v9957_v34 = vpop.f32.mrf.mxu1  ;;  %v3785_v33 = vsel %vm9019_vm11, %v7806_v44, %v3784_v9  ;;  %v3277_v52 = vsel %vm9019_vm11, %v7724_v20, %v3276_v39  ;;  %v3298_v60 = vunpack.c.l.b16 %v3280_v17  ;;  %v7819_v39 = vld [vmem:[%s8536_s17 + $0x34c] sm:$0xf]  ;;  %v3534_v41 = vsel %vm8564_vm7, %v3532_v24, %v3533_v16  ;;  %v7820_v44 = vld [vmem:[%s8536_s17 + $0x350] sm:$0x7] }
 0x1e1   : > { %v2400_v18 = vmax.f32 %v2384_v32, 0.0  ;;  %2915 = vst.msk [vmem:[#allocation2 + $0x40] sm:$0xff] %vm511_vm8, %v2899_v7  ;;  %v2115_v43 = vpop.f32.mrf.mxu3  ;;  %v3805_v57 = vunpack.c.l.b16 %v3785_v33  ;;  %v3297_v3 = vunpack.c.l.b16 %v3277_v52  ;;  %v3052_v9 = vpack.c.b16 %v3044_v0, %v3043_v61 }
 0x1e2   : > { %v2153_v63 = vadd.f32 %v2137_v48, %v2115_v43  ;;  %v9963_v56 = vpop.f32.mrf.mxu2  ;;  %v3993_v32 = vrot.slane %v7819_v39, 7  ;;  %v3552_v20 = vunpack.c.l.b16 %v3534_v41  ;;  %v7842_v48 = vrot.slane %v7818_v19, 11  ;;  %v7822_v19 = vld [vmem:[%s8536_s17 + $0x368] sm:$0xf] }
 0x1e3   : > { %v2416_v42 = vpack.c.bf16 %v2400_v18, %v2400_v18  ;;  %7773 = vmatmul.msk.bf16.gmra.mxu1 %vm433_vm4, %v3559_v54  ;;  %v3814_v1 = vpack.c.b16 %v3806_v49, %v3805_v57  ;;  %v3306_v14 = vpack.c.b16 %v3298_v60, %v3297_v3  ;;  %v7861_v18 = vld [vmem:[%s8536_s17 + $0x358] sm:$0x1]  ;;  %v3996_v8 = vrot.slane %v7820_v44, 7 }
 0x1e4   : > { %v2318_v22 = vld [vmem:[#allocation2 + $0x58] sm:$0xff]  ;;  %2169 = vst.msk [vmem:[#allocation2 + $0x60] sm:$0xff] %vm511_vm8, %v2153_v63  ;;  %v3995_v63 = vrot.slane %v3993_v32, 4  ;;  %v4250_v49 = vrot.slane %v7861_v18, 5 }
 0x1e5   : > { %2433 = vst.msk [vmem:[%s9627_s16 + $0x24] sm:$0xf] %vm2423_vm12, %v2416_v42  ;;  %v2334_v6 = vadd.f32 %v2318_v22, %v9906_v10  ;;  %v9981_v23 = vpop.f32.mrf.mxu0  ;;  %v2139_v42 = vld [vmem:[#allocation2 + $0x70] sm:$0xff] }
 0x1e6   : > { %v2365_v50 = vld [vmem:[#allocation2 + $0x50] sm:$0xff]  ;;  %v3997_v61 = vsel %vm9019_vm11, %v3995_v63, %v3996_v8  ;;  %v7823_v63 = vld [vmem:[%s8536_s17 + $0x36c] sm:$0x7]  ;;  %v4000_v8 = vrot.slane %v7822_v19, 7 }
 0x1e7   : > { %v2385_v46 = vadd.f32 %v9580_v11, %v2365_v50  ;;  %2350 = vst.msk [vmem:[#allocation2 + $0x58] sm:$0xff] %vm511_vm8, %v2334_v6  ;;  %v2884_v2 = vld [vmem:[#allocation2 + $0x48] sm:$0xff]  ;;  %7815 = vmatmul.msk.bf16.gmra.mxu2 %vm433_vm4, %v3814_v1  ;;  %v3531_v11 = vsel %vm8564_vm7, %v7765_v26, %v3530_v47  ;;  %v7900_v26 = vld [vmem:[%s8536_s17 + $0x354] sm:$0x8]  ;;  %v3994_v50 = vsel %vm9019_vm11, %v7842_v48, %v3993_v32 }
 0x1e8   : > { %2663 = vst.msk [vmem:[#allocation2 + $0x50] sm:$0xff] %vm511_vm8, %v9883_v62  ;;  %v2900_v10 = vadd.f32 %v2884_v2, %v9819_v25  ;;  %v9990_v29 = vpop.f32.mrf.mxu1  ;;  %v7860_v62 = vld [vmem:[%s8536_s17 + $0x354] sm:$0xf]  ;;  %v3551_v31 = vunpack.c.l.b16 %v3531_v11  ;;  %v7902_v6 = vld [vmem:[%s8536_s17 + $0x35c] sm:$0x7]  ;;  %v7924_v3 = vrot.slane %v7900_v26, 11  ;;  %v4049_v41 = vunpack.c.l.b16 %v3994_v50 }
 0x1e9   : > { %v2401_v5 = vmax.f32 %v2385_v46, 0.0  ;;  %v2117_v4 = vpop.f32.mrf.mxu3  ;;  %v4247_v30 = vrot.slane %v7860_v62, 5  ;;  %v4504_v60 = vrot.slane %v7902_v6, 7  ;;  %v4050_v62 = vunpack.c.l.b16 %v3997_v61 }
 0x1ea   : > { %2916 = vst.msk [vmem:[#allocation2 + $0x48] sm:$0xff] %vm511_vm8, %v2900_v10  ;;  %v2154_v25 = vadd.f32 %v2138_v28, %v2117_v4  ;;  %v9998_v55 = vpop.f32.mrf.mxu2  ;;  %v3560_v45 = vpack.c.b16 %v3552_v20, %v3551_v31  ;;  %v8327_v10 = vld [vmem:[%s8536_s17] sm:$0xff]  ;;  %v7863_v20 = vld [vmem:[%s8536_s17 + $0x370] sm:$0xf] }
 0x1eb   : > { %v2417_v7 = vpack.c.bf16 %v2401_v5, %v2401_v5  ;;  %v2319_v13 = vld [vmem:[#allocation2 + $0x60] sm:$0xff]  ;;  %v4249_v36 = vrot.slane %v4247_v30, 4  ;;  %v4248_v0 = vsel %vm8564_vm7, %v7883_v58, %v4247_v30  ;;  %v4065_v18 = vpack.c.b16 %v4050_v62, %v4049_v41 }
 0x1ec   : > { %v2335_v54 = vadd.f32 %v2319_v13, %v9942_v37  ;;  %2170 = vst.msk [vmem:[#allocation2 + $0x68] sm:$0xff] %vm511_vm8, %v2154_v25  ;;  %v10016_v37 = vld [vmem:[%s11544_s2] ss:$0 sm:$0xff]  ;;  %v8035_v62 = vld [vmem:[%s11543_s1 + $0x54] sm:$0xf] }
 0x1ed   : > { %2434 = vst.msk [vmem:[%s9627_s16 + $0x28] sm:$0xf] %vm2423_vm12, %v2417_v7  ;;  %v10007_v53 = vpop.f32.mrf.mxu0  ;;  %v4251_v2 = vsel %vm8564_vm7, %v4249_v36, %v4250_v49  ;;  %v4303_v7 = vunpack.c.l.b16 %v4248_v0  ;;  %v4254_v36 = vrot.slane %v7863_v20, 5 }
 0x1ee   : > { %v2366_v43 = vld [vmem:[#allocation2 + $0x58] sm:$0xff]  ;;  %2351 = vst.msk [vmem:[#allocation2 + $0x60] sm:$0xff] %vm511_vm8, %v2335_v54  ;;  %7692 = vmatmul.msk.bf16.gmra.mxu3 %vm433_vm4, %v3052_v9  ;;  %v4304_v13 = vunpack.c.l.b16 %v4251_v2 }
 0x1ef   : > { %v2386_v47 = vadd.f32 %v10016_v37, %v2366_v43  ;;  %2664 = vst.msk [vmem:[#allocation2 + $0x58] sm:$0xff] %vm511_vm8, %v9927_v15  ;;  %v2885_v33 = vld [vmem:[#allocation2 + $0x50] sm:$0xff]  ;;  %v4501_v15 = vrot.slane %v7901_v27, 7  ;;  %v2140_v54 = vld [vmem:[#allocation2 + $0x78] sm:$0xff] }
 0x1f0   : > { %v2901_v57 = vadd.f32 %v2885_v33, %v9859_v40  ;;  %7733 = vmatmul.msk.bf16.gmra.mxu0 %vm433_vm4, %v3306_v14  ;;  %v10023_v17 = vpop.f32.mrf.mxu1  ;;  %v7821_v33 = vld [vmem:[%s8536_s17 + $0x364] sm:$0x8] }
 0x1f1   : > { %v2402_v22 = vmax.f32 %v2386_v47, 0.0  ;;  %v2120_v52 = vpop.f32.mrf.mxu3  ;;  %v4503_v4 = vrot.slane %v4501_v15, 4  ;;  %v4319_v47 = vpack.c.b16 %v4304_v13, %v4303_v7  ;;  %v5534_v13 = vsel %vm458_vm0, %v8035_v62, 0 }
 0x1f2   : > { %2917 = vst.msk [vmem:[#allocation2 + $0x50] sm:$0xff] %vm511_vm8, %v2901_v57  ;;  %v2155_v24 = vadd.f32 %v2139_v42, %v2120_v52  ;;  %v10028_v16 = vpop.f32.mrf.mxu2  ;;  %v7864_v52 = vld [vmem:[%s8536_s17 + $0x374] sm:$0x1]  ;;  %5543 = vmatpush.bf16.msrb.mxu1 %v5534_v13 }
 0x1f3   : > { %v2418_v40 = vpack.c.bf16 %v2402_v22, %v2402_v22  ;;  %v2320_v1 = vld [vmem:[#allocation2 + $0x68] sm:$0xff]  ;;  %7774 = vmatmul.msk.bf16.gmra.mxu1 %vm433_vm4, %v3560_v45  ;;  %v4505_v31 = vsel %vm9019_vm11, %v4503_v4, %v4504_v60  ;;  %v7862_v45 = vld [vmem:[%s8536_s17 + $0x36c] sm:$0xe]  ;;  %v4257_v2 = vrot.slane %v7864_v52, 5  ;;  %v3129_v60 = vld [vmem:[#allocation2] sm:$0xff] }
 0x1f4   : > { %v2336_v46 = vadd.f32 %v2320_v1, %v9981_v23  ;;  %2171 = vst.msk [vmem:[#allocation2 + $0x70] sm:$0xff] %vm511_vm8, %v2155_v24  ;;  %v7993_v23 = vld [vmem:[%s11543_s1 + $0x4c] sm:$0xf]  ;;  %v4558_v42 = vunpack.c.l.b16 %v4505_v31  ;;  %v7904_v24 = vld [vmem:[%s8536_s17 + $0x374] sm:$0xf]  ;;  %v4003_v1 = vrot.slane %v7823_v63, 7 }
 0x1f5   : > { %2435 = vst.msk [vmem:[%s9627_s16 + $0x2c] sm:$0xf] %vm2423_vm12, %v2418_v40  ;;  %v2367_v39 = vld [vmem:[#allocation2 + $0x60] sm:$0xff]  ;;  %v10044_v5 = vpop.f32.mrf.mxu0  ;;  %v5098_v25 = vsel %vm458_vm0, %v7993_v23, 0  ;;  %v4002_v40 = vrot.slane %v4000_v8, 4  ;;  %v7884_v50 = vrot.slane %v7862_v45, 9 }
 0x1f6   : > { %v2387_v28 = vadd.f32 %v10016_v37, %v2367_v39  ;;  %2352 = vst.msk [vmem:[#allocation2 + $0x68] sm:$0xff] %vm511_vm8, %v2336_v46  ;;  %v2886_v11 = vld [vmem:[#allocation2 + $0x58] sm:$0xff]  ;;  %5107 = vmatpush.bf16.msrb.mxu3 %v5098_v25  ;;  %v4256_v46 = vrot.slane %v4254_v36, 4  ;;  %v7903_v4 = vld [vmem:[%s8536_s17 + $0x370] sm:$0x8]  ;;  %v8328_v31 = vld [vmem:[%s8536_s17 + $0x1c] sm:$0xff] }
 0x1f7   : > { %2665 = vst.msk [vmem:[#allocation2 + $0x60] sm:$0xff] %vm511_vm8, %v9957_v34  ;;  %v2902_v9 = vadd.f32 %v2886_v11, %v9889_v51  ;;  %7977 = vmatmul.msk.bf16.vlgmr.msra.gmra.mxu2 %vm433_vm4, %v8327_v10  ;;  %v8010_v51 = vld [vmem:[%s11543_s1 + $0x50] sm:$0xf]  ;;  %v4502_v34 = vsel %vm9019_vm11, %v7924_v3, %v4501_v15  ;;  %v7843_v15 = vrot.slane %v7821_v33, 11  ;;  %v4004_v41 = vsel %vm9019_vm11, %v4002_v40, %v4003_v1  ;;  %v7866_v45 = vld [vmem:[%s8536_s17 + $0x38c] sm:$0xf] }
 0x1f8   : > { %v2403_v14 = vmax.f32 %v2387_v28, 0.0  ;;  %v10058_v44 = vpop.f32.mrf.mxu1  ;;  %v5352_v43 = vsel %vm458_vm0, %v8010_v51, 0  ;;  %v4557_v57 = vunpack.c.l.b16 %v4502_v34  ;;  %v7905_v28 = vld [vmem:[%s8536_s17 + $0x378] sm:$0x7]  ;;  %v4258_v7 = vsel %vm8564_vm7, %v4256_v46, %v4257_v2  ;;  %v7826_v40 = vld [vmem:[%s8536_s17 + $0x388] sm:$0x7] }
 0x1f9   : > { %2918 = vst.msk [vmem:[#allocation2 + $0x58] sm:$0xff] %vm511_vm8, %v2902_v9  ;;  %v2122_v32 = vpop.f32.mrf.mxu3  ;;  %5361 = vmatpush.bf16.msrb.mxu0 %v5352_v43  ;;  %v4001_v11 = vsel %vm9019_vm11, %v7843_v15, %v4000_v8  ;;  %v4255_v9 = vsel %vm8564_vm7, %v7884_v50, %v4254_v36  ;;  %v4511_v34 = vrot.slane %v7905_v28, 7  ;;  %v4306_v63 = vunpack.c.l.b16 %v4258_v7  ;;  %v3131_v7 = vld [vmem:[#allocation2 + $0x10] sm:$0xff] }
 0x1fa   : > { %v2419_v21 = vpack.c.bf16 %v2403_v14, %v2403_v14  ;;  %v2156_v30 = vadd.f32 %v2140_v54, %v2122_v32  ;;  %v10069_v48 = vpop.f32.mrf.mxu2  ;;  %v4573_v0 = vpack.c.b16 %v4558_v42, %v4557_v57  ;;  %v7925_v54 = vrot.slane %v7903_v4, 11 }
 0x1fb   : > { %v2321_v27 = vld [vmem:[#allocation2 + $0x70] sm:$0xff]  ;;  %v4305_v33 = vunpack.c.l.b16 %v4255_v9 }
 0x1fc   : > { %2436 = vst.msk [vmem:[%s9627_s16 + $0x30] sm:$0xf] %vm2423_vm12, %v2419_v21  ;;  %v2337_v58 = vadd.f32 %v2321_v27, %v10007_v53 }
 0x1fd   : > { %v2368_v49 = vld [vmem:[#allocation2 + $0x68] sm:$0xff]  ;;  %2172 = vst.msk [vmem:[#allocation2 + $0x78] sm:$0xff] %vm511_vm8, %v2156_v30  ;;  %v10078_v22 = vpop.f32.mrf.mxu0  ;;  %v4051_v30 = vunpack.c.l.b16 %v4001_v11 }
 0x1fe   : > { %v2388_v26 = vadd.f32 %v10016_v37, %v2368_v49  ;;  %2353 = vst.msk [vmem:[#allocation2 + $0x70] sm:$0xff] %vm511_vm8, %v2337_v58  ;;  %v2887_v6 = vld [vmem:[#allocation2 + $0x60] sm:$0xff]  ;;  %7851 = vmatmul.msk.bf16.vlgmr.msra.gmra.mxu3 %vm433_vm4, %v4065_v18  ;;  %v4052_v18 = vunpack.c.l.b16 %v4004_v41  ;;  %v3130_v58 = vld [vmem:[#allocation2 + $0x8] sm:$0xff] }
 0x1ff   : > { %2666 = vst.msk [vmem:[#allocation2 + $0x68] sm:$0xff] %vm511_vm8, %v9990_v29  ;;  %v2903_v53 = vadd.f32 %v2887_v6, %v9932_v59  ;;  %v4508_v29 = vrot.slane %v7904_v24, 7  ;;  %v7824_v6 = vld [vmem:[%s8536_s17 + $0x380] sm:$0x8] }
 0x200   : > { %v2404_v61 = vmax.f32 %v2388_v26, 0.0  ;;  %7892 = vmatmul.msk.bf16.vlgmr.msra.gmra.mxu0 %vm433_vm4, %v4319_v47  ;;  %v10090_v10 = vpop.f32.mrf.mxu1  ;;  %v4066_v52 = vpack.c.b16 %v4052_v18, %v4051_v30  ;;  %v7844_v28 = vrot.slane %v7824_v6, 11  ;;  %v3132_v6 = vld [vmem:[#allocation2 + $0x18] sm:$0xff] }
 0x201   : > { %2919 = vst.msk [vmem:[#allocation2 + $0x60] sm:$0xff] %vm511_vm8, %v2903_v53  ;;  %v3089_v3 = vpop.f32.mrf.mxu3  ;;  %v4510_v51 = vrot.slane %v4508_v29, 4  ;;  %v4509_v42 = vsel %vm9019_vm11, %v7925_v54, %v4508_v29  ;;  %v4320_v53 = vpack.c.b16 %v4306_v63, %v4305_v33  ;;  %v8329_v63 = vld [vmem:[%s8536_s17 + $0x38] sm:$0xff] }
 0x202   : > { %v2420_v59 = vpack.c.bf16 %v2404_v61, %v2404_v61  ;;  %v3145_v39 = vadd.f32 %v3129_v60, %v3089_v3  ;;  %v10092_v23 = vpop.f32.mrf.mxu2  ;;  %v4559_v1 = vunpack.c.l.b16 %v4509_v42  ;;  %v4261_v61 = vrot.slane %v7866_v45, 5  ;;  %v7865_v3 = vld [vmem:[%s8536_s17 + $0x388] sm:$0xe]  ;;  %v7867_v60 = vld [vmem:[%s8536_s17 + $0x390] sm:$0x1] }
 0x203   : > { %7933 = vmatmul.msk.bf16.vlgmr.msra.gmra.mxu1 %vm433_vm4, %v4573_v0  ;;  %v7885_v62 = vrot.slane %v7865_v3, 9  ;;  %v7827_v3 = vld [vmem:[%s8536_s17 + $0x39c] sm:$0x8] }
 0x204   : > { %2437 = vst.msk [vmem:[%s9627_s16 + $0x34] sm:$0xf] %vm2423_vm12, %v2420_v59  ;;  %v2322_v25 = vld [vmem:[#allocation2 + $0x78] sm:$0xff] }
 0x205   : > { %v2369_v14 = vld [vmem:[#allocation2 + $0x70] sm:$0xff]  ;;  %v2338_v19 = vadd.f32 %v2322_v25, %v10044_v5  ;;  %3161 = vst.msk [vmem:[#allocation2] sm:$0xff] %vm511_vm8, %v3145_v39  ;;  %v10113_v32 = vpop.f32.mrf.mxu0  ;;  %v8108_v5 = vld [vmem:[%s11543_s1 + $0x58] sm:$0xf]  ;;  %v7907_v39 = vld [vmem:[%s8536_s17 + $0x390] sm:$0xf]  ;;  %v4262_v30 = vsel %vm8564_vm7, %v7885_v62, %v4261_v61 }
 0x206   : > { %v2389_v20 = vadd.f32 %v10016_v37, %v2369_v14  ;;  %2667 = vst.msk [vmem:[#allocation2 + $0x70] sm:$0xff] %vm511_vm8, %v10023_v17  ;;  %v2888_v21 = vld [vmem:[#allocation2 + $0x68] sm:$0xff]  ;;  %v5788_v27 = vsel %vm458_vm0, %v8108_v5, 0  ;;  %v7825_v17 = vld [vmem:[%s8536_s17 + $0x384] sm:$0xf]  ;;  %v4264_v25 = vrot.slane %v7867_v60, 5 }
 0x207   : > { %2354 = vst.msk [vmem:[#allocation2 + $0x78] sm:$0xff] %vm511_vm8, %v2338_v19  ;;  %v2904_v43 = vadd.f32 %v2888_v21, %v9963_v56  ;;  %5797 = vmatpush.bf16.msrb.mxu2 %v5788_v27  ;;  %v4512_v56 = vsel %vm9019_vm11, %v4510_v51, %v4511_v34  ;;  %v4007_v15 = vrot.slane %v7825_v17, 7  ;;  %v4515_v14 = vrot.slane %v7907_v39, 7  ;;  %v7906_v51 = vld [vmem:[%s8536_s17 + $0x38c] sm:$0x8] }
 0x208   : > { %v2405_v47 = vmax.f32 %v2389_v20, 0.0  ;;  %v10127_v57 = vpop.f32.mrf.mxu1  ;;  %7978 = vmatmul.msk.bf16.gmra.mxu2 %vm433_vm4, %v8328_v31  ;;  %v4560_v50 = vunpack.c.l.b16 %v4512_v56  ;;  %v7926_v27 = vrot.slane %v7906_v51, 11  ;;  %v7829_v60 = vld [vmem:[%s8536_s17 + $0x3a4] sm:$0x7]  ;;  %v7845_v62 = vrot.slane %v7827_v3, 11  ;;  %v3133_v51 = vld [vmem:[#allocation2 + $0x20] sm:$0xff] }
 0x209   : > { %2920 = vst.msk [vmem:[#allocation2 + $0x68] sm:$0xff] %vm511_vm8, %v2904_v43  ;;  %v3091_v8 = vpop.f32.mrf.mxu3  ;;  %v4009_v11 = vrot.slane %v4007_v15, 4  ;;  %v4008_v31 = vsel %vm9019_vm11, %v7844_v28, %v4007_v15 }
 0x20a   : > { %v2421_v36 = vpack.c.bf16 %v2405_v47, %v2405_v47  ;;  %v3146_v49 = vadd.f32 %v3130_v58, %v3091_v8  ;;  %v10135_v26 = vpop.f32.mrf.mxu2  ;;  %v4574_v41 = vpack.c.b16 %v4560_v50, %v4559_v1  ;;  %v4517_v47 = vrot.slane %v4515_v14, 4 }
 0x20b   : > { %v4053_v8 = vunpack.c.l.b16 %v4008_v31 }
 0x20c   : > { %2438 = vst.msk [vmem:[%s9627_s16 + $0x38] sm:$0xf] %vm2423_vm12, %v2421_v36  ;;  %v3383_v24 = vld [vmem:[#allocation2] sm:$0xff]  ;;  %v4307_v36 = vunpack.c.l.b16 %v4262_v30 }
 0x20d   : > { %v3399_v0 = vadd.f32 %v3383_v24, %v10078_v22  ;;  %v2889_v46 = vld [vmem:[#allocation2 + $0x70] sm:$0xff]  ;;  %3162 = vst.msk [vmem:[#allocation2 + $0x8] sm:$0xff] %vm511_vm8, %v3146_v49  ;;  %v10143_v2 = vpop.f32.mrf.mxu0  ;;  %v4010_v22 = vrot.slane %v7826_v40, 7  ;;  %v4516_v24 = vsel %vm9019_vm11, %v7926_v27, %v4515_v14  ;;  %v7869_v40 = vld [vmem:[%s8536_s17 + $0x3a8] sm:$0xf] }
 0x20e   : > { %v2370_v29 = vld [vmem:[#allocation2 + $0x78] sm:$0xff]  ;;  %v2905_v59 = vadd.f32 %v2889_v46, %v9998_v55  ;;  %7852 = vmatmul.msk.bf16.gmra.mxu3 %vm433_vm4, %v4066_v52  ;;  %v4263_v55 = vrot.slane %v4261_v61, 4  ;;  %v4268_v28 = vrot.slane %v7869_v40, 5  ;;  %v7911_v30 = vld [vmem:[%s8536_s17 + $0x3b0] sm:$0x7] }
 0x20f   : > { %v2390_v4 = vadd.f32 %v10016_v37, %v2370_v29  ;;  %3415 = vst.msk [vmem:[#allocation2] sm:$0xff] %vm511_vm8, %v3399_v0  ;;  %v4011_v20 = vsel %vm9019_vm11, %v4009_v11, %v4010_v22  ;;  %v4561_v29 = vunpack.c.l.b16 %v4516_v24  ;;  %v7870_v22 = vld [vmem:[%s8536_s17 + $0x3ac] sm:$0x1]  ;;  %v7831_v24 = vld [vmem:[%s8536_s17 + $0x3bc] sm:$0xf] }
 0x210   : > { %2668 = vst.msk [vmem:[#allocation2 + $0x78] sm:$0xff] %vm511_vm8, %v10058_v44  ;;  %7893 = vmatmul.msk.bf16.gmra.mxu0 %vm433_vm4, %v4320_v53  ;;  %v10156_v13 = vpop.f32.mrf.mxu1  ;;  %v7908_v44 = vld [vmem:[%s8536_s17 + $0x394] sm:$0x7]  ;;  %v4265_v18 = vsel %vm8564_vm7, %v4263_v55, %v4264_v25  ;;  %v4054_v58 = vunpack.c.l.b16 %v4011_v20  ;;  %v4017_v25 = vrot.slane %v7829_v60, 7  ;;  %v4021_v3 = vrot.slane %v7831_v24, 7 }
 0x211   : > { %v2406_v9 = vmax.f32 %v2390_v4, 0.0  ;;  %2921 = vst.msk [vmem:[#allocation2 + $0x70] sm:$0xff] %vm511_vm8, %v2905_v59  ;;  %v3094_v37 = vpop.f32.mrf.mxu3  ;;  %v4518_v33 = vrot.slane %v7908_v44, 7  ;;  %v4308_v49 = vunpack.c.l.b16 %v4265_v18  ;;  %v7868_v4 = vld [vmem:[%s8536_s17 + $0x3a4] sm:$0xe] }
 0x212   : > { %v3147_v19 = vadd.f32 %v3131_v7, %v3094_v37  ;;  %v10158_v54 = vpop.f32.mrf.mxu2  ;;  %v4067_v53 = vpack.c.b16 %v4054_v58, %v4053_v8  ;;  %v7886_v7 = vrot.slane %v7868_v4, 9  ;;  %v7830_v4 = vld [vmem:[%s8536_s17 + $0x3b8] sm:$0x8] }
 0x213   : > { %v2422_v34 = vpack.c.bf16 %v2406_v9, %v2406_v9  ;;  %7934 = vmatmul.msk.bf16.gmra.mxu1 %vm433_vm4, %v4574_v41  ;;  %v4321_v46 = vpack.c.b16 %v4308_v49, %v4307_v36  ;;  %v7910_v41 = vld [vmem:[%s8536_s17 + $0x3ac] sm:$0xf] }
 0x214   : > { %v3384_v21 = vld [vmem:[#allocation2 + $0x8] sm:$0xff]  ;;  %3163 = vst.msk [vmem:[#allocation2 + $0x10] sm:$0xff] %vm511_vm8, %v3147_v19  ;;  %v4522_v31 = vrot.slane %v7910_v41, 7 }
 0x215   : > { %2439 = vst.msk [vmem:[%s9627_s16 + $0x3c] sm:$0xf] %vm2423_vm12, %v2422_v34  ;;  %v3400_v5 = vadd.f32 %v3384_v21, %v10113_v32  ;;  %v10175_v43 = vpop.f32.mrf.mxu0  ;;  %v7828_v32 = vld [vmem:[%s8536_s17 + $0x3a0] sm:$0xf]  ;;  %v4270_v34 = vrot.slane %v4268_v28, 4 }
 0x216   : > { %v3637_v17 = vld [vmem:[#allocation2] sm:$0xff]  ;;  %v4014_v50 = vrot.slane %v7828_v32, 7  ;;  %v7909_v21 = vld [vmem:[%s8536_s17 + $0x3a8] sm:$0x8] }
 0x217   : > { %3416 = vst.msk [vmem:[#allocation2 + $0x8] sm:$0xff] %vm511_vm8, %v3400_v5  ;;  %v3653_v42 = vadd.f32 %v3637_v17, %v10090_v10  ;;  %v2890_v56 = vld [vmem:[#allocation2 + $0x78] sm:$0xff]  ;;  %v4519_v10 = vsel %vm9019_vm11, %v4517_v47, %v4518_v33  ;;  %v4269_v33 = vsel %vm8564_vm7, %v7886_v7, %v4268_v28  ;;  %v7927_v58 = vrot.slane %v7909_v21, 11  ;;  %v7832_v28 = vld [vmem:[%s8536_s17 + $0x3c0] sm:$0x7] }
 0x218   : > { %v2906_v45 = vadd.f32 %v2890_v56, %v10028_v16  ;;  %v10183_v15 = vpop.f32.mrf.mxu1  ;;  %7979 = vmatmul.msk.bf16.gmra.mxu2 %vm433_vm4, %v8329_v63  ;;  %v4562_v59 = vunpack.c.l.b16 %v4519_v10  ;;  %v4016_v55 = vrot.slane %v4014_v50, 4  ;;  %v4015_v5 = vsel %vm9019_vm11, %v7845_v62, %v4014_v50  ;;  %v7871_v62 = vld [vmem:[%s8536_s17 + $0x3c0] sm:$0xe] }
 0x219   : > { %3669 = vst.msk [vmem:[#allocation2] sm:$0xff] %vm511_vm8, %v3653_v42  ;;  %v3096_v52 = vpop.f32.mrf.mxu3  ;;  %v4524_v42 = vrot.slane %v4522_v31, 4  ;;  %v4525_v56 = vrot.slane %v7911_v30, 7  ;;  %v4055_v36 = vunpack.c.l.b16 %v4015_v5  ;;  %v7846_v7 = vrot.slane %v7830_v4, 11 }
 0x21a   : > { %2922 = vst.msk [vmem:[#allocation2 + $0x78] sm:$0xff] %vm511_vm8, %v2906_v45  ;;  %v3148_v16 = vadd.f32 %v3132_v6, %v3096_v52  ;;  %v10192_v61 = vpop.f32.mrf.mxu2  ;;  %v4575_v37 = vpack.c.b16 %v4562_v59, %v4561_v29  ;;  %v8330_v45 = vld [vmem:[%s8536_s17 + $0x54] sm:$0xff]  ;;  %v4309_v52 = vunpack.c.l.b16 %v4269_v33 }
 0x21b   : > { %v3385_v1 = vld [vmem:[#allocation2 + $0x10] sm:$0xff] }
 0x21c   : > { %v3401_v0 = vadd.f32 %v3385_v1, %v10143_v2  ;;  %3164 = vst.msk [vmem:[#allocation2 + $0x18] sm:$0xff] %vm511_vm8, %v3148_v16  ;;  %v4526_v1 = vsel %vm9019_vm11, %v4524_v42, %v4525_v56 }
 0x21d   : > { %v10198_v39 = vpop.f32.mrf.mxu0 }
 0x21e   : > { %3417 = vst.msk [vmem:[#allocation2 + $0x10] sm:$0xff] %vm511_vm8, %v3401_v0  ;;  %v3638_v11 = vld [vmem:[#allocation2 + $0x8] sm:$0xff]  ;;  %7853 = vmatmul.msk.bf16.gmra.mxu3 %vm433_vm4, %v4067_v53 }
 0x21f   : > { %v3654_v2 = vadd.f32 %v3638_v11, %v10127_v57  ;;  %v4271_v57 = vrot.slane %v7870_v22, 5  ;;  %v3134_v53 = vld [vmem:[#allocation2 + $0x28] sm:$0xff]  ;;  %v4564_v22 = vunpack.c.l.b16 %v4526_v1 }
 0x220   : > { %v3891_v9 = vld [vmem:[#allocation2] sm:$0xff]  ;;  %7894 = vmatmul.msk.bf16.gmra.mxu0 %vm433_vm4, %v4321_v46  ;;  %v10209_v44 = vpop.f32.mrf.mxu1  ;;  %v7872_v46 = vld [vmem:[%s8536_s17 + $0x3c4] sm:$0xf]  ;;  %v7834_v1 = vld [vmem:[%s8536_s17 + $0x3d8] sm:$0xf] }
 0x221   : > { %3670 = vst.msk [vmem:[#allocation2 + $0x8] sm:$0xff] %vm511_vm8, %v3654_v2  ;;  %v3907_v14 = vadd.f32 %v3891_v9, %v10069_v48  ;;  %v3099_v19 = vpop.f32.mrf.mxu3  ;;  %v4018_v48 = vsel %vm9019_vm11, %v4016_v55, %v4017_v25  ;;  %v4272_v8 = vsel %vm8564_vm7, %v4270_v34, %v4271_v57  ;;  %v4275_v55 = vrot.slane %v7872_v46, 5  ;;  %v7873_v9 = vld [vmem:[%s8536_s17 + $0x3c8] sm:$0x1] }
 0x222   : > { %v3149_v20 = vadd.f32 %v3133_v51, %v3099_v19  ;;  %v10218_v27 = vpop.f32.mrf.mxu2  ;;  %v4056_v49 = vunpack.c.l.b16 %v4018_v48  ;;  %v4310_v6 = vunpack.c.l.b16 %v4272_v8  ;;  %v4024_v19 = vrot.slane %v7832_v28, 7  ;;  %v7912_v48 = vld [vmem:[%s8536_s17 + $0x3c4] sm:$0x8] }
 0x223   : > { %3923 = vst.msk [vmem:[#allocation2] sm:$0xff] %vm511_vm8, %v3907_v14  ;;  %v3386_v18 = vld [vmem:[#allocation2 + $0x18] sm:$0xff]  ;;  %7935 = vmatmul.msk.bf16.gmra.mxu1 %vm433_vm4, %v4575_v37  ;;  %v4023_v14 = vrot.slane %v4021_v3, 4  ;;  %v7887_v57 = vrot.slane %v7871_v62, 9  ;;  %v4277_v21 = vrot.slane %v4275_v55, 4  ;;  %v4278_v30 = vrot.slane %v7873_v9, 5 }
 0x224   : > { %v3402_v47 = vadd.f32 %v3386_v18, %v10175_v43  ;;  %3165 = vst.msk [vmem:[#allocation2 + $0x20] sm:$0xff] %vm511_vm8, %v3149_v20  ;;  %v4068_v0 = vpack.c.b16 %v4056_v49, %v4055_v36  ;;  %v4322_v59 = vpack.c.b16 %v4310_v6, %v4309_v52  ;;  %v7928_v36 = vrot.slane %v7912_v48, 11  ;;  %v8331_v52 = vld [vmem:[%s8536_s17 + $0x70] sm:$0xff]  ;;  %v7835_v62 = vld [vmem:[%s8536_s17 + $0x3dc] sm:$0x7] }
 0x225   : > { %v3639_v63 = vld [vmem:[#allocation2 + $0x10] sm:$0xff]  ;;  %v10225_v17 = vpop.f32.mrf.mxu0  ;;  %v4276_v42 = vsel %vm8564_vm7, %v7887_v57, %v4275_v55  ;;  %v4028_v4 = vrot.slane %v7834_v1, 7 }
 0x226   : > { %3418 = vst.msk [vmem:[#allocation2 + $0x18] sm:$0xff] %vm511_vm8, %v3402_v47  ;;  %v3655_v43 = vadd.f32 %v3639_v63, %v10156_v13  ;;  %v4523_v13 = vsel %vm9019_vm11, %v7927_v58, %v4522_v31  ;;  %v7914_v47 = vld [vmem:[%s8536_s17 + $0x3cc] sm:$0x7]  ;;  %v4025_v63 = vsel %vm9019_vm11, %v4023_v14, %v4024_v19  ;;  %v7876_v19 = vld [vmem:[%s8536_s17 + $0x3e4] sm:$0x1] }
 0x227   : > { %v4563_v11 = vunpack.c.l.b16 %v4523_v13  ;;  %v4058_v24 = vunpack.c.l.b16 %v4025_v63  ;;  %v4030_v57 = vrot.slane %v4028_v4, 4  ;;  %v7915_v63 = vld [vmem:[%s8536_s17 + $0x3e0] sm:$0x8] }
 0x228   : > { %3671 = vst.msk [vmem:[#allocation2 + $0x10] sm:$0xff] %vm511_vm8, %v3655_v43  ;;  %v3892_v32 = vld [vmem:[#allocation2 + $0x8] sm:$0xff]  ;;  %v10235_v40 = vpop.f32.mrf.mxu1  ;;  %7980 = vmatmul.msk.bf16.gmra.mxu2 %vm433_vm4, %v8330_v45  ;;  %v4279_v43 = vsel %vm8564_vm7, %v4277_v21, %v4278_v30 }
 0x229   : > { %v3908_v10 = vadd.f32 %v3892_v32, %v10092_v23  ;;  %v3101_v16 = vpop.f32.mrf.mxu3  ;;  %v4576_v34 = vpack.c.b16 %v4564_v22, %v4563_v11  ;;  %v4532_v32 = vrot.slane %v7914_v47, 7  ;;  %v4312_v13 = vunpack.c.l.b16 %v4279_v43 }
 0x22a   : > { %v3150_v50 = vadd.f32 %v3134_v53, %v3101_v16  ;;  %v10244_v60 = vpop.f32.mrf.mxu2  ;;  %v4311_v53 = vunpack.c.l.b16 %v4276_v42  ;;  %v4285_v47 = vrot.slane %v7876_v19, 5 }
 0x22b   : > { %3924 = vst.msk [vmem:[#allocation2 + $0x8] sm:$0xff] %vm511_vm8, %v3908_v10  ;;  %v3387_v23 = vld [vmem:[#allocation2 + $0x20] sm:$0xff] }
 0x22c   : > { %v3403_v29 = vadd.f32 %v3387_v23, %v10198_v39  ;;  %3166 = vst.msk [vmem:[#allocation2 + $0x28] sm:$0xff] %vm511_vm8, %v3150_v50  ;;  %v7913_v39 = vld [vmem:[%s8536_s17 + $0x3c8] sm:$0xf]  ;;  %v4323_v22 = vpack.c.b16 %v4312_v13, %v4311_v53 }
 0x22d   : > { %v3640_v41 = vld [vmem:[#allocation2 + $0x18] sm:$0xff]  ;;  %v10250_v2 = vpop.f32.mrf.mxu0  ;;  %v4529_v18 = vrot.slane %v7913_v39, 7 }
 0x22e   : > { %3419 = vst.msk [vmem:[#allocation2 + $0x20] sm:$0xff] %vm511_vm8, %v3403_v29  ;;  %v3656_v25 = vadd.f32 %v3640_v41, %v10183_v15  ;;  %7854 = vmatmul.msk.bf16.gmra.mxu3 %vm433_vm4, %v4068_v0  ;;  %v3135_v15 = vld [vmem:[#allocation2 + $0x30] sm:$0xff]  ;;  %v3136_v0 = vld [vmem:[#allocation2 + $0x38] sm:$0xff]  ;;  %v7833_v41 = vld [vmem:[%s8536_s17 + $0x3d4] sm:$0x8] }
 0x22f   : > { %v3893_v37 = vld [vmem:[#allocation2 + $0x10] sm:$0xff]  ;;  %v4531_v49 = vrot.slane %v4529_v18, 4 }
 0x230   : > { %3672 = vst.msk [vmem:[#allocation2 + $0x18] sm:$0xff] %vm511_vm8, %v3656_v25  ;;  %v3909_v51 = vadd.f32 %v3893_v37, %v10135_v26  ;;  %7895 = vmatmul.msk.bf16.gmra.mxu0 %vm433_vm4, %v4322_v59  ;;  %v10261_v20 = vpop.f32.mrf.mxu1  ;;  %v4022_v26 = vsel %vm9019_vm11, %v7846_v7, %v4021_v3  ;;  %v7875_v29 = vld [vmem:[%s8536_s17 + $0x3e0] sm:$0xf]  ;;  %v7874_v37 = vld [vmem:[%s8536_s17 + $0x3dc] sm:$0xe] }
 0x231   : > { %v3104_v31 = vpop.f32.mrf.mxu3  ;;  %v4057_v6 = vunpack.c.l.b16 %v4022_v26  ;;  %v4533_v23 = vsel %vm9019_vm11, %v4531_v49, %v4532_v32  ;;  %v4282_v7 = vrot.slane %v7875_v29, 5  ;;  %v7888_v30 = vrot.slane %v7874_v37, 9  ;;  %v7838_v37 = vld [vmem:[%s8536_s17 + $0x3f8] sm:$0x7] }
 0x232   : > { %3925 = vst.msk [vmem:[#allocation2 + $0x10] sm:$0xff] %vm511_vm8, %v3909_v51  ;;  %v3151_v5 = vadd.f32 %v3135_v15, %v3104_v31  ;;  %v10270_v8 = vpop.f32.mrf.mxu2  ;;  %v4566_v25 = vunpack.c.l.b16 %v4533_v23  ;;  %v4031_v31 = vrot.slane %v7835_v62, 7  ;;  %v7837_v23 = vld [vmem:[%s8536_s17 + $0x3f4] sm:$0xf] }
 0x233   : > { %v3388_v33 = vld [vmem:[#allocation2 + $0x28] sm:$0xff]  ;;  %7936 = vmatmul.msk.bf16.gmra.mxu1 %vm433_vm4, %v4576_v34  ;;  %v4069_v3 = vpack.c.b16 %v4058_v24, %v4057_v6  ;;  %v7847_v34 = vrot.slane %v7833_v41, 11  ;;  %v4284_v48 = vrot.slane %v4282_v7, 4  ;;  %v4283_v49 = vsel %vm8564_vm7, %v7888_v30, %v4282_v7 }
 0x234   : > { %v3404_v58 = vadd.f32 %v3388_v33, %v10225_v17  ;;  %3167 = vst.msk [vmem:[#allocation2 + $0x30] sm:$0xff] %vm511_vm8, %v3151_v5  ;;  %v7929_v6 = vrot.slane %v7915_v63, 11  ;;  %v4035_v41 = vrot.slane %v7837_v23, 7 }
 0x235   : > { %v3641_v56 = vld [vmem:[#allocation2 + $0x20] sm:$0xff]  ;;  %v10277_v45 = vpop.f32.mrf.mxu0 }
 0x236   : > { %3420 = vst.msk [vmem:[#allocation2 + $0x28] sm:$0xff] %vm511_vm8, %v3404_v58  ;;  %v3657_v17 = vadd.f32 %v3641_v56, %v10209_v44  ;;  %v4530_v44 = vsel %vm9019_vm11, %v7928_v36, %v4529_v18  ;;  %v7917_v58 = vld [vmem:[%s8536_s17 + $0x3e8] sm:$0x7]  ;;  %v4032_v56 = vsel %vm9019_vm11, %v4030_v57, %v4031_v31  ;;  %v7879_v31 = vld [vmem:[%s8536_s17 + $0x400] sm:$0x1]  ;;  %v4037_v30 = vrot.slane %v4035_v41, 4 }
 0x237   : > { %v3894_v10 = vld [vmem:[#allocation2 + $0x18] sm:$0xff]  ;;  %v4565_v55 = vunpack.c.l.b16 %v4530_v44  ;;  %v4060_v13 = vunpack.c.l.b16 %v4032_v56  ;;  %v7918_v56 = vld [vmem:[%s8536_s17 + $0x3fc] sm:$0x8] }
 0x238   : > { %3673 = vst.msk [vmem:[#allocation2 + $0x20] sm:$0xff] %vm511_vm8, %v3657_v17  ;;  %v3910_v16 = vadd.f32 %v3894_v10, %v10158_v54  ;;  %v10287_v46 = vpop.f32.mrf.mxu1  ;;  %7981 = vmatmul.msk.bf16.gmra.mxu2 %vm433_vm4, %v8331_v52  ;;  %v4286_v17 = vsel %vm8564_vm7, %v4284_v48, %v4285_v47  ;;  %v4539_v10 = vrot.slane %v7917_v58, 7  ;;  %v4292_v58 = vrot.slane %v7879_v31, 5  ;;  %v7880_v31 = vld [vmem:[%s8536_s17 + $0x414] sm:$0xe] }
 0x239   : > { %v3106_v50 = vpop.f32.mrf.mxu3  ;;  %v4577_v21 = vpack.c.b16 %v4566_v25, %v4565_v55  ;;  %v4314_v44 = vunpack.c.l.b16 %v4286_v17 }
 0x23a   : > { %3926 = vst.msk [vmem:[#allocation2 + $0x18] sm:$0xff] %vm511_vm8, %v3910_v16  ;;  %v3152_v54 = vadd.f32 %v3136_v0, %v3106_v50  ;;  %v10296_v28 = vpop.f32.mrf.mxu2  ;;  %v8332_v16 = vld [vmem:[%s8536_s17 + $0x8c] sm:$0xff]  ;;  %v4313_v0 = vunpack.c.l.b16 %v4283_v49 }
 0x23b   : > { %v3389_v59 = vld [vmem:[#allocation2 + $0x30] sm:$0xff] }
 0x23c   : > { %v3405_v11 = vadd.f32 %v3389_v59, %v10250_v2  ;;  %3168 = vst.msk [vmem:[#allocation2 + $0x38] sm:$0xff] %vm511_vm8, %v3152_v54  ;;  %v7916_v2 = vld [vmem:[%s8536_s17 + $0x3e4] sm:$0xf]  ;;  %v4324_v25 = vpack.c.b16 %v4314_v44, %v4313_v0 }
 0x23d   : > { %v3642_v9 = vld [vmem:[#allocation2 + $0x28] sm:$0xff]  ;;  %v10302_v39 = vpop.f32.mrf.mxu0  ;;  %v4536_v33 = vrot.slane %v7916_v2, 7 }
 0x23e   : > { %3421 = vst.msk [vmem:[#allocation2 + $0x30] sm:$0xff] %vm511_vm8, %v3405_v11  ;;  %v3658_v14 = vadd.f32 %v3642_v9, %v10235_v40  ;;  %7855 = vmatmul.msk.bf16.gmra.mxu3 %vm433_vm4, %v4069_v3  ;;  %v3137_v40 = vld [vmem:[#allocation2 + $0x40] sm:$0xff]  ;;  %v3138_v3 = vld [vmem:[#allocation2 + $0x48] sm:$0xff] }
 0x23f   : > { %v3895_v51 = vld [vmem:[#allocation2 + $0x20] sm:$0xff]  ;;  %v4538_v24 = vrot.slane %v4536_v33, 4  ;;  %v7878_v11 = vld [vmem:[%s8536_s17 + $0x3fc] sm:$0xf] }
 0x240   : > { %3674 = vst.msk [vmem:[#allocation2 + $0x28] sm:$0xff] %vm511_vm8, %v3658_v14  ;;  %v3911_v15 = vadd.f32 %v3895_v51, %v10192_v61  ;;  %7896 = vmatmul.msk.bf16.gmra.mxu0 %vm433_vm4, %v4323_v22  ;;  %v10313_v5 = vpop.f32.mrf.mxu1  ;;  %v4029_v61 = vsel %vm9019_vm11, %v7847_v34, %v4028_v4  ;;  %v7836_v9 = vld [vmem:[%s8536_s17 + $0x3f0] sm:$0x8]  ;;  %v7877_v51 = vld [vmem:[%s8536_s17 + $0x3f8] sm:$0xe]  ;;  %v4289_v34 = vrot.slane %v7878_v11, 5 }
 0x241   : > { %v3109_v18 = vpop.f32.mrf.mxu3  ;;  %v4059_v53 = vunpack.c.l.b16 %v4029_v61  ;;  %v4540_v59 = vsel %vm9019_vm11, %v4538_v24, %v4539_v10  ;;  %v7889_v47 = vrot.slane %v7877_v51, 9  ;;  %v7841_v51 = vld [vmem:[%s8536_s17 + $0x414] sm:$0x7] }
 0x242   : > { %3927 = vst.msk [vmem:[#allocation2 + $0x20] sm:$0xff] %vm511_vm8, %v3911_v15  ;;  %v3153_v26 = vadd.f32 %v3137_v40, %v3109_v18  ;;  %v10322_v43 = vpop.f32.mrf.mxu2  ;;  %v4568_v14 = vunpack.c.l.b16 %v4540_v59  ;;  %v4038_v18 = vrot.slane %v7838_v37, 7  ;;  %v4291_v63 = vrot.slane %v4289_v34, 4  ;;  %v7840_v59 = vld [vmem:[%s8536_s17 + $0x410] sm:$0xf] }
 0x243   : > { %v3390_v42 = vld [vmem:[#allocation2 + $0x38] sm:$0xff]  ;;  %7937 = vmatmul.msk.bf16.gmra.mxu1 %vm433_vm4, %v4577_v21  ;;  %v4070_v4 = vpack.c.b16 %v4060_v13, %v4059_v53  ;;  %v7848_v21 = vrot.slane %v7836_v9, 11  ;;  %v4290_v24 = vsel %vm8564_vm7, %v7889_v47, %v4289_v34  ;;  %v7930_v53 = vrot.slane %v7918_v56, 11 }
 0x244   : > { %v3406_v36 = vadd.f32 %v3390_v42, %v10277_v45  ;;  %3169 = vst.msk [vmem:[#allocation2 + $0x40] sm:$0xff] %vm511_vm8, %v3153_v26  ;;  %v7839_v9 = vld [vmem:[%s8536_s17 + $0x40c] sm:$0x8]  ;;  %v4042_v37 = vrot.slane %v7840_v59, 7 }
 0x245   : > { %v3643_v32 = vld [vmem:[#allocation2 + $0x30] sm:$0xff]  ;;  %v10329_v52 = vpop.f32.mrf.mxu0  ;;  %v10441_v59 = vld [vmem:[%s8536_s17 + $0xc] sm:$0xf] }
 0x246   : > { %3422 = vst.msk [vmem:[#allocation2 + $0x38] sm:$0xff] %vm511_vm8, %v3406_v36  ;;  %v3659_v45 = vadd.f32 %v3643_v32, %v10261_v20  ;;  %v4537_v20 = vsel %vm9019_vm11, %v7929_v6, %v4536_v33  ;;  %v7920_v36 = vld [vmem:[%s8536_s17 + $0x404] sm:$0x7]  ;;  %v4039_v32 = vsel %vm9019_vm11, %v4037_v30, %v4038_v18  ;;  %v7922_v30 = vld [vmem:[%s8536_s17 + $0x41c] sm:$0xf]  ;;  %v4044_v47 = vrot.slane %v4042_v37, 4 }
 0x247   : > { %v3896_v1 = vld [vmem:[#allocation2 + $0x28] sm:$0xff]  ;;  %v4567_v7 = vunpack.c.l.b16 %v4537_v20  ;;  %v4062_v44 = vunpack.c.l.b16 %v4039_v32  ;;  %v7923_v32 = vld [vmem:[%s8536_s17 + $0x420] sm:$0x7] }
 0x248   : > { %3675 = vst.msk [vmem:[#allocation2 + $0x30] sm:$0xff] %vm511_vm8, %v3659_v45  ;;  %v3912_v50 = vadd.f32 %v3896_v1, %v10218_v27  ;;  %v10339_v29 = vpop.f32.mrf.mxu1  ;;  %7982 = vmatmul.msk.bf16.gmra.mxu2 %vm433_vm4, %v8332_v16  ;;  %v4293_v45 = vsel %vm8564_vm7, %v4291_v63, %v4292_v58  ;;  %v4546_v1 = vrot.slane %v7920_v36, 7  ;;  %v3141_v58 = vld [vmem:[#allocation2 + $0x60] sm:$0xff] }
 0x249   : > { %v3111_v54 = vpop.f32.mrf.mxu3  ;;  %v4578_v48 = vpack.c.b16 %v4568_v14, %v4567_v7  ;;  %v4316_v20 = vunpack.c.l.b16 %v4293_v45 }
 0x24a   : > { %3928 = vst.msk [vmem:[#allocation2 + $0x28] sm:$0xff] %vm511_vm8, %v3912_v50  ;;  %v3154_v27 = vadd.f32 %v3138_v3, %v3111_v54  ;;  %v10348_v62 = vpop.f32.mrf.mxu2  ;;  %v8333_v50 = vld [vmem:[%s8536_s17 + $0xa8] sm:$0xff]  ;;  %v4315_v3 = vunpack.c.l.b16 %v4290_v24 }
 0x24b   : > { %v3391_v22 = vld [vmem:[#allocation2 + $0x40] sm:$0xff] }
 0x24c   : > { %v3407_v55 = vadd.f32 %v3391_v22, %v10302_v39  ;;  %3170 = vst.msk [vmem:[#allocation2 + $0x48] sm:$0xff] %vm511_vm8, %v3154_v27  ;;  %v7919_v39 = vld [vmem:[%s8536_s17 + $0x400] sm:$0xf] }
 0x24d   : > { %v3644_v19 = vld [vmem:[#allocation2 + $0x38] sm:$0xff]  ;;  %v10354_v2 = vpop.f32.mrf.mxu0  ;;  %v4543_v42 = vrot.slane %v7919_v39, 7 }
 0x24e   : > { %3423 = vst.msk [vmem:[#allocation2 + $0x40] sm:$0xff] %vm511_vm8, %v3407_v55  ;;  %v3660_v57 = vadd.f32 %v3644_v19, %v10287_v46  ;;  %7856 = vmatmul.msk.bf16.gmra.mxu3 %vm433_vm4, %v4070_v4  ;;  %v3139_v46 = vld [vmem:[#allocation2 + $0x50] sm:$0xff]  ;;  %v3140_v4 = vld [vmem:[#allocation2 + $0x58] sm:$0xff]  ;;  %v7881_v55 = vld [vmem:[%s8536_s17 + $0x418] sm:$0xf]  ;;  %v4325_v19 = vpack.c.b16 %v4316_v20, %v4315_v3 }
 0x24f   : > { %v3897_v15 = vld [vmem:[#allocation2 + $0x30] sm:$0xff]  ;;  %v4545_v13 = vrot.slane %v4543_v42, 4 }
 0x250   : > { %3676 = vst.msk [vmem:[#allocation2 + $0x38] sm:$0xff] %vm511_vm8, %v3660_v57  ;;  %v3913_v40 = vadd.f32 %v3897_v15, %v10244_v60  ;;  %7897 = vmatmul.msk.bf16.gmra.mxu0 %vm433_vm4, %v4324_v25  ;;  %v10365_v26 = vpop.f32.mrf.mxu1  ;;  %v4036_v60 = vsel %vm9019_vm11, %v7848_v21, %v4035_v41  ;;  %v4296_v21 = vrot.slane %v7881_v55, 5 }
 0x251   : > { %v3114_v33 = vpop.f32.mrf.mxu3  ;;  %v4061_v0 = vunpack.c.l.b16 %v4036_v60  ;;  %v4547_v22 = vsel %vm9019_vm11, %v4545_v13, %v4546_v1  ;;  %v7921_v60 = vld [vmem:[%s8536_s17 + $0x418] sm:$0x8] }
 0x252   : > { %3929 = vst.msk [vmem:[#allocation2 + $0x30] sm:$0xff] %vm511_vm8, %v3913_v40  ;;  %v3155_v61 = vadd.f32 %v3139_v46, %v3114_v33  ;;  %v10374_v17 = vpop.f32.mrf.mxu2  ;;  %v4570_v57 = vunpack.c.l.b16 %v4547_v22  ;;  %v7882_v40 = vld [vmem:[%s8536_s17 + $0x41c] sm:$0x1]  ;;  %v4045_v33 = vrot.slane %v7841_v51, 7  ;;  %v7890_v46 = vrot.slane %v7880_v31, 9 }
 0x253   : > { %v3392_v49 = vld [vmem:[#allocation2 + $0x48] sm:$0xff]  ;;  %7938 = vmatmul.msk.bf16.gmra.mxu1 %vm433_vm4, %v4578_v48  ;;  %v4071_v41 = vpack.c.b16 %v4062_v44, %v4061_v0  ;;  %v7849_v48 = vrot.slane %v7839_v9, 11  ;;  %v4298_v36 = vrot.slane %v4296_v21, 4  ;;  %v7931_v1 = vrot.slane %v7921_v60, 11  ;;  %v4943_v51 = vld [vmem:[%s8536_s17 + $0x8] sm:$0xe] }
 0x254   : > { %v3408_v6 = vadd.f32 %v3392_v49, %v10329_v52  ;;  %3171 = vst.msk [vmem:[#allocation2 + $0x50] sm:$0xff] %vm511_vm8, %v3155_v61  ;;  %v4550_v61 = vrot.slane %v7922_v30, 7  ;;  %v4299_v49 = vrot.slane %v7882_v40, 5  ;;  %v4297_v45 = vsel %vm8564_vm7, %v7890_v46, %v4296_v21  ;;  %v8077_v46 = vld [vmem:[%s8536_s17 + $0x204] sm:$0xf] }
 0x255   : > { %v3645_v10 = vld [vmem:[#allocation2 + $0x40] sm:$0xff]  ;;  %v10381_v16 = vpop.f32.mrf.mxu0  ;;  %v8078_v60 = vld [vmem:[%s8536_s17 + $0x208] sm:$0x1] }
 0x256   : > { %3424 = vst.msk [vmem:[#allocation2 + $0x48] sm:$0xff] %vm511_vm8, %v3408_v6  ;;  %v3661_v52 = vadd.f32 %v3645_v10, %v10313_v5  ;;  %v4544_v5 = vsel %vm9019_vm11, %v7930_v53, %v4543_v42  ;;  %v4046_v10 = vsel %vm9019_vm11, %v4044_v47, %v4045_v33  ;;  %v5247_v33 = vrot.slane %v5198_v35, 6 }
 0x257   : > { %v3898_v23 = vld [vmem:[#allocation2 + $0x38] sm:$0xff]  ;;  %v4569_v34 = vunpack.c.l.b16 %v4544_v5 }
 0x258   : > { %3677 = vst.msk [vmem:[#allocation2 + $0x40] sm:$0xff] %vm511_vm8, %v3661_v52  ;;  %v3914_v54 = vadd.f32 %v3898_v23, %v10270_v8  ;;  %v10391_v11 = vpop.f32.mrf.mxu1  ;;  %7983 = vmatmul.msk.bf16.gmra.mxu2 %vm433_vm4, %v8333_v50  ;;  %v4552_v50 = vrot.slane %v4550_v61, 4  ;;  %v4553_v52 = vrot.slane %v7923_v32, 7  ;;  %v4300_v23 = vsel %vm8564_vm7, %v4298_v36, %v4299_v49  ;;  %v8076_v49 = vld [vmem:[%s8536_s17 + $0x200] sm:$0xe] }
 0x259   : > { %v3116_v27 = vpop.f32.mrf.mxu3  ;;  %v4579_v42 = vpack.c.b16 %v4570_v57, %v4569_v34  ;;  %v4318_v22 = vunpack.c.l.b16 %v4300_v23 }
 0x25a   : > { %3930 = vst.msk [vmem:[#allocation2 + $0x38] sm:$0xff] %vm511_vm8, %v3914_v54  ;;  %v3156_v8 = vadd.f32 %v3140_v4, %v3116_v27  ;;  %v10401_v7 = vpop.f32.mrf.mxu2  ;;  %v8334_v54 = vld [vmem:[%s8536_s17 + $0xc4] sm:$0xff]  ;;  %v4317_v4 = vunpack.c.l.b16 %v4297_v45 }
 0x25b   : > { %v3393_v25 = vld [vmem:[#allocation2 + $0x50] sm:$0xff] }
 0x25c   : > { %v3409_v14 = vadd.f32 %v3393_v25, %v10354_v2  ;;  %3172 = vst.msk [vmem:[#allocation2 + $0x58] sm:$0xff] %vm511_vm8, %v3156_v8  ;;  %v8149_v8 = vld [vmem:[%s11543_s1 + $0x5c] sm:$0xf]  ;;  %v4326_v30 = vpack.c.b16 %v4318_v22, %v4317_v4 }
 0x25d   : > { %v3646_v39 = vld [vmem:[#allocation2 + $0x48] sm:$0xff]  ;;  %v10407_v15 = vpop.f32.mrf.mxu0 }
 0x25e   : > { %3425 = vst.msk [vmem:[#allocation2 + $0x50] sm:$0xff] %vm511_vm8, %v3409_v14  ;;  %v3662_v18 = vadd.f32 %v3646_v39, %v10339_v29  ;;  %7857 = vmatmul.msk.bf16.gmra.mxu3 %vm433_vm4, %v4071_v41  ;;  %v4554_v41 = vsel %vm9019_vm11, %v4552_v50, %v4553_v52  ;;  %v3142_v25 = vld [vmem:[#allocation2 + $0x68] sm:$0xff] }
 0x25f   : > { %v3899_v2 = vld [vmem:[#allocation2 + $0x40] sm:$0xff]  ;;  %v4572_v31 = vunpack.c.l.b16 %v4554_v41 }
 0x260   : > { %3678 = vst.msk [vmem:[#allocation2 + $0x48] sm:$0xff] %vm511_vm8, %v3662_v18  ;;  %v3915_v63 = vadd.f32 %v3899_v2, %v10296_v28  ;;  %7898 = vmatmul.msk.bf16.gmra.mxu0 %vm433_vm4, %v4325_v19  ;;  %v10417_v56 = vpop.f32.mrf.mxu1  ;;  %v4043_v28 = vsel %vm9019_vm11, %v7849_v48, %v4042_v37  ;;  %v4993_v37 = vrot.slane %v10441_v59, 5  ;;  %v4945_v18 = vld [vmem:[%s8536_s17 + $0x10] sm:$0x1]  ;;  %v7985_v48 = vrot.slane %v4943_v51, 9 }
 0x261   : > { %v3119_v29 = vpop.f32.mrf.mxu3  ;;  %v4063_v20 = vunpack.c.l.b16 %v4043_v28  ;;  %v5686_v28 = vrot.slane %v8078_v60, 5  ;;  %v8176_v51 = vld [vmem:[%s11543_s1 + $0x60] sm:$0xf] }
 0x262   : > { %3931 = vst.msk [vmem:[#allocation2 + $0x40] sm:$0xff] %vm511_vm8, %v3915_v63  ;;  %v3157_v6 = vadd.f32 %v3141_v58, %v3119_v29  ;;  %v10428_v53 = vpop.f32.mrf.mxu2  ;;  %v4995_v47 = vrot.slane %v4993_v37, 4  ;;  %v5199_v58 = vld [vmem:[%s8536_s17 + $0x18] sm:$0x3]  ;;  %v4996_v29 = vrot.slane %v4945_v18, 5 }
 0x263   : > { %v3394_v24 = vld [vmem:[#allocation2 + $0x58] sm:$0xff]  ;;  %7939 = vmatmul.msk.bf16.gmra.mxu1 %vm433_vm4, %v4579_v42  ;;  %v5683_v42 = vrot.slane %v8077_v46, 5  ;;  %v5250_v50 = vrot.slane %v5199_v58, 6  ;;  %v5201_v18 = vld [vmem:[%s8536_s17 + $0x30] sm:$0xf] }
 0x264   : > { %v3410_v13 = vadd.f32 %v3394_v24, %v10381_v16  ;;  %3173 = vst.msk [vmem:[#allocation2 + $0x60] sm:$0xff] %vm511_vm8, %v3157_v6  ;;  %v4064_v16 = vunpack.c.l.b16 %v4046_v10  ;;  %v8100_v6 = vrot.slane %v8076_v49, 9  ;;  %v3143_v10 = vld [vmem:[#allocation2 + $0x70] sm:$0xff]  ;;  %v4948_v46 = vld [vmem:[%s8536_s17 + $0x2c] sm:$0x1] }
 0x265   : > { %v3647_v0 = vld [vmem:[#allocation2 + $0x50] sm:$0xff]  ;;  %v10433_v44 = vpop.f32.mrf.mxu0  ;;  %v5685_v24 = vrot.slane %v5683_v42, 4  ;;  %v5202_v49 = vld [vmem:[%s8536_s17 + $0x34] sm:$0x3] }
 0x266   : > { %3426 = vst.msk [vmem:[#allocation2 + $0x58] sm:$0xff] %vm511_vm8, %v3410_v13  ;;  %v3663_v3 = vadd.f32 %v3647_v0, %v10365_v26  ;;  %v4551_v26 = vsel %vm9019_vm11, %v7931_v1, %v4550_v61  ;;  %v4072_v19 = vpack.c.b16 %v4064_v16, %v4063_v20  ;;  %v5249_v1 = vrot.slane %v5247_v33, 4 }
 0x267   : > { %v3900_v27 = vld [vmem:[#allocation2 + $0x48] sm:$0xff]  ;;  %v4571_v57 = vunpack.c.l.b16 %v4551_v26  ;;  %v5684_v0 = vsel %vm8564_vm7, %v8100_v6, %v5683_v42  ;;  %v5003_v6 = vrot.slane %v4948_v46, 5 }
 0x268   : > { %3679 = vst.msk [vmem:[#allocation2 + $0x50] sm:$0xff] %vm511_vm8, %v3663_v3  ;;  %v3916_v5 = vadd.f32 %v3900_v27, %v10322_v43  ;;  %v10452_v9 = vpop.f32.mrf.mxu1  ;;  %v6042_v43 = vsel %vm458_vm0, %v8149_v8, 0  ;;  %7984 = vmatmul.msk.bf16.gmra.mxu2 %vm433_vm4, %v8334_v54  ;;  %v4994_v54 = vsel %vm8564_vm7, %v7985_v48, %v4993_v37  ;;  %v4997_v3 = vsel %vm8564_vm7, %v4995_v47, %v4996_v29  ;;  %v8080_v29 = vld [vmem:[%s8536_s17 + $0x220] sm:$0xf] }
 0x269   : > { %v3121_v55 = vpop.f32.mrf.mxu3  ;;  %6051 = vmatpush.bf16.msra.mxu3 %v6042_v43  ;;  %v4580_v36 = vpack.c.b16 %v4572_v31, %v4571_v57  ;;  %v5739_v16 = vunpack.c.l.b16 %v5684_v0  ;;  %v5251_v8 = vsel %vm8540_vm3, %v5249_v1, %v5250_v50  ;;  %v6228_v31 = vsel %vm458_vm0, %v8176_v51, 0  ;;  %v10562_v51 = vld [vmem:[%s8536_s17 + $0x44] sm:$0xf] }
 0x26a   : > { %3932 = vst.msk [vmem:[#allocation2 + $0x48] sm:$0xff] %vm511_vm8, %v3916_v5  ;;  %v3158_v14 = vadd.f32 %v3142_v25, %v3121_v55  ;;  %v10460_v39 = vpop.f32.mrf.mxu2  ;;  %v5049_v55 = vunpack.c.l.b16 %v4994_v54  ;;  %v4947_v25 = vld [vmem:[%s8536_s17 + $0x28] sm:$0xf]  ;;  %6237 = vmatpush.bf16.msra.mxu0 %v6228_v31  ;;  %v5690_v60 = vrot.slane %v8080_v29, 5  ;;  %v5257_v54 = vrot.slane %v5202_v49, 6 }
 0x26b   : > { %v3395_v34 = vld [vmem:[#allocation2 + $0x60] sm:$0xff]  ;;  %v5000_v57 = vrot.slane %v4947_v25, 5  ;;  %v8290_v31 = vld [vmem:[%s11543_s1 + $0x68] sm:$0xf] }
 0x26c   : > { %v3411_v21 = vadd.f32 %v3395_v34, %v10407_v15  ;;  %3174 = vst.msk [vmem:[#allocation2 + $0x68] sm:$0xff] %vm511_vm8, %v3158_v14  ;;  %v5197_v15 = vld [vmem:[%s8536_s17 + $0x10] sm:$0xc]  ;;  %v3144_v34 = vld [vmem:[#allocation2 + $0x78] sm:$0xff]  ;;  %v5692_v1 = vrot.slane %v5690_v60, 4 }
 0x26d   : > { %v3648_v40 = vld [vmem:[#allocation2 + $0x58] sm:$0xff]  ;;  %v10465_v2 = vpop.f32.mrf.mxu0  ;;  %v8002_v13 = vrot.slane %v5197_v15, 10  ;;  %v5002_v42 = vrot.slane %v5000_v57, 4 }
 0x26e   : > { %3427 = vst.msk [vmem:[#allocation2 + $0x60] sm:$0xff] %vm511_vm8, %v3411_v21  ;;  %v3664_v63 = vadd.f32 %v3648_v40, %v10391_v11  ;;  %7858 = vmatmul.msk.bf16.gmra.mxu3 %vm433_vm4, %v4072_v19  ;;  %v5304_v19 = vunpack.c.l.b16 %v5251_v8 }
 0x26f   : > { %v3901_v61 = vld [vmem:[#allocation2 + $0x50] sm:$0xff]  ;;  %v5248_v22 = vsel %vm8540_vm3, %v8002_v13, %v5247_v33 }
 0x270   : > { %3680 = vst.msk [vmem:[#allocation2 + $0x58] sm:$0xff] %vm511_vm8, %v3664_v63  ;;  %v3917_v32 = vadd.f32 %v3901_v61, %v10348_v62  ;;  %7899 = vmatmul.msk.bf16.gmra.mxu0 %vm433_vm4, %v4326_v30  ;;  %v10478_v45 = vpop.f32.mrf.mxu1  ;;  %v5687_v62 = vsel %vm8564_vm7, %v5685_v24, %v5686_v28  ;;  %v5303_v14 = vunpack.c.l.b16 %v5248_v22  ;;  %v4946_v30 = vld [vmem:[%s8536_s17 + $0x24] sm:$0xe]  ;;  %v5254_v61 = vrot.slane %v5201_v18, 6  ;;  %v8079_v24 = vld [vmem:[%s8536_s17 + $0x21c] sm:$0xe] }
 0x271   : > { %v3124_v11 = vpop.f32.mrf.mxu3  ;;  %v5740_v59 = vunpack.c.l.b16 %v5687_v62  ;;  %v7986_v58 = vrot.slane %v4946_v30, 9  ;;  %v8081_v28 = vld [vmem:[%s8536_s17 + $0x224] sm:$0x1]  ;;  %v8101_v13 = vrot.slane %v8079_v24, 9  ;;  %v6736_v30 = vsel %vm458_vm0, %v8290_v31, 0 }
 0x272   : > { %3933 = vst.msk [vmem:[#allocation2 + $0x50] sm:$0xff] %vm511_vm8, %v3917_v32  ;;  %v3159_v52 = vadd.f32 %v3143_v10, %v3124_v11  ;;  %v10489_v20 = vpop.f32.mrf.mxu2  ;;  %v5319_v33 = vpack.c.b16 %v5304_v19, %v5303_v14  ;;  %v8335_v10 = vld [vmem:[%s8536_s17 + $0x1f8] sm:$0xff]  ;;  %v5693_v50 = vrot.slane %v8081_v28, 5  ;;  %6745 = vmatpush.bf16.msra.mxu2 %v6736_v30 }
 0x273   : > { %v3396_v23 = vld [vmem:[#allocation2 + $0x68] sm:$0xff]  ;;  %7940 = vmatmul.msk.bf16.gmra.mxu1 %vm433_vm4, %v4580_v36  ;;  %v5755_v26 = vpack.c.b16 %v5740_v59, %v5739_v16  ;;  %v5691_v16 = vsel %vm8564_vm7, %v8101_v13, %v5690_v60 }
 0x274   : > { %v3412_v27 = vadd.f32 %v3396_v23, %v10433_v44  ;;  %3175 = vst.msk [vmem:[#allocation2 + $0x70] sm:$0xff] %vm511_vm8, %v3159_v52  ;;  %v5050_v44 = vunpack.c.l.b16 %v4997_v3  ;;  %v4149_v52 = vld [vmem:[#allocation2] sm:$0xff]  ;;  %v5256_v23 = vrot.slane %v5254_v61, 4  ;;  %v5741_v8 = vunpack.c.l.b16 %v5691_v16  ;;  %v8083_v28 = vld [vmem:[%s8536_s17 + $0x23c] sm:$0xf] }
 0x275   : > { %v3649_v4 = vld [vmem:[#allocation2 + $0x60] sm:$0xff]  ;;  %v10494_v5 = vpop.f32.mrf.mxu0  ;;  %v5697_v13 = vrot.slane %v8083_v28, 5  ;;  %v10637_v28 = vld [vmem:[%s11544_s2 + $0x1] ss:$0 sm:$0xff] }
 0x276   : > { %3428 = vst.msk [vmem:[#allocation2 + $0x68] sm:$0xff] %vm511_vm8, %v3412_v27  ;;  %v3665_v41 = vadd.f32 %v3649_v4, %v10417_v56  ;;  %v5001_v27 = vsel %vm8564_vm7, %v7986_v58, %v5000_v57  ;;  %v5004_v4 = vsel %vm8564_vm7, %v5002_v42, %v5003_v6  ;;  %v4949_v58 = vld [vmem:[%s8536_s17 + $0x40] sm:$0xe] }
 0x277   : > { %v3902_v37 = vld [vmem:[#allocation2 + $0x58] sm:$0xff]  ;;  %v5051_v14 = vunpack.c.l.b16 %v5001_v27  ;;  %v5052_v19 = vunpack.c.l.b16 %v5004_v4 }
 0x278   : > { %3681 = vst.msk [vmem:[#allocation2 + $0x60] sm:$0xff] %vm511_vm8, %v3665_v41  ;;  %v3918_v43 = vadd.f32 %v3902_v37, %v10374_v17  ;;  %v10508_v56 = vpop.f32.mrf.mxu1  ;;  %8109 = vmatmul.msk.bf16.vlgmr.msrb.gmra.mxu2 %vm433_vm4, %v5755_v26  ;;  %v5065_v17 = vpack.c.b16 %v5050_v44, %v5049_v55  ;;  %v5258_v37 = vsel %vm8540_vm3, %v5256_v23, %v5257_v54  ;;  %v8336_v23 = vld [vmem:[%s8536_s17 + $0x214] sm:$0xff] }
 0x279   : > { %v3126_v35 = vpop.f32.mrf.mxu3 }
 0x27a   : > { %3934 = vst.msk [vmem:[#allocation2 + $0x58] sm:$0xff] %vm511_vm8, %v3918_v43  ;;  %v3160_v21 = vadd.f32 %v3144_v34, %v3126_v35  ;;  %v10515_v48 = vpop.f32.mrf.mxu2 }
 0x27b   : > { %v3397_v40 = vld [vmem:[#allocation2 + $0x70] sm:$0xff] }
 0x27c   : > { %v3413_v47 = vadd.f32 %v3397_v40, %v10465_v2  ;;  %3176 = vst.msk [vmem:[#allocation2 + $0x78] sm:$0xff] %vm511_vm8, %v3160_v21  ;;  %v5200_v2 = vld [vmem:[%s8536_s17 + $0x2c] sm:$0xc]  ;;  %v4150_v40 = vld [vmem:[#allocation2 + $0x8] sm:$0xff] }
 0x27d   : > { %v3650_v63 = vld [vmem:[#allocation2 + $0x68] sm:$0xff]  ;;  %v10520_v15 = vpop.f32.mrf.mxu0  ;;  %v8003_v62 = vrot.slane %v5200_v2, 10 }
 0x27e   : > { %3429 = vst.msk [vmem:[#allocation2 + $0x70] sm:$0xff] %vm511_vm8, %v3413_v47  ;;  %v3666_v36 = vadd.f32 %v3650_v63, %v10452_v9  ;;  %7994 = vmatmul.msk.bf16.vlgmr.msrb.gmra.mxu3 %vm433_vm4, %v5065_v17  ;;  %v5306_v17 = vunpack.c.l.b16 %v5258_v37  ;;  %v5066_v63 = vpack.c.b16 %v5052_v19, %v5051_v14 }
 0x27f   : > { %v3903_v32 = vld [vmem:[#allocation2 + $0x60] sm:$0xff]  ;;  %v5255_v25 = vsel %vm8540_vm3, %v8003_v62, %v5254_v61 }
 0x280   : > { %3682 = vst.msk [vmem:[#allocation2 + $0x68] sm:$0xff] %vm511_vm8, %v3666_v36  ;;  %v3919_v11 = vadd.f32 %v3903_v32, %v10401_v7  ;;  %8011 = vmatmul.msk.bf16.vlgmr.msrb.gmra.mxu0 %vm433_vm4, %v5319_v33  ;;  %v10534_v0 = vpop.f32.mrf.mxu1  ;;  %v5694_v7 = vsel %vm8564_vm7, %v5692_v1, %v5693_v50  ;;  %v5305_v21 = vunpack.c.l.b16 %v5255_v25  ;;  %v5007_v33 = vrot.slane %v10562_v51, 5  ;;  %v4951_v36 = vld [vmem:[%s8536_s17 + $0x48] sm:$0x1] }
 0x281   : > { %v4109_v9 = vpop.f32.mrf.mxu3  ;;  %v5742_v26 = vunpack.c.l.b16 %v5694_v7  ;;  %v7987_v32 = vrot.slane %v4949_v58, 9  ;;  %v5010_v50 = vrot.slane %v4951_v36, 5  ;;  %v4152_v58 = vld [vmem:[#allocation2 + $0x18] sm:$0xff]  ;;  %v4954_v36 = vld [vmem:[%s8536_s17 + $0x64] sm:$0x1] }
 0x282   : > { %3935 = vst.msk [vmem:[#allocation2 + $0x60] sm:$0xff] %vm511_vm8, %v3919_v11  ;;  %v4165_v3 = vadd.f32 %v4149_v52, %v4109_v9  ;;  %v10545_v22 = vpop.f32.mrf.mxu2  ;;  %v5320_v29 = vpack.c.b16 %v5306_v17, %v5305_v21  ;;  %v5009_v6 = vrot.slane %v5007_v33, 4  ;;  %v5203_v11 = vld [vmem:[%s8536_s17 + $0x48] sm:$0xc]  ;;  %v8082_v9 = vld [vmem:[%s8536_s17 + $0x238] sm:$0xe] }
 0x283   : > { %v3398_v59 = vld [vmem:[#allocation2 + $0x78] sm:$0xff]  ;;  %8068 = vmatmul.msk.bf16.vlgmr.msrb.gmra.mxu1 %vm433_vm4, %v8335_v10  ;;  %v5756_v35 = vpack.c.b16 %v5742_v26, %v5741_v8  ;;  %v5205_v10 = vld [vmem:[%s8536_s17 + $0x50] sm:$0x3]  ;;  %v8084_v52 = vld [vmem:[%s8536_s17 + $0x240] sm:$0x1]  ;;  %v8102_v54 = vrot.slane %v8082_v9, 9 }
 0x284   : > { %v3414_v41 = vadd.f32 %v3398_v59, %v10494_v5  ;;  %4181 = vst.msk [vmem:[#allocation2] sm:$0xff] %vm511_vm8, %v4165_v3  ;;  %v8249_v5 = vld [vmem:[%s11543_s1 + $0x64] sm:$0xf]  ;;  %v5699_v3 = vrot.slane %v5697_v13, 4  ;;  %v8004_v59 = vrot.slane %v5203_v11, 10  ;;  %v5264_v4 = vrot.slane %v5205_v10, 6 }
 0x285   : > { %v3651_v55 = vld [vmem:[#allocation2 + $0x70] sm:$0xff]  ;;  %v10550_v44 = vpop.f32.mrf.mxu0  ;;  %v6482_v57 = vsel %vm458_vm0, %v8249_v5, 0  ;;  %v5700_v8 = vrot.slane %v8084_v52, 5  ;;  %v5011_v25 = vsel %vm8564_vm7, %v5009_v6, %v5010_v50  ;;  %v5017_v9 = vrot.slane %v4954_v36, 5  ;;  %v4154_v36 = vld [vmem:[#allocation2 + $0x28] sm:$0xff] }
 0x286   : > { %3430 = vst.msk [vmem:[#allocation2 + $0x78] sm:$0xff] %vm511_vm8, %v3414_v41  ;;  %v3667_v43 = vadd.f32 %v3651_v55, %v10478_v45  ;;  %6491 = vmatpush.bf16.msra.mxu1 %v6482_v57  ;;  %v5698_v41 = vsel %vm8564_vm7, %v8102_v54, %v5697_v13  ;;  %v5008_v55 = vsel %vm8564_vm7, %v7987_v32, %v5007_v33  ;;  %v4953_v21 = vld [vmem:[%s8536_s17 + $0x60] sm:$0xf]  ;;  %v5208_v32 = vld [vmem:[%s8536_s17 + $0x6c] sm:$0x3] }
 0x287   : > { %v3904_v34 = vld [vmem:[#allocation2 + $0x68] sm:$0xff]  ;;  %v5701_v37 = vsel %vm8564_vm7, %v5699_v3, %v5700_v8  ;;  %v5053_v31 = vunpack.c.l.b16 %v5008_v55 }
 0x288   : > { %3683 = vst.msk [vmem:[#allocation2 + $0x70] sm:$0xff] %vm511_vm8, %v3667_v43  ;;  %v3920_v45 = vadd.f32 %v3904_v34, %v10428_v53  ;;  %v10571_v47 = vpop.f32.mrf.mxu1  ;;  %8110 = vmatmul.msk.bf16.gmra.mxu2 %vm433_vm4, %v5756_v35  ;;  %v5204_v53 = vld [vmem:[%s8536_s17 + $0x4c] sm:$0xf]  ;;  %v5743_v43 = vunpack.c.l.b16 %v5698_v41  ;;  %v5744_v5 = vunpack.c.l.b16 %v5701_v37 }
 0x289   : > { %v4111_v18 = vpop.f32.mrf.mxu3  ;;  %v5261_v24 = vrot.slane %v5204_v53, 6 }
 0x28a   : > { %3936 = vst.msk [vmem:[#allocation2 + $0x68] sm:$0xff] %vm511_vm8, %v3920_v45  ;;  %v4166_v46 = vadd.f32 %v4150_v40, %v4111_v18  ;;  %v5054_v45 = vunpack.c.l.b16 %v5011_v25  ;;  %v5757_v17 = vpack.c.b16 %v5744_v5, %v5743_v43 }
 0x28b   : > { %v4403_v42 = vld [vmem:[#allocation2] sm:$0xff]  ;;  %v10581_v2 = vpop.f32.mrf.mxu2  ;;  %v5263_v27 = vrot.slane %v5261_v24, 4  ;;  %v5262_v34 = vsel %vm8540_vm3, %v8004_v59, %v5261_v24  ;;  %v8087_v59 = vld [vmem:[%s8536_s17 + $0x25c] sm:$0x1] }
 0x28c   : > { %v4419_v61 = vadd.f32 %v4403_v42, %v10520_v15  ;;  %4182 = vst.msk [vmem:[#allocation2 + $0x8] sm:$0xff] %vm511_vm8, %v4166_v46  ;;  %v5307_v40 = vunpack.c.l.b16 %v5262_v34  ;;  %v5207_v46 = vld [vmem:[%s8536_s17 + $0x68] sm:$0xf] }
 0x28d   : > { %v3652_v49 = vld [vmem:[#allocation2 + $0x78] sm:$0xff]  ;;  %v10583_v60 = vpop.f32.mrf.mxu0  ;;  %v5265_v57 = vsel %vm8540_vm3, %v5263_v27, %v5264_v4  ;;  %v5268_v6 = vrot.slane %v5207_v46, 6  ;;  %v8337_v4 = vld [vmem:[%s8536_s17 + $0x230] sm:$0xff] }
 0x28e   : > { %4435 = vst.msk [vmem:[#allocation2] sm:$0xff] %vm511_vm8, %v4419_v61  ;;  %v3668_v15 = vadd.f32 %v3652_v49, %v10508_v56  ;;  %7995 = vmatmul.msk.bf16.gmra.mxu3 %vm433_vm4, %v5066_v63  ;;  %v4151_v56 = vld [vmem:[#allocation2 + $0x10] sm:$0xff]  ;;  %v5308_v33 = vunpack.c.l.b16 %v5265_v57  ;;  %v5067_v61 = vpack.c.b16 %v5054_v45, %v5053_v31 }
 0x28f   : > { %v3905_v1 = vld [vmem:[#allocation2 + $0x70] sm:$0xff] }
 0x290   : > { %3684 = vst.msk [vmem:[#allocation2 + $0x78] sm:$0xff] %vm511_vm8, %v3668_v15  ;;  %v3921_v62 = vadd.f32 %v3905_v1, %v10460_v39  ;;  %8012 = vmatmul.msk.bf16.gmra.mxu0 %vm433_vm4, %v5320_v29  ;;  %v10597_v7 = vpop.f32.mrf.mxu1  ;;  %v4952_v29 = vld [vmem:[%s8536_s17 + $0x5c] sm:$0xe]  ;;  %v5321_v15 = vpack.c.b16 %v5308_v33, %v5307_v40 }
 0x291   : > { %v4114_v16 = vpop.f32.mrf.mxu3  ;;  %v7988_v1 = vrot.slane %v4952_v29, 9  ;;  %v10684_v40 = vld [vmem:[%s8536_s17 + $0x7c] sm:$0xf] }
 0x292   : > { %3937 = vst.msk [vmem:[#allocation2 + $0x70] sm:$0xff] %vm511_vm8, %v3921_v62  ;;  %v4167_v26 = vadd.f32 %v4151_v56, %v4114_v16  ;;  %v5270_v16 = vrot.slane %v5268_v6, 4  ;;  %v8085_v56 = vld [vmem:[%s8536_s17 + $0x254] sm:$0xe]  ;;  %v5021_v29 = vrot.slane %v10684_v40, 5 }
 0x293   : > { %v4404_v39 = vld [vmem:[#allocation2 + $0x8] sm:$0xff]  ;;  %8069 = vmatmul.msk.bf16.gmra.mxu1 %vm433_vm4, %v8336_v23  ;;  %v10611_v19 = vpop.f32.mrf.mxu2  ;;  %v5271_v23 = vrot.slane %v5208_v32, 6  ;;  %v8103_v8 = vrot.slane %v8085_v56, 9  ;;  %v8089_v56 = vld [vmem:[%s8536_s17 + $0x274] sm:$0xf] }
 0x294   : > { %v4420_v14 = vadd.f32 %v4404_v39, %v10550_v44  ;;  %4183 = vst.msk [vmem:[#allocation2 + $0x10] sm:$0xff] %vm511_vm8, %v4167_v26  ;;  %v4153_v39 = vld [vmem:[#allocation2 + $0x20] sm:$0xff] }
 0x295   : > { %v4657_v51 = vld [vmem:[#allocation2] sm:$0xff]  ;;  %v10613_v35 = vpop.f32.mrf.mxu0 }
 0x296   : > { %4436 = vst.msk [vmem:[#allocation2 + $0x8] sm:$0xff] %vm511_vm8, %v4420_v14  ;;  %v4673_v44 = vadd.f32 %v4657_v51, %v10534_v0  ;;  %v5014_v0 = vrot.slane %v4953_v21, 5  ;;  %v5272_v21 = vsel %vm8540_vm3, %v5270_v16, %v5271_v23 }
 0x297   : > { %v3906_v30 = vld [vmem:[#allocation2 + $0x78] sm:$0xff] }
 0x298   : > { %4689 = vst.msk [vmem:[#allocation2] sm:$0xff] %vm511_vm8, %v4673_v44  ;;  %v3922_v18 = vadd.f32 %v3906_v30, %v10489_v20  ;;  %v10625_v53 = vpop.f32.mrf.mxu1  ;;  %8111 = vmatmul.msk.bf16.gmra.mxu2 %vm433_vm4, %v5757_v17  ;;  %v5206_v20 = vld [vmem:[%s8536_s17 + $0x64] sm:$0xc]  ;;  %v5016_v50 = vrot.slane %v5014_v0, 4  ;;  %v5015_v25 = vsel %vm8564_vm7, %v7988_v1, %v5014_v0 }
 0x299   : > { %v4116_v63 = vpop.f32.mrf.mxu3  ;;  %v8005_v62 = vrot.slane %v5206_v20, 10  ;;  %v4955_v20 = vld [vmem:[%s8536_s17 + $0x78] sm:$0xe] }
 0x29a   : > { %3938 = vst.msk [vmem:[#allocation2 + $0x78] sm:$0xff] %vm511_vm8, %v3922_v18  ;;  %v4168_v42 = vadd.f32 %v4152_v58, %v4116_v63  ;;  %v5018_v51 = vsel %vm8564_vm7, %v5016_v50, %v5017_v9 }
 0x29b   : > { %v4405_v49 = vld [vmem:[#allocation2 + $0x10] sm:$0xff]  ;;  %v10640_v11 = vpop.f32.mrf.mxu2  ;;  %v5269_v34 = vsel %vm8540_vm3, %v8005_v62, %v5268_v6  ;;  %v5056_v46 = vunpack.c.l.b16 %v5018_v51 }
 0x29c   : > { %v4421_v24 = vadd.f32 %v4405_v49, %v10583_v60  ;;  %4184 = vst.msk [vmem:[#allocation2 + $0x18] sm:$0xff] %vm511_vm8, %v4168_v42  ;;  %v8086_v60 = vld [vmem:[%s8536_s17 + $0x258] sm:$0xf]  ;;  %v5309_v0 = vunpack.c.l.b16 %v5269_v34  ;;  %v5310_v42 = vunpack.c.l.b16 %v5272_v21 }
 0x29d   : > { %v4658_v10 = vld [vmem:[#allocation2 + $0x8] sm:$0xff]  ;;  %v10642_v13 = vpop.f32.mrf.mxu0  ;;  %v5704_v54 = vrot.slane %v8086_v60, 5  ;;  %v7989_v60 = vrot.slane %v4955_v20, 9 }
 0x29e   : > { %4437 = vst.msk [vmem:[#allocation2 + $0x10] sm:$0xff] %vm511_vm8, %v4421_v24  ;;  %v4674_v52 = vadd.f32 %v4658_v10, %v10571_v47  ;;  %7996 = vmatmul.msk.bf16.gmra.mxu3 %vm433_vm4, %v5067_v61  ;;  %v5707_v47 = vrot.slane %v8087_v59, 5  ;;  %v5210_v10 = vld [vmem:[%s8536_s17 + $0x84] sm:$0xf]  ;;  %v5322_v50 = vpack.c.b16 %v5310_v42, %v5309_v0 }
 0x29f   : > { %v4705_v3 = vld [vmem:[#allocation2] sm:$0xff]  ;;  %v5706_v26 = vrot.slane %v5704_v54, 4  ;;  %v5705_v14 = vsel %vm8564_vm7, %v8103_v8, %v5704_v54  ;;  %v5275_v16 = vrot.slane %v5210_v10, 6 }
 0x2a0   : > { %4690 = vst.msk [vmem:[#allocation2 + $0x8] sm:$0xff] %vm511_vm8, %v4674_v52  ;;  %v4726_v27 = vadd.f32 %v10637_v28, %v4705_v3  ;;  %8013 = vmatmul.msk.bf16.gmra.mxu0 %vm433_vm4, %v5321_v15  ;;  %v10656_v55 = vpop.f32.mrf.mxu1  ;;  %v5745_v57 = vunpack.c.l.b16 %v5705_v14  ;;  %v4957_v15 = vld [vmem:[%s8536_s17 + $0x80] sm:$0x1]  ;;  %v5023_v52 = vrot.slane %v5021_v29, 4  ;;  %v5209_v3 = vld [vmem:[%s8536_s17 + $0x80] sm:$0xc] }
 0x2a1   : > { %4927 = vst.msk [vmem:[#allocation2] sm:$0xff] %vm511_vm8, %v10515_v48  ;;  %v4119_v41 = vpop.f32.mrf.mxu3  ;;  %v5708_v5 = vsel %vm8564_vm7, %v5706_v26, %v5707_v47  ;;  %v5024_v54 = vrot.slane %v4957_v15, 5  ;;  %v8088_v26 = vld [vmem:[%s8536_s17 + $0x270] sm:$0xe]  ;;  %v8090_v47 = vld [vmem:[%s8536_s17 + $0x278] sm:$0x1] }
 0x2a2   : > { %v4742_v37 = vmax.f32 %v4726_v27, 0.0  ;;  %v4169_v43 = vadd.f32 %v4153_v39, %v4119_v41  ;;  %v5746_v44 = vunpack.c.l.b16 %v5708_v5  ;;  %v5711_v27 = vrot.slane %v8089_v56, 5  ;;  %v8338_v39 = vld [vmem:[%s8536_s17 + $0x24c] sm:$0xff]  ;;  %v4155_v14 = vld [vmem:[#allocation2 + $0x30] sm:$0xff] }
 0x2a3   : > { %v4406_v48 = vld [vmem:[#allocation2 + $0x18] sm:$0xff]  ;;  %8070 = vmatmul.msk.bf16.gmra.mxu1 %vm433_vm4, %v8337_v4  ;;  %v10679_v17 = vpop.f32.mrf.mxu2  ;;  %v5714_v34 = vrot.slane %v8090_v47, 5  ;;  %v5025_v21 = vsel %vm8564_vm7, %v5023_v52, %v5024_v54  ;;  %v5213_v52 = vld [vmem:[%s8536_s17 + $0xa0] sm:$0xf] }
 0x2a4   : > { %v4758_v31 = vpack.c.bf16 %v4742_v37, %v4742_v37  ;;  %v4422_v45 = vadd.f32 %v4406_v48, %v10613_v35  ;;  %4185 = vst.msk [vmem:[#allocation2 + $0x20] sm:$0xff] %vm511_vm8, %v4169_v43  ;;  %v5055_v35 = vunpack.c.l.b16 %v5015_v25  ;;  %v5758_v63 = vpack.c.b16 %v5746_v44, %v5745_v57 }
 0x2a5   : > { %v4659_v30 = vld [vmem:[#allocation2 + $0x10] sm:$0xff]  ;;  %v10681_v18 = vpop.f32.mrf.mxu0  ;;  %v8104_v25 = vrot.slane %v8088_v26, 9  ;;  %v5713_v37 = vrot.slane %v5711_v27, 4  ;;  %v5277_v48 = vrot.slane %v5275_v16, 4  ;;  %v5212_v26 = vld [vmem:[%s8536_s17 + $0x9c] sm:$0xc] }
 0x2a6   : > { %4774 = vst.msk [vmem:[%s10668_s29] sm:$0xf] %vm2423_vm12, %v4758_v31  ;;  %v4675_v33 = vadd.f32 %v4659_v30, %v10597_v7  ;;  %v5068_v24 = vpack.c.b16 %v5056_v46, %v5055_v35  ;;  %v5282_v47 = vrot.slane %v5213_v52, 6 }
 0x2a7   : > { %4438 = vst.msk [vmem:[#allocation2 + $0x18] sm:$0xff] %vm511_vm8, %v4422_v45  ;;  %v4706_v58 = vld [vmem:[#allocation2 + $0x8] sm:$0xff]  ;;  %v5022_v45 = vsel %vm8564_vm7, %v7989_v60, %v5021_v29  ;;  %v5715_v30 = vsel %vm8564_vm7, %v5713_v37, %v5714_v34  ;;  %v5058_v29 = vunpack.c.l.b16 %v5025_v21 }
 0x2a8   : > { %4691 = vst.msk [vmem:[#allocation2 + $0x10] sm:$0xff] %vm511_vm8, %v4675_v33  ;;  %v4727_v61 = vadd.f32 %v10637_v28, %v4706_v58  ;;  %v10695_v49 = vpop.f32.mrf.mxu1  ;;  %8112 = vmatmul.msk.bf16.gmra.mxu2 %vm433_vm4, %v5758_v63  ;;  %v5748_v63 = vunpack.c.l.b16 %v5715_v30  ;;  %v8007_v30 = vrot.slane %v5212_v26, 10 }
 0x2a9   : > { %4928 = vst.msk [vmem:[#allocation2 + $0x8] sm:$0xff] %vm511_vm8, %v10545_v22  ;;  %v4121_v7 = vpop.f32.mrf.mxu3 }
 0x2aa   : > { %v4743_v32 = vmax.f32 %v4727_v61, 0.0  ;;  %v4170_v6 = vadd.f32 %v4154_v36, %v4121_v7  ;;  %v4959_v7 = vld [vmem:[%s8536_s17 + $0x98] sm:$0xf] }
 0x2ab   : > { %v4407_v1 = vld [vmem:[#allocation2 + $0x20] sm:$0xff]  ;;  %v10703_v62 = vpop.f32.mrf.mxu2 }
 0x2ac   : > { %v4759_v9 = vpack.c.bf16 %v4743_v32, %v4743_v32  ;;  %v4423_v22 = vadd.f32 %v4407_v1, %v10642_v13  ;;  %4186 = vst.msk [vmem:[#allocation2 + $0x28] sm:$0xff] %vm511_vm8, %v4170_v6  ;;  %v5211_v13 = vld [vmem:[%s8536_s17 + $0x88] sm:$0x3] }
 0x2ad   : > { %v10705_v23 = vpop.f32.mrf.mxu0  ;;  %v5278_v51 = vrot.slane %v5211_v13, 6  ;;  %v4156_v1 = vld [vmem:[#allocation2 + $0x38] sm:$0xff] }
 0x2ae   : > { %4775 = vst.msk [vmem:[%s10668_s29 + $0x4] sm:$0xf] %vm2423_vm12, %v4759_v9  ;;  %v4660_v59 = vld [vmem:[#allocation2 + $0x18] sm:$0xff]  ;;  %7997 = vmatmul.msk.bf16.gmra.mxu3 %vm433_vm4, %v5068_v24  ;;  %v4958_v9 = vld [vmem:[%s8536_s17 + $0x94] sm:$0xe] }
 0x2af   : > { %4439 = vst.msk [vmem:[#allocation2 + $0x20] sm:$0xff] %vm511_vm8, %v4423_v22  ;;  %v4676_v4 = vadd.f32 %v4660_v59, %v10625_v53  ;;  %v4707_v8 = vld [vmem:[#allocation2 + $0x10] sm:$0xff]  ;;  %v8006_v53 = vrot.slane %v5209_v3, 10  ;;  %v5279_v42 = vsel %vm8540_vm3, %v5277_v48, %v5278_v51  ;;  %v5028_v22 = vrot.slane %v4959_v7, 5  ;;  %v8339_v51 = vld [vmem:[%s8536_s17 + $0x268] sm:$0xff] }
 0x2b0   : > { %v4728_v41 = vadd.f32 %v10637_v28, %v4707_v8  ;;  %4929 = vst.msk [vmem:[#allocation2 + $0x10] sm:$0xff] %vm511_vm8, %v10581_v2  ;;  %8014 = vmatmul.msk.bf16.gmra.mxu0 %vm433_vm4, %v5322_v50  ;;  %v10723_v5 = vpop.f32.mrf.mxu1  ;;  %v5712_v2 = vsel %vm8564_vm7, %v8104_v25, %v5711_v27  ;;  %v5312_v24 = vunpack.c.l.b16 %v5279_v42  ;;  %v7990_v13 = vrot.slane %v4958_v9, 9  ;;  %v5214_v25 = vld [vmem:[%s8536_s17 + $0xa4] sm:$0x3]  ;;  %v4962_v9 = vld [vmem:[%s8536_s17 + $0xb4] sm:$0xf] }
 0x2b1   : > { %4692 = vst.msk [vmem:[#allocation2 + $0x18] sm:$0xff] %vm511_vm8, %v4676_v4  ;;  %v4124_v43 = vpop.f32.mrf.mxu3  ;;  %v5747_v40 = vunpack.c.l.b16 %v5712_v2  ;;  %v5276_v0 = vsel %vm8540_vm3, %v8006_v53, %v5275_v16  ;;  %v4960_v16 = vld [vmem:[%s8536_s17 + $0x9c] sm:$0x1]  ;;  %v5030_v8 = vrot.slane %v5028_v22, 4  ;;  %v8093_v53 = vld [vmem:[%s8536_s17 + $0x294] sm:$0x1] }
 0x2b2   : > { %v4744_v57 = vmax.f32 %v4728_v41, 0.0  ;;  %v4171_v44 = vadd.f32 %v4155_v14, %v4124_v43  ;;  %v5311_v6 = vunpack.c.l.b16 %v5276_v0  ;;  %v8092_v41 = vld [vmem:[%s8536_s17 + $0x290] sm:$0xf]  ;;  %v8091_v14 = vld [vmem:[%s8536_s17 + $0x28c] sm:$0xe] }
 0x2b3   : > { %v4408_v31 = vld [vmem:[#allocation2 + $0x28] sm:$0xff]  ;;  %8071 = vmatmul.msk.bf16.gmra.mxu1 %vm433_vm4, %v8338_v39  ;;  %v10736_v46 = vpop.f32.mrf.mxu2  ;;  %v5759_v36 = vpack.c.b16 %v5748_v63, %v5747_v40  ;;  %v5031_v39 = vrot.slane %v4960_v16, 5  ;;  %v5718_v37 = vrot.slane %v8092_v41, 5  ;;  %v8105_v34 = vrot.slane %v8091_v14, 9 }
 0x2b4   : > { %v4760_v33 = vpack.c.bf16 %v4744_v57, %v4744_v57  ;;  %v4424_v35 = vadd.f32 %v4408_v31, %v10681_v18  ;;  %4187 = vst.msk [vmem:[#allocation2 + $0x30] sm:$0xff] %vm511_vm8, %v4171_v44  ;;  %v5057_v18 = vunpack.c.l.b16 %v5022_v45  ;;  %v5323_v59 = vpack.c.b16 %v5312_v24, %v5311_v6  ;;  %v4157_v45 = vld [vmem:[#allocation2 + $0x40] sm:$0xff]  ;;  %v4963_v41 = vld [vmem:[%s8536_s17 + $0xb8] sm:$0x1] }
 0x2b5   : > { %v10738_v58 = vpop.f32.mrf.mxu0  ;;  %v5720_v57 = vrot.slane %v5718_v37, 4  ;;  %v5721_v44 = vrot.slane %v8093_v53, 5  ;;  %v5284_v40 = vrot.slane %v5282_v47, 4  ;;  %v5719_v63 = vsel %vm8564_vm7, %v8105_v34, %v5718_v37 }
 0x2b6   : > { %4776 = vst.msk [vmem:[%s10668_s29 + $0x8] sm:$0xf] %vm2423_vm12, %v4760_v33  ;;  %v4661_v61 = vld [vmem:[#allocation2 + $0x20] sm:$0xff]  ;;  %v5283_v24 = vsel %vm8540_vm3, %v8007_v30, %v5282_v47 }
 0x2b7   : > { %4440 = vst.msk [vmem:[#allocation2 + $0x28] sm:$0xff] %vm511_vm8, %v4424_v35  ;;  %v4677_v20 = vadd.f32 %v4661_v61, %v10656_v55  ;;  %v5069_v55 = vpack.c.b16 %v5058_v29, %v5057_v18  ;;  %v5029_v35 = vsel %vm8564_vm7, %v7990_v13, %v5028_v22  ;;  %v5722_v0 = vsel %vm8564_vm7, %v5720_v57, %v5721_v44  ;;  %v8095_v57 = vld [vmem:[%s8536_s17 + $0x2ac] sm:$0xf] }
 0x2b8   : > { %v4708_v32 = vld [vmem:[#allocation2 + $0x18] sm:$0xff]  ;;  %v10751_v50 = vpop.f32.mrf.mxu1  ;;  %8113 = vmatmul.msk.bf16.gmra.mxu2 %vm433_vm4, %v5759_v36  ;;  %v5032_v18 = vsel %vm8564_vm7, %v5030_v8, %v5031_v39  ;;  %v5749_v29 = vunpack.c.l.b16 %v5719_v63  ;;  %v5750_v7 = vunpack.c.l.b16 %v5722_v0  ;;  %v4961_v8 = vld [vmem:[%s8536_s17 + $0xb0] sm:$0xe]  ;;  %v5038_v44 = vrot.slane %v4963_v41, 5  ;;  %v8096_v63 = vld [vmem:[%s8536_s17 + $0x2b0] sm:$0x1] }
 0x2b9   : > { %4693 = vst.msk [vmem:[#allocation2 + $0x20] sm:$0xff] %vm511_vm8, %v4677_v20  ;;  %v4729_v15 = vadd.f32 %v10637_v28, %v4708_v32  ;;  %v4126_v10 = vpop.f32.mrf.mxu3  ;;  %v4160_v41 = vld [vmem:[#allocation2 + $0x58] sm:$0xff] }
 0x2ba   : > { %4930 = vst.msk [vmem:[#allocation2 + $0x18] sm:$0xff] %vm511_vm8, %v10611_v19  ;;  %v4172_v60 = vadd.f32 %v4156_v1, %v4126_v10  ;;  %v5059_v10 = vunpack.c.l.b16 %v5029_v35  ;;  %v5060_v1 = vunpack.c.l.b16 %v5032_v18  ;;  %v5760_v22 = vpack.c.b16 %v5750_v7, %v5749_v29 }
 0x2bb   : > { %v4745_v54 = vmax.f32 %v4729_v15, 0.0  ;;  %v4409_v3 = vld [vmem:[#allocation2 + $0x30] sm:$0xff]  ;;  %v10761_v19 = vpop.f32.mrf.mxu2  ;;  %v5728_v29 = vrot.slane %v8096_v63, 5 }
 0x2bc   : > { %v4425_v56 = vadd.f32 %v4409_v3, %v10705_v23  ;;  %4188 = vst.msk [vmem:[#allocation2 + $0x38] sm:$0xff] %vm511_vm8, %v4172_v60  ;;  %v4158_v3 = vld [vmem:[#allocation2 + $0x48] sm:$0xff] }
 0x2bd   : > { %v4761_v27 = vpack.c.bf16 %v4745_v54, %v4745_v54  ;;  %v10763_v4 = vpop.f32.mrf.mxu0 }
 0x2be   : > { %4441 = vst.msk [vmem:[#allocation2 + $0x30] sm:$0xff] %vm511_vm8, %v4425_v56  ;;  %v4662_v23 = vld [vmem:[#allocation2 + $0x28] sm:$0xff]  ;;  %7998 = vmatmul.msk.bf16.gmra.mxu3 %vm433_vm4, %v5069_v55  ;;  %v5313_v55 = vunpack.c.l.b16 %v5283_v24  ;;  %v5035_v56 = vrot.slane %v4962_v9, 5 }
 0x2bf   : > { %4777 = vst.msk [vmem:[%s10668_s29 + $0xc] sm:$0xf] %vm2423_vm12, %v4761_v27  ;;  %v4678_v43 = vadd.f32 %v4662_v23, %v10695_v49  ;;  %v5285_v49 = vrot.slane %v5214_v25, 6  ;;  %v5070_v27 = vpack.c.b16 %v5060_v1, %v5059_v10  ;;  %v5215_v23 = vld [vmem:[%s8536_s17 + $0xb8] sm:$0xc] }
 0x2c0   : > { %v4709_v48 = vld [vmem:[#allocation2 + $0x20] sm:$0xff]  ;;  %8015 = vmatmul.msk.bf16.gmra.mxu0 %vm433_vm4, %v5323_v59  ;;  %v10779_v21 = vpop.f32.mrf.mxu1  ;;  %v5216_v59 = vld [vmem:[%s8536_s17 + $0xbc] sm:$0xf]  ;;  %v5217_v25 = vld [vmem:[%s8536_s17 + $0xc0] sm:$0x3]  ;;  %v5037_v34 = vrot.slane %v5035_v56, 4 }
 0x2c1   : > { %4694 = vst.msk [vmem:[#allocation2 + $0x28] sm:$0xff] %vm511_vm8, %v4678_v43  ;;  %v4730_v2 = vadd.f32 %v10637_v28, %v4709_v48  ;;  %v4129_v31 = vpop.f32.mrf.mxu3  ;;  %v5286_v15 = vsel %vm8540_vm3, %v5284_v40, %v5285_v49  ;;  %v5289_v37 = vrot.slane %v5216_v59, 6  ;;  %v5292_v40 = vrot.slane %v5217_v25, 6  ;;  %v8094_v49 = vld [vmem:[%s8536_s17 + $0x2a8] sm:$0xe] }
 0x2c2   : > { %4931 = vst.msk [vmem:[#allocation2 + $0x20] sm:$0xff] %vm511_vm8, %v10640_v11  ;;  %v4173_v33 = vadd.f32 %v4157_v45, %v4129_v31  ;;  %v5314_v52 = vunpack.c.l.b16 %v5286_v15  ;;  %v8008_v31 = vrot.slane %v5215_v23, 10  ;;  %v5725_v45 = vrot.slane %v8095_v57, 5 }
 0x2c3   : > { %v4746_v42 = vmax.f32 %v4730_v2, 0.0  ;;  %v4410_v61 = vld [vmem:[#allocation2 + $0x38] sm:$0xff]  ;;  %8072 = vmatmul.msk.bf16.gmra.mxu1 %vm433_vm4, %v8339_v51  ;;  %v10794_v36 = vpop.f32.mrf.mxu2  ;;  %v7991_v51 = vrot.slane %v4961_v8, 9  ;;  %v5291_v35 = vrot.slane %v5289_v37, 4  ;;  %v5039_v15 = vsel %vm8564_vm7, %v5037_v34, %v5038_v44 }
 0x2c4   : > { %v4426_v11 = vadd.f32 %v4410_v61, %v10738_v58  ;;  %4189 = vst.msk [vmem:[#allocation2 + $0x40] sm:$0xff] %vm511_vm8, %v4173_v33  ;;  %v8340_v2 = vld [vmem:[%s8536_s17 + $0x284] sm:$0xff]  ;;  %v5727_v0 = vrot.slane %v5725_v45, 4 }
 0x2c5   : > { %v4762_v20 = vpack.c.bf16 %v4746_v42, %v4746_v42  ;;  %v4663_v32 = vld [vmem:[#allocation2 + $0x30] sm:$0xff]  ;;  %v10796_v6 = vpop.f32.mrf.mxu0 }
 0x2c6   : > { %4442 = vst.msk [vmem:[#allocation2 + $0x38] sm:$0xff] %vm511_vm8, %v4426_v11  ;;  %v4679_v58 = vadd.f32 %v4663_v32, %v10723_v5  ;;  %v4159_v61 = vld [vmem:[#allocation2 + $0x50] sm:$0xff] }
 0x2c7   : > { %4778 = vst.msk [vmem:[%s10668_s29 + $0x10] sm:$0xf] %vm2423_vm12, %v4762_v20  ;;  %v5036_v20 = vsel %vm8564_vm7, %v7991_v51, %v5035_v56  ;;  %v5062_v56 = vunpack.c.l.b16 %v5039_v15 }
 0x2c8   : > { %4695 = vst.msk [vmem:[#allocation2 + $0x30] sm:$0xff] %vm511_vm8, %v4679_v58  ;;  %v4710_v60 = vld [vmem:[#allocation2 + $0x28] sm:$0xff]  ;;  %v10811_v16 = vpop.f32.mrf.mxu1  ;;  %8114 = vmatmul.msk.bf16.gmra.mxu2 %vm433_vm4, %v5760_v22  ;;  %v5729_v58 = vsel %vm8564_vm7, %v5727_v0, %v5728_v29  ;;  %v5293_v22 = vsel %vm8540_vm3, %v5291_v35, %v5292_v40  ;;  %v8097_v0 = vld [vmem:[%s8536_s17 + $0x2c4] sm:$0xe] }
 0x2c9   : > { %v4731_v54 = vadd.f32 %v10637_v28, %v4710_v60  ;;  %4932 = vst.msk [vmem:[#allocation2 + $0x28] sm:$0xff] %vm511_vm8, %v10679_v17  ;;  %v4131_v5 = vpop.f32.mrf.mxu3  ;;  %v5324_v17 = vpack.c.b16 %v5314_v52, %v5313_v55  ;;  %v5752_v55 = vunpack.c.l.b16 %v5729_v58  ;;  %v5316_v8 = vunpack.c.l.b16 %v5293_v22  ;;  %v8341_v29 = vld [vmem:[%s8536_s17 + $0x2a0] sm:$0xff] }
 0x2ca   : > { %v4174_v13 = vadd.f32 %v4158_v3, %v4131_v5  ;;  %v10861_v5 = vld [vmem:[%s8536_s17 + $0xd0] sm:$0xf]  ;;  %v5061_v3 = vunpack.c.l.b16 %v5036_v20 }
 0x2cb   : > { %v4747_v26 = vmax.f32 %v4731_v54, 0.0  ;;  %v4411_v47 = vld [vmem:[#allocation2 + $0x40] sm:$0xff]  ;;  %v10821_v43 = vpop.f32.mrf.mxu2 }
 0x2cc   : > { %v4427_v39 = vadd.f32 %v4411_v47, %v10763_v4  ;;  %4190 = vst.msk [vmem:[#allocation2 + $0x48] sm:$0xff] %vm511_vm8, %v4174_v13  ;;  %v5042_v47 = vrot.slane %v10861_v5, 5 }
 0x2cd   : > { %v4763_v14 = vpack.c.bf16 %v4747_v26, %v4747_v26  ;;  %v4664_v53 = vld [vmem:[#allocation2 + $0x38] sm:$0xff]  ;;  %v10823_v48 = vpop.f32.mrf.mxu0 }
 0x2ce   : > { %4443 = vst.msk [vmem:[#allocation2 + $0x40] sm:$0xff] %vm511_vm8, %v4427_v39  ;;  %v4680_v4 = vadd.f32 %v4664_v53, %v10751_v50  ;;  %7999 = vmatmul.msk.bf16.gmra.mxu3 %vm433_vm4, %v5070_v27  ;;  %v8106_v50 = vrot.slane %v8094_v49, 9  ;;  %v4964_v39 = vld [vmem:[%s8536_s17 + $0xcc] sm:$0xe]  ;;  %v5219_v53 = vld [vmem:[%s8536_s17 + $0xd8] sm:$0xf] }
 0x2cf   : > { %4779 = vst.msk [vmem:[%s10668_s29 + $0x14] sm:$0xf] %vm2423_vm12, %v4763_v14  ;;  %v4711_v30 = vld [vmem:[#allocation2 + $0x30] sm:$0xff]  ;;  %v4966_v14 = vld [vmem:[%s8536_s17 + $0xd4] sm:$0x1]  ;;  %v5044_v44 = vrot.slane %v5042_v47, 4 }
 0x2d0   : > { %4696 = vst.msk [vmem:[#allocation2 + $0x38] sm:$0xff] %vm511_vm8, %v4680_v4  ;;  %v4732_v33 = vadd.f32 %v10637_v28, %v4711_v30  ;;  %8016 = vmatmul.msk.bf16.gmra.mxu0 %vm433_vm4, %v5324_v17  ;;  %v10839_v18 = vpop.f32.mrf.mxu1  ;;  %v5726_v32 = vsel %vm8564_vm7, %v8106_v50, %v5725_v45  ;;  %v7992_v4 = vrot.slane %v4964_v39, 9  ;;  %v5045_v45 = vrot.slane %v4966_v14, 5  ;;  %v5218_v30 = vld [vmem:[%s8536_s17 + $0xd4] sm:$0xc] }
 0x2d1   : > { %4933 = vst.msk [vmem:[#allocation2 + $0x30] sm:$0xff] %vm511_vm8, %v10703_v62  ;;  %v4134_v42 = vpop.f32.mrf.mxu3  ;;  %v5290_v62 = vsel %vm8540_vm3, %v8008_v31, %v5289_v37  ;;  %v5751_v10 = vunpack.c.l.b16 %v5726_v32  ;;  %v5071_v37 = vpack.c.b16 %v5062_v56, %v5061_v3  ;;  %v5296_v40 = vrot.slane %v5219_v53, 6  ;;  %v8098_v49 = vld [vmem:[%s8536_s17 + $0x2c8] sm:$0xf]  ;;  %v4161_v32 = vld [vmem:[#allocation2 + $0x60] sm:$0xff] }
 0x2d2   : > { %v4748_v7 = vmax.f32 %v4732_v33, 0.0  ;;  %v4175_v11 = vadd.f32 %v4159_v61, %v4134_v42  ;;  %v5315_v27 = vunpack.c.l.b16 %v5290_v62  ;;  %v5732_v35 = vrot.slane %v8098_v49, 5  ;;  %v8099_v42 = vld [vmem:[%s8536_s17 + $0x2cc] sm:$0x1]  ;;  %v8119_v49 = vld [vmem:[%s8536_s17 + $0x210] sm:$0x3] }
 0x2d3   : > { %v4412_v24 = vld [vmem:[#allocation2 + $0x48] sm:$0xff]  ;;  %8073 = vmatmul.msk.bf16.gmra.mxu1 %vm433_vm4, %v8340_v2  ;;  %v10856_v60 = vpop.f32.mrf.mxu2  ;;  %v5761_v59 = vpack.c.b16 %v5752_v55, %v5751_v10  ;;  %v5298_v15 = vrot.slane %v5296_v40, 4  ;;  %v5735_v58 = vrot.slane %v8099_v42, 5  ;;  %v5043_v22 = vsel %vm8564_vm7, %v7992_v4, %v5042_v47 }
 0x2d4   : > { %v4764_v1 = vpack.c.bf16 %v4748_v7, %v4748_v7  ;;  %v4428_v9 = vadd.f32 %v4412_v24, %v10796_v6  ;;  %4191 = vst.msk [vmem:[#allocation2 + $0x50] sm:$0xff] %vm511_vm8, %v4175_v11  ;;  %v5325_v34 = vpack.c.b16 %v5316_v8, %v5315_v27  ;;  %v8107_v7 = vrot.slane %v8097_v0, 9 }
 0x2d5   : > { %v4665_v52 = vld [vmem:[#allocation2 + $0x40] sm:$0xff]  ;;  %v10858_v54 = vpop.f32.mrf.mxu0  ;;  %v5734_v11 = vrot.slane %v5732_v35, 4  ;;  %v5046_v55 = vsel %vm8564_vm7, %v5044_v44, %v5045_v45  ;;  %v8117_v44 = vld [vmem:[%s8536_s17 + $0x208] sm:$0xc] }
 0x2d6   : > { %4780 = vst.msk [vmem:[%s10668_s29 + $0x18] sm:$0xf] %vm2423_vm12, %v4764_v1  ;;  %v4681_v6 = vadd.f32 %v4665_v52, %v10779_v21  ;;  %v5064_v47 = vunpack.c.l.b16 %v5046_v55  ;;  %v8217_v55 = vld [vmem:[%s8536_s17 + $0x3f8] sm:$0xe] }
 0x2d7   : > { %4444 = vst.msk [vmem:[#allocation2 + $0x48] sm:$0xff] %vm511_vm8, %v4428_v9  ;;  %v4712_v13 = vld [vmem:[#allocation2 + $0x38] sm:$0xff]  ;;  %v5736_v52 = vsel %vm8564_vm7, %v5734_v11, %v5735_v58 }
 0x2d8   : > { %4697 = vst.msk [vmem:[#allocation2 + $0x40] sm:$0xff] %vm511_vm8, %v4681_v6  ;;  %v4733_v26 = vadd.f32 %v10637_v28, %v4712_v13  ;;  %v10872_v23 = vpop.f32.mrf.mxu1  ;;  %8115 = vmatmul.msk.bf16.gmra.mxu2 %vm433_vm4, %v5761_v59  ;;  %v5754_v59 = vunpack.c.l.b16 %v5736_v52  ;;  %v8219_v52 = vld [vmem:[%s8536_s17 + $0x400] sm:$0x1] }
 0x2d9   : > { %4934 = vst.msk [vmem:[#allocation2 + $0x38] sm:$0xff] %vm511_vm8, %v10736_v46  ;;  %v4136_v21 = vpop.f32.mrf.mxu3 }
 0x2da   : > { %v4749_v17 = vmax.f32 %v4733_v26, 0.0  ;;  %v4176_v25 = vadd.f32 %v4160_v41, %v4136_v21 }
 0x2db   : > { %v4413_v51 = vld [vmem:[#allocation2 + $0x50] sm:$0xff]  ;;  %v10880_v2 = vpop.f32.mrf.mxu2 }
 0x2dc   : > { %v4765_v57 = vpack.c.bf16 %v4749_v17, %v4749_v17  ;;  %v4429_v46 = vadd.f32 %v4413_v51, %v10823_v48  ;;  %4192 = vst.msk [vmem:[#allocation2 + $0x58] sm:$0xff] %vm511_vm8, %v4176_v25  ;;  %v5220_v48 = vld [vmem:[%s8536_s17 + $0xdc] sm:$0x3] }
 0x2dd   : > { %v10882_v31 = vpop.f32.mrf.mxu0  ;;  %v5299_v62 = vrot.slane %v5220_v48, 6  ;;  %v4162_v51 = vld [vmem:[#allocation2 + $0x68] sm:$0xff] }
 0x2de   : > { %4781 = vst.msk [vmem:[%s10668_s29 + $0x1c] sm:$0xf] %vm2423_vm12, %v4765_v57  ;;  %v4666_v33 = vld [vmem:[#allocation2 + $0x48] sm:$0xff]  ;;  %8000 = vmatmul.msk.bf16.gmra.mxu3 %vm433_vm4, %v5071_v37  ;;  %v8118_v37 = vld [vmem:[%s8536_s17 + $0x20c] sm:$0xf] }
 0x2df   : > { %4445 = vst.msk [vmem:[#allocation2 + $0x50] sm:$0xff] %vm511_vm8, %v4429_v46  ;;  %v4682_v63 = vadd.f32 %v4666_v33, %v10811_v16  ;;  %v4713_v50 = vld [vmem:[#allocation2 + $0x40] sm:$0xff]  ;;  %v8009_v16 = vrot.slane %v5218_v30, 10  ;;  %v5300_v8 = vsel %vm8540_vm3, %v5298_v15, %v5299_v62  ;;  %v5937_v45 = vrot.slane %v8118_v37, 6 }
 0x2e0   : > { %v4734_v61 = vadd.f32 %v10637_v28, %v4713_v50  ;;  %4935 = vst.msk [vmem:[#allocation2 + $0x40] sm:$0xff] %vm511_vm8, %v10761_v19  ;;  %8017 = vmatmul.msk.bf16.gmra.mxu0 %vm433_vm4, %v5325_v34  ;;  %v10900_v24 = vpop.f32.mrf.mxu1  ;;  %v5733_v19 = vsel %vm8564_vm7, %v8107_v7, %v5732_v35  ;;  %v5318_v25 = vunpack.c.l.b16 %v5300_v8  ;;  %v8259_v35 = vld [vmem:[%s8536_s17 + $0x404] sm:$0xf]  ;;  %v8141_v50 = vrot.slane %v8117_v44, 10  ;;  %v8258_v7 = vld [vmem:[%s8536_s17 + $0x400] sm:$0xc] }
 0x2e1   : > { %4698 = vst.msk [vmem:[#allocation2 + $0x48] sm:$0xff] %vm511_vm8, %v4682_v63  ;;  %v4139_v20 = vpop.f32.mrf.mxu3  ;;  %v5753_v5 = vunpack.c.l.b16 %v5733_v19  ;;  %v5297_v27 = vsel %vm8540_vm3, %v8009_v16, %v5296_v40  ;;  %v6631_v0 = vrot.slane %v8259_v35, 6  ;;  %v8282_v16 = vrot.slane %v8258_v7, 10 }
 0x2e2   : > { %v4750_v10 = vmax.f32 %v4734_v61, 0.0  ;;  %v4177_v1 = vadd.f32 %v4161_v32, %v4139_v20  ;;  %v5317_v17 = vunpack.c.l.b16 %v5297_v27  ;;  %v5939_v61 = vrot.slane %v5937_v45, 4  ;;  %v8342_v20 = vld [vmem:[%s8536_s17 + $0x2bc] sm:$0xff]  ;;  %v8260_v32 = vld [vmem:[%s8536_s17 + $0x408] sm:$0x3] }
 0x2e3   : > { %v4414_v9 = vld [vmem:[#allocation2 + $0x58] sm:$0xff]  ;;  %8074 = vmatmul.msk.bf16.gmra.mxu1 %vm433_vm4, %v8341_v29  ;;  %v10913_v56 = vpop.f32.mrf.mxu2  ;;  %v5762_v21 = vpack.c.b16 %v5754_v59, %v5753_v5  ;;  %v5940_v29 = vrot.slane %v8119_v49, 6  ;;  %v6633_v15 = vrot.slane %v6631_v0, 4  ;;  %v6634_v19 = vrot.slane %v8260_v32, 6 }
 0x2e4   : > { %v4766_v6 = vpack.c.bf16 %v4750_v10, %v4750_v10  ;;  %v4430_v3 = vadd.f32 %v4414_v9, %v10858_v54  ;;  %4193 = vst.msk [vmem:[#allocation2 + $0x60] sm:$0xff] %vm511_vm8, %v4177_v1  ;;  %v5063_v54 = vunpack.c.l.b16 %v5043_v22  ;;  %v5326_v40 = vpack.c.b16 %v5318_v25, %v5317_v17  ;;  %v4163_v10 = vld [vmem:[#allocation2 + $0x70] sm:$0xff] }
 0x2e5   : > { %v10915_v13 = vpop.f32.mrf.mxu0  ;;  %v5938_v22 = vsel %vm8540_vm3, %v8141_v50, %v5937_v45  ;;  %v6632_v5 = vsel %vm8540_vm3, %v8282_v16, %v6631_v0  ;;  %v5941_v59 = vsel %vm8540_vm3, %v5939_v61, %v5940_v29  ;;  %v6635_v27 = vsel %vm8540_vm3, %v6633_v15, %v6634_v19  ;;  %v8343_v50 = vld [vmem:[%s8536_s17 + $0x3f0] sm:$0xff]  ;;  %v8221_v15 = vld [vmem:[%s8536_s17 + $0x418] sm:$0xf] }
 0x2e6   : > { %4782 = vst.msk [vmem:[%s10668_s29 + $0x20] sm:$0xf] %vm2423_vm12, %v4766_v6  ;;  %v4667_v26 = vld [vmem:[#allocation2 + $0x50] sm:$0xff]  ;;  %v6687_v8 = vunpack.c.l.b16 %v6632_v5  ;;  %v6380_v25 = vrot.slane %v8219_v52, 5  ;;  %v5993_v37 = vunpack.c.l.b16 %v5938_v22  ;;  %v5149_v5 = vld [vmem:[#allocation2] sm:$0xff] }
 0x2e7   : > { %4446 = vst.msk [vmem:[#allocation2 + $0x58] sm:$0xff] %vm511_vm8, %v4430_v3  ;;  %v4683_v41 = vadd.f32 %v4667_v26, %v10839_v18  ;;  %v5072_v18 = vpack.c.b16 %v5064_v47, %v5063_v54  ;;  %v6688_v54 = vunpack.c.l.b16 %v6635_v27 }
 0x2e8   : > { %v4714_v39 = vld [vmem:[#allocation2 + $0x48] sm:$0xff]  ;;  %v10928_v34 = vpop.f32.mrf.mxu1  ;;  %8116 = vmatmul.msk.bf16.gmra.mxu2 %vm433_vm4, %v5762_v21 }
 0x2e9   : > { %4699 = vst.msk [vmem:[#allocation2 + $0x50] sm:$0xff] %vm511_vm8, %v4683_v41  ;;  %v4735_v14 = vadd.f32 %v10637_v28, %v4714_v39  ;;  %v4141_v53 = vpop.f32.mrf.mxu3  ;;  %v8241_v39 = vrot.slane %v8217_v55, 9 }
 0x2ea   : > { %4936 = vst.msk [vmem:[#allocation2 + $0x48] sm:$0xff] %vm511_vm8, %v10794_v36  ;;  %v4178_v57 = vadd.f32 %v4162_v51, %v4141_v53  ;;  %v6703_v53 = vpack.c.b16 %v6688_v54, %v6687_v8  ;;  %v8121_v51 = vld [vmem:[%s8536_s17 + $0x228] sm:$0xf]  ;;  %v8222_v54 = vld [vmem:[%s8536_s17 + $0x41c] sm:$0x1] }
 0x2eb   : > { %v4751_v46 = vmax.f32 %v4735_v14, 0.0  ;;  %v4415_v4 = vld [vmem:[#allocation2 + $0x60] sm:$0xff]  ;;  %v10937_v33 = vpop.f32.mrf.mxu2  ;;  %v5994_v14 = vunpack.c.l.b16 %v5941_v59  ;;  %v5944_v49 = vrot.slane %v8121_v51, 6 }
 0x2ec   : > { %v4431_v30 = vadd.f32 %v4415_v4, %v10882_v31  ;;  %4194 = vst.msk [vmem:[#allocation2 + $0x68] sm:$0xff] %vm511_vm8, %v4178_v57  ;;  %v8218_v31 = vld [vmem:[%s8536_s17 + $0x3fc] sm:$0xf]  ;;  %v4164_v4 = vld [vmem:[#allocation2 + $0x78] sm:$0xff] }
 0x2ed   : > { %v4767_v36 = vpack.c.bf16 %v4751_v46, %v4751_v46  ;;  %v10939_v48 = vpop.f32.mrf.mxu0  ;;  %v5946_v16 = vrot.slane %v5944_v49, 4 }
 0x2ee   : > { %4447 = vst.msk [vmem:[#allocation2 + $0x60] sm:$0xff] %vm511_vm8, %v4431_v30  ;;  %v4668_v63 = vld [vmem:[#allocation2 + $0x58] sm:$0xff]  ;;  %8001 = vmatmul.msk.bf16.gmra.mxu3 %vm433_vm4, %v5072_v18 }
 0x2ef   : > { %4783 = vst.msk [vmem:[%s10668_s29 + $0x24] sm:$0xf] %vm2423_vm12, %v4767_v36  ;;  %v4684_v42 = vadd.f32 %v4668_v63, %v10872_v23  ;;  %v6377_v23 = vrot.slane %v8218_v31, 5  ;;  %v8122_v31 = vld [vmem:[%s8536_s17 + $0x22c] sm:$0x3] }
 0x2f0   : > { %v4715_v11 = vld [vmem:[#allocation2 + $0x50] sm:$0xff]  ;;  %8018 = vmatmul.msk.bf16.gmra.mxu0 %vm433_vm4, %v5326_v40  ;;  %v10954_v1 = vpop.f32.mrf.mxu1  ;;  %v6009_v40 = vpack.c.b16 %v5994_v14, %v5993_v37 }
 0x2f1   : > { %4700 = vst.msk [vmem:[#allocation2 + $0x58] sm:$0xff] %vm511_vm8, %v4684_v42  ;;  %v4736_v62 = vadd.f32 %v10637_v28, %v4715_v11  ;;  %v4144_v58 = vpop.f32.mrf.mxu3  ;;  %v6379_v17 = vrot.slane %v6377_v23, 4  ;;  %v6378_v44 = vsel %vm8564_vm7, %v8241_v39, %v6377_v23  ;;  %v8261_v23 = vld [vmem:[%s8536_s17 + $0x41c] sm:$0xc] }
 0x2f2   : > { %4937 = vst.msk [vmem:[#allocation2 + $0x50] sm:$0xff] %vm511_vm8, %v10821_v43  ;;  %v4179_v9 = vadd.f32 %v4163_v10, %v4144_v58  ;;  %v6433_v0 = vunpack.c.l.b16 %v6378_v44  ;;  %v5947_v10 = vrot.slane %v8122_v31, 6  ;;  %v8283_v22 = vrot.slane %v8261_v23, 10 }
 0x2f3   : > { %v4752_v6 = vmax.f32 %v4736_v62, 0.0  ;;  %v4416_v3 = vld [vmem:[#allocation2 + $0x68] sm:$0xff]  ;;  %8075 = vmatmul.msk.bf16.gmra.mxu1 %vm433_vm4, %v8342_v20  ;;  %v10971_v26 = vpop.f32.mrf.mxu2  ;;  %v6381_v45 = vsel %vm8564_vm7, %v6379_v17, %v6380_v25  ;;  %v8262_v20 = vld [vmem:[%s8536_s17 + $0x420] sm:$0xf] }
 0x2f4   : > { %v4432_v43 = vadd.f32 %v4416_v3, %v10915_v13  ;;  %4195 = vst.msk [vmem:[#allocation2 + $0x70] sm:$0xff] %vm511_vm8, %v4179_v9  ;;  %v6434_v42 = vunpack.c.l.b16 %v6381_v45  ;;  %v6638_v62 = vrot.slane %v8262_v20, 6  ;;  %v8263_v9 = vld [vmem:[%s8536_s17 + $0x424] sm:$0x3]  ;;  %v6384_v3 = vrot.slane %v8221_v15, 5 }
 0x2f5   : > { %v4768_v47 = vpack.c.bf16 %v4752_v6, %v4752_v6  ;;  %v4669_v21 = vld [vmem:[#allocation2 + $0x60] sm:$0xff]  ;;  %v10973_v41 = vpop.f32.mrf.mxu0  ;;  %v6641_v59 = vrot.slane %v8263_v9, 6 }
 0x2f6   : > { %4448 = vst.msk [vmem:[#allocation2 + $0x68] sm:$0xff] %vm511_vm8, %v4432_v43  ;;  %v4685_v13 = vadd.f32 %v4669_v21, %v10900_v24  ;;  %v6640_v55 = vrot.slane %v6638_v62, 4  ;;  %v8220_v43 = vld [vmem:[%s8536_s17 + $0x414] sm:$0xe] }
 0x2f7   : > { %4784 = vst.msk [vmem:[%s10668_s29 + $0x28] sm:$0xf] %vm2423_vm12, %v4768_v47 }
 0x2f8   : > { %4701 = vst.msk [vmem:[#allocation2 + $0x60] sm:$0xff] %vm511_vm8, %v4685_v13  ;;  %v4716_v57 = vld [vmem:[#allocation2 + $0x58] sm:$0xff]  ;;  %v10984_v24 = vpop.f32.mrf.mxu1  ;;  %8291 = vmatmul.msk.bf16.vlgmr.msra.gmra.mxu2 %vm433_vm4, %v6703_v53  ;;  %v6642_v39 = vsel %vm8540_vm3, %v6640_v55, %v6641_v59 }
 0x2f9   : > { %v4737_v18 = vadd.f32 %v10637_v28, %v4716_v57  ;;  %4938 = vst.msk [vmem:[#allocation2 + $0x58] sm:$0xff] %vm511_vm8, %v10856_v60  ;;  %v4146_v46 = vpop.f32.mrf.mxu3  ;;  %v8120_v60 = vld [vmem:[%s8536_s17 + $0x224] sm:$0xc]  ;;  %v6690_v14 = vunpack.c.l.b16 %v6642_v39  ;;  %v8242_v57 = vrot.slane %v8220_v43, 9 }
 0x2fa   : > { %v4180_v30 = vadd.f32 %v4164_v4, %v4146_v46  ;;  %v8142_v32 = vrot.slane %v8120_v60, 10  ;;  %v6387_v46 = vrot.slane %v8222_v54, 5 }
 0x2fb   : > { %v4753_v36 = vmax.f32 %v4737_v18, 0.0  ;;  %v4417_v35 = vld [vmem:[#allocation2 + $0x70] sm:$0xff]  ;;  %v10996_v61 = vpop.f32.mrf.mxu2  ;;  %v6386_v18 = vrot.slane %v6384_v3, 4 }
 0x2fc   : > { %v4433_v63 = vadd.f32 %v4417_v35, %v10939_v48  ;;  %4196 = vst.msk [vmem:[#allocation2 + $0x78] sm:$0xff] %vm511_vm8, %v4180_v30  ;;  %v5945_v21 = vsel %vm8540_vm3, %v8142_v32, %v5944_v49  ;;  %v5150_v35 = vld [vmem:[#allocation2 + $0x8] sm:$0xff]  ;;  %v8344_v32 = vld [vmem:[%s8536_s17 + $0x40c] sm:$0xff] }
 0x2fd   : > { %v4769_v29 = vpack.c.bf16 %v4753_v36, %v4753_v36  ;;  %v4670_v7 = vld [vmem:[#allocation2 + $0x68] sm:$0xff]  ;;  %v10998_v11 = vpop.f32.mrf.mxu0  ;;  %v5995_v44 = vunpack.c.l.b16 %v5945_v21  ;;  %v8124_v36 = vld [vmem:[%s8536_s17 + $0x244] sm:$0xf] }
 0x2fe   : > { %4449 = vst.msk [vmem:[#allocation2 + $0x70] sm:$0xff] %vm511_vm8, %v4433_v63  ;;  %v4686_v48 = vadd.f32 %v4670_v7, %v10928_v34  ;;  %8150 = vmatmul.msk.bf16.vlgmr.msra.gmra.mxu3 %vm433_vm4, %v6009_v40  ;;  %v6449_v34 = vpack.c.b16 %v6434_v42, %v6433_v0  ;;  %v11041_v40 = vld [vmem:[%s11544_s2 + $0x1] ss:$0 sm:$0xff]  ;;  %v6385_v63 = vsel %vm8564_vm7, %v8242_v57, %v6384_v3  ;;  %v5951_v7 = vrot.slane %v8124_v36, 6  ;;  %v8264_v3 = vld [vmem:[%s8536_s17 + $0x438] sm:$0xc] }
 0x2ff   : > { %4785 = vst.msk [vmem:[%s10668_s29 + $0x2c] sm:$0xf] %vm2423_vm12, %v4769_v29  ;;  %v4717_v58 = vld [vmem:[#allocation2 + $0x60] sm:$0xff]  ;;  %v8123_v29 = vld [vmem:[%s8536_s17 + $0x240] sm:$0xc]  ;;  %v6435_v15 = vunpack.c.l.b16 %v6385_v63  ;;  %v8284_v43 = vrot.slane %v8264_v3, 10 }
 0x300   : > { %4702 = vst.msk [vmem:[#allocation2 + $0x68] sm:$0xff] %vm511_vm8, %v4686_v48  ;;  %v4738_v19 = vadd.f32 %v10637_v28, %v4717_v58  ;;  %8209 = vmatmul.msk.bf16.vlgmr.msra.gmra.mxu0 %vm433_vm4, %v8343_v50  ;;  %v11014_v6 = vpop.f32.mrf.mxu1  ;;  %v6639_v28 = vsel %vm8540_vm3, %v8283_v22, %v6638_v62  ;;  %v6388_v50 = vsel %vm8564_vm7, %v6386_v18, %v6387_v46  ;;  %v8268_v3 = vld [vmem:[%s8536_s17 + $0x458] sm:$0xf] }
 0x301   : > { %4939 = vst.msk [vmem:[#allocation2 + $0x60] sm:$0xff] %vm511_vm8, %v10880_v2  ;;  %v5109_v52 = vpop.f32.mrf.mxu3  ;;  %v5948_v2 = vsel %vm8540_vm3, %v5946_v16, %v5947_v10  ;;  %v6689_v17 = vunpack.c.l.b16 %v6639_v28  ;;  %v8125_v16 = vld [vmem:[%s8536_s17 + $0x248] sm:$0x3]  ;;  %v6436_v62 = vunpack.c.l.b16 %v6388_v50  ;;  %v8143_v10 = vrot.slane %v8123_v29, 10 }
 0x302   : > { %v4754_v27 = vmax.f32 %v4738_v19, 0.0  ;;  %v5165_v8 = vadd.f32 %v5149_v5, %v5109_v52  ;;  %v8265_v19 = vld [vmem:[%s8536_s17 + $0x43c] sm:$0xf]  ;;  %v5953_v52 = vrot.slane %v5951_v7, 4  ;;  %v5954_v5 = vrot.slane %v8125_v16, 6 }
 0x303   : > { %v4418_v47 = vld [vmem:[#allocation2 + $0x78] sm:$0xff]  ;;  %8250 = vmatmul.msk.bf16.vlgmr.msra.gmra.mxu1 %vm433_vm4, %v6449_v34  ;;  %v11029_v37 = vpop.f32.mrf.mxu2  ;;  %v6704_v45 = vpack.c.b16 %v6690_v14, %v6689_v17  ;;  %v6645_v9 = vrot.slane %v8265_v19, 6  ;;  %v8128_v19 = vld [vmem:[%s8536_s17 + $0x264] sm:$0x3] }
 0x304   : > { %v4770_v25 = vpack.c.bf16 %v4754_v27, %v4754_v27  ;;  %v4434_v13 = vadd.f32 %v4418_v47, %v10973_v41  ;;  %5181 = vst.msk [vmem:[#allocation2] sm:$0xff] %vm511_vm8, %v5165_v8  ;;  %v5996_v41 = vunpack.c.l.b16 %v5948_v2  ;;  %v6450_v27 = vpack.c.b16 %v6436_v62, %v6435_v15  ;;  %v8266_v8 = vld [vmem:[%s8536_s17 + $0x440] sm:$0x3] }
 0x305   : > { %v4671_v53 = vld [vmem:[#allocation2 + $0x70] sm:$0xff]  ;;  %v11031_v51 = vpop.f32.mrf.mxu0  ;;  %v6647_v21 = vrot.slane %v6645_v9, 4  ;;  %v6648_v2 = vrot.slane %v8266_v8, 6  ;;  %v5955_v57 = vsel %vm8540_vm3, %v5953_v52, %v5954_v5  ;;  %v8227_v5 = vld [vmem:[%s8536_s17 + $0x450] sm:$0xf]  ;;  %v5961_v8 = vrot.slane %v8128_v19, 6 }
 0x306   : > { %4786 = vst.msk [vmem:[%s10668_s29 + $0x30] sm:$0xf] %vm2423_vm12, %v4770_v25  ;;  %v4687_v4 = vadd.f32 %v4671_v53, %v10954_v1  ;;  %v6010_v42 = vpack.c.b16 %v5996_v41, %v5995_v44  ;;  %v8223_v25 = vld [vmem:[%s8536_s17 + $0x430] sm:$0xe]  ;;  %v5952_v53 = vsel %vm8540_vm3, %v8143_v10, %v5951_v7  ;;  %v5998_v50 = vunpack.c.l.b16 %v5955_v57  ;;  %v5152_v7 = vld [vmem:[#allocation2 + $0x18] sm:$0xff] }
 0x307   : > { %4450 = vst.msk [vmem:[#allocation2 + $0x78] sm:$0xff] %vm511_vm8, %v4434_v13  ;;  %v4718_v30 = vld [vmem:[#allocation2 + $0x68] sm:$0xff]  ;;  %v6649_v18 = vsel %vm8540_vm3, %v6647_v21, %v6648_v2  ;;  %v5997_v63 = vunpack.c.l.b16 %v5952_v53  ;;  %v5153_v53 = vld [vmem:[#allocation2 + $0x20] sm:$0xff] }
 0x308   : > { %4703 = vst.msk [vmem:[#allocation2 + $0x70] sm:$0xff] %vm511_vm8, %v4687_v4  ;;  %v4739_v49 = vadd.f32 %v11041_v40, %v4718_v30  ;;  %v11047_v60 = vpop.f32.mrf.mxu1  ;;  %8292 = vmatmul.msk.bf16.gmra.mxu2 %vm433_vm4, %v6704_v45  ;;  %v8225_v13 = vld [vmem:[%s8536_s17 + $0x438] sm:$0x1]  ;;  %v6692_v41 = vunpack.c.l.b16 %v6649_v18  ;;  %v8126_v10 = vld [vmem:[%s8536_s17 + $0x25c] sm:$0xc] }
 0x309   : > { %4940 = vst.msk [vmem:[#allocation2 + $0x68] sm:$0xff] %vm511_vm8, %v10913_v56  ;;  %v5111_v1 = vpop.f32.mrf.mxu3  ;;  %v6011_v16 = vpack.c.b16 %v5998_v50, %v5997_v63  ;;  %v8228_v18 = vld [vmem:[%s8536_s17 + $0x454] sm:$0x1] }
 0x30a   : > { %v4755_v31 = vmax.f32 %v4739_v49, 0.0  ;;  %v5166_v0 = vadd.f32 %v5150_v35, %v5111_v1  ;;  %v8243_v49 = vrot.slane %v8223_v25, 9  ;;  %v6394_v1 = vrot.slane %v8225_v13, 5 }
 0x30b   : > { %v5403_v56 = vld [vmem:[#allocation2] sm:$0xff]  ;;  %v11061_v23 = vpop.f32.mrf.mxu2  ;;  %v6401_v50 = vrot.slane %v8228_v18, 5 }
 0x30c   : > { %v4771_v20 = vpack.c.bf16 %v4755_v31, %v4755_v31  ;;  %v5419_v48 = vadd.f32 %v5403_v56, %v10998_v11  ;;  %5182 = vst.msk [vmem:[#allocation2 + $0x8] sm:$0xff] %vm511_vm8, %v5166_v0  ;;  %v8224_v11 = vld [vmem:[%s8536_s17 + $0x434] sm:$0xf]  ;;  %v8127_v0 = vld [vmem:[%s8536_s17 + $0x260] sm:$0xf] }
 0x30d   : > { %v11059_v58 = vpop.f32.mrf.mxu0  ;;  %v6391_v47 = vrot.slane %v8224_v11, 5  ;;  %v5958_v15 = vrot.slane %v8127_v0, 6  ;;  %v8345_v11 = vld [vmem:[%s8536_s17 + $0x428] sm:$0xff] }
 0x30e   : > { %4787 = vst.msk [vmem:[%s10668_s29 + $0x34] sm:$0xf] %vm2423_vm12, %v4771_v20  ;;  %v4672_v34 = vld [vmem:[#allocation2 + $0x78] sm:$0xff]  ;;  %8151 = vmatmul.msk.bf16.gmra.mxu3 %vm433_vm4, %v6010_v42 }
 0x30f   : > { %5435 = vst.msk [vmem:[#allocation2] sm:$0xff] %vm511_vm8, %v5419_v48  ;;  %v4688_v22 = vadd.f32 %v4672_v34, %v10984_v24  ;;  %v4719_v55 = vld [vmem:[#allocation2 + $0x70] sm:$0xff]  ;;  %v6393_v36 = vrot.slane %v6391_v47, 4  ;;  %v6392_v48 = vsel %vm8564_vm7, %v8243_v49, %v6391_v47  ;;  %v8267_v47 = vld [vmem:[%s8536_s17 + $0x454] sm:$0xc] }
 0x310   : > { %v4740_v59 = vadd.f32 %v11041_v40, %v4719_v55  ;;  %4941 = vst.msk [vmem:[#allocation2 + $0x70] sm:$0xff] %vm511_vm8, %v10937_v33  ;;  %8210 = vmatmul.msk.bf16.gmra.mxu0 %vm433_vm4, %v8344_v32  ;;  %v5151_v24 = vld [vmem:[#allocation2 + $0x10] sm:$0xff]  ;;  %v11077_v28 = vpop.f32.mrf.mxu1  ;;  %v6646_v33 = vsel %vm8540_vm3, %v8284_v43, %v6645_v9  ;;  %v6437_v9 = vunpack.c.l.b16 %v6392_v48  ;;  %v6652_v43 = vrot.slane %v8268_v3, 6 }
 0x311   : > { %4704 = vst.msk [vmem:[#allocation2 + $0x78] sm:$0xff] %vm511_vm8, %v4688_v22  ;;  %v5114_v54 = vpop.f32.mrf.mxu3  ;;  %v6691_v46 = vunpack.c.l.b16 %v6646_v33  ;;  %v6395_v32 = vsel %vm8564_vm7, %v6393_v36, %v6394_v1  ;;  %v8285_v25 = vrot.slane %v8267_v47, 10  ;;  %v8131_v3 = vld [vmem:[%s8536_s17 + $0x280] sm:$0x3] }
 0x312   : > { %v4756_v39 = vmax.f32 %v4740_v59, 0.0  ;;  %v5167_v17 = vadd.f32 %v5151_v24, %v5114_v54  ;;  %v8226_v24 = vld [vmem:[%s8536_s17 + $0x44c] sm:$0xe]  ;;  %v6654_v13 = vrot.slane %v6652_v43, 4 }
 0x313   : > { %v5404_v14 = vld [vmem:[#allocation2 + $0x8] sm:$0xff]  ;;  %8251 = vmatmul.msk.bf16.gmra.mxu1 %vm433_vm4, %v6450_v27  ;;  %v11094_v30 = vpop.f32.mrf.mxu2  ;;  %v6705_v31 = vpack.c.b16 %v6692_v41, %v6691_v46  ;;  %v5960_v27 = vrot.slane %v5958_v15, 4 }
 0x314   : > { %v4772_v4 = vpack.c.bf16 %v4756_v39, %v4756_v39  ;;  %v5420_v44 = vadd.f32 %v5404_v14, %v11031_v51  ;;  %5183 = vst.msk [vmem:[#allocation2 + $0x10] sm:$0xff] %vm511_vm8, %v5167_v17  ;;  %v6398_v39 = vrot.slane %v8227_v5, 5  ;;  %v8269_v17 = vld [vmem:[%s8536_s17 + $0x45c] sm:$0x3]  ;;  %v8346_v5 = vld [vmem:[%s8536_s17 + $0x444] sm:$0xff] }
 0x315   : > { %v11092_v45 = vpop.f32.mrf.mxu0  ;;  %v5962_v49 = vsel %vm8540_vm3, %v5960_v27, %v5961_v8  ;;  %v8230_v8 = vld [vmem:[%s8536_s17 + $0x46c] sm:$0xf] }
 0x316   : > { %4788 = vst.msk [vmem:[%s10668_s29 + $0x38] sm:$0xf] %vm2423_vm12, %v4772_v4  ;;  %v5585_v35 = vld [vmem:[#allocation2] sm:$0xff]  ;;  %v6400_v63 = vrot.slane %v6398_v39, 4 }
 0x317   : > { %5436 = vst.msk [vmem:[#allocation2 + $0x8] sm:$0xff] %vm511_vm8, %v5420_v44  ;;  %v5601_v51 = vadd.f32 %v5585_v35, %v11014_v6  ;;  %v6653_v44 = vsel %vm8540_vm3, %v8285_v25, %v6652_v43  ;;  %v8271_v43 = vld [vmem:[%s8536_s17 + $0x474] sm:$0xf]  ;;  %v8272_v25 = vld [vmem:[%s8536_s17 + $0x478] sm:$0x3] }
 0x318   : > { %v4720_v42 = vld [vmem:[#allocation2 + $0x78] sm:$0xff]  ;;  %v11103_v20 = vpop.f32.mrf.mxu1  ;;  %8293 = vmatmul.msk.bf16.gmra.mxu2 %vm433_vm4, %v6705_v31  ;;  %v6693_v1 = vunpack.c.l.b16 %v6653_v44  ;;  %v6659_v47 = vrot.slane %v8271_v43, 6  ;;  %v6662_v44 = vrot.slane %v8272_v25, 6 }
 0x319   : > { %5617 = vst.msk [vmem:[#allocation2] sm:$0xff] %vm511_vm8, %v5601_v51  ;;  %v4741_v29 = vadd.f32 %v11041_v40, %v4720_v42  ;;  %v5116_v56 = vpop.f32.mrf.mxu3 }
 0x31a   : > { %4942 = vst.msk [vmem:[#allocation2 + $0x78] sm:$0xff] %vm511_vm8, %v10971_v26  ;;  %v5168_v6 = vadd.f32 %v5152_v7, %v5116_v56  ;;  %v6438_v26 = vunpack.c.l.b16 %v6395_v32  ;;  %v6000_v7 = vunpack.c.l.b16 %v5962_v49 }
 0x31b   : > { %v4757_v40 = vmax.f32 %v4741_v29, 0.0  ;;  %v5405_v62 = vld [vmem:[#allocation2 + $0x10] sm:$0xff]  ;;  %v11119_v52 = vpop.f32.mrf.mxu2 }
 0x31c   : > { %v5421_v34 = vadd.f32 %v5405_v62, %v11059_v58  ;;  %5184 = vst.msk [vmem:[#allocation2 + $0x18] sm:$0xff] %vm511_vm8, %v5168_v6  ;;  %v8144_v58 = vrot.slane %v8126_v10, 10  ;;  %v6451_v2 = vpack.c.b16 %v6438_v26, %v6437_v9  ;;  %v8129_v9 = vld [vmem:[%s8536_s17 + $0x278] sm:$0xc] }
 0x31d   : > { %v4773_v22 = vpack.c.bf16 %v4757_v40, %v4757_v40  ;;  %v11117_v55 = vpop.f32.mrf.mxu0 }
 0x31e   : > { %5437 = vst.msk [vmem:[#allocation2 + $0x10] sm:$0xff] %vm511_vm8, %v5421_v34  ;;  %v5586_v59 = vld [vmem:[#allocation2 + $0x8] sm:$0xff]  ;;  %8152 = vmatmul.msk.bf16.gmra.mxu3 %vm433_vm4, %v6011_v16  ;;  %v5959_v4 = vsel %vm8540_vm3, %v8144_v58, %v5958_v15  ;;  %v6402_v16 = vsel %vm8564_vm7, %v6400_v63, %v6401_v50 }
 0x31f   : > { %4789 = vst.msk [vmem:[%s10668_s29 + $0x3c] sm:$0xf] %vm2423_vm12, %v4773_v22  ;;  %v5602_v54 = vadd.f32 %v5586_v59, %v11047_v60  ;;  %v6655_v60 = vrot.slane %v8269_v17, 6  ;;  %v5999_v56 = vunpack.c.l.b16 %v5959_v4  ;;  %v6440_v22 = vunpack.c.l.b16 %v6402_v16  ;;  %v8270_v17 = vld [vmem:[%s8536_s17 + $0x470] sm:$0xc] }
 0x320   : > { %v5839_v21 = vld [vmem:[#allocation2] sm:$0xff]  ;;  %8211 = vmatmul.msk.bf16.gmra.mxu0 %vm433_vm4, %v8345_v11  ;;  %v11134_v57 = vpop.f32.mrf.mxu1 }
 0x321   : > { %5618 = vst.msk [vmem:[#allocation2 + $0x8] sm:$0xff] %vm511_vm8, %v5602_v54  ;;  %v5855_v33 = vadd.f32 %v5839_v21, %v10996_v61  ;;  %v5119_v14 = vpop.f32.mrf.mxu3  ;;  %v8244_v61 = vrot.slane %v8226_v24, 9  ;;  %v6656_v36 = vsel %vm8540_vm3, %v6654_v13, %v6655_v60  ;;  %v6012_v19 = vpack.c.b16 %v6000_v7, %v5999_v56  ;;  %v5155_v60 = vld [vmem:[#allocation2 + $0x30] sm:$0xff]  ;;  %v8231_v4 = vld [vmem:[%s8536_s17 + $0x470] sm:$0x1] }
 0x322   : > { %v5169_v46 = vadd.f32 %v5153_v53, %v5119_v14  ;;  %v6694_v31 = vunpack.c.l.b16 %v6656_v36  ;;  %v6405_v14 = vrot.slane %v8230_v8, 5  ;;  %v6661_v53 = vrot.slane %v6659_v47, 4  ;;  %v8134_v8 = vld [vmem:[%s8536_s17 + $0x29c] sm:$0x3] }
 0x323   : > { %5871 = vst.msk [vmem:[#allocation2] sm:$0xff] %vm511_vm8, %v5855_v33  ;;  %v5406_v41 = vld [vmem:[#allocation2 + $0x18] sm:$0xff]  ;;  %8252 = vmatmul.msk.bf16.gmra.mxu1 %vm433_vm4, %v6451_v2  ;;  %v11151_v42 = vpop.f32.mrf.mxu2  ;;  %v6399_v6 = vsel %vm8564_vm7, %v8244_v61, %v6398_v39  ;;  %v5968_v2 = vrot.slane %v8131_v3, 6  ;;  %v5975_v25 = vrot.slane %v8134_v8, 6 }
 0x324   : > { %v5422_v35 = vadd.f32 %v5406_v41, %v11092_v45  ;;  %5185 = vst.msk [vmem:[#allocation2 + $0x20] sm:$0xff] %vm511_vm8, %v5169_v46  ;;  %v6706_v48 = vpack.c.b16 %v6694_v31, %v6693_v1  ;;  %v8130_v45 = vld [vmem:[%s8536_s17 + $0x27c] sm:$0xf]  ;;  %v6439_v26 = vunpack.c.l.b16 %v6399_v6  ;;  %v8229_v33 = vld [vmem:[%s8536_s17 + $0x468] sm:$0xe]  ;;  %v6407_v31 = vrot.slane %v6405_v14, 4 }
 0x325   : > { %v5587_v51 = vld [vmem:[#allocation2 + $0x10] sm:$0xff]  ;;  %v11149_v0 = vpop.f32.mrf.mxu0  ;;  %v5965_v34 = vrot.slane %v8130_v45, 6  ;;  %v8245_v1 = vrot.slane %v8229_v33, 9  ;;  %v8273_v33 = vld [vmem:[%s8536_s17 + $0x48c] sm:$0xc] }
 0x326   : > { %5438 = vst.msk [vmem:[#allocation2 + $0x18] sm:$0xff] %vm511_vm8, %v5422_v35  ;;  %v5603_v29 = vadd.f32 %v5587_v51, %v11077_v28  ;;  %v5154_v28 = vld [vmem:[#allocation2 + $0x28] sm:$0xff]  ;;  %v6452_v39 = vpack.c.b16 %v6440_v22, %v6439_v26  ;;  %v6663_v35 = vsel %vm8540_vm3, %v6661_v53, %v6662_v44  ;;  %v6408_v51 = vrot.slane %v8231_v4, 5  ;;  %v8132_v22 = vld [vmem:[%s8536_s17 + $0x294] sm:$0xc] }
 0x327   : > { %v5967_v24 = vrot.slane %v5965_v34, 4  ;;  %v8232_v53 = vld [vmem:[%s8536_s17 + $0x484] sm:$0xe]  ;;  %v5157_v44 = vld [vmem:[#allocation2 + $0x40] sm:$0xff] }
 0x328   : > { %5619 = vst.msk [vmem:[#allocation2 + $0x10] sm:$0xff] %vm511_vm8, %v5603_v29  ;;  %v5840_v32 = vld [vmem:[#allocation2 + $0x8] sm:$0xff]  ;;  %v11162_v62 = vpop.f32.mrf.mxu1  ;;  %8294 = vmatmul.msk.bf16.gmra.mxu2 %vm433_vm4, %v6706_v48  ;;  %v6696_v29 = vunpack.c.l.b16 %v6663_v35 }
 0x329   : > { %v5856_v15 = vadd.f32 %v5840_v32, %v11029_v37  ;;  %v5121_v40 = vpop.f32.mrf.mxu3  ;;  %v5969_v36 = vsel %vm8540_vm3, %v5967_v24, %v5968_v2  ;;  %v8233_v24 = vld [vmem:[%s8536_s17 + $0x488] sm:$0xf] }
 0x32a   : > { %v5170_v10 = vadd.f32 %v5154_v28, %v5121_v40  ;;  %v6002_v6 = vunpack.c.l.b16 %v5969_v36  ;;  %v6406_v28 = vsel %vm8564_vm7, %v8245_v1, %v6405_v14  ;;  %v8275_v14 = vld [vmem:[%s8536_s17 + $0x494] sm:$0x3] }
 0x32b   : > { %5872 = vst.msk [vmem:[#allocation2 + $0x8] sm:$0xff] %vm511_vm8, %v5856_v15  ;;  %v5407_v11 = vld [vmem:[#allocation2 + $0x20] sm:$0xff]  ;;  %v11173_v27 = vpop.f32.mrf.mxu2  ;;  %v8133_v15 = vld [vmem:[%s8536_s17 + $0x298] sm:$0xf] }
 0x32c   : > { %v5423_v37 = vadd.f32 %v5407_v11, %v11117_v55  ;;  %5186 = vst.msk [vmem:[#allocation2 + $0x28] sm:$0xff] %vm511_vm8, %v5170_v10  ;;  %v8145_v55 = vrot.slane %v8129_v9, 10  ;;  %v6409_v10 = vsel %vm8564_vm7, %v6407_v31, %v6408_v51  ;;  %v5972_v26 = vrot.slane %v8133_v15, 6 }
 0x32d   : > { %v5588_v59 = vld [vmem:[#allocation2 + $0x18] sm:$0xff]  ;;  %v11171_v58 = vpop.f32.mrf.mxu0 }
 0x32e   : > { %5439 = vst.msk [vmem:[#allocation2 + $0x20] sm:$0xff] %vm511_vm8, %v5423_v37  ;;  %v5604_v54 = vadd.f32 %v5588_v59, %v11103_v20  ;;  %8153 = vmatmul.msk.bf16.gmra.mxu3 %vm433_vm4, %v6012_v19  ;;  %v8286_v20 = vrot.slane %v8270_v17, 10  ;;  %v5966_v49 = vsel %vm8540_vm3, %v8145_v55, %v5965_v34  ;;  %v6441_v37 = vunpack.c.l.b16 %v6406_v28  ;;  %v8347_v59 = vld [vmem:[%s8536_s17 + $0x460] sm:$0xff] }
 0x32f   : > { %v5841_v21 = vld [vmem:[#allocation2 + $0x10] sm:$0xff]  ;;  %v6001_v32 = vunpack.c.l.b16 %v5966_v49  ;;  %v5974_v2 = vrot.slane %v5972_v26, 4  ;;  %v8234_v49 = vld [vmem:[%s8536_s17 + $0x48c] sm:$0x1] }
 0x330   : > { %5620 = vst.msk [vmem:[#allocation2 + $0x18] sm:$0xff] %vm511_vm8, %v5604_v54  ;;  %v5857_v13 = vadd.f32 %v5841_v21, %v11061_v23  ;;  %8212 = vmatmul.msk.bf16.gmra.mxu0 %vm433_vm4, %v8346_v5  ;;  %v11186_v46 = vpop.f32.mrf.mxu1  ;;  %v6660_v23 = vsel %vm8540_vm3, %v8286_v20, %v6659_v47  ;;  %v6442_v5 = vunpack.c.l.b16 %v6409_v10  ;;  %v8274_v47 = vld [vmem:[%s8536_s17 + $0x490] sm:$0xf]  ;;  %v8136_v10 = vld [vmem:[%s8536_s17 + $0x2b4] sm:$0xf] }
 0x331   : > { %v5124_v18 = vpop.f32.mrf.mxu3  ;;  %v6695_v63 = vunpack.c.l.b16 %v6660_v23  ;;  %v6013_v9 = vpack.c.b16 %v6002_v6, %v6001_v32  ;;  %v6669_v23 = vrot.slane %v8275_v14, 6  ;;  %v5976_v35 = vsel %vm8540_vm3, %v5974_v2, %v5975_v25  ;;  %v8236_v2 = vld [vmem:[%s8536_s17 + $0x4a4] sm:$0xf] }
 0x332   : > { %5873 = vst.msk [vmem:[#allocation2 + $0x10] sm:$0xff] %vm511_vm8, %v5857_v13  ;;  %v5171_v41 = vadd.f32 %v5155_v60, %v5124_v18  ;;  %v6453_v13 = vpack.c.b16 %v6442_v5, %v6441_v37  ;;  %v6412_v18 = vrot.slane %v8233_v24, 5  ;;  %v5979_v37 = vrot.slane %v8136_v10, 6  ;;  %v8135_v5 = vld [vmem:[%s8536_s17 + $0x2b0] sm:$0xc] }
 0x333   : > { %v5408_v61 = vld [vmem:[#allocation2 + $0x28] sm:$0xff]  ;;  %8253 = vmatmul.msk.bf16.gmra.mxu1 %vm433_vm4, %v6452_v39  ;;  %v11203_v48 = vpop.f32.mrf.mxu2  ;;  %v6707_v16 = vpack.c.b16 %v6696_v29, %v6695_v63  ;;  %v6666_v39 = vrot.slane %v8274_v47, 6  ;;  %v8246_v63 = vrot.slane %v8232_v53, 9  ;;  %v8276_v53 = vld [vmem:[%s8536_s17 + $0x4a8] sm:$0xc] }
 0x334   : > { %v5424_v50 = vadd.f32 %v5408_v61, %v11149_v0  ;;  %5187 = vst.msk [vmem:[#allocation2 + $0x30] sm:$0xff] %vm511_vm8, %v5171_v41  ;;  %v6414_v29 = vrot.slane %v6412_v18, 4  ;;  %v8137_v24 = vld [vmem:[%s8536_s17 + $0x2b8] sm:$0x3]  ;;  %v5981_v25 = vrot.slane %v5979_v37, 4 }
 0x335   : > { %v5589_v56 = vld [vmem:[#allocation2 + $0x20] sm:$0xff]  ;;  %v11201_v7 = vpop.f32.mrf.mxu0  ;;  %v6668_v60 = vrot.slane %v6666_v39, 4  ;;  %v5982_v14 = vrot.slane %v8137_v24, 6 }
 0x336   : > { %5440 = vst.msk [vmem:[#allocation2 + $0x28] sm:$0xff] %vm511_vm8, %v5424_v50  ;;  %v5605_v45 = vadd.f32 %v5589_v56, %v11134_v57  ;;  %v5156_v57 = vld [vmem:[#allocation2 + $0x38] sm:$0xff]  ;;  %v6415_v56 = vrot.slane %v8234_v49, 5 }
 0x337   : > { %v5842_v0 = vld [vmem:[#allocation2 + $0x18] sm:$0xff]  ;;  %v6670_v50 = vsel %vm8540_vm3, %v6668_v60, %v6669_v23  ;;  %v8235_v60 = vld [vmem:[%s8536_s17 + $0x4a0] sm:$0xe] }
 0x338   : > { %5621 = vst.msk [vmem:[#allocation2 + $0x20] sm:$0xff] %vm511_vm8, %v5605_v45  ;;  %v5858_v40 = vadd.f32 %v5842_v0, %v11094_v30  ;;  %v11214_v34 = vpop.f32.mrf.mxu1  ;;  %8295 = vmatmul.msk.bf16.gmra.mxu2 %vm433_vm4, %v6707_v16  ;;  %v6698_v45 = vunpack.c.l.b16 %v6670_v50  ;;  %v5159_v23 = vld [vmem:[#allocation2 + $0x50] sm:$0xff]  ;;  %v5983_v50 = vsel %vm8540_vm3, %v5981_v25, %v5982_v14  ;;  %v8280_v25 = vld [vmem:[%s8536_s17 + $0x4c8] sm:$0xf] }
 0x339   : > { %v5126_v19 = vpop.f32.mrf.mxu3  ;;  %v8239_v14 = vld [vmem:[%s8536_s17 + $0x4c0] sm:$0xf] }
 0x33a   : > { %5874 = vst.msk [vmem:[#allocation2 + $0x18] sm:$0xff] %vm511_vm8, %v5858_v40  ;;  %v5172_v11 = vadd.f32 %v5156_v57, %v5126_v19  ;;  %v6004_v40 = vunpack.c.l.b16 %v5976_v35  ;;  %v6413_v57 = vsel %vm8564_vm7, %v8246_v63, %v6412_v18  ;;  %v8278_v18 = vld [vmem:[%s8536_s17 + $0x4b0] sm:$0x3] }
 0x33b   : > { %v5409_v30 = vld [vmem:[#allocation2 + $0x30] sm:$0xff]  ;;  %v11225_v55 = vpop.f32.mrf.mxu2 }
 0x33c   : > { %v5425_v3 = vadd.f32 %v5409_v30, %v11171_v58  ;;  %5188 = vst.msk [vmem:[#allocation2 + $0x38] sm:$0xff] %vm511_vm8, %v5172_v11  ;;  %v8146_v58 = vrot.slane %v8132_v22, 10  ;;  %v6416_v11 = vsel %vm8564_vm7, %v6414_v29, %v6415_v56 }
 0x33d   : > { %v5590_v43 = vld [vmem:[#allocation2 + $0x28] sm:$0xff]  ;;  %v11223_v54 = vpop.f32.mrf.mxu0 }
 0x33e   : > { %5441 = vst.msk [vmem:[#allocation2 + $0x30] sm:$0xff] %vm511_vm8, %v5425_v3  ;;  %v5606_v21 = vadd.f32 %v5590_v43, %v11162_v62  ;;  %8154 = vmatmul.msk.bf16.gmra.mxu3 %vm433_vm4, %v6013_v9  ;;  %v8287_v62 = vrot.slane %v8273_v33, 10  ;;  %v5973_v36 = vsel %vm8540_vm3, %v8146_v58, %v5972_v26  ;;  %v6443_v3 = vunpack.c.l.b16 %v6413_v57  ;;  %v8348_v43 = vld [vmem:[%s8536_s17 + $0x47c] sm:$0xff] }
 0x33f   : > { %v5843_v17 = vld [vmem:[#allocation2 + $0x20] sm:$0xff]  ;;  %v6003_v15 = vunpack.c.l.b16 %v5973_v36  ;;  %v8237_v36 = vld [vmem:[%s8536_s17 + $0x4a8] sm:$0x1] }
 0x340   : > { %5622 = vst.msk [vmem:[#allocation2 + $0x28] sm:$0xff] %vm511_vm8, %v5606_v21  ;;  %v5859_v20 = vadd.f32 %v5843_v17, %v11119_v52  ;;  %8213 = vmatmul.msk.bf16.gmra.mxu0 %vm433_vm4, %v8347_v59  ;;  %v11238_v41 = vpop.f32.mrf.mxu1  ;;  %v6667_v52 = vsel %vm8540_vm3, %v8287_v62, %v6666_v39  ;;  %v6444_v59 = vunpack.c.l.b16 %v6416_v11  ;;  %v8277_v39 = vld [vmem:[%s8536_s17 + $0x4ac] sm:$0xf]  ;;  %v8139_v11 = vld [vmem:[%s8536_s17 + $0x2d0] sm:$0xf] }
 0x341   : > { %v5129_v4 = vpop.f32.mrf.mxu3  ;;  %v6697_v31 = vunpack.c.l.b16 %v6667_v52  ;;  %v6014_v22 = vpack.c.b16 %v6004_v40, %v6003_v15  ;;  %v6676_v52 = vrot.slane %v8278_v18, 6 }
 0x342   : > { %5875 = vst.msk [vmem:[#allocation2 + $0x20] sm:$0xff] %vm511_vm8, %v5859_v20  ;;  %v5173_v61 = vadd.f32 %v5157_v44, %v5129_v4  ;;  %v6454_v20 = vpack.c.b16 %v6444_v59, %v6443_v3  ;;  %v6419_v4 = vrot.slane %v8236_v2, 5  ;;  %v5986_v3 = vrot.slane %v8139_v11, 6  ;;  %v8138_v59 = vld [vmem:[%s8536_s17 + $0x2cc] sm:$0xc] }
 0x343   : > { %v5410_v1 = vld [vmem:[#allocation2 + $0x38] sm:$0xff]  ;;  %8254 = vmatmul.msk.bf16.gmra.mxu1 %vm433_vm4, %v6453_v13  ;;  %v11255_v16 = vpop.f32.mrf.mxu2  ;;  %v6708_v28 = vpack.c.b16 %v6698_v45, %v6697_v31  ;;  %v6673_v13 = vrot.slane %v8277_v39, 6  ;;  %v8247_v31 = vrot.slane %v8235_v60, 9  ;;  %v8140_v2 = vld [vmem:[%s8536_s17 + $0x2d4] sm:$0x3] }
 0x344   : > { %v5426_v51 = vadd.f32 %v5410_v1, %v11201_v7  ;;  %5189 = vst.msk [vmem:[#allocation2 + $0x40] sm:$0xff] %vm511_vm8, %v5173_v61  ;;  %v6421_v45 = vrot.slane %v6419_v4, 4  ;;  %v5989_v18 = vrot.slane %v8140_v2, 6  ;;  %v8279_v60 = vld [vmem:[%s8536_s17 + $0x4c4] sm:$0xc] }
 0x345   : > { %v5591_v32 = vld [vmem:[#allocation2 + $0x30] sm:$0xff]  ;;  %v11253_v6 = vpop.f32.mrf.mxu0  ;;  %v6675_v44 = vrot.slane %v6673_v13, 4 }
 0x346   : > { %5442 = vst.msk [vmem:[#allocation2 + $0x38] sm:$0xff] %vm511_vm8, %v5426_v51  ;;  %v5607_v0 = vadd.f32 %v5591_v32, %v11186_v46  ;;  %v5158_v46 = vld [vmem:[#allocation2 + $0x48] sm:$0xff]  ;;  %v6422_v32 = vrot.slane %v8237_v36, 5  ;;  %v5161_v36 = vld [vmem:[#allocation2 + $0x60] sm:$0xff] }
 0x347   : > { %v5844_v7 = vld [vmem:[#allocation2 + $0x28] sm:$0xff]  ;;  %v6677_v51 = vsel %vm8540_vm3, %v6675_v44, %v6676_v52 }
 0x348   : > { %5623 = vst.msk [vmem:[#allocation2 + $0x30] sm:$0xff] %vm511_vm8, %v5607_v0  ;;  %v5860_v19 = vadd.f32 %v5844_v7, %v11151_v42  ;;  %v11266_v26 = vpop.f32.mrf.mxu1  ;;  %8296 = vmatmul.msk.bf16.gmra.mxu2 %vm433_vm4, %v6708_v28  ;;  %v6700_v0 = vunpack.c.l.b16 %v6677_v51 }
 0x349   : > { %v5131_v9 = vpop.f32.mrf.mxu3 }
 0x34a   : > { %5876 = vst.msk [vmem:[#allocation2 + $0x28] sm:$0xff] %vm511_vm8, %v5860_v19  ;;  %v5174_v30 = vadd.f32 %v5158_v46, %v5131_v9  ;;  %v6006_v19 = vunpack.c.l.b16 %v5983_v50  ;;  %v6420_v46 = vsel %vm8564_vm7, %v8247_v31, %v6419_v4  ;;  %v8281_v4 = vld [vmem:[%s8536_s17 + $0x4cc] sm:$0x3] }
 0x34b   : > { %v5411_v42 = vld [vmem:[#allocation2 + $0x40] sm:$0xff]  ;;  %v11277_v58 = vpop.f32.mrf.mxu2 }
 0x34c   : > { %v5427_v8 = vadd.f32 %v5411_v42, %v11223_v54  ;;  %5190 = vst.msk [vmem:[#allocation2 + $0x48] sm:$0xff] %vm511_vm8, %v5174_v30  ;;  %v8147_v54 = vrot.slane %v8135_v5, 10  ;;  %v6423_v30 = vsel %vm8564_vm7, %v6421_v45, %v6422_v32 }
 0x34d   : > { %v5592_v47 = vld [vmem:[#allocation2 + $0x38] sm:$0xff]  ;;  %v11275_v21 = vpop.f32.mrf.mxu0 }
 0x34e   : > { %5443 = vst.msk [vmem:[#allocation2 + $0x40] sm:$0xff] %vm511_vm8, %v5427_v8  ;;  %v5608_v17 = vadd.f32 %v5592_v47, %v11214_v34  ;;  %8155 = vmatmul.msk.bf16.gmra.mxu3 %vm433_vm4, %v6014_v22  ;;  %v8288_v34 = vrot.slane %v8276_v53, 10  ;;  %v5980_v35 = vsel %vm8540_vm3, %v8147_v54, %v5979_v37  ;;  %v6445_v8 = vunpack.c.l.b16 %v6420_v46  ;;  %v8349_v47 = vld [vmem:[%s8536_s17 + $0x498] sm:$0xff] }
 0x34f   : > { %v5845_v33 = vld [vmem:[#allocation2 + $0x30] sm:$0xff]  ;;  %v6005_v10 = vunpack.c.l.b16 %v5980_v35 }
 0x350   : > { %5624 = vst.msk [vmem:[#allocation2 + $0x38] sm:$0xff] %vm511_vm8, %v5608_v17  ;;  %v5861_v62 = vadd.f32 %v5845_v33, %v11173_v27  ;;  %8214 = vmatmul.msk.bf16.gmra.mxu0 %vm433_vm4, %v8348_v43  ;;  %v11290_v61 = vpop.f32.mrf.mxu1  ;;  %v6674_v27 = vsel %vm8540_vm3, %v8288_v34, %v6673_v13  ;;  %v6446_v43 = vunpack.c.l.b16 %v6423_v30  ;;  %v8148_v33 = vrot.slane %v8138_v59, 10 }
 0x351   : > { %v5134_v49 = vpop.f32.mrf.mxu3  ;;  %v6699_v29 = vunpack.c.l.b16 %v6674_v27  ;;  %v6015_v5 = vpack.c.b16 %v6006_v19, %v6005_v10  ;;  %v8238_v27 = vld [vmem:[%s8536_s17 + $0x4bc] sm:$0xe] }
 0x352   : > { %5877 = vst.msk [vmem:[#allocation2 + $0x30] sm:$0xff] %vm511_vm8, %v5861_v62  ;;  %v5175_v1 = vadd.f32 %v5159_v23, %v5134_v49  ;;  %v6455_v62 = vpack.c.b16 %v6446_v43, %v6445_v8  ;;  %v6683_v49 = vrot.slane %v8281_v4, 6  ;;  %v5987_v51 = vsel %vm8540_vm3, %v8148_v33, %v5986_v3  ;;  %v5163_v33 = vld [vmem:[#allocation2 + $0x70] sm:$0xff] }
 0x353   : > { %v5412_v63 = vld [vmem:[#allocation2 + $0x48] sm:$0xff]  ;;  %8255 = vmatmul.msk.bf16.gmra.mxu1 %vm433_vm4, %v6454_v20  ;;  %v11307_v28 = vpop.f32.mrf.mxu2  ;;  %v6709_v57 = vpack.c.b16 %v6700_v0, %v6699_v29  ;;  %v6680_v20 = vrot.slane %v8280_v25, 6  ;;  %v8248_v10 = vrot.slane %v8238_v27, 9 }
 0x354   : > { %v5428_v56 = vadd.f32 %v5412_v63, %v11253_v6  ;;  %5191 = vst.msk [vmem:[#allocation2 + $0x50] sm:$0xff] %vm511_vm8, %v5175_v1  ;;  %v6426_v1 = vrot.slane %v8239_v14, 5  ;;  %v8240_v63 = vld [vmem:[%s8536_s17 + $0x4c4] sm:$0x1] }
 0x355   : > { %v5593_v15 = vld [vmem:[#allocation2 + $0x40] sm:$0xff]  ;;  %v11305_v40 = vpop.f32.mrf.mxu0  ;;  %v6682_v44 = vrot.slane %v6680_v20, 4 }
 0x356   : > { %5444 = vst.msk [vmem:[#allocation2 + $0x48] sm:$0xff] %vm511_vm8, %v5428_v56  ;;  %v5609_v7 = vadd.f32 %v5593_v15, %v11238_v41  ;;  %v5160_v41 = vld [vmem:[#allocation2 + $0x58] sm:$0xff]  ;;  %v6428_v19 = vrot.slane %v6426_v1, 4 }
 0x357   : > { %v5846_v6 = vld [vmem:[#allocation2 + $0x38] sm:$0xff] }
 0x358   : > { %5625 = vst.msk [vmem:[#allocation2 + $0x40] sm:$0xff] %vm511_vm8, %v5609_v7  ;;  %v5862_v9 = vadd.f32 %v5846_v6, %v11203_v48  ;;  %v11318_v37 = vpop.f32.mrf.mxu1  ;;  %8297 = vmatmul.msk.bf16.gmra.mxu2 %vm433_vm4, %v6709_v57  ;;  %v6429_v57 = vrot.slane %v8240_v63, 5  ;;  %v6007_v6 = vunpack.c.l.b16 %v5987_v51 }
 0x359   : > { %v5136_v22 = vpop.f32.mrf.mxu3 }
 0x35a   : > { %5878 = vst.msk [vmem:[#allocation2 + $0x38] sm:$0xff] %vm511_vm8, %v5862_v9  ;;  %v5176_v42 = vadd.f32 %v5160_v41, %v5136_v22  ;;  %v5162_v22 = vld [vmem:[#allocation2 + $0x68] sm:$0xff] }
 0x35b   : > { %v5413_v48 = vld [vmem:[#allocation2 + $0x50] sm:$0xff]  ;;  %v11329_v54 = vpop.f32.mrf.mxu2 }
 0x35c   : > { %v5429_v24 = vadd.f32 %v5413_v48, %v11275_v21  ;;  %5192 = vst.msk [vmem:[#allocation2 + $0x58] sm:$0xff] %vm511_vm8, %v5176_v42  ;;  %v5988_v21 = vrot.slane %v5986_v3, 4  ;;  %v6427_v42 = vsel %vm8564_vm7, %v8248_v10, %v6426_v1 }
 0x35d   : > { %v5594_v39 = vld [vmem:[#allocation2 + $0x48] sm:$0xff]  ;;  %v11327_v17 = vpop.f32.mrf.mxu0  ;;  %v6447_v8 = vunpack.c.l.b16 %v6427_v42  ;;  %v6095_v42 = vld [vmem:[#allocation2 + $0x10] sm:$0xff] }
 0x35e   : > { %5445 = vst.msk [vmem:[#allocation2 + $0x50] sm:$0xff] %vm511_vm8, %v5429_v24  ;;  %v5610_v13 = vadd.f32 %v5594_v39, %v11266_v26  ;;  %8156 = vmatmul.msk.bf16.gmra.mxu3 %vm433_vm4, %v6015_v5  ;;  %v8289_v26 = vrot.slane %v8279_v60, 10  ;;  %v5990_v29 = vsel %vm8540_vm3, %v5988_v21, %v5989_v18  ;;  %v6430_v5 = vsel %vm8564_vm7, %v6428_v19, %v6429_v57  ;;  %v6094_v19 = vld [vmem:[#allocation2 + $0x8] sm:$0xff] }
 0x35f   : > { %v5847_v53 = vld [vmem:[#allocation2 + $0x40] sm:$0xff]  ;;  %v6008_v11 = vunpack.c.l.b16 %v5990_v29  ;;  %v6448_v43 = vunpack.c.l.b16 %v6430_v5 }
 0x360   : > { %5626 = vst.msk [vmem:[#allocation2 + $0x48] sm:$0xff] %vm511_vm8, %v5610_v13  ;;  %v5863_v34 = vadd.f32 %v5847_v53, %v11225_v55  ;;  %8215 = vmatmul.msk.bf16.gmra.mxu0 %vm433_vm4, %v8349_v47  ;;  %v11341_v52 = vpop.f32.mrf.mxu1  ;;  %v6681_v50 = vsel %vm8540_vm3, %v8289_v26, %v6680_v20  ;;  %v6684_v55 = vsel %vm8540_vm3, %v6682_v44, %v6683_v49  ;;  %v5164_v26 = vld [vmem:[#allocation2 + $0x78] sm:$0xff] }
 0x361   : > { %v5139_v23 = vpop.f32.mrf.mxu3  ;;  %v6701_v56 = vunpack.c.l.b16 %v6681_v50  ;;  %v6702_v45 = vunpack.c.l.b16 %v6684_v55  ;;  %v6016_v3 = vpack.c.b16 %v6008_v11, %v6007_v6  ;;  %v6456_v25 = vpack.c.b16 %v6448_v43, %v6447_v8  ;;  %v6093_v50 = vld [vmem:[#allocation2] sm:$0xff] }
 0x362   : > { %5879 = vst.msk [vmem:[#allocation2 + $0x40] sm:$0xff] %vm511_vm8, %v5863_v34  ;;  %v5177_v35 = vadd.f32 %v5161_v36, %v5139_v23 }
 0x363   : > { %v5414_v31 = vld [vmem:[#allocation2 + $0x58] sm:$0xff]  ;;  %8256 = vmatmul.msk.bf16.gmra.mxu1 %vm433_vm4, %v6455_v62  ;;  %v11357_v7 = vpop.f32.mrf.mxu2  ;;  %v6710_v9 = vpack.c.b16 %v6702_v45, %v6701_v56 }
 0x364   : > { %v5430_v32 = vadd.f32 %v5414_v31, %v11305_v40  ;;  %5193 = vst.msk [vmem:[#allocation2 + $0x60] sm:$0xff] %vm511_vm8, %v5177_v35 }
 0x365   : > { %v5595_v0 = vld [vmem:[#allocation2 + $0x50] sm:$0xff]  ;;  %v5395_v15 = vpop.f32.mrf.mxu0 }
 0x366   : > { %5446 = vst.msk [vmem:[#allocation2 + $0x58] sm:$0xff] %vm511_vm8, %v5430_v32  ;;  %v5611_v12 = vadd.f32 %v5595_v0, %v11290_v61 }
 0x367   : > { %v5848_v40 = vld [vmem:[#allocation2 + $0x48] sm:$0xff] }
 0x368   : > { %5627 = vst.msk [vmem:[#allocation2 + $0x50] sm:$0xff] %vm511_vm8, %v5611_v12  ;;  %v5864_v46 = vadd.f32 %v5848_v40, %v11255_v16  ;;  %v5577_v41 = vpop.f32.mrf.mxu1  ;;  %8298 = vmatmul.msk.bf16.gmra.mxu2 %vm433_vm4, %v6710_v9  ;;  %v8350_v16 = vld [vmem:[%s8536_s17 + $0x4b4] sm:$0xff] }
 0x369   : > { %v5141_v30 = vpop.f32.mrf.mxu3 }
 0x36a   : > { %5880 = vst.msk [vmem:[#allocation2 + $0x48] sm:$0xff] %vm511_vm8, %v5864_v46  ;;  %v5178_v61 = vadd.f32 %v5162_v22, %v5141_v30 }
 0x36b   : > { %v5415_v48 = vld [vmem:[#allocation2 + $0x60] sm:$0xff]  ;;  %v11375_v2 = vpop.f32.mrf.mxu2 }
 0x36c   : > { %v5431_v59 = vadd.f32 %v5415_v48, %v11327_v17  ;;  %5194 = vst.msk [vmem:[#allocation2 + $0x68] sm:$0xff] %vm511_vm8, %v5178_v61 }
 0x36d   : > { %v5596_v24 = vld [vmem:[#allocation2 + $0x58] sm:$0xff]  ;;  %v5398_v47 = vpop.f32.mrf.mxu0 }
 0x36e   : > { %5447 = vst.msk [vmem:[#allocation2 + $0x60] sm:$0xff] %vm511_vm8, %v5431_v59  ;;  %v5612_v38 = vadd.f32 %v5596_v24, %v11318_v37  ;;  %8157 = vmatmul.msk.bf16.gmra.mxu3 %vm433_vm4, %v6016_v3 }
 0x36f   : > { %v5849_v39 = vld [vmem:[#allocation2 + $0x50] sm:$0xff] }
 0x370   : > { %5628 = vst.msk [vmem:[#allocation2 + $0x58] sm:$0xff] %vm511_vm8, %v5612_v38  ;;  %v5865_v17 = vadd.f32 %v5849_v39, %v11277_v58  ;;  %8216 = vmatmul.msk.bf16.gmra.mxu0 %vm433_vm4, %v8350_v16  ;;  %v5580_v21 = vpop.f32.mrf.mxu1 }
 0x371   : > { %v5144_v13 = vpop.f32.mrf.mxu3 }
 0x372   : > { %5881 = vst.msk [vmem:[#allocation2 + $0x50] sm:$0xff] %vm511_vm8, %v5865_v17  ;;  %v5179_v14 = vadd.f32 %v5163_v33, %v5144_v13 }
 0x373   : > { %v5416_v20 = vld [vmem:[#allocation2 + $0x68] sm:$0xff]  ;;  %8257 = vmatmul.msk.bf16.gmra.mxu1 %vm433_vm4, %v6456_v25  ;;  %v11387_v4 = vpop.f32.mrf.mxu2 }
 0x374   : > { %v5432_v37 = vadd.f32 %v5416_v20, %v5395_v15  ;;  %5195 = vst.msk [vmem:[#allocation2 + $0x70] sm:$0xff] %vm511_vm8, %v5179_v14 }
 0x375   : > { %v5597_v53 = vld [vmem:[#allocation2 + $0x60] sm:$0xff]  ;;  %v5400_v18 = vpop.f32.mrf.mxu0 }
 0x376   : > { %5448 = vst.msk [vmem:[#allocation2 + $0x68] sm:$0xff] %vm511_vm8, %v5432_v37  ;;  %v5613_v58 = vadd.f32 %v5597_v53, %v11341_v52 }
 0x377   : > { %v5850_v62 = vld [vmem:[#allocation2 + $0x58] sm:$0xff] }
 0x378   : > { %5629 = vst.msk [vmem:[#allocation2 + $0x60] sm:$0xff] %vm511_vm8, %v5613_v58  ;;  %v5866_v60 = vadd.f32 %v5850_v62, %v11307_v28  ;;  %v5582_v44 = vpop.f32.mrf.mxu1  ;;  %v6097_v58 = vld [vmem:[#allocation2 + $0x20] sm:$0xff] }
 0x379   : > { %v5146_v34 = vpop.f32.mrf.mxu3 }
 0x37a   : > { %5882 = vst.msk [vmem:[#allocation2 + $0x58] sm:$0xff] %vm511_vm8, %v5866_v60  ;;  %v5180_v49 = vadd.f32 %v5164_v26, %v5146_v34 }
 0x37b   : > { %v5417_v23 = vld [vmem:[#allocation2 + $0x70] sm:$0xff]  ;;  %v6747_v51 = vpop.f32.mrf.mxu2 }
 0x37c   : > { %v5433_v36 = vadd.f32 %v5417_v23, %v5398_v47  ;;  %5196 = vst.msk [vmem:[#allocation2 + $0x78] sm:$0xff] %vm511_vm8, %v5180_v49  ;;  %v11418_v49 = vld [vmem:[%s11544_s2 + $0x2] ss:$0 sm:$0xff] }
 0x37d   : > { %v5598_v1 = vld [vmem:[#allocation2 + $0x68] sm:$0xff]  ;;  %v6239_v35 = vpop.f32.mrf.mxu0 }
 0x37e   : > { %5449 = vst.msk [vmem:[#allocation2 + $0x70] sm:$0xff] %vm511_vm8, %v5433_v36  ;;  %v5614_v52 = vadd.f32 %v5598_v1, %v5577_v41 }
 0x37f   : > { %v5851_v27 = vld [vmem:[#allocation2 + $0x60] sm:$0xff] }
 0x380   : > { %5630 = vst.msk [vmem:[#allocation2 + $0x68] sm:$0xff] %vm511_vm8, %v5614_v52  ;;  %v5867_v28 = vadd.f32 %v5851_v27, %v11329_v54  ;;  %v6493_v55 = vpop.f32.mrf.mxu1  ;;  %v6098_v27 = vld [vmem:[#allocation2 + $0x28] sm:$0xff] }
 0x381   : > { %v6053_v63 = vpop.f32.mrf.mxu3 }
 0x382   : > { %5883 = vst.msk [vmem:[#allocation2 + $0x60] sm:$0xff] %vm511_vm8, %v5867_v28  ;;  %v6109_v31 = vadd.f32 %v6093_v50, %v6053_v63 }
 0x383   : > { %v5418_v29 = vld [vmem:[#allocation2 + $0x78] sm:$0xff]  ;;  %v6749_v9 = vpop.f32.mrf.mxu2 }
 0x384   : > { %v5434_v56 = vadd.f32 %v5418_v29, %v5400_v18  ;;  %6125 = vst.msk [vmem:[#allocation2] sm:$0xff] %vm511_vm8, %v6109_v31 }
 0x385   : > { %v5599_v45 = vld [vmem:[#allocation2 + $0x70] sm:$0xff]  ;;  %v6241_v32 = vpop.f32.mrf.mxu0 }
 0x386   : > { %5450 = vst.msk [vmem:[#allocation2 + $0x78] sm:$0xff] %vm511_vm8, %v5434_v56  ;;  %v5615_v0 = vadd.f32 %v5599_v45, %v5580_v21 }
 0x387   : > { %v5852_v15 = vld [vmem:[#allocation2 + $0x68] sm:$0xff] }
 0x388   : > { %5631 = vst.msk [vmem:[#allocation2 + $0x70] sm:$0xff] %vm511_vm8, %v5615_v0  ;;  %v5868_v54 = vadd.f32 %v5852_v15, %v11357_v7  ;;  %v6495_v57 = vpop.f32.mrf.mxu1 }
 0x389   : > { %v6055_v10 = vpop.f32.mrf.mxu3 }
 0x38a   : > { %5884 = vst.msk [vmem:[#allocation2 + $0x68] sm:$0xff] %vm511_vm8, %v5868_v54  ;;  %v6110_v12 = vadd.f32 %v6094_v19, %v6055_v10 }
 0x38b   : > { %v6279_v6 = vld [vmem:[#allocation2] sm:$0xff]  ;;  %v6752_v43 = vpop.f32.mrf.mxu2 }
 0x38c   : > { %v6295_v11 = vadd.f32 %v6279_v6, %v6239_v35  ;;  %6126 = vst.msk [vmem:[#allocation2 + $0x8] sm:$0xff] %vm511_vm8, %v6110_v12 }
 0x38d   : > { %v5600_v40 = vld [vmem:[#allocation2 + $0x78] sm:$0xff]  ;;  %v6244_v46 = vpop.f32.mrf.mxu0 }
 0x38e   : > { %6311 = vst.msk [vmem:[#allocation2] sm:$0xff] %vm511_vm8, %v6295_v11  ;;  %v5616_v30 = vadd.f32 %v5600_v40, %v5582_v44 }
 0x38f   : > { %v5853_v22 = vld [vmem:[#allocation2 + $0x70] sm:$0xff] }
 0x390   : > { %5632 = vst.msk [vmem:[#allocation2 + $0x78] sm:$0xff] %vm511_vm8, %v5616_v30  ;;  %v5869_v7 = vadd.f32 %v5853_v22, %v11375_v2  ;;  %v6498_v5 = vpop.f32.mrf.mxu1  ;;  %v6096_v2 = vld [vmem:[#allocation2 + $0x18] sm:$0xff] }
 0x391   : > { %v6058_v41 = vpop.f32.mrf.mxu3 }
 0x392   : > { %5885 = vst.msk [vmem:[#allocation2 + $0x70] sm:$0xff] %vm511_vm8, %v5869_v7  ;;  %v6111_v61 = vadd.f32 %v6095_v42, %v6058_v41 }
 0x393   : > { %v6280_v3 = vld [vmem:[#allocation2 + $0x8] sm:$0xff]  ;;  %v6754_v53 = vpop.f32.mrf.mxu2 }
 0x394   : > { %v6296_v48 = vadd.f32 %v6280_v3, %v6241_v32  ;;  %6127 = vst.msk [vmem:[#allocation2 + $0x10] sm:$0xff] %vm511_vm8, %v6111_v61 }
 0x395   : > { %v6533_v59 = vld [vmem:[#allocation2] sm:$0xff]  ;;  %v6246_v16 = vpop.f32.mrf.mxu0 }
 0x396   : > { %6312 = vst.msk [vmem:[#allocation2 + $0x8] sm:$0xff] %vm511_vm8, %v6296_v48  ;;  %v6549_v8 = vadd.f32 %v6533_v59, %v6493_v55  ;;  %v6100_v59 = vld [vmem:[#allocation2 + $0x38] sm:$0xff] }
 0x397   : > { %v5854_v24 = vld [vmem:[#allocation2 + $0x78] sm:$0xff] }
 0x398   : > { %6565 = vst.msk [vmem:[#allocation2] sm:$0xff] %vm511_vm8, %v6549_v8  ;;  %v5870_v47 = vadd.f32 %v5854_v24, %v11387_v4  ;;  %v6500_v39 = vpop.f32.mrf.mxu1 }
 0x399   : > { %v6060_v38 = vpop.f32.mrf.mxu3 }
 0x39a   : > { %5886 = vst.msk [vmem:[#allocation2 + $0x78] sm:$0xff] %vm511_vm8, %v5870_v47  ;;  %v6112_v17 = vadd.f32 %v6096_v2, %v6060_v38 }
 0x39b   : > { %v6281_v25 = vld [vmem:[#allocation2 + $0x10] sm:$0xff]  ;;  %v6757_v55 = vpop.f32.mrf.mxu2 }
 0x39c   : > { %v6297_v13 = vadd.f32 %v6281_v25, %v6244_v46  ;;  %6128 = vst.msk [vmem:[#allocation2 + $0x18] sm:$0xff] %vm511_vm8, %v6112_v17 }
 0x39d   : > { %v6534_v33 = vld [vmem:[#allocation2 + $0x8] sm:$0xff]  ;;  %v6249_v21 = vpop.f32.mrf.mxu0 }
 0x39e   : > { %6313 = vst.msk [vmem:[#allocation2 + $0x10] sm:$0xff] %vm511_vm8, %v6297_v13  ;;  %v6550_v14 = vadd.f32 %v6534_v33, %v6495_v57  ;;  %v6099_v57 = vld [vmem:[#allocation2 + $0x30] sm:$0xff] }
 0x39f   : > { %v6787_v20 = vld [vmem:[#allocation2] sm:$0xff] }
 0x3a0   : > { %6566 = vst.msk [vmem:[#allocation2 + $0x8] sm:$0xff] %vm511_vm8, %v6550_v14  ;;  %v6803_v37 = vadd.f32 %v6787_v20, %v6747_v51  ;;  %v6503_v62 = vpop.f32.mrf.mxu1  ;;  %v6101_v20 = vld [vmem:[#allocation2 + $0x40] sm:$0xff] }
 0x3a1   : > { %v6063_v18 = vpop.f32.mrf.mxu3 }
 0x3a2   : > { %6819 = vst.msk [vmem:[#allocation2] sm:$0xff] %vm511_vm8, %v6803_v37  ;;  %v6113_v60 = vadd.f32 %v6097_v58, %v6063_v18 }
 0x3a3   : > { %v6282_v4 = vld [vmem:[#allocation2 + $0x18] sm:$0xff]  ;;  %v6759_v30 = vpop.f32.mrf.mxu2 }
 0x3a4   : > { %v6298_v34 = vadd.f32 %v6282_v4, %v6246_v16  ;;  %6129 = vst.msk [vmem:[#allocation2 + $0x20] sm:$0xff] %vm511_vm8, %v6113_v60 }
 0x3a5   : > { %v6535_v26 = vld [vmem:[#allocation2 + $0x10] sm:$0xff]  ;;  %v6251_v44 = vpop.f32.mrf.mxu0 }
 0x3a6   : > { %6314 = vst.msk [vmem:[#allocation2 + $0x18] sm:$0xff] %vm511_vm8, %v6298_v34  ;;  %v6551_v23 = vadd.f32 %v6535_v26, %v6498_v5 }
 0x3a7   : > { %v6788_v36 = vld [vmem:[#allocation2 + $0x8] sm:$0xff] }
 0x3a8   : > { %6567 = vst.msk [vmem:[#allocation2 + $0x10] sm:$0xff] %vm511_vm8, %v6551_v23  ;;  %v6804_v1 = vadd.f32 %v6788_v36, %v6749_v9  ;;  %v6505_v28 = vpop.f32.mrf.mxu1 }
 0x3a9   : > { %v6835_v35 = vld [vmem:[#allocation2] sm:$0xff]  ;;  %v6065_v52 = vpop.f32.mrf.mxu3 }
 0x3aa   : > { %v6856_v63 = vadd.f32 %v11418_v49, %v6835_v35  ;;  %6820 = vst.msk [vmem:[#allocation2 + $0x8] sm:$0xff] %vm511_vm8, %v6804_v1  ;;  %v6114_v50 = vadd.f32 %v6098_v27, %v6065_v52  ;;  %v6102_v27 = vld [vmem:[#allocation2 + $0x48] sm:$0xff] }
 0x3ab   : > { %v6283_v31 = vld [vmem:[#allocation2 + $0x20] sm:$0xff]  ;;  %v6762_v13 = vpop.f32.mrf.mxu2 }
 0x3ac   : > { %v6872_v51 = vmax.f32 %v6856_v63, 0.0  ;;  %v6299_v29 = vadd.f32 %v6283_v31, %v6249_v21  ;;  %6130 = vst.msk [vmem:[#allocation2 + $0x28] sm:$0xff] %vm511_vm8, %v6114_v50 }
 0x3ad   : > { %v6536_v56 = vld [vmem:[#allocation2 + $0x18] sm:$0xff]  ;;  %v6254_v45 = vpop.f32.mrf.mxu0 }
 0x3ae   : > { %v6888_v32 = vpack.c.bf16 %v6872_v51, %v6872_v51  ;;  %6315 = vst.msk [vmem:[#allocation2 + $0x20] sm:$0xff] %vm511_vm8, %v6299_v29  ;;  %v6552_v0 = vadd.f32 %v6536_v56, %v6500_v39 }
 0x3af   : > { %v6789_v15 = vld [vmem:[#allocation2 + $0x10] sm:$0xff] }
 0x3b0   : > { %6904 = vst.msk [vmem:[%s11429_s18] sm:$0xf] %vm2423_vm12, %v6888_v32  ;;  %v6805_v54 = vadd.f32 %v6789_v15, %v6752_v43  ;;  %v6508_v11 = vpop.f32.mrf.mxu1 }
 0x3b1   : > { %v6836_v10 = vld [vmem:[#allocation2 + $0x8] sm:$0xff]  ;;  %6568 = vst.msk [vmem:[#allocation2 + $0x18] sm:$0xff] %vm511_vm8, %v6552_v0  ;;  %v6068_v19 = vpop.f32.mrf.mxu3 }
 0x3b2   : > { %v6857_v12 = vadd.f32 %v11418_v49, %v6836_v10  ;;  %6821 = vst.msk [vmem:[#allocation2 + $0x10] sm:$0xff] %vm511_vm8, %v6805_v54  ;;  %v6115_v6 = vadd.f32 %v6099_v57, %v6068_v19  ;;  %v6103_v10 = vld [vmem:[#allocation2 + $0x50] sm:$0xff] }
 0x3b3   : > { %v6284_v9 = vld [vmem:[#allocation2 + $0x28] sm:$0xff]  ;;  %v6764_v1 = vpop.f32.mrf.mxu2 }
 0x3b4   : > { %v6873_v40 = vmax.f32 %v6857_v12, 0.0  ;;  %v6300_v46 = vadd.f32 %v6284_v9, %v6251_v44  ;;  %6131 = vst.msk [vmem:[#allocation2 + $0x30] sm:$0xff] %vm511_vm8, %v6115_v6 }
 0x3b5   : > { %v6537_v22 = vld [vmem:[#allocation2 + $0x20] sm:$0xff]  ;;  %v6256_v7 = vpop.f32.mrf.mxu0 }
 0x3b6   : > { %v6889_v41 = vpack.c.bf16 %v6873_v40, %v6873_v40  ;;  %6316 = vst.msk [vmem:[#allocation2 + $0x28] sm:$0xff] %vm511_vm8, %v6300_v46  ;;  %v6553_v42 = vadd.f32 %v6537_v22, %v6503_v62 }
 0x3b8   : > { %6905 = vst.msk [vmem:[%s11429_s18 + $0x4] sm:$0xf] %vm2423_vm12, %v6889_v41  ;;  %v6790_v5 = vld [vmem:[#allocation2 + $0x18] sm:$0xff]  ;;  %v6510_v38 = vpop.f32.mrf.mxu1 }
 0x3b9   : > { %v6837_v61 = vld [vmem:[#allocation2 + $0x10] sm:$0xff]  ;;  %6569 = vst.msk [vmem:[#allocation2 + $0x20] sm:$0xff] %vm511_vm8, %v6553_v42  ;;  %v6806_v3 = vadd.f32 %v6790_v5, %v6754_v53  ;;  %v6070_v48 = vpop.f32.mrf.mxu3 }
 0x3ba   : > { %v6858_v16 = vadd.f32 %v11418_v49, %v6837_v61  ;;  %v6116_v8 = vadd.f32 %v6100_v59, %v6070_v48 }
 0x3bb   : > { %6822 = vst.msk [vmem:[#allocation2 + $0x18] sm:$0xff] %vm511_vm8, %v6806_v3  ;;  %v6285_v43 = vld [vmem:[#allocation2 + $0x30] sm:$0xff]  ;;  %v6767_v6 = vpop.f32.mrf.mxu2  ;;  %v6104_v3 = vld [vmem:[#allocation2 + $0x58] sm:$0xff] }
 0x3bc   : > { %v6874_v24 = vmax.f32 %v6858_v16, 0.0  ;;  %v6301_v47 = vadd.f32 %v6285_v43, %v6254_v45  ;;  %6132 = vst.msk [vmem:[#allocation2 + $0x38] sm:$0xff] %vm511_vm8, %v6116_v8 }
 0x3bd   : > { %v6538_v2 = vld [vmem:[#allocation2 + $0x28] sm:$0xff]  ;;  %v6259_v39 = vpop.f32.mrf.mxu0 }
 0x3be   : > { %v6890_v17 = vpack.c.bf16 %v6874_v24, %v6874_v24  ;;  %6317 = vst.msk [vmem:[#allocation2 + $0x30] sm:$0xff] %vm511_vm8, %v6301_v47  ;;  %v6554_v25 = vadd.f32 %v6538_v2, %v6505_v28 }
 0x3c0   : > { %6906 = vst.msk [vmem:[%s11429_s18 + $0x8] sm:$0xf] %vm2423_vm12, %v6890_v17  ;;  %v6791_v33 = vld [vmem:[#allocation2 + $0x20] sm:$0xff]  ;;  %v6513_v26 = vpop.f32.mrf.mxu1 }
 0x3c1   : > { %6570 = vst.msk [vmem:[#allocation2 + $0x28] sm:$0xff] %vm511_vm8, %v6554_v25  ;;  %v6807_v21 = vadd.f32 %v6791_v33, %v6757_v55  ;;  %v6073_v14 = vpop.f32.mrf.mxu3 }
 0x3c2   : > { %v6838_v37 = vld [vmem:[#allocation2 + $0x18] sm:$0xff]  ;;  %v6117_v53 = vadd.f32 %v6101_v20, %v6073_v14  ;;  %v6105_v14 = vld [vmem:[#allocation2 + $0x60] sm:$0xff] }
 0x3c3   : > { %v6859_v18 = vadd.f32 %v11418_v49, %v6838_v37  ;;  %6823 = vst.msk [vmem:[#allocation2 + $0x20] sm:$0xff] %vm511_vm8, %v6807_v21  ;;  %v6286_v58 = vld [vmem:[#allocation2 + $0x38] sm:$0xff] }
 0x3c4   : > { %v6302_v62 = vadd.f32 %v6286_v58, %v6256_v7  ;;  %6133 = vst.msk [vmem:[#allocation2 + $0x40] sm:$0xff] %vm511_vm8, %v6117_v53 }
 0x3c5   : > { %v6875_v60 = vmax.f32 %v6859_v18, 0.0  ;;  %v6539_v4 = vld [vmem:[#allocation2 + $0x30] sm:$0xff]  ;;  %v6261_v23 = vpop.f32.mrf.mxu0 }
 0x3c6   : > { %6318 = vst.msk [vmem:[#allocation2 + $0x38] sm:$0xff] %vm511_vm8, %v6302_v62  ;;  %v6555_v34 = vadd.f32 %v6539_v4, %v6508_v11 }
 0x3c7   : > { %v6891_v44 = vpack.c.bf16 %v6875_v60, %v6875_v60 }
 0x3c8   : > { %6571 = vst.msk [vmem:[#allocation2 + $0x30] sm:$0xff] %vm511_vm8, %v6555_v34  ;;  %v6792_v36 = vld [vmem:[#allocation2 + $0x28] sm:$0xff]  ;;  %v6515_v15 = vpop.f32.mrf.mxu1 }
 0x3c9   : > { %6907 = vst.msk [vmem:[%s11429_s18 + $0xc] sm:$0xf] %vm2423_vm12, %v6891_v44  ;;  %v6808_v35 = vadd.f32 %v6792_v36, %v6759_v30  ;;  %v6075_v52 = vpop.f32.mrf.mxu3 }
 0x3ca   : > { %v6839_v28 = vld [vmem:[#allocation2 + $0x20] sm:$0xff]  ;;  %v6118_v63 = vadd.f32 %v6102_v27, %v6075_v52  ;;  %v6106_v52 = vld [vmem:[#allocation2 + $0x68] sm:$0xff] }
 0x3cb   : > { %v6860_v50 = vadd.f32 %v11418_v49, %v6839_v28  ;;  %6824 = vst.msk [vmem:[#allocation2 + $0x28] sm:$0xff] %vm511_vm8, %v6808_v35  ;;  %v6287_v55 = vld [vmem:[#allocation2 + $0x40] sm:$0xff] }
 0x3cc   : > { %v6303_v31 = vadd.f32 %v6287_v55, %v6259_v39  ;;  %6134 = vst.msk [vmem:[#allocation2 + $0x48] sm:$0xff] %vm511_vm8, %v6118_v63 }
 0x3cd   : > { %v6876_v51 = vmax.f32 %v6860_v50, 0.0  ;;  %v6540_v29 = vld [vmem:[#allocation2 + $0x38] sm:$0xff]  ;;  %v6264_v19 = vpop.f32.mrf.mxu0 }
 0x3ce   : > { %6319 = vst.msk [vmem:[#allocation2 + $0x40] sm:$0xff] %vm511_vm8, %v6303_v31  ;;  %v6556_v56 = vadd.f32 %v6540_v29, %v6510_v38  ;;  %v6769_v38 = vpop.f32.mrf.mxu2 }
 0x3cf   : > { %v6892_v45 = vpack.c.bf16 %v6876_v51, %v6876_v51  ;;  %v6793_v32 = vld [vmem:[#allocation2 + $0x30] sm:$0xff] }
 0x3d0   : > { %6572 = vst.msk [vmem:[#allocation2 + $0x38] sm:$0xff] %vm511_vm8, %v6556_v56  ;;  %v6809_v0 = vadd.f32 %v6793_v32, %v6762_v13  ;;  %v6518_v16 = vpop.f32.mrf.mxu1 }
 0x3d1   : > { %6908 = vst.msk [vmem:[%s11429_s18 + $0x10] sm:$0xf] %vm2423_vm12, %v6892_v45  ;;  %v6078_v54 = vpop.f32.mrf.mxu3 }
 0x3d2   : > { %v6840_v57 = vld [vmem:[#allocation2 + $0x28] sm:$0xff]  ;;  %6825 = vst.msk [vmem:[#allocation2 + $0x30] sm:$0xff] %vm511_vm8, %v6809_v0  ;;  %v6119_v12 = vadd.f32 %v6103_v10, %v6078_v54  ;;  %v6107_v10 = vld [vmem:[#allocation2 + $0x70] sm:$0xff] }
 0x3d3   : > { %v6861_v11 = vadd.f32 %v11418_v49, %v6840_v57  ;;  %v6288_v9 = vld [vmem:[#allocation2 + $0x48] sm:$0xff] }
 0x3d4   : > { %v6304_v40 = vadd.f32 %v6288_v9, %v6261_v23  ;;  %6135 = vst.msk [vmem:[#allocation2 + $0x50] sm:$0xff] %vm511_vm8, %v6119_v12 }
 0x3d5   : > { %v6877_v46 = vmax.f32 %v6861_v11, 0.0  ;;  %v6541_v30 = vld [vmem:[#allocation2 + $0x40] sm:$0xff]  ;;  %v6266_v43 = vpop.f32.mrf.mxu0 }
 0x3d6   : > { %6320 = vst.msk [vmem:[#allocation2 + $0x48] sm:$0xff] %vm511_vm8, %v6304_v40  ;;  %v6557_v22 = vadd.f32 %v6541_v30, %v6513_v26  ;;  %v6772_v44 = vpop.f32.mrf.mxu2 }
 0x3d7   : > { %v6893_v7 = vpack.c.bf16 %v6877_v46, %v6877_v46  ;;  %v6794_v41 = vld [vmem:[#allocation2 + $0x38] sm:$0xff] }
 0x3d8   : > { %6573 = vst.msk [vmem:[#allocation2 + $0x40] sm:$0xff] %vm511_vm8, %v6557_v22  ;;  %v6810_v42 = vadd.f32 %v6794_v41, %v6764_v1  ;;  %v6520_v62 = vpop.f32.mrf.mxu1 }
 0x3d9   : > { %6909 = vst.msk [vmem:[%s11429_s18 + $0x14] sm:$0xf] %vm2423_vm12, %v6893_v7  ;;  %v6841_v5 = vld [vmem:[#allocation2 + $0x30] sm:$0xff]  ;;  %v6080_v61 = vpop.f32.mrf.mxu3 }
 0x3da   : > { %v6862_v48 = vadd.f32 %v11418_v49, %v6841_v5  ;;  %6826 = vst.msk [vmem:[#allocation2 + $0x38] sm:$0xff] %vm511_vm8, %v6810_v42  ;;  %v6120_v59 = vadd.f32 %v6104_v3, %v6080_v61  ;;  %v6108_v61 = vld [vmem:[#allocation2 + $0x78] sm:$0xff] }
 0x3db   : > { %v6289_v8 = vld [vmem:[#allocation2 + $0x50] sm:$0xff] }
 0x3dc   : > { %v6878_v24 = vmax.f32 %v6862_v48, 0.0  ;;  %v6305_v47 = vadd.f32 %v6289_v8, %v6264_v19  ;;  %6136 = vst.msk [vmem:[#allocation2 + $0x58] sm:$0xff] %vm511_vm8, %v6120_v59 }
 0x3dd   : > { %v6542_v2 = vld [vmem:[#allocation2 + $0x48] sm:$0xff]  ;;  %v6269_v4 = vpop.f32.mrf.mxu0 }
 0x3de   : > { %v6894_v39 = vpack.c.bf16 %v6878_v24, %v6878_v24  ;;  %6321 = vst.msk [vmem:[#allocation2 + $0x50] sm:$0xff] %vm511_vm8, %v6305_v47  ;;  %v6558_v17 = vadd.f32 %v6542_v2, %v6515_v15  ;;  %v6774_v0 = vpop.f32.mrf.mxu2 }
 0x3df   : > { %v6795_v25 = vld [vmem:[#allocation2 + $0x40] sm:$0xff] }
 0x3e0   : > { %6910 = vst.msk [vmem:[%s11429_s18 + $0x18] sm:$0xf] %vm2423_vm12, %v6894_v39  ;;  %v6811_v13 = vadd.f32 %v6795_v25, %v6767_v6  ;;  %v6523_v56 = vpop.f32.mrf.mxu1 }
 0x3e1   : > { %v6842_v33 = vld [vmem:[#allocation2 + $0x38] sm:$0xff]  ;;  %6574 = vst.msk [vmem:[#allocation2 + $0x48] sm:$0xff] %vm511_vm8, %v6558_v17  ;;  %v6083_v21 = vpop.f32.mrf.mxu3 }
 0x3e2   : > { %v6863_v20 = vadd.f32 %v11418_v49, %v6842_v33  ;;  %6827 = vst.msk [vmem:[#allocation2 + $0x40] sm:$0xff] %vm511_vm8, %v6811_v13  ;;  %v6121_v37 = vadd.f32 %v6105_v14, %v6083_v21 }
 0x3e3   : > { %v6290_v53 = vld [vmem:[#allocation2 + $0x58] sm:$0xff] }
 0x3e4   : > { %v6879_v18 = vmax.f32 %v6863_v20, 0.0  ;;  %v6306_v58 = vadd.f32 %v6290_v53, %v6266_v43  ;;  %6137 = vst.msk [vmem:[#allocation2 + $0x60] sm:$0xff] %vm511_vm8, %v6121_v37 }
 0x3e5   : > { %v6543_v60 = vld [vmem:[#allocation2 + $0x50] sm:$0xff]  ;;  %v6271_v45 = vpop.f32.mrf.mxu0 }
 0x3e6   : > { %v6895_v34 = vpack.c.bf16 %v6879_v18, %v6879_v18  ;;  %6322 = vst.msk [vmem:[#allocation2 + $0x58] sm:$0xff] %vm511_vm8, %v6306_v58  ;;  %v6559_v26 = vadd.f32 %v6543_v60, %v6518_v16  ;;  %v6777_v48 = vpop.f32.mrf.mxu2 }
 0x3e8   : > { %6911 = vst.msk [vmem:[%s11429_s18 + $0x1c] sm:$0xf] %vm2423_vm12, %v6895_v34  ;;  %v6796_v23 = vld [vmem:[#allocation2 + $0x48] sm:$0xff]  ;;  %v6525_v7 = vpop.f32.mrf.mxu1 }
 0x3e9   : > { %v6843_v36 = vld [vmem:[#allocation2 + $0x40] sm:$0xff]  ;;  %6575 = vst.msk [vmem:[#allocation2 + $0x50] sm:$0xff] %vm511_vm8, %v6559_v26  ;;  %v6812_v1 = vadd.f32 %v6796_v23, %v6769_v38  ;;  %v6085_v35 = vpop.f32.mrf.mxu3 }
 0x3ea   : > { %v6864_v27 = vadd.f32 %v11418_v49, %v6843_v36  ;;  %v6122_v28 = vadd.f32 %v6106_v52, %v6085_v35 }
 0x3eb   : > { %6828 = vst.msk [vmem:[#allocation2 + $0x48] sm:$0xff] %vm511_vm8, %v6812_v1  ;;  %v6291_v63 = vld [vmem:[#allocation2 + $0x60] sm:$0xff] }
 0x3ec   : > { %v6880_v50 = vmax.f32 %v6864_v27, 0.0  ;;  %v6307_v55 = vadd.f32 %v6291_v63, %v6269_v4  ;;  %6138 = vst.msk [vmem:[#allocation2 + $0x68] sm:$0xff] %vm511_vm8, %v6122_v28 }
 0x3ed   : > { %v6544_v31 = vld [vmem:[#allocation2 + $0x58] sm:$0xff]  ;;  %v6274_v42 = vpop.f32.mrf.mxu0 }
 0x3ee   : > { %v6896_v51 = vpack.c.bf16 %v6880_v50, %v6880_v50  ;;  %6323 = vst.msk [vmem:[#allocation2 + $0x60] sm:$0xff] %vm511_vm8, %v6307_v55  ;;  %v6560_v29 = vadd.f32 %v6544_v31, %v6520_v62  ;;  %v6779_v37 = vpop.f32.mrf.mxu2 }
 0x3f0   : > { %6912 = vst.msk [vmem:[%s11429_s18 + $0x20] sm:$0xf] %vm2423_vm12, %v6896_v51  ;;  %v6797_v32 = vld [vmem:[#allocation2 + $0x50] sm:$0xff]  ;;  %v6528_v14 = vpop.f32.mrf.mxu1 }
 0x3f1   : > { %6576 = vst.msk [vmem:[#allocation2 + $0x58] sm:$0xff] %vm511_vm8, %v6560_v29  ;;  %v6813_v15 = vadd.f32 %v6797_v32, %v6772_v44  ;;  %v6088_v54 = vpop.f32.mrf.mxu3 }
 0x3f2   : > { %v6844_v19 = vld [vmem:[#allocation2 + $0x48] sm:$0xff]  ;;  %v6123_v57 = vadd.f32 %v6107_v10, %v6088_v54 }
 0x3f3   : > { %v6865_v12 = vadd.f32 %v11418_v49, %v6844_v19  ;;  %6829 = vst.msk [vmem:[#allocation2 + $0x50] sm:$0xff] %vm511_vm8, %v6813_v15  ;;  %v6292_v6 = vld [vmem:[#allocation2 + $0x68] sm:$0xff] }
 0x3f4   : > { %v6308_v11 = vadd.f32 %v6292_v6, %v6271_v45  ;;  %6139 = vst.msk [vmem:[#allocation2 + $0x70] sm:$0xff] %vm511_vm8, %v6123_v57 }
 0x3f5   : > { %v6881_v9 = vmax.f32 %v6865_v12, 0.0  ;;  %v6545_v40 = vld [vmem:[#allocation2 + $0x60] sm:$0xff]  ;;  %v6276_v33 = vpop.f32.mrf.mxu0 }
 0x3f6   : > { %6324 = vst.msk [vmem:[#allocation2 + $0x68] sm:$0xff] %vm511_vm8, %v6308_v11  ;;  %v6561_v46 = vadd.f32 %v6545_v40, %v6523_v56  ;;  %v6782_v52 = vpop.f32.mrf.mxu2 }
 0x3f7   : > { %v6897_v30 = vpack.c.bf16 %v6881_v9, %v6881_v9 }
 0x3f8   : > { %6577 = vst.msk [vmem:[#allocation2 + $0x60] sm:$0xff] %vm511_vm8, %v6561_v46  ;;  %v6798_v22 = vld [vmem:[#allocation2 + $0x58] sm:$0xff]  ;;  %v6530_v23 = vpop.f32.mrf.mxu1 }
 0x3f9   : > { %6913 = vst.msk [vmem:[%s11429_s18 + $0x24] sm:$0xf] %vm2423_vm12, %v6897_v30  ;;  %v6814_v41 = vadd.f32 %v6798_v22, %v6774_v0  ;;  %v6090_v5 = vpop.f32.mrf.mxu3 }
 0x3fa   : > { %v6845_v3 = vld [vmem:[#allocation2 + $0x50] sm:$0xff]  ;;  %v6124_v59 = vadd.f32 %v6108_v61, %v6090_v5 }
 0x3fb   : > { %v6866_v16 = vadd.f32 %v11418_v49, %v6845_v3  ;;  %6830 = vst.msk [vmem:[#allocation2 + $0x58] sm:$0xff] %vm511_vm8, %v6814_v41  ;;  %v6293_v8 = vld [vmem:[#allocation2 + $0x70] sm:$0xff] }
 0x3fc   : > { %v6309_v43 = vadd.f32 %v6293_v8, %v6274_v42  ;;  %6140 = vst.msk [vmem:[#allocation2 + $0x78] sm:$0xff] %vm511_vm8, %v6124_v59 }
 0x3fd   : > { %v6882_v24 = vmax.f32 %v6866_v16, 0.0  ;;  %v6546_v47 = vld [vmem:[#allocation2 + $0x68] sm:$0xff] }
 0x3fe   : > { %6325 = vst.msk [vmem:[#allocation2 + $0x70] sm:$0xff] %vm511_vm8, %v6309_v43  ;;  %v6562_v38 = vadd.f32 %v6546_v47, %v6525_v7  ;;  %v6784_v51 = vpop.f32.mrf.mxu2 }
 0x3ff   : > { %v6898_v2 = vpack.c.bf16 %v6882_v24, %v6882_v24  ;;  %v6799_v39 = vld [vmem:[#allocation2 + $0x60] sm:$0xff] }
 0x400   : > { %6578 = vst.msk [vmem:[#allocation2 + $0x68] sm:$0xff] %vm511_vm8, %v6562_v38  ;;  %v6815_v17 = vadd.f32 %v6799_v39, %v6777_v48 }
 0x401   : > { %6914 = vst.msk [vmem:[%s11429_s18 + $0x28] sm:$0xf] %vm2423_vm12, %v6898_v2 }
 0x402   : > { %v6846_v25 = vld [vmem:[#allocation2 + $0x58] sm:$0xff]  ;;  %6831 = vst.msk [vmem:[#allocation2 + $0x60] sm:$0xff] %vm511_vm8, %v6815_v17 }
 0x403   : > { %v6867_v13 = vadd.f32 %v11418_v49, %v6846_v25  ;;  %v6294_v21 = vld [vmem:[#allocation2 + $0x78] sm:$0xff] }
 0x404   : > { %v6310_v20 = vadd.f32 %v6294_v21, %v6276_v33 }
 0x405   : > { %v6883_v53 = vmax.f32 %v6867_v13, 0.0  ;;  %v6547_v18 = vld [vmem:[#allocation2 + $0x70] sm:$0xff] }
 0x406   : > { %6326 = vst.msk [vmem:[#allocation2 + $0x78] sm:$0xff] %vm511_vm8, %v6310_v20  ;;  %v6563_v58 = vadd.f32 %v6547_v18, %v6528_v14 }
 0x407   : > { %v6899_v62 = vpack.c.bf16 %v6883_v53, %v6883_v53  ;;  %v6800_v60 = vld [vmem:[#allocation2 + $0x68] sm:$0xff] }
 0x408   : > { %6579 = vst.msk [vmem:[#allocation2 + $0x70] sm:$0xff] %vm511_vm8, %v6563_v58  ;;  %v6816_v4 = vadd.f32 %v6800_v60, %v6779_v37 }
 0x409   : > { %6915 = vst.msk [vmem:[%s11429_s18 + $0x2c] sm:$0xf] %vm2423_vm12, %v6899_v62  ;;  %v6847_v34 = vld [vmem:[#allocation2 + $0x60] sm:$0xff] }
 0x40a   : > { %v6868_v26 = vadd.f32 %v11418_v49, %v6847_v34  ;;  %6832 = vst.msk [vmem:[#allocation2 + $0x68] sm:$0xff] %vm511_vm8, %v6816_v4 }
 0x40c   : > { %v6884_v44 = vmax.f32 %v6868_v26, 0.0 }
 0x40d   : > { %v6548_v36 = vld [vmem:[#allocation2 + $0x78] sm:$0xff] }
 0x40e   : > { %v6900_v1 = vpack.c.bf16 %v6884_v44, %v6884_v44  ;;  %v6564_v35 = vadd.f32 %v6548_v36, %v6530_v23 }
 0x40f   : > { %v6801_v27 = vld [vmem:[#allocation2 + $0x70] sm:$0xff] }
 0x410   : > { %6916 = vst.msk [vmem:[%s11429_s18 + $0x30] sm:$0xf] %vm2423_vm12, %v6900_v1  ;;  %v6817_v28 = vadd.f32 %v6801_v27, %v6782_v52 }
 0x411   : > { %v6848_v63 = vld [vmem:[#allocation2 + $0x68] sm:$0xff]  ;;  %6580 = vst.msk [vmem:[#allocation2 + $0x78] sm:$0xff] %vm511_vm8, %v6564_v35 }
 0x412   : > { %v6869_v50 = vadd.f32 %v11418_v49, %v6848_v63  ;;  %6833 = vst.msk [vmem:[#allocation2 + $0x70] sm:$0xff] %vm511_vm8, %v6817_v28 }
 0x414   : > { %v6885_v55 = vmax.f32 %v6869_v50, 0.0 }
 0x416   : > { %v6901_v31 = vpack.c.bf16 %v6885_v55, %v6885_v55 }
 0x418   : > { %6917 = vst.msk [vmem:[%s11429_s18 + $0x34] sm:$0xf] %vm2423_vm12, %v6901_v31  ;;  %v6802_v29 = vld [vmem:[#allocation2 + $0x78] sm:$0xff] }
 0x419   : > { %v6849_v56 = vld [vmem:[#allocation2 + $0x70] sm:$0xff]  ;;  %v6818_v45 = vadd.f32 %v6802_v29, %v6784_v51 }
 0x41a   : > { %v6870_v32 = vadd.f32 %v11418_v49, %v6849_v56 }
 0x41b   : > { %6834 = vst.msk [vmem:[#allocation2 + $0x78] sm:$0xff] %vm511_vm8, %v6818_v45 }
 0x41c   : > { %v6886_v0 = vmax.f32 %v6870_v32, 0.0 }
 0x41e   : > { %v6902_v15 = vpack.c.bf16 %v6886_v0, %v6886_v0 }
 0x420   : > { %6918 = vst.msk [vmem:[%s11429_s18 + $0x38] sm:$0xf] %vm2423_vm12, %v6902_v15 }
 0x422   : > { %v6850_v54 = vld [vmem:[#allocation2 + $0x78] sm:$0xff] }
 0x423   : > { %v6871_v10 = vadd.f32 %v11418_v49, %v6850_v54 }
 0x425   : > { %v6887_v19 = vmax.f32 %v6871_v10, 0.0 }
 0x427   : > { %v6903_v57 = vpack.c.bf16 %v6887_v19, %v6887_v19 }
 0x429   : > { %6919 = vst.msk [vmem:[%s11429_s18 + $0x3c] sm:$0xf] %vm2423_vm12, %v6903_v57 }
 0x42a PF: > { %s16_s22 = sadd.s32 1, %s8438_s22   ;;  %s11555_s18 = smov %s8430_s20 }
 0x42b   : > { %p13_p7 = scmp.ge.s32.totalorder %s16_s22, 6   ;;  %s11556_s19 = smov %s8434_s21 }
 0x42c   : > { %s11557_s20 = smov %s11560_s23  ;;  %s11558_s21 = smov %s11564_s24 }
 0x42d   :  { %15 = sbr.rel (!%p13_p7) target bundleno = 3 (0x3), region = 121 }

</bundles_post_ra>
